<compile_context>
chip_gen: v7x
topology: tpu7x:2x2x1
jax: 0.10.0
libtpu: 0.0.40
codegen_flags: <defaults>
</compile_context>

<pallas_src>
import math

import jax
import jax.numpy as jnp
from jax import lax
from jax.experimental import pallas as pl
from jax.experimental.pallas import tpu as pltpu

# ----------------------------- static sizes ---------------------------------
B = 2
H_IMG = 8
N = H_IMG * H_IMG          # 64 tokens
BN = B * N                 # 128 fused rows
C = 32                     # hidden size
NUM_HEADS = 4
HEAD_DIM = C // NUM_HEADS  # 8
I = 64                     # intermediate size
EXP = I // C               # expansion ratio = 2
EPS = 1e-12                # layer_norm_eps
NEG_INF = -1e30
INV_SQRT_D = 1.0 / math.sqrt(HEAD_DIM)

# ------------------------- packed-parameter indices --------------------------
# per-hidden (length C) parameter rows, packed into pc: (NPC, C)
LNB_G, LNB_B = 0, 1                       # layernorm_before
LNA_G, LNA_B = 2, 3                       # layernorm_after
MOVEQ, MOVEK, MOVEV = 4, 5, 6
BQ, BK, BV = 7, 8, 9                      # q/k/v linear biases (folded eff. in kernel copy)
NQ_G, NQ_B, NK_G, NK_B, NV_G, NV_B = 10, 11, 12, 13, 14, 15
RPQ, RPK, RPV = 16, 19, 22                # each RPReLU uses 3 rows: move1, prelu_w, move2
MOVEQ2, MOVEK2, MOVEV2 = 25, 26, 27
NCTX_G, NCTX_B = 28, 29                   # norm_context
RPCTX = 30                                # rprelu_context (3 rows)
SO_B, SO_MOVE, SO_NG, SO_NB = 33, 34, 35, 36   # ViTSelfOutput
SO_RP = 37
SO_LS_A, SO_LS_M = 40, 41
IM_MOVE = 42                              # ViTIntermediate.move (length C)
OUT_B = 43                                # ViTOutput dense bias (length C)
OUT_NG, OUT_NB = 44, 45
OUT_RP = 46
OUT_LS_A, OUT_LS_M = 49, 50
NPC = 51

# per-intermediate (length I) parameter rows, packed into pin: (NPI, I)
II_B, II_NG, II_NB = 0, 1, 2              # ViTIntermediate dense bias / norm
II_RP = 3                                 # ViTIntermediate rprelu (3 rows)
II_OMOVE = 6                              # ViTOutput.move (length I)
NPI = 7


# ------------------------------ shared math ----------------------------------
def _ln(x, g, b):
    """torch.nn.LayerNorm over the last dim (biased variance)."""
    mu = jnp.mean(x, axis=-1, keepdims=True)
    xc = x - mu
    var = jnp.mean(xc * xc, axis=-1, keepdims=True)
    return xc * lax.rsqrt(var + EPS) * g + b


def _rprelu(x, m1, pw, m2):
    """RPReLU: per-channel PReLU(x - move1) + move2."""
    y = x - m1
    return jnp.where(y > 0, y, y * pw) + m2


# ------------------------------ Pallas kernel ---------------------------------
def vit_layer_kernel(x_ref, pc_ref, pi_ref, wqkv_ref, wd_ref, wi_ref, wo2_ref,
                     bmask_ref, hmask_ref, out_ref):
    # x_ref: (BN, C) — batch fused into the matmul M dimension.
    x = x_ref[...]

    def pcv(i):                                    # (1, C) parameter row
        return pc_ref[i:i + 1, :]

    def piv(i):                                    # (1, I) parameter row
        return pi_ref[i:i + 1, :]

    # ---- layernorm_before ----
    hn = _ln(x, pcv(LNB_G), pcv(LNB_B))

    # ---- ViTSelfAttention: fused q/k/v projection (reduction_ratio == 1) ----
    # The per-branch `move` params are already folded into the effective biases
    # stored in rows BQ/BK/BV by the wrapper, so a single MXU pass projects to 3C.
    bqkv = jnp.concatenate([pcv(BQ), pcv(BK), pcv(BV)], axis=-1)      # (1, 3C)
    qkv = jnp.dot(hn, wqkv_ref[...], preferred_element_type=jnp.float32) + bqkv

    def branch(z, ng_i, nb_i, rp_i):
        z = _ln(z, pcv(ng_i), pcv(nb_i)) + hn
        return _rprelu(z, pcv(rp_i), pcv(rp_i + 1), pcv(rp_i + 2))

    mixed_q = branch(qkv[:, :C], NQ_G, NQ_B, RPQ)
    mixed_k = branch(qkv[:, C:2 * C], NK_G, NK_B, RPK)
    mixed_v = branch(qkv[:, 2 * C:], NV_G, NV_B, RPV)

    qa = (mixed_q + pcv(MOVEQ2)) * INV_SQRT_D      # fold score scaling into q once
    ka = mixed_k + pcv(MOVEK2)
    va = mixed_v + pcv(MOVEV2)

    # ---- head-stacked multi-head attention ----
    # q_stack row (h*BN + r) holds q row r with only head h's channels kept, so
    # ONE (H*BN, BN) score matmul + ONE softmax pass covers all heads.
    # bmask: block-diagonal additive mask (0 within a batch, -1e30 across
    # batches), pre-tiled over heads in the wrapper.
    hmask = hmask_ref[...]                         # (NUM_HEADS, C) 0/1 selectors
    q_stack = jnp.concatenate(
        [qa * hmask[h:h + 1, :] for h in range(NUM_HEADS)], axis=0)   # (H*BN, C)
    s = lax.dot_general(q_stack, ka, (((1,), (1,)), ((), ())),
                        preferred_element_type=jnp.float32)           # (H*BN, BN)
    s = s + bmask_ref[...]
    s = s - jnp.max(s, axis=-1, keepdims=True)
    e = jnp.exp(s)
    p = e * pl.reciprocal(jnp.sum(e, axis=-1, keepdims=True), approx=True)
    # attention_probs dropout: eval mode -> identity
    ctx_stack = jnp.dot(p, va, preferred_element_type=jnp.float32)    # (H*BN, C)
    # Per-head channel selection: 128-aligned sublane slices + head masks.
    ctx = jnp.zeros((BN, C), jnp.float32)
    for h in range(NUM_HEADS):
        ctx = ctx + ctx_stack[h * BN:(h + 1) * BN, :] * hmask[h:h + 1, :]

    ctx = _ln(ctx, pcv(NCTX_G), pcv(NCTX_B)) + mixed_q + mixed_k + mixed_v
    ctx = _rprelu(ctx, pcv(RPCTX), pcv(RPCTX + 1), pcv(RPCTX + 2))

    # ---- ViTSelfOutput (SO_MOVE folded into effective SO_B) ----
    so = jnp.dot(ctx, wd_ref[...], preferred_element_type=jnp.float32) + pcv(SO_B)
    so = _ln(so, pcv(SO_NG), pcv(SO_NB)) + ctx
    so = _rprelu(so, pcv(SO_RP), pcv(SO_RP + 1), pcv(SO_RP + 2))
    so = so * pcv(SO_LS_A) + pcv(SO_LS_M)          # LayerScale

    # ---- first residual (drop_path = identity) ----
    h1 = so + x

    # ---- layernorm_after ----
    hn2 = _ln(h1, pcv(LNA_G), pcv(LNA_B))

    # ---- ViTIntermediate (IM_MOVE folded into effective II_B) ----
    it = jnp.dot(hn2, wi_ref[...], preferred_element_type=jnp.float32) + piv(II_B)
    # residual: torch.concat([hn2]*EXP, dim=-1) as a lane concat (no MXU op)
    it = _ln(it, piv(II_NG), piv(II_NB)) + jnp.concatenate([hn2] * EXP, axis=-1)
    it = _rprelu(it, piv(II_RP), piv(II_RP + 1), piv(II_RP + 2))

    # ---- ViTOutput: dense and AvgPool1d residual fused into one (I, 2C) matmul
    #      (II_OMOVE folded into effective OUT_B; pooling half takes no bias) ----
    r = jnp.dot(it, wo2_ref[...], preferred_element_type=jnp.float32)  # (BN, 2C)
    ot = r[:, :C] + pcv(OUT_B)
    pooled = r[:, C:]
    ot = _ln(ot, pcv(OUT_NG), pcv(OUT_NB)) + pooled
    ot = _rprelu(ot, pcv(OUT_RP), pcv(OUT_RP + 1), pcv(OUT_RP + 2))
    ot = ot * pcv(OUT_LS_A) + pcv(OUT_LS_M)        # LayerScale
    # hidden/drop_path dropout: eval mode -> identity
    # TODO(synk): avg_res3 / avg_res5 residual branches and the reduction_ratio>1
    # pyramid-pooling branch are config-disabled here; binary quantizers
    # (input_bits==1) are likewise not instantiated.

    out_ref[...] = ot + h1


@jax.jit
def vit_layer_pallas(x, pc, pin, w4, wi, wo):
    # Fuse batch into the matmul M dim in the wrapper (free relayout, contiguous).
    x2 = x.reshape(BN, C)

    wq, wk, wv, wdense = w4[0], w4[1], w4[2], w4[3]

    # Parameter-only constant folding: (h + move) @ W + b == h @ W + (b + move @ W).
    # Lets the kernel drop all pre-matmul adds and fuse the q/k/v projections.
    pc2 = pc
    pc2 = pc2.at[BQ].set(pc[BQ] + pc[MOVEQ] @ wq)
    pc2 = pc2.at[BK].set(pc[BK] + pc[MOVEK] @ wk)
    pc2 = pc2.at[BV].set(pc[BV] + pc[MOVEV] @ wv)
    pc2 = pc2.at[SO_B].set(pc[SO_B] + pc[SO_MOVE] @ wdense)
    pc2 = pc2.at[OUT_B].set(pc[OUT_B] + pin[II_OMOVE] @ wo)
    pin2 = pin.at[II_B].set(pin[II_B] + pc[IM_MOVE] @ wi)

    wqkv = jnp.concatenate([wq, wk, wv], axis=1)                  # (C, 3C)

    # AvgPool1d(kernel=EXP) over the channel dim as a 1/EXP matrix, fused with
    # the ViTOutput dense weight so `it` makes a single MXU pass.
    rr = jnp.arange(I, dtype=jnp.int32)
    cc = jnp.arange(C, dtype=jnp.int32)
    pmat = ((rr[:, None] // EXP) == cc[None, :]).astype(jnp.float32) * (1.0 / EXP)
    wo2 = jnp.concatenate([wo, pmat], axis=1)                     # (I, 2C)

    # Block-diagonal additive attention mask (no cross-batch attention),
    # pre-tiled over heads for the head-stacked score matrix.
    row_b = jnp.arange(BN, dtype=jnp.int32) // N
    bmask = jnp.where(row_b[:, None] == row_b[None, :], 0.0, NEG_INF).astype(jnp.float32)
    bmask_all = jnp.concatenate([bmask] * NUM_HEADS, axis=0)      # (H*BN, BN)

    head_of_ch = jnp.arange(C, dtype=jnp.int32) // HEAD_DIM
    hmask = (head_of_ch[None, :] ==
             jnp.arange(NUM_HEADS, dtype=jnp.int32)[:, None]).astype(jnp.float32)

    out2 = pl.pallas_call(
        vit_layer_kernel,
        out_shape=jax.ShapeDtypeStruct((BN, C), jnp.float32),
        grid_spec=pltpu.PrefetchScalarGridSpec(
            num_scalar_prefetch=0,
            grid=(1,),
            in_specs=[
                pl.BlockSpec((BN, C), lambda i: (0, 0)),
                pl.BlockSpec((NPC, C), lambda i: (0, 0)),
                pl.BlockSpec((NPI, I), lambda i: (0, 0)),
                pl.BlockSpec((C, 3 * C), lambda i: (0, 0)),
                pl.BlockSpec((C, C), lambda i: (0, 0)),
                pl.BlockSpec((C, I), lambda i: (0, 0)),
                pl.BlockSpec((I, 2 * C), lambda i: (0, 0)),
                pl.BlockSpec((NUM_HEADS * BN, BN), lambda i: (0, 0)),
                pl.BlockSpec((NUM_HEADS, C), lambda i: (0, 0)),
            ],
            out_specs=pl.BlockSpec((BN, C), lambda i: (0, 0)),
        ),
        compiler_params=pltpu.CompilerParams(
            dimension_semantics=("arbitrary",)),
    )(x2, pc2, pin2, wqkv, wdense, wi, wo2, bmask_all, hmask)
    return out2.reshape(B, N, C)


# --------------------------- pure-JAX reference -------------------------------
def vit_layer_ref(x, pc, pin, w4, wi, wo):
    P = lambda i: pc[i]
    Q = lambda i: pin[i]

    hn = _ln(x, P(LNB_G), P(LNB_B))

    def branch(h, mi, w, bi, ng, nb, rp):
        z = jnp.einsum('bnc,cd->bnd', h + P(mi), w) + P(bi)
        z = _ln(z, P(ng), P(nb)) + h
        return _rprelu(z, P(rp), P(rp + 1), P(rp + 2))

    mq = branch(hn, MOVEQ, w4[0], BQ, NQ_G, NQ_B, RPQ)
    mk = branch(hn, MOVEK, w4[1], BK, NK_G, NK_B, RPK)
    mv = branch(hn, MOVEV, w4[2], BV, NV_G, NV_B, RPV)

    q = (mq + P(MOVEQ2)).reshape(B, N, NUM_HEADS, HEAD_DIM).transpose(0, 2, 1, 3)
    k = (mk + P(MOVEK2)).reshape(B, N, NUM_HEADS, HEAD_DIM).transpose(0, 2, 1, 3)
    v = (mv + P(MOVEV2)).reshape(B, N, NUM_HEADS, HEAD_DIM).transpose(0, 2, 1, 3)
    s = jnp.einsum('bhnd,bhmd->bhnm', q, k) / math.sqrt(HEAD_DIM)
    p = jax.nn.softmax(s, axis=-1)
    ctx = jnp.einsum('bhnm,bhmd->bhnd', p, v).transpose(0, 2, 1, 3).reshape(B, N, C)

    ctx = _ln(ctx, P(NCTX_G), P(NCTX_B)) + mq + mk + mv
    ctx = _rprelu(ctx, P(RPCTX), P(RPCTX + 1), P(RPCTX + 2))

    so = jnp.einsum('bnc,cd->bnd', ctx + P(SO_MOVE), w4[3]) + P(SO_B)
    so = _ln(so, P(SO_NG), P(SO_NB)) + ctx
    so = _rprelu(so, P(SO_RP), P(SO_RP + 1), P(SO_RP + 2))
    so = so * P(SO_LS_A) + P(SO_LS_M)

    h1 = so + x
    hn2 = _ln(h1, P(LNA_G), P(LNA_B))

    it = jnp.einsum('bnc,ci->bni', hn2 + P(IM_MOVE), wi) + Q(II_B)
    it = _ln(it, Q(II_NG), Q(II_NB)) + jnp.concatenate([hn2] * EXP, axis=-1)
    it = _rprelu(it, Q(II_RP), Q(II_RP + 1), Q(II_RP + 2))

    ot = jnp.einsum('bni,ic->bnc', it + Q(II_OMOVE), wo) + P(OUT_B)
    pooled = it.reshape(B, N, C, EXP).mean(axis=-1)
    ot = _ln(ot, P(OUT_NG), P(OUT_NB)) + pooled
    ot = _rprelu(ot, P(OUT_RP), P(OUT_RP + 1), P(OUT_RP + 2))
    ot = ot * P(OUT_LS_A) + P(OUT_LS_M)
    return ot + h1


# ------------------------------ parameter init --------------------------------
def init_params():
    key = jax.random.PRNGKey(0)
    ks = jax.random.split(key, 8)

    def rnd(k, shape, scale=0.02):
        return (scale * jax.random.normal(k, shape)).astype(jnp.float32)

    w4 = rnd(ks[0], (4, C, C))     # query, key, value, selfoutput.dense (in, out)
    wi = rnd(ks[1], (C, I))        # intermediate.dense
    wo = rnd(ks[2], (I, C))        # output.dense

    pc = jnp.zeros((NPC, C), jnp.float32)
    for idx in (LNB_G, LNA_G, NQ_G, NK_G, NV_G, NCTX_G, SO_NG, OUT_NG):
        pc = pc.at[idx].set(1.0)                         # LayerNorm gammas
    for idx in (RPQ + 1, RPK + 1, RPV + 1, RPCTX + 1, SO_RP + 1, OUT_RP + 1):
        pc = pc.at[idx].set(0.25)                        # PReLU default weight
    pc = pc.at[SO_LS_A].set(0.1)                         # LayerScale alpha
    pc = pc.at[OUT_LS_A].set(0.1)
    misc_c = (MOVEQ, MOVEK, MOVEV, BQ, BK, BV, MOVEQ2, MOVEK2, MOVEV2,
              SO_B, SO_MOVE, IM_MOVE, OUT_B,
              RPQ, RPQ + 2, RPK, RPK + 2, RPV, RPV + 2, RPCTX, RPCTX + 2,
              SO_RP, SO_RP + 2, OUT_RP, OUT_RP + 2,
              LNB_B, LNA_B, NQ_B, NK_B, NV_B, NCTX_B, SO_NB, OUT_NB,
              SO_LS_M, OUT_LS_M)
    for j, idx in enumerate(misc_c):
        pc = pc.at[idx].set(rnd(jax.random.fold_in(ks[3], j), (C,)))

    pin = jnp.zeros((NPI, I), jnp.float32)
    pin = pin.at[II_NG].set(1.0)
    pin = pin.at[II_RP + 1].set(0.25)
    for j, idx in enumerate((II_B, II_NB, II_RP, II_RP + 2, II_OMOVE)):
        pin = pin.at[idx].set(rnd(jax.random.fold_in(ks[4], j), (I,)))

    return pc, pin, w4, wi, wo


# ------------------------------------ main -------------------------------------
if __name__ == "__main__":
    root = jax.random.PRNGKey(0)
    kx, _ = jax.random.split(root)
    x = jax.random.normal(kx, (B, N, C), dtype=jnp.float32)

    pc, pin, w4, wi, wo = init_params()

    out = vit_layer_pallas(x, pc, pin, w4, wi, wo)
    out = jax.block_until_ready(out)

    ref = vit_layer_ref(x, pc, pin, w4, wi, wo)
    assert out.shape == (B, N, C), out.shape
    max_err = float(jnp.max(jnp.abs(out - ref)))
    # tolerance accommodates the EUP approximate-reciprocal softmax denominator
    # and the wrapper-side bias folds (float reassociation)
    if not bool(jnp.allclose(out, ref, rtol=5e-3, atol=5e-3)):
        raise AssertionError(f"kernel mismatch vs reference, max_abs_err={max_err}")
    print("KERNEL_OK")
</pallas_src>

<mosaic_0001>
module attributes {stable_mosaic.version = 11 : i64} {
  func.func @vit_layer_kernel(%arg0: i32, %arg1: memref<128x32xf32, #tpu.memory_space<vmem>>, %arg2: memref<51x32xf32, #tpu.memory_space<vmem>>, %arg3: memref<7x64xf32, #tpu.memory_space<vmem>>, %arg4: memref<32x96xf32, #tpu.memory_space<vmem>>, %arg5: memref<32x32xf32, #tpu.memory_space<vmem>>, %arg6: memref<32x64xf32, #tpu.memory_space<vmem>>, %arg7: memref<64x64xf32, #tpu.memory_space<vmem>>, %arg8: memref<512x128xf32, #tpu.memory_space<vmem>>, %arg9: memref<4x32xf32, #tpu.memory_space<vmem>>, %arg10: memref<128x32xf32, #tpu.memory_space<vmem>>) attributes {dimension_semantics = [#tpu.dimension_semantics<arbitrary>], iteration_bounds = array<i64: 1>, scalar_prefetch = 0 : i64, scratch_operands = 0 : i64, tpu.core_type = #tpu.core_type<tc>, window_params = [{pipeline_mode = #tpu.pipeline_mode<synchronous>, transform_indices = @transform_0, window_bounds = array<i64: 128, 32>}, {pipeline_mode = #tpu.pipeline_mode<synchronous>, transform_indices = @transform_1, window_bounds = array<i64: 51, 32>}, {pipeline_mode = #tpu.pipeline_mode<synchronous>, transform_indices = @transform_2, window_bounds = array<i64: 7, 64>}, {pipeline_mode = #tpu.pipeline_mode<synchronous>, transform_indices = @transform_3, window_bounds = array<i64: 32, 96>}, {pipeline_mode = #tpu.pipeline_mode<synchronous>, transform_indices = @transform_4, window_bounds = array<i64: 32, 32>}, {pipeline_mode = #tpu.pipeline_mode<synchronous>, transform_indices = @transform_5, window_bounds = array<i64: 32, 64>}, {pipeline_mode = #tpu.pipeline_mode<synchronous>, transform_indices = @transform_6, window_bounds = array<i64: 64, 64>}, {pipeline_mode = #tpu.pipeline_mode<synchronous>, transform_indices = @transform_7, window_bounds = array<i64: 512, 128>}, {pipeline_mode = #tpu.pipeline_mode<synchronous>, transform_indices = @transform_8, window_bounds = array<i64: 4, 32>}, {pipeline_mode = #tpu.pipeline_mode<synchronous>, transform_indices = @transform_9, window_bounds = array<i64: 128, 32>}]} {
    %c0 = arith.constant 0 : index
    %c0_0 = arith.constant 0 : index
    %0 = vector.load %arg1[%c0, %c0_0] : memref<128x32xf32, #tpu.memory_space<vmem>>, vector<128x32xf32>
    %c0_1 = arith.constant 0 : index
    %c0_2 = arith.constant 0 : index
    %1 = vector.load %arg2[%c0_1, %c0_2] : memref<51x32xf32, #tpu.memory_space<vmem>>, vector<1x32xf32>
    %c1 = arith.constant 1 : index
    %c0_3 = arith.constant 0 : index
    %2 = vector.load %arg2[%c1, %c0_3] : memref<51x32xf32, #tpu.memory_space<vmem>>, vector<1x32xf32>
    %cst = arith.constant dense<0.000000e+00> : vector<128xf32>
    %3 = vector.multi_reduction <add>, %0, %cst [1] : vector<128x32xf32> to vector<128xf32>
    %4 = vector.shape_cast %3 : vector<128xf32> to vector<128x1xf32>
    %cst_4 = arith.constant 3.200000e+01 : f32
    %5 = vector.broadcast %cst_4 : f32 to vector<128x1xf32>
    %6 = arith.divf %4, %5 : vector<128x1xf32>
    %7 = vector.broadcast %6 : vector<128x1xf32> to vector<128x32xf32>
    %8 = arith.subf %0, %7 : vector<128x32xf32>
    %9 = arith.mulf %8, %8 : vector<128x32xf32>
    %cst_5 = arith.constant dense<0.000000e+00> : vector<128xf32>
    %10 = vector.multi_reduction <add>, %9, %cst_5 [1] : vector<128x32xf32> to vector<128xf32>
    %11 = vector.shape_cast %10 : vector<128xf32> to vector<128x1xf32>
    %cst_6 = arith.constant 3.200000e+01 : f32
    %12 = vector.broadcast %cst_6 : f32 to vector<128x1xf32>
    %13 = arith.divf %11, %12 : vector<128x1xf32>
    %cst_7 = arith.constant 9.99999996E-13 : f32
    %14 = vector.broadcast %cst_7 : f32 to vector<128x1xf32>
    %15 = arith.addf %13, %14 : vector<128x1xf32>
    %16 = math.rsqrt %15 : vector<128x1xf32>
    %17 = vector.broadcast %16 : vector<128x1xf32> to vector<128x32xf32>
    %18 = arith.mulf %8, %17 : vector<128x32xf32>
    %19 = vector.broadcast %1 : vector<1x32xf32> to vector<128x32xf32>
    %20 = arith.mulf %18, %19 : vector<128x32xf32>
    %21 = vector.broadcast %2 : vector<1x32xf32> to vector<128x32xf32>
    %22 = arith.addf %20, %21 : vector<128x32xf32>
    %c7 = arith.constant 7 : index
    %c0_8 = arith.constant 0 : index
    %23 = vector.load %arg2[%c7, %c0_8] : memref<51x32xf32, #tpu.memory_space<vmem>>, vector<1x32xf32>
    %c8 = arith.constant 8 : index
    %c0_9 = arith.constant 0 : index
    %24 = vector.load %arg2[%c8, %c0_9] : memref<51x32xf32, #tpu.memory_space<vmem>>, vector<1x32xf32>
    %c9 = arith.constant 9 : index
    %c0_10 = arith.constant 0 : index
    %25 = vector.load %arg2[%c9, %c0_10] : memref<51x32xf32, #tpu.memory_space<vmem>>, vector<1x32xf32>
    %26 = tpu.concatenate %23, %24, %25 in 1 : vector<1x32xf32>, vector<1x32xf32>, vector<1x32xf32> -> vector<1x96xf32>
    %c0_11 = arith.constant 0 : index
    %c0_12 = arith.constant 0 : index
    %27 = vector.load %arg4[%c0_11, %c0_12] : memref<32x96xf32, #tpu.memory_space<vmem>>, vector<32x96xf32>
    %cst_13 = arith.constant dense<0.000000e+00> : vector<128x96xf32>
    %28 = tpu.matmul %22, %27, %cst_13 {dimension_numbers = #tpu.dot_dimension_numbers<[1], [0], [0], [1], [0, 0, 1, 1], [], []>} : vector<128x32xf32>, vector<32x96xf32>, vector<128x96xf32> -> vector<128x96xf32>
    %29 = vector.broadcast %26 : vector<1x96xf32> to vector<128x96xf32>
    %30 = arith.addf %28, %29 : vector<128x96xf32>
    %31 = vector.extract_strided_slice %30 {offsets = [0, 0], sizes = [128, 32], strides = [1, 1]} : vector<128x96xf32> to vector<128x32xf32>
    %c10 = arith.constant 10 : index
    %c0_14 = arith.constant 0 : index
    %32 = vector.load %arg2[%c10, %c0_14] : memref<51x32xf32, #tpu.memory_space<vmem>>, vector<1x32xf32>
    %c11 = arith.constant 11 : index
    %c0_15 = arith.constant 0 : index
    %33 = vector.load %arg2[%c11, %c0_15] : memref<51x32xf32, #tpu.memory_space<vmem>>, vector<1x32xf32>
    %cst_16 = arith.constant dense<0.000000e+00> : vector<128xf32>
    %34 = vector.multi_reduction <add>, %31, %cst_16 [1] : vector<128x32xf32> to vector<128xf32>
    %35 = vector.shape_cast %34 : vector<128xf32> to vector<128x1xf32>
    %cst_17 = arith.constant 3.200000e+01 : f32
    %36 = vector.broadcast %cst_17 : f32 to vector<128x1xf32>
    %37 = arith.divf %35, %36 : vector<128x1xf32>
    %38 = vector.broadcast %37 : vector<128x1xf32> to vector<128x32xf32>
    %39 = arith.subf %31, %38 : vector<128x32xf32>
    %40 = arith.mulf %39, %39 : vector<128x32xf32>
    %cst_18 = arith.constant dense<0.000000e+00> : vector<128xf32>
    %41 = vector.multi_reduction <add>, %40, %cst_18 [1] : vector<128x32xf32> to vector<128xf32>
    %42 = vector.shape_cast %41 : vector<128xf32> to vector<128x1xf32>
    %cst_19 = arith.constant 3.200000e+01 : f32
    %43 = vector.broadcast %cst_19 : f32 to vector<128x1xf32>
    %44 = arith.divf %42, %43 : vector<128x1xf32>
    %cst_20 = arith.constant 9.99999996E-13 : f32
    %45 = vector.broadcast %cst_20 : f32 to vector<128x1xf32>
    %46 = arith.addf %44, %45 : vector<128x1xf32>
    %47 = math.rsqrt %46 : vector<128x1xf32>
    %48 = vector.broadcast %47 : vector<128x1xf32> to vector<128x32xf32>
    %49 = arith.mulf %39, %48 : vector<128x32xf32>
    %50 = vector.broadcast %32 : vector<1x32xf32> to vector<128x32xf32>
    %51 = arith.mulf %49, %50 : vector<128x32xf32>
    %52 = vector.broadcast %33 : vector<1x32xf32> to vector<128x32xf32>
    %53 = arith.addf %51, %52 : vector<128x32xf32>
    %54 = arith.addf %53, %22 : vector<128x32xf32>
    %c16 = arith.constant 16 : index
    %c0_21 = arith.constant 0 : index
    %55 = vector.load %arg2[%c16, %c0_21] : memref<51x32xf32, #tpu.memory_space<vmem>>, vector<1x32xf32>
    %c17 = arith.constant 17 : index
    %c0_22 = arith.constant 0 : index
    %56 = vector.load %arg2[%c17, %c0_22] : memref<51x32xf32, #tpu.memory_space<vmem>>, vector<1x32xf32>
    %c18 = arith.constant 18 : index
    %c0_23 = arith.constant 0 : index
    %57 = vector.load %arg2[%c18, %c0_23] : memref<51x32xf32, #tpu.memory_space<vmem>>, vector<1x32xf32>
    %58 = vector.broadcast %55 : vector<1x32xf32> to vector<128x32xf32>
    %59 = arith.subf %54, %58 : vector<128x32xf32>
    %cst_24 = arith.constant 0.000000e+00 : f32
    %60 = vector.broadcast %cst_24 : f32 to vector<128x32xf32>
    %61 = arith.cmpf ogt, %59, %60 : vector<128x32xf32>
    %62 = vector.broadcast %56 : vector<1x32xf32> to vector<128x32xf32>
    %63 = arith.mulf %59, %62 : vector<128x32xf32>
    %64 = arith.select %61, %59, %63 : vector<128x32xi1>, vector<128x32xf32>
    %65 = vector.broadcast %57 : vector<1x32xf32> to vector<128x32xf32>
    %66 = arith.addf %64, %65 : vector<128x32xf32>
    %67 = vector.extract_strided_slice %30 {offsets = [0, 32], sizes = [128, 32], strides = [1, 1]} : vector<128x96xf32> to vector<128x32xf32>
    %c12 = arith.constant 12 : index
    %c0_25 = arith.constant 0 : index
    %68 = vector.load %arg2[%c12, %c0_25] : memref<51x32xf32, #tpu.memory_space<vmem>>, vector<1x32xf32>
    %c13 = arith.constant 13 : index
    %c0_26 = arith.constant 0 : index
    %69 = vector.load %arg2[%c13, %c0_26] : memref<51x32xf32, #tpu.memory_space<vmem>>, vector<1x32xf32>
    %cst_27 = arith.constant dense<0.000000e+00> : vector<128xf32>
    %70 = vector.multi_reduction <add>, %67, %cst_27 [1] : vector<128x32xf32> to vector<128xf32>
    %71 = vector.shape_cast %70 : vector<128xf32> to vector<128x1xf32>
    %cst_28 = arith.constant 3.200000e+01 : f32
    %72 = vector.broadcast %cst_28 : f32 to vector<128x1xf32>
    %73 = arith.divf %71, %72 : vector<128x1xf32>
    %74 = vector.broadcast %73 : vector<128x1xf32> to vector<128x32xf32>
    %75 = arith.subf %67, %74 : vector<128x32xf32>
    %76 = arith.mulf %75, %75 : vector<128x32xf32>
    %cst_29 = arith.constant dense<0.000000e+00> : vector<128xf32>
    %77 = vector.multi_reduction <add>, %76, %cst_29 [1] : vector<128x32xf32> to vector<128xf32>
    %78 = vector.shape_cast %77 : vector<128xf32> to vector<128x1xf32>
    %cst_30 = arith.constant 3.200000e+01 : f32
    %79 = vector.broadcast %cst_30 : f32 to vector<128x1xf32>
    %80 = arith.divf %78, %79 : vector<128x1xf32>
    %cst_31 = arith.constant 9.99999996E-13 : f32
    %81 = vector.broadcast %cst_31 : f32 to vector<128x1xf32>
    %82 = arith.addf %80, %81 : vector<128x1xf32>
    %83 = math.rsqrt %82 : vector<128x1xf32>
    %84 = vector.broadcast %83 : vector<128x1xf32> to vector<128x32xf32>
    %85 = arith.mulf %75, %84 : vector<128x32xf32>
    %86 = vector.broadcast %68 : vector<1x32xf32> to vector<128x32xf32>
    %87 = arith.mulf %85, %86 : vector<128x32xf32>
    %88 = vector.broadcast %69 : vector<1x32xf32> to vector<128x32xf32>
    %89 = arith.addf %87, %88 : vector<128x32xf32>
    %90 = arith.addf %89, %22 : vector<128x32xf32>
    %c19 = arith.constant 19 : index
    %c0_32 = arith.constant 0 : index
    %91 = vector.load %arg2[%c19, %c0_32] : memref<51x32xf32, #tpu.memory_space<vmem>>, vector<1x32xf32>
    %c20 = arith.constant 20 : index
    %c0_33 = arith.constant 0 : index
    %92 = vector.load %arg2[%c20, %c0_33] : memref<51x32xf32, #tpu.memory_space<vmem>>, vector<1x32xf32>
    %c21 = arith.constant 21 : index
    %c0_34 = arith.constant 0 : index
    %93 = vector.load %arg2[%c21, %c0_34] : memref<51x32xf32, #tpu.memory_space<vmem>>, vector<1x32xf32>
    %94 = vector.broadcast %91 : vector<1x32xf32> to vector<128x32xf32>
    %95 = arith.subf %90, %94 : vector<128x32xf32>
    %cst_35 = arith.constant 0.000000e+00 : f32
    %96 = vector.broadcast %cst_35 : f32 to vector<128x32xf32>
    %97 = arith.cmpf ogt, %95, %96 : vector<128x32xf32>
    %98 = vector.broadcast %92 : vector<1x32xf32> to vector<128x32xf32>
    %99 = arith.mulf %95, %98 : vector<128x32xf32>
    %100 = arith.select %97, %95, %99 : vector<128x32xi1>, vector<128x32xf32>
    %101 = vector.broadcast %93 : vector<1x32xf32> to vector<128x32xf32>
    %102 = arith.addf %100, %101 : vector<128x32xf32>
    %103 = vector.extract_strided_slice %30 {offsets = [0, 64], sizes = [128, 32], strides = [1, 1]} : vector<128x96xf32> to vector<128x32xf32>
    %c14 = arith.constant 14 : index
    %c0_36 = arith.constant 0 : index
    %104 = vector.load %arg2[%c14, %c0_36] : memref<51x32xf32, #tpu.memory_space<vmem>>, vector<1x32xf32>
    %c15 = arith.constant 15 : index
    %c0_37 = arith.constant 0 : index
    %105 = vector.load %arg2[%c15, %c0_37] : memref<51x32xf32, #tpu.memory_space<vmem>>, vector<1x32xf32>
    %cst_38 = arith.constant dense<0.000000e+00> : vector<128xf32>
    %106 = vector.multi_reduction <add>, %103, %cst_38 [1] : vector<128x32xf32> to vector<128xf32>
    %107 = vector.shape_cast %106 : vector<128xf32> to vector<128x1xf32>
    %cst_39 = arith.constant 3.200000e+01 : f32
    %108 = vector.broadcast %cst_39 : f32 to vector<128x1xf32>
    %109 = arith.divf %107, %108 : vector<128x1xf32>
    %110 = vector.broadcast %109 : vector<128x1xf32> to vector<128x32xf32>
    %111 = arith.subf %103, %110 : vector<128x32xf32>
    %112 = arith.mulf %111, %111 : vector<128x32xf32>
    %cst_40 = arith.constant dense<0.000000e+00> : vector<128xf32>
    %113 = vector.multi_reduction <add>, %112, %cst_40 [1] : vector<128x32xf32> to vector<128xf32>
    %114 = vector.shape_cast %113 : vector<128xf32> to vector<128x1xf32>
    %cst_41 = arith.constant 3.200000e+01 : f32
    %115 = vector.broadcast %cst_41 : f32 to vector<128x1xf32>
    %116 = arith.divf %114, %115 : vector<128x1xf32>
    %cst_42 = arith.constant 9.99999996E-13 : f32
    %117 = vector.broadcast %cst_42 : f32 to vector<128x1xf32>
    %118 = arith.addf %116, %117 : vector<128x1xf32>
    %119 = math.rsqrt %118 : vector<128x1xf32>
    %120 = vector.broadcast %119 : vector<128x1xf32> to vector<128x32xf32>
    %121 = arith.mulf %111, %120 : vector<128x32xf32>
    %122 = vector.broadcast %104 : vector<1x32xf32> to vector<128x32xf32>
    %123 = arith.mulf %121, %122 : vector<128x32xf32>
    %124 = vector.broadcast %105 : vector<1x32xf32> to vector<128x32xf32>
    %125 = arith.addf %123, %124 : vector<128x32xf32>
    %126 = arith.addf %125, %22 : vector<128x32xf32>
    %c22 = arith.constant 22 : index
    %c0_43 = arith.constant 0 : index
    %127 = vector.load %arg2[%c22, %c0_43] : memref<51x32xf32, #tpu.memory_space<vmem>>, vector<1x32xf32>
    %c23 = arith.constant 23 : index
    %c0_44 = arith.constant 0 : index
    %128 = vector.load %arg2[%c23, %c0_44] : memref<51x32xf32, #tpu.memory_space<vmem>>, vector<1x32xf32>
    %c24 = arith.constant 24 : index
    %c0_45 = arith.constant 0 : index
    %129 = vector.load %arg2[%c24, %c0_45] : memref<51x32xf32, #tpu.memory_space<vmem>>, vector<1x32xf32>
    %130 = vector.broadcast %127 : vector<1x32xf32> to vector<128x32xf32>
    %131 = arith.subf %126, %130 : vector<128x32xf32>
    %cst_46 = arith.constant 0.000000e+00 : f32
    %132 = vector.broadcast %cst_46 : f32 to vector<128x32xf32>
    %133 = arith.cmpf ogt, %131, %132 : vector<128x32xf32>
    %134 = vector.broadcast %128 : vector<1x32xf32> to vector<128x32xf32>
    %135 = arith.mulf %131, %134 : vector<128x32xf32>
    %136 = arith.select %133, %131, %135 : vector<128x32xi1>, vector<128x32xf32>
    %137 = vector.broadcast %129 : vector<1x32xf32> to vector<128x32xf32>
    %138 = arith.addf %136, %137 : vector<128x32xf32>
    %c25 = arith.constant 25 : index
    %c0_47 = arith.constant 0 : index
    %139 = vector.load %arg2[%c25, %c0_47] : memref<51x32xf32, #tpu.memory_space<vmem>>, vector<1x32xf32>
    %140 = vector.broadcast %139 : vector<1x32xf32> to vector<128x32xf32>
    %141 = arith.addf %66, %140 : vector<128x32xf32>
    %cst_48 = arith.constant 0.353553385 : f32
    %142 = vector.broadcast %cst_48 : f32 to vector<128x32xf32>
    %143 = arith.mulf %141, %142 : vector<128x32xf32>
    %c26 = arith.constant 26 : index
    %c0_49 = arith.constant 0 : index
    %144 = vector.load %arg2[%c26, %c0_49] : memref<51x32xf32, #tpu.memory_space<vmem>>, vector<1x32xf32>
    %145 = vector.broadcast %144 : vector<1x32xf32> to vector<128x32xf32>
    %146 = arith.addf %102, %145 : vector<128x32xf32>
    %c27 = arith.constant 27 : index
    %c0_50 = arith.constant 0 : index
    %147 = vector.load %arg2[%c27, %c0_50] : memref<51x32xf32, #tpu.memory_space<vmem>>, vector<1x32xf32>
    %148 = vector.broadcast %147 : vector<1x32xf32> to vector<128x32xf32>
    %149 = arith.addf %138, %148 : vector<128x32xf32>
    %c0_51 = arith.constant 0 : index
    %c0_52 = arith.constant 0 : index
    %150 = vector.load %arg9[%c0_51, %c0_52] : memref<4x32xf32, #tpu.memory_space<vmem>>, vector<4x32xf32>
    %151 = vector.extract_strided_slice %150 {offsets = [0, 0], sizes = [1, 32], strides = [1, 1]} : vector<4x32xf32> to vector<1x32xf32>
    %152 = vector.broadcast %151 : vector<1x32xf32> to vector<128x32xf32>
    %153 = arith.mulf %143, %152 : vector<128x32xf32>
    %154 = vector.extract_strided_slice %150 {offsets = [1, 0], sizes = [1, 32], strides = [1, 1]} : vector<4x32xf32> to vector<1x32xf32>
    %155 = vector.broadcast %154 : vector<1x32xf32> to vector<128x32xf32>
    %156 = arith.mulf %143, %155 : vector<128x32xf32>
    %157 = vector.extract_strided_slice %150 {offsets = [2, 0], sizes = [1, 32], strides = [1, 1]} : vector<4x32xf32> to vector<1x32xf32>
    %158 = vector.broadcast %157 : vector<1x32xf32> to vector<128x32xf32>
    %159 = arith.mulf %143, %158 : vector<128x32xf32>
    %160 = vector.extract_strided_slice %150 {offsets = [3, 0], sizes = [1, 32], strides = [1, 1]} : vector<4x32xf32> to vector<1x32xf32>
    %161 = vector.broadcast %160 : vector<1x32xf32> to vector<128x32xf32>
    %162 = arith.mulf %143, %161 : vector<128x32xf32>
    %163 = tpu.concatenate %153, %156, %159, %162 in 0 : vector<128x32xf32>, vector<128x32xf32>, vector<128x32xf32>, vector<128x32xf32> -> vector<512x32xf32>
    %cst_53 = arith.constant dense<0.000000e+00> : vector<512x128xf32>
    %164 = tpu.matmul %163, %146, %cst_53 {dimension_numbers = #tpu.dot_dimension_numbers<[1], [1], [0], [0], [0, 0, 1, 0], [], []>} : vector<512x32xf32>, vector<128x32xf32>, vector<512x128xf32> -> vector<512x128xf32>
    %c0_54 = arith.constant 0 : index
    %c0_55 = arith.constant 0 : index
    %165 = vector.load %arg8[%c0_54, %c0_55] : memref<512x128xf32, #tpu.memory_space<vmem>>, vector<512x128xf32>
    %166 = arith.addf %164, %165 : vector<512x128xf32>
    %cst_56 = arith.constant dense<0xFF800000> : vector<512xf32>
    %167 = vector.multi_reduction <maximumf>, %166, %cst_56 [1] : vector<512x128xf32> to vector<512xf32>
    %168 = vector.shape_cast %167 : vector<512xf32> to vector<512x1xf32>
    %169 = vector.broadcast %168 : vector<512x1xf32> to vector<512x128xf32>
    %170 = arith.subf %166, %169 : vector<512x128xf32>
    %171 = math.exp %170 : vector<512x128xf32>
    %cst_57 = arith.constant dense<0.000000e+00> : vector<512xf32>
    %172 = vector.multi_reduction <add>, %171, %cst_57 [1] : vector<512x128xf32> to vector<512xf32>
    %173 = vector.shape_cast %172 : vector<512xf32> to vector<512x1xf32>
    %174 = tpu.reciprocal %173 {approx = true} : vector<512x1xf32> -> vector<512x1xf32>
    %175 = vector.broadcast %174 : vector<512x1xf32> to vector<512x128xf32>
    %176 = arith.mulf %171, %175 : vector<512x128xf32>
    %cst_58 = arith.constant dense<0.000000e+00> : vector<512x32xf32>
    %177 = tpu.matmul %176, %149, %cst_58 {dimension_numbers = #tpu.dot_dimension_numbers<[1], [0], [0], [1], [0, 0, 1, 1], [], []>} : vector<512x128xf32>, vector<128x32xf32>, vector<512x32xf32> -> vector<512x32xf32>
    %cst_59 = arith.constant 0.000000e+00 : f32
    %178 = vector.broadcast %cst_59 : f32 to vector<128x32xf32>
    %179 = vector.extract_strided_slice %177 {offsets = [0, 0], sizes = [128, 32], strides = [1, 1]} : vector<512x32xf32> to vector<128x32xf32>
    %180 = vector.extract_strided_slice %150 {offsets = [0, 0], sizes = [1, 32], strides = [1, 1]} : vector<4x32xf32> to vector<1x32xf32>
    %181 = vector.broadcast %180 : vector<1x32xf32> to vector<128x32xf32>
    %182 = arith.mulf %179, %181 : vector<128x32xf32>
    %183 = arith.addf %178, %182 : vector<128x32xf32>
    %184 = vector.extract_strided_slice %177 {offsets = [128, 0], sizes = [128, 32], strides = [1, 1]} : vector<512x32xf32> to vector<128x32xf32>
    %185 = vector.extract_strided_slice %150 {offsets = [1, 0], sizes = [1, 32], strides = [1, 1]} : vector<4x32xf32> to vector<1x32xf32>
    %186 = vector.broadcast %185 : vector<1x32xf32> to vector<128x32xf32>
    %187 = arith.mulf %184, %186 : vector<128x32xf32>
    %188 = arith.addf %183, %187 : vector<128x32xf32>
    %189 = vector.extract_strided_slice %177 {offsets = [256, 0], sizes = [128, 32], strides = [1, 1]} : vector<512x32xf32> to vector<128x32xf32>
    %190 = vector.extract_strided_slice %150 {offsets = [2, 0], sizes = [1, 32], strides = [1, 1]} : vector<4x32xf32> to vector<1x32xf32>
    %191 = vector.broadcast %190 : vector<1x32xf32> to vector<128x32xf32>
    %192 = arith.mulf %189, %191 : vector<128x32xf32>
    %193 = arith.addf %188, %192 : vector<128x32xf32>
    %194 = vector.extract_strided_slice %177 {offsets = [384, 0], sizes = [128, 32], strides = [1, 1]} : vector<512x32xf32> to vector<128x32xf32>
    %195 = vector.extract_strided_slice %150 {offsets = [3, 0], sizes = [1, 32], strides = [1, 1]} : vector<4x32xf32> to vector<1x32xf32>
    %196 = vector.broadcast %195 : vector<1x32xf32> to vector<128x32xf32>
    %197 = arith.mulf %194, %196 : vector<128x32xf32>
    %198 = arith.addf %193, %197 : vector<128x32xf32>
    %c28 = arith.constant 28 : index
    %c0_60 = arith.constant 0 : index
    %199 = vector.load %arg2[%c28, %c0_60] : memref<51x32xf32, #tpu.memory_space<vmem>>, vector<1x32xf32>
    %c29 = arith.constant 29 : index
    %c0_61 = arith.constant 0 : index
    %200 = vector.load %arg2[%c29, %c0_61] : memref<51x32xf32, #tpu.memory_space<vmem>>, vector<1x32xf32>
    %cst_62 = arith.constant dense<0.000000e+00> : vector<128xf32>
    %201 = vector.multi_reduction <add>, %198, %cst_62 [1] : vector<128x32xf32> to vector<128xf32>
    %202 = vector.shape_cast %201 : vector<128xf32> to vector<128x1xf32>
    %cst_63 = arith.constant 3.200000e+01 : f32
    %203 = vector.broadcast %cst_63 : f32 to vector<128x1xf32>
    %204 = arith.divf %202, %203 : vector<128x1xf32>
    %205 = vector.broadcast %204 : vector<128x1xf32> to vector<128x32xf32>
    %206 = arith.subf %198, %205 : vector<128x32xf32>
    %207 = arith.mulf %206, %206 : vector<128x32xf32>
    %cst_64 = arith.constant dense<0.000000e+00> : vector<128xf32>
    %208 = vector.multi_reduction <add>, %207, %cst_64 [1] : vector<128x32xf32> to vector<128xf32>
    %209 = vector.shape_cast %208 : vector<128xf32> to vector<128x1xf32>
    %cst_65 = arith.constant 3.200000e+01 : f32
    %210 = vector.broadcast %cst_65 : f32 to vector<128x1xf32>
    %211 = arith.divf %209, %210 : vector<128x1xf32>
    %cst_66 = arith.constant 9.99999996E-13 : f32
    %212 = vector.broadcast %cst_66 : f32 to vector<128x1xf32>
    %213 = arith.addf %211, %212 : vector<128x1xf32>
    %214 = math.rsqrt %213 : vector<128x1xf32>
    %215 = vector.broadcast %214 : vector<128x1xf32> to vector<128x32xf32>
    %216 = arith.mulf %206, %215 : vector<128x32xf32>
    %217 = vector.broadcast %199 : vector<1x32xf32> to vector<128x32xf32>
    %218 = arith.mulf %216, %217 : vector<128x32xf32>
    %219 = vector.broadcast %200 : vector<1x32xf32> to vector<128x32xf32>
    %220 = arith.addf %218, %219 : vector<128x32xf32>
    %221 = arith.addf %220, %66 : vector<128x32xf32>
    %222 = arith.addf %221, %102 : vector<128x32xf32>
    %223 = arith.addf %222, %138 : vector<128x32xf32>
    %c30 = arith.constant 30 : index
    %c0_67 = arith.constant 0 : index
    %224 = vector.load %arg2[%c30, %c0_67] : memref<51x32xf32, #tpu.memory_space<vmem>>, vector<1x32xf32>
    %c31 = arith.constant 31 : index
    %c0_68 = arith.constant 0 : index
    %225 = vector.load %arg2[%c31, %c0_68] : memref<51x32xf32, #tpu.memory_space<vmem>>, vector<1x32xf32>
    %c32 = arith.constant 32 : index
    %c0_69 = arith.constant 0 : index
    %226 = vector.load %arg2[%c32, %c0_69] : memref<51x32xf32, #tpu.memory_space<vmem>>, vector<1x32xf32>
    %227 = vector.broadcast %224 : vector<1x32xf32> to vector<128x32xf32>
    %228 = arith.subf %223, %227 : vector<128x32xf32>
    %cst_70 = arith.constant 0.000000e+00 : f32
    %229 = vector.broadcast %cst_70 : f32 to vector<128x32xf32>
    %230 = arith.cmpf ogt, %228, %229 : vector<128x32xf32>
    %231 = vector.broadcast %225 : vector<1x32xf32> to vector<128x32xf32>
    %232 = arith.mulf %228, %231 : vector<128x32xf32>
    %233 = arith.select %230, %228, %232 : vector<128x32xi1>, vector<128x32xf32>
    %234 = vector.broadcast %226 : vector<1x32xf32> to vector<128x32xf32>
    %235 = arith.addf %233, %234 : vector<128x32xf32>
    %c0_71 = arith.constant 0 : index
    %c0_72 = arith.constant 0 : index
    %236 = vector.load %arg5[%c0_71, %c0_72] : memref<32x32xf32, #tpu.memory_space<vmem>>, vector<32x32xf32>
    %cst_73 = arith.constant dense<0.000000e+00> : vector<128x32xf32>
    %237 = tpu.matmul %235, %236, %cst_73 {dimension_numbers = #tpu.dot_dimension_numbers<[1], [0], [0], [1], [0, 0, 1, 1], [], []>} : vector<128x32xf32>, vector<32x32xf32>, vector<128x32xf32> -> vector<128x32xf32>
    %c33 = arith.constant 33 : index
    %c0_74 = arith.constant 0 : index
    %238 = vector.load %arg2[%c33, %c0_74] : memref<51x32xf32, #tpu.memory_space<vmem>>, vector<1x32xf32>
    %239 = vector.broadcast %238 : vector<1x32xf32> to vector<128x32xf32>
    %240 = arith.addf %237, %239 : vector<128x32xf32>
    %c35 = arith.constant 35 : index
    %c0_75 = arith.constant 0 : index
    %241 = vector.load %arg2[%c35, %c0_75] : memref<51x32xf32, #tpu.memory_space<vmem>>, vector<1x32xf32>
    %c36 = arith.constant 36 : index
    %c0_76 = arith.constant 0 : index
    %242 = vector.load %arg2[%c36, %c0_76] : memref<51x32xf32, #tpu.memory_space<vmem>>, vector<1x32xf32>
    %cst_77 = arith.constant dense<0.000000e+00> : vector<128xf32>
    %243 = vector.multi_reduction <add>, %240, %cst_77 [1] : vector<128x32xf32> to vector<128xf32>
    %244 = vector.shape_cast %243 : vector<128xf32> to vector<128x1xf32>
    %cst_78 = arith.constant 3.200000e+01 : f32
    %245 = vector.broadcast %cst_78 : f32 to vector<128x1xf32>
    %246 = arith.divf %244, %245 : vector<128x1xf32>
    %247 = vector.broadcast %246 : vector<128x1xf32> to vector<128x32xf32>
    %248 = arith.subf %240, %247 : vector<128x32xf32>
    %249 = arith.mulf %248, %248 : vector<128x32xf32>
    %cst_79 = arith.constant dense<0.000000e+00> : vector<128xf32>
    %250 = vector.multi_reduction <add>, %249, %cst_79 [1] : vector<128x32xf32> to vector<128xf32>
    %251 = vector.shape_cast %250 : vector<128xf32> to vector<128x1xf32>
    %cst_80 = arith.constant 3.200000e+01 : f32
    %252 = vector.broadcast %cst_80 : f32 to vector<128x1xf32>
    %253 = arith.divf %251, %252 : vector<128x1xf32>
    %cst_81 = arith.constant 9.99999996E-13 : f32
    %254 = vector.broadcast %cst_81 : f32 to vector<128x1xf32>
    %255 = arith.addf %253, %254 : vector<128x1xf32>
    %256 = math.rsqrt %255 : vector<128x1xf32>
    %257 = vector.broadcast %256 : vector<128x1xf32> to vector<128x32xf32>
    %258 = arith.mulf %248, %257 : vector<128x32xf32>
    %259 = vector.broadcast %241 : vector<1x32xf32> to vector<128x32xf32>
    %260 = arith.mulf %258, %259 : vector<128x32xf32>
    %261 = vector.broadcast %242 : vector<1x32xf32> to vector<128x32xf32>
    %262 = arith.addf %260, %261 : vector<128x32xf32>
    %263 = arith.addf %262, %235 : vector<128x32xf32>
    %c37 = arith.constant 37 : index
    %c0_82 = arith.constant 0 : index
    %264 = vector.load %arg2[%c37, %c0_82] : memref<51x32xf32, #tpu.memory_space<vmem>>, vector<1x32xf32>
    %c38 = arith.constant 38 : index
    %c0_83 = arith.constant 0 : index
    %265 = vector.load %arg2[%c38, %c0_83] : memref<51x32xf32, #tpu.memory_space<vmem>>, vector<1x32xf32>
    %c39 = arith.constant 39 : index
    %c0_84 = arith.constant 0 : index
    %266 = vector.load %arg2[%c39, %c0_84] : memref<51x32xf32, #tpu.memory_space<vmem>>, vector<1x32xf32>
    %267 = vector.broadcast %264 : vector<1x32xf32> to vector<128x32xf32>
    %268 = arith.subf %263, %267 : vector<128x32xf32>
    %cst_85 = arith.constant 0.000000e+00 : f32
    %269 = vector.broadcast %cst_85 : f32 to vector<128x32xf32>
    %270 = arith.cmpf ogt, %268, %269 : vector<128x32xf32>
    %271 = vector.broadcast %265 : vector<1x32xf32> to vector<128x32xf32>
    %272 = arith.mulf %268, %271 : vector<128x32xf32>
    %273 = arith.select %270, %268, %272 : vector<128x32xi1>, vector<128x32xf32>
    %274 = vector.broadcast %266 : vector<1x32xf32> to vector<128x32xf32>
    %275 = arith.addf %273, %274 : vector<128x32xf32>
    %c40 = arith.constant 40 : index
    %c0_86 = arith.constant 0 : index
    %276 = vector.load %arg2[%c40, %c0_86] : memref<51x32xf32, #tpu.memory_space<vmem>>, vector<1x32xf32>
    %277 = vector.broadcast %276 : vector<1x32xf32> to vector<128x32xf32>
    %278 = arith.mulf %275, %277 : vector<128x32xf32>
    %c41 = arith.constant 41 : index
    %c0_87 = arith.constant 0 : index
    %279 = vector.load %arg2[%c41, %c0_87] : memref<51x32xf32, #tpu.memory_space<vmem>>, vector<1x32xf32>
    %280 = vector.broadcast %279 : vector<1x32xf32> to vector<128x32xf32>
    %281 = arith.addf %278, %280 : vector<128x32xf32>
    %282 = arith.addf %281, %0 : vector<128x32xf32>
    %c2 = arith.constant 2 : index
    %c0_88 = arith.constant 0 : index
    %283 = vector.load %arg2[%c2, %c0_88] : memref<51x32xf32, #tpu.memory_space<vmem>>, vector<1x32xf32>
    %c3 = arith.constant 3 : index
    %c0_89 = arith.constant 0 : index
    %284 = vector.load %arg2[%c3, %c0_89] : memref<51x32xf32, #tpu.memory_space<vmem>>, vector<1x32xf32>
    %cst_90 = arith.constant dense<0.000000e+00> : vector<128xf32>
    %285 = vector.multi_reduction <add>, %282, %cst_90 [1] : vector<128x32xf32> to vector<128xf32>
    %286 = vector.shape_cast %285 : vector<128xf32> to vector<128x1xf32>
    %cst_91 = arith.constant 3.200000e+01 : f32
    %287 = vector.broadcast %cst_91 : f32 to vector<128x1xf32>
    %288 = arith.divf %286, %287 : vector<128x1xf32>
    %289 = vector.broadcast %288 : vector<128x1xf32> to vector<128x32xf32>
    %290 = arith.subf %282, %289 : vector<128x32xf32>
    %291 = arith.mulf %290, %290 : vector<128x32xf32>
    %cst_92 = arith.constant dense<0.000000e+00> : vector<128xf32>
    %292 = vector.multi_reduction <add>, %291, %cst_92 [1] : vector<128x32xf32> to vector<128xf32>
    %293 = vector.shape_cast %292 : vector<128xf32> to vector<128x1xf32>
    %cst_93 = arith.constant 3.200000e+01 : f32
    %294 = vector.broadcast %cst_93 : f32 to vector<128x1xf32>
    %295 = arith.divf %293, %294 : vector<128x1xf32>
    %cst_94 = arith.constant 9.99999996E-13 : f32
    %296 = vector.broadcast %cst_94 : f32 to vector<128x1xf32>
    %297 = arith.addf %295, %296 : vector<128x1xf32>
    %298 = math.rsqrt %297 : vector<128x1xf32>
    %299 = vector.broadcast %298 : vector<128x1xf32> to vector<128x32xf32>
    %300 = arith.mulf %290, %299 : vector<128x32xf32>
    %301 = vector.broadcast %283 : vector<1x32xf32> to vector<128x32xf32>
    %302 = arith.mulf %300, %301 : vector<128x32xf32>
    %303 = vector.broadcast %284 : vector<1x32xf32> to vector<128x32xf32>
    %304 = arith.addf %302, %303 : vector<128x32xf32>
    %c0_95 = arith.constant 0 : index
    %c0_96 = arith.constant 0 : index
    %305 = vector.load %arg6[%c0_95, %c0_96] : memref<32x64xf32, #tpu.memory_space<vmem>>, vector<32x64xf32>
    %cst_97 = arith.constant dense<0.000000e+00> : vector<128x64xf32>
    %306 = tpu.matmul %304, %305, %cst_97 {dimension_numbers = #tpu.dot_dimension_numbers<[1], [0], [0], [1], [0, 0, 1, 1], [], []>} : vector<128x32xf32>, vector<32x64xf32>, vector<128x64xf32> -> vector<128x64xf32>
    %c0_98 = arith.constant 0 : index
    %c0_99 = arith.constant 0 : index
    %307 = vector.load %arg3[%c0_98, %c0_99] : memref<7x64xf32, #tpu.memory_space<vmem>>, vector<1x64xf32>
    %308 = vector.broadcast %307 : vector<1x64xf32> to vector<128x64xf32>
    %309 = arith.addf %306, %308 : vector<128x64xf32>
    %c1_100 = arith.constant 1 : index
    %c0_101 = arith.constant 0 : index
    %310 = vector.load %arg3[%c1_100, %c0_101] : memref<7x64xf32, #tpu.memory_space<vmem>>, vector<1x64xf32>
    %c2_102 = arith.constant 2 : index
    %c0_103 = arith.constant 0 : index
    %311 = vector.load %arg3[%c2_102, %c0_103] : memref<7x64xf32, #tpu.memory_space<vmem>>, vector<1x64xf32>
    %cst_104 = arith.constant dense<0.000000e+00> : vector<128xf32>
    %312 = vector.multi_reduction <add>, %309, %cst_104 [1] : vector<128x64xf32> to vector<128xf32>
    %313 = vector.shape_cast %312 : vector<128xf32> to vector<128x1xf32>
    %cst_105 = arith.constant 6.400000e+01 : f32
    %314 = vector.broadcast %cst_105 : f32 to vector<128x1xf32>
    %315 = arith.divf %313, %314 : vector<128x1xf32>
    %316 = vector.broadcast %315 : vector<128x1xf32> to vector<128x64xf32>
    %317 = arith.subf %309, %316 : vector<128x64xf32>
    %318 = arith.mulf %317, %317 : vector<128x64xf32>
    %cst_106 = arith.constant dense<0.000000e+00> : vector<128xf32>
    %319 = vector.multi_reduction <add>, %318, %cst_106 [1] : vector<128x64xf32> to vector<128xf32>
    %320 = vector.shape_cast %319 : vector<128xf32> to vector<128x1xf32>
    %cst_107 = arith.constant 6.400000e+01 : f32
    %321 = vector.broadcast %cst_107 : f32 to vector<128x1xf32>
    %322 = arith.divf %320, %321 : vector<128x1xf32>
    %cst_108 = arith.constant 9.99999996E-13 : f32
    %323 = vector.broadcast %cst_108 : f32 to vector<128x1xf32>
    %324 = arith.addf %322, %323 : vector<128x1xf32>
    %325 = math.rsqrt %324 : vector<128x1xf32>
    %326 = vector.broadcast %325 : vector<128x1xf32> to vector<128x64xf32>
    %327 = arith.mulf %317, %326 : vector<128x64xf32>
    %328 = vector.broadcast %310 : vector<1x64xf32> to vector<128x64xf32>
    %329 = arith.mulf %327, %328 : vector<128x64xf32>
    %330 = vector.broadcast %311 : vector<1x64xf32> to vector<128x64xf32>
    %331 = arith.addf %329, %330 : vector<128x64xf32>
    %332 = tpu.concatenate %304, %304 in 1 : vector<128x32xf32>, vector<128x32xf32> -> vector<128x64xf32>
    %333 = arith.addf %331, %332 : vector<128x64xf32>
    %c3_109 = arith.constant 3 : index
    %c0_110 = arith.constant 0 : index
    %334 = vector.load %arg3[%c3_109, %c0_110] : memref<7x64xf32, #tpu.memory_space<vmem>>, vector<1x64xf32>
    %c4 = arith.constant 4 : index
    %c0_111 = arith.constant 0 : index
    %335 = vector.load %arg3[%c4, %c0_111] : memref<7x64xf32, #tpu.memory_space<vmem>>, vector<1x64xf32>
    %c5 = arith.constant 5 : index
    %c0_112 = arith.constant 0 : index
    %336 = vector.load %arg3[%c5, %c0_112] : memref<7x64xf32, #tpu.memory_space<vmem>>, vector<1x64xf32>
    %337 = vector.broadcast %334 : vector<1x64xf32> to vector<128x64xf32>
    %338 = arith.subf %333, %337 : vector<128x64xf32>
    %cst_113 = arith.constant 0.000000e+00 : f32
    %339 = vector.broadcast %cst_113 : f32 to vector<128x64xf32>
    %340 = arith.cmpf ogt, %338, %339 : vector<128x64xf32>
    %341 = vector.broadcast %335 : vector<1x64xf32> to vector<128x64xf32>
    %342 = arith.mulf %338, %341 : vector<128x64xf32>
    %343 = arith.select %340, %338, %342 : vector<128x64xi1>, vector<128x64xf32>
    %344 = vector.broadcast %336 : vector<1x64xf32> to vector<128x64xf32>
    %345 = arith.addf %343, %344 : vector<128x64xf32>
    %c0_114 = arith.constant 0 : index
    %c0_115 = arith.constant 0 : index
    %346 = vector.load %arg7[%c0_114, %c0_115] : memref<64x64xf32, #tpu.memory_space<vmem>>, vector<64x64xf32>
    %cst_116 = arith.constant dense<0.000000e+00> : vector<128x64xf32>
    %347 = tpu.matmul %345, %346, %cst_116 {dimension_numbers = #tpu.dot_dimension_numbers<[1], [0], [0], [1], [0, 0, 1, 1], [], []>} : vector<128x64xf32>, vector<64x64xf32>, vector<128x64xf32> -> vector<128x64xf32>
    %348 = vector.extract_strided_slice %347 {offsets = [0, 0], sizes = [128, 32], strides = [1, 1]} : vector<128x64xf32> to vector<128x32xf32>
    %c43 = arith.constant 43 : index
    %c0_117 = arith.constant 0 : index
    %349 = vector.load %arg2[%c43, %c0_117] : memref<51x32xf32, #tpu.memory_space<vmem>>, vector<1x32xf32>
    %350 = vector.broadcast %349 : vector<1x32xf32> to vector<128x32xf32>
    %351 = arith.addf %348, %350 : vector<128x32xf32>
    %352 = vector.extract_strided_slice %347 {offsets = [0, 32], sizes = [128, 32], strides = [1, 1]} : vector<128x64xf32> to vector<128x32xf32>
    %c44 = arith.constant 44 : index
    %c0_118 = arith.constant 0 : index
    %353 = vector.load %arg2[%c44, %c0_118] : memref<51x32xf32, #tpu.memory_space<vmem>>, vector<1x32xf32>
    %c45 = arith.constant 45 : index
    %c0_119 = arith.constant 0 : index
    %354 = vector.load %arg2[%c45, %c0_119] : memref<51x32xf32, #tpu.memory_space<vmem>>, vector<1x32xf32>
    %cst_120 = arith.constant dense<0.000000e+00> : vector<128xf32>
    %355 = vector.multi_reduction <add>, %351, %cst_120 [1] : vector<128x32xf32> to vector<128xf32>
    %356 = vector.shape_cast %355 : vector<128xf32> to vector<128x1xf32>
    %cst_121 = arith.constant 3.200000e+01 : f32
    %357 = vector.broadcast %cst_121 : f32 to vector<128x1xf32>
    %358 = arith.divf %356, %357 : vector<128x1xf32>
    %359 = vector.broadcast %358 : vector<128x1xf32> to vector<128x32xf32>
    %360 = arith.subf %351, %359 : vector<128x32xf32>
    %361 = arith.mulf %360, %360 : vector<128x32xf32>
    %cst_122 = arith.constant dense<0.000000e+00> : vector<128xf32>
    %362 = vector.multi_reduction <add>, %361, %cst_122 [1] : vector<128x32xf32> to vector<128xf32>
    %363 = vector.shape_cast %362 : vector<128xf32> to vector<128x1xf32>
    %cst_123 = arith.constant 3.200000e+01 : f32
    %364 = vector.broadcast %cst_123 : f32 to vector<128x1xf32>
    %365 = arith.divf %363, %364 : vector<128x1xf32>
    %cst_124 = arith.constant 9.99999996E-13 : f32
    %366 = vector.broadcast %cst_124 : f32 to vector<128x1xf32>
    %367 = arith.addf %365, %366 : vector<128x1xf32>
    %368 = math.rsqrt %367 : vector<128x1xf32>
    %369 = vector.broadcast %368 : vector<128x1xf32> to vector<128x32xf32>
    %370 = arith.mulf %360, %369 : vector<128x32xf32>
    %371 = vector.broadcast %353 : vector<1x32xf32> to vector<128x32xf32>
    %372 = arith.mulf %370, %371 : vector<128x32xf32>
    %373 = vector.broadcast %354 : vector<1x32xf32> to vector<128x32xf32>
    %374 = arith.addf %372, %373 : vector<128x32xf32>
    %375 = arith.addf %374, %352 : vector<128x32xf32>
    %c46 = arith.constant 46 : index
    %c0_125 = arith.constant 0 : index
    %376 = vector.load %arg2[%c46, %c0_125] : memref<51x32xf32, #tpu.memory_space<vmem>>, vector<1x32xf32>
    %c47 = arith.constant 47 : index
    %c0_126 = arith.constant 0 : index
    %377 = vector.load %arg2[%c47, %c0_126] : memref<51x32xf32, #tpu.memory_space<vmem>>, vector<1x32xf32>
    %c48 = arith.constant 48 : index
    %c0_127 = arith.constant 0 : index
    %378 = vector.load %arg2[%c48, %c0_127] : memref<51x32xf32, #tpu.memory_space<vmem>>, vector<1x32xf32>
    %379 = vector.broadcast %376 : vector<1x32xf32> to vector<128x32xf32>
    %380 = arith.subf %375, %379 : vector<128x32xf32>
    %cst_128 = arith.constant 0.000000e+00 : f32
    %381 = vector.broadcast %cst_128 : f32 to vector<128x32xf32>
    %382 = arith.cmpf ogt, %380, %381 : vector<128x32xf32>
    %383 = vector.broadcast %377 : vector<1x32xf32> to vector<128x32xf32>
    %384 = arith.mulf %380, %383 : vector<128x32xf32>
    %385 = arith.select %382, %380, %384 : vector<128x32xi1>, vector<128x32xf32>
    %386 = vector.broadcast %378 : vector<1x32xf32> to vector<128x32xf32>
    %387 = arith.addf %385, %386 : vector<128x32xf32>
    %c49 = arith.constant 49 : index
    %c0_129 = arith.constant 0 : index
    %388 = vector.load %arg2[%c49, %c0_129] : memref<51x32xf32, #tpu.memory_space<vmem>>, vector<1x32xf32>
    %389 = vector.broadcast %388 : vector<1x32xf32> to vector<128x32xf32>
    %390 = arith.mulf %387, %389 : vector<128x32xf32>
    %c50 = arith.constant 50 : index
    %c0_130 = arith.constant 0 : index
    %391 = vector.load %arg2[%c50, %c0_130] : memref<51x32xf32, #tpu.memory_space<vmem>>, vector<1x32xf32>
    %392 = vector.broadcast %391 : vector<1x32xf32> to vector<128x32xf32>
    %393 = arith.addf %390, %392 : vector<128x32xf32>
    %394 = arith.addf %393, %282 : vector<128x32xf32>
    %c0_131 = arith.constant 0 : index
    %c0_132 = arith.constant 0 : index
    %395 = vector.load %arg10[%c0_131, %c0_132] : memref<128x32xf32, #tpu.memory_space<vmem>>, vector<128x32xf32>
    tpu.vector_store %arg10[%c0_131, %c0_132], %394 {strides = array<i32>} : memref<128x32xf32, #tpu.memory_space<vmem>>, vector<128x32xf32>,
    return
  }
  func.func @transform_0(%arg0: i32) -> (i32, i32) {
    %c0_i32 = arith.constant 0 : i32
    %c0_i32_0 = arith.constant 0 : i32
    %c0_i32_1 = arith.constant 0 : i32
    return %c0_i32, %c0_i32_0 : i32, i32
  }
  func.func @transform_1(%arg0: i32) -> (i32, i32) {
    %c0_i32 = arith.constant 0 : i32
    %c0_i32_0 = arith.constant 0 : i32
    %c0_i32_1 = arith.constant 0 : i32
    return %c0_i32, %c0_i32_0 : i32, i32
  }
  func.func @transform_2(%arg0: i32) -> (i32, i32) {
    %c0_i32 = arith.constant 0 : i32
    %c0_i32_0 = arith.constant 0 : i32
    %c0_i32_1 = arith.constant 0 : i32
    return %c0_i32, %c0_i32_0 : i32, i32
  }
  func.func @transform_3(%arg0: i32) -> (i32, i32) {
    %c0_i32 = arith.constant 0 : i32
    %c0_i32_0 = arith.constant 0 : i32
    %c0_i32_1 = arith.constant 0 : i32
    return %c0_i32, %c0_i32_0 : i32, i32
  }
  func.func @transform_4(%arg0: i32) -> (i32, i32) {
    %c0_i32 = arith.constant 0 : i32
    %c0_i32_0 = arith.constant 0 : i32
    %c0_i32_1 = arith.constant 0 : i32
    return %c0_i32, %c0_i32_0 : i32, i32
  }
  func.func @transform_5(%arg0: i32) -> (i32, i32) {
    %c0_i32 = arith.constant 0 : i32
    %c0_i32_0 = arith.constant 0 : i32
    %c0_i32_1 = arith.constant 0 : i32
    return %c0_i32, %c0_i32_0 : i32, i32
  }
  func.func @transform_6(%arg0: i32) -> (i32, i32) {
    %c0_i32 = arith.constant 0 : i32
    %c0_i32_0 = arith.constant 0 : i32
    %c0_i32_1 = arith.constant 0 : i32
    return %c0_i32, %c0_i32_0 : i32, i32
  }
  func.func @transform_7(%arg0: i32) -> (i32, i32) {
    %c0_i32 = arith.constant 0 : i32
    %c0_i32_0 = arith.constant 0 : i32
    %c0_i32_1 = arith.constant 0 : i32
    return %c0_i32, %c0_i32_0 : i32, i32
  }
  func.func @transform_8(%arg0: i32) -> (i32, i32) {
    %c0_i32 = arith.constant 0 : i32
    %c0_i32_0 = arith.constant 0 : i32
    %c0_i32_1 = arith.constant 0 : i32
    return %c0_i32, %c0_i32_0 : i32, i32
  }
  func.func @transform_9(%arg0: i32) -> (i32, i32) {
    %c0_i32 = arith.constant 0 : i32
    %c0_i32_0 = arith.constant 0 : i32
    %c0_i32_1 = arith.constant 0 : i32
    return %c0_i32, %c0_i32_0 : i32, i32
  }
}

</mosaic_0001>

<bundles_post_ra>
// kernel: vit_layer_pallas.1
= control target key start
LH: loop header
LB: loop body
LE: loop exit
PB: predicated region body
PF: predicated region fallthrough
CT: control target
= control target key end

     0   :  { %vm50_vm0 = vcmask 261120   ;;  %s8363_s22 = smov 64   ;;  %s8364_s27 = smov 32   ;;  %vm312_vm1 = vcmask 523264   ;;  %s13494_s0 = inlined_call_operand.vmem [shape: f32[128,32], index: 0, kind: input, shape index: {}]   ;;  %s13495_s1 = inlined_call_operand.vmem [shape: f32[51,32], index: 1, kind: input, shape index: {}]   ;;  %s13496_s3 = inlined_call_operand.vmem [shape: f32[32,96], index: 3, kind: input, shape index: {}]   ;;  %s13497_s8 = inlined_call_operand.vmem [shape: f32[4,32], index: 8, kind: input, shape index: {}]   ;;  %s13498_s7 = inlined_call_operand.vmem [shape: f32[512,128], index: 7, kind: input, shape index: {}]   ;;  %s13499_s4 = inlined_call_operand.vmem [shape: f32[32,32], index: 4, kind: input, shape index: {}]   ;;  %s13500_s5 = inlined_call_operand.vmem [shape: f32[32,64], index: 5, kind: input, shape index: {}]   ;;  %s13501_s2 = inlined_call_operand.vmem [shape: f32[7,64], index: 2, kind: input, shape index: {}]   ;;  %s13502_s6 = inlined_call_operand.vmem [shape: f32[64,64], index: 6, kind: input, shape index: {}]   ;;  %s13503_s9 = inlined_call_operand.vmem [shape: f32[128,32], index: 9, kind: output, shape index: {}]  }
   0x1   :  { %v8419_v0 = vld [vmem:[%s13494_s0] sm:$0xff]  ;;  %v8424_v1 = vld [vmem:[%s13494_s0 + $0x10] sm:$0xff]  ;;  %v8429_v2 = vld [vmem:[%s13494_s0 + $0x8] sm:$0xff]  ;;  %s8365_s11 = smov 96  }
   0x2   :  { %v51_v3 = vsel %vm50_vm0, %v8419_v0, 0.0  ;;  %v57_v4 = vsel %vm50_vm0, %v8424_v1, 0.0  ;;  %v8438_v5 = vld [vmem:[%s13494_s0 + $0x18] sm:$0xff]  ;;  %v54_v6 = vsel %vm50_vm0, %v8429_v2, 0.0  ;;  %v8447_v8 = vld [vmem:[%s13494_s0 + $0x20] sm:$0xff]  ;;  %v8452_v9 = vld [vmem:[%s13494_s0 + $0x28] sm:$0xff] }
   0x3   :  { %52 = vadd.xlane.f32.xlu0 %v51_v3  ;;  %58 = vadd.xlane.f32.xlu1 %v57_v4  ;;  %v60_v7 = vsel %vm50_vm0, %v8438_v5, 0.0  ;;  %v63_v10 = vsel %vm50_vm0, %v8447_v8, 0.0  ;;  %v66_v11 = vsel %vm50_vm0, %v8452_v9, 0.0  ;;  %v8461_v12 = vld [vmem:[%s13494_s0 + $0x30] sm:$0xff]  ;;  %v8466_v13 = vld [vmem:[%s13494_s0 + $0x38] sm:$0xff]  ;;  %v8475_v16 = vld [vmem:[%s13494_s0 + $0x40] sm:$0xff] }
   0x4   :  { %v69_v14 = vsel %vm50_vm0, %v8461_v12, 0.0  ;;  %v72_v15 = vsel %vm50_vm0, %v8466_v13, 0.0  ;;  %v8480_v17 = vld [vmem:[%s13494_s0 + $0x48] sm:$0xff]  ;;  %v75_v18 = vsel %vm50_vm0, %v8475_v16, 0.0  ;;  %v8489_v20 = vld [vmem:[%s13494_s0 + $0x50] sm:$0xff]  ;;  %v8494_v21 = vld [vmem:[%s13494_s0 + $0x58] sm:$0xff] }
   0x5   :  { %v78_v19 = vsel %vm50_vm0, %v8480_v17, 0.0  ;;  %v81_v22 = vsel %vm50_vm0, %v8489_v20, 0.0  ;;  %v84_v23 = vsel %vm50_vm0, %v8494_v21, 0.0  ;;  %v8503_v24 = vld [vmem:[%s13494_s0 + $0x60] sm:$0xff]  ;;  %v8508_v25 = vld [vmem:[%s13494_s0 + $0x68] sm:$0xff]  ;;  %v8517_v28 = vld [vmem:[%s13494_s0 + $0x70] sm:$0xff] }
   0x6   :  { %v87_v26 = vsel %vm50_vm0, %v8503_v24, 0.0  ;;  %v90_v27 = vsel %vm50_vm0, %v8508_v25, 0.0  ;;  %v8522_v29 = vld [vmem:[%s13494_s0 + $0x78] sm:$0xff]  ;;  %v93_v30 = vsel %vm50_vm0, %v8517_v28, 0.0  ;;  %v302_v32 = vld [vmem:[%s13495_s1 + $0x9] sm:$0x1] }
   0x7   :  { %55 = vadd.xlane.f32.xlu0 %v54_v6  ;;  %61 = vadd.xlane.f32.xlu1 %v60_v7  ;;  %v96_v31 = vsel %vm50_vm0, %v8522_v29, 0.0  ;;  %v6785_v33 = vld [vmem:[%s13495_s1 + $0xd] ss:$0 sm:$0xff]  ;;  %v301_v34 = vld [vmem:[%s13495_s1 + $0x8] sm:$0x1] }
   0x8   :  { %v6787_v35 = vld [vmem:[%s13495_s1 + $0x14] ss:$0 sm:$0xff]  ;;  %v6784_v36 = vld [vmem:[%s13495_s1 + $0xc] ss:$0 sm:$0xff]  ;;  %v6786_v37 = vld [vmem:[%s13495_s1 + $0x13] ss:$0 sm:$0xff] }
   0x9   :  { %v6788_v38 = vld [vmem:[%s13495_s1 + $0x15] ss:$0 sm:$0xff]  ;;  %v6795_v39 = vld [vmem:[%s13495_s1 + $0x1a] ss:$0 sm:$0xff] }
   0xb   :  { %64 = vadd.xlane.f32.xlu0 %v63_v10  ;;  %67 = vadd.xlane.f32.xlu1 %v66_v11 }
   0xf   :  { %70 = vadd.xlane.f32.xlu0 %v69_v14  ;;  %73 = vadd.xlane.f32.xlu1 %v72_v15 }
  0x13   :  { %76 = vadd.xlane.f32.xlu0 %v75_v18  ;;  %79 = vadd.xlane.f32.xlu1 %v78_v19 }
  0x17   :  { %82 = vadd.xlane.f32.xlu0 %v81_v22  ;;  %85 = vadd.xlane.f32.xlu1 %v84_v23 }
  0x1b   :  { %88 = vadd.xlane.f32.xlu0 %v87_v26  ;;  %91 = vadd.xlane.f32.xlu1 %v90_v27 }
  0x1f   :  { %94 = vadd.xlane.f32.xlu0 %v93_v30  ;;  %97 = vadd.xlane.f32.xlu1 %v96_v31 }
  0x30   :  { %308 = vrot.lane.b32.xlu1 %v302_v32, %s8363_s22 }
  0x34   :  { %1243 = vrot.lane.b32.xlu1 %v6785_v33, %s8364_s27 }
  0x35   :  { %304 = vrot.lane.b32.xlu0 %v301_v34, %s8364_s27 }
  0x38   :  { %1374 = vrot.lane.b32.xlu1 %v6787_v35, %s8364_s27 }
  0x39   :  { %1219 = vrot.lane.b32.xlu0 %v6784_v36, %s8364_s27 }
  0x3d   :  { %1334 = vrot.lane.b32.xlu0 %v6786_v37, %s8364_s27 }
  0x41   :  { %1414 = vrot.lane.b32.xlu0 %v6788_v38, %s8364_s27 }
  0x45   :  { %2017 = vrot.lane.b32.xlu0 %v6795_v39, %s8364_s27 }
  0x90   :  { %v53_v40 = vpop.xlane.xlu0 %52  ;;  %v59_v41 = vpop.xlane.xlu1 %58 }
  0x91   :  { %v100_v42 = vmul.f32 0.03125, %v53_v40  ;;  %v102_v43 = vmul.f32 0.03125, %v59_v41 }
  0x93   :  { %v8561_v44 = vsub.f32 %v8419_v0, %v100_v42  ;;  %v8564_v45 = vsub.f32 %v8424_v1, %v102_v43 }
  0x94   :  { %v56_v46 = vpop.xlane.xlu0 %55  ;;  %v62_v47 = vpop.xlane.xlu1 %61 }
  0x95   :  { %v101_v48 = vmul.f32 0.03125, %v56_v46  ;;  %v103_v49 = vmul.f32 0.03125, %v62_v47  ;;  %v132_v50 = vmul.f32 %v8561_v44, %v8561_v44  ;;  %v134_v51 = vmul.f32 %v8564_v45, %v8564_v45 }
  0x97   :  { %v8571_v52 = vsub.f32 %v8429_v2, %v101_v48  ;;  %v8574_v53 = vsub.f32 %v8438_v5, %v103_v49  ;;  %v148_v54 = vsel %vm50_vm0, %v132_v50, 0.0  ;;  %v154_v57 = vsel %vm50_vm0, %v134_v51, 0.0 }
  0x98   :  { %149 = vadd.xlane.f32.xlu0 %v148_v54  ;;  %v65_v55 = vpop.xlane.xlu0 %64  ;;  %v68_v56 = vpop.xlane.xlu1 %67 }
  0x99   :  { %v104_v58 = vmul.f32 0.03125, %v65_v55  ;;  %v105_v59 = vmul.f32 0.03125, %v68_v56  ;;  %v133_v60 = vmul.f32 %v8571_v52, %v8571_v52  ;;  %v135_v61 = vmul.f32 %v8574_v53, %v8574_v53 }
  0x9b   :  { %v8583_v62 = vsub.f32 %v8447_v8, %v104_v58  ;;  %v8586_v63 = vsub.f32 %v8452_v9, %v105_v59  ;;  %v151_v0 = vsel %vm50_vm0, %v133_v60, 0.0  ;;  %v157_v3 = vsel %vm50_vm0, %v135_v61, 0.0  ;;  %v315_v61 = vld [vmem:[%s13496_s3 + $0x8] sm:$0xff] }
  0x9c   :  { %155 = vadd.xlane.f32.xlu0 %v154_v57  ;;  %152 = vadd.xlane.f32.xlu1 %v151_v0  ;;  %v71_v1 = vpop.xlane.xlu0 %70  ;;  %v74_v2 = vpop.xlane.xlu1 %73 }
  0x9d   :  { %v106_v4 = vmul.f32 0.03125, %v71_v1  ;;  %v107_v5 = vmul.f32 0.03125, %v74_v2  ;;  %v136_v6 = vmul.f32 %v8583_v62, %v8583_v62  ;;  %v137_v7 = vmul.f32 %v8586_v63, %v8586_v63  ;;  %v316_v1 = vld [vmem:[%s13496_s3 + $0x10] sm:$0xff]  ;;  %v317_v2 = vld [vmem:[%s13496_s3 + $0x18] sm:$0xff] }
  0x9f   :  { %v8595_v8 = vsub.f32 %v8461_v12, %v106_v4  ;;  %v8598_v9 = vsub.f32 %v8466_v13, %v107_v5  ;;  %v160_v10 = vsel %vm50_vm0, %v136_v6, 0.0  ;;  %v163_v15 = vsel %vm50_vm0, %v137_v7, 0.0 }
  0xa0   :  { %158 = vadd.xlane.f32.xlu1 %v157_v3  ;;  %161 = vadd.xlane.f32.xlu0 %v160_v10  ;;  %v77_v11 = vpop.xlane.xlu0 %76  ;;  %v80_v14 = vpop.xlane.xlu1 %79  ;;  %v7594_v3 = vpack.c.bf16 %v317_v2, %v316_v1 }
  0xa1   :  { %v108_v18 = vmul.f32 0.03125, %v77_v11  ;;  %v109_v19 = vmul.f32 0.03125, %v80_v14  ;;  %v138_v22 = vmul.f32 %v8595_v8, %v8595_v8  ;;  %v139_v12 = vmul.f32 %v8598_v9, %v8598_v9 }
  0xa3   :  { %v8607_v23 = vsub.f32 %v8475_v16, %v108_v18  ;;  %v8610_v13 = vsub.f32 %v8480_v17, %v109_v19  ;;  %v166_v26 = vsel %vm50_vm0, %v138_v22, 0.0  ;;  %v169_v31 = vsel %vm50_vm0, %v139_v12, 0.0 }
  0xa4   :  { %164 = vadd.xlane.f32.xlu1 %v163_v15  ;;  %167 = vadd.xlane.f32.xlu0 %v166_v26  ;;  %v83_v27 = vpop.xlane.xlu0 %82  ;;  %v86_v30 = vpop.xlane.xlu1 %85 }
  0xa5   :  { %v110_v32 = vmul.f32 0.03125, %v83_v27  ;;  %v111_v33 = vmul.f32 0.03125, %v86_v30  ;;  %v140_v34 = vmul.f32 %v8607_v23, %v8607_v23  ;;  %v141_v16 = vmul.f32 %v8610_v13, %v8610_v13 }
  0xa7   :  { %v8619_v35 = vsub.f32 %v8489_v20, %v110_v32  ;;  %v8622_v17 = vsub.f32 %v8494_v21, %v111_v33  ;;  %v172_v36 = vsel %vm50_vm0, %v140_v34, 0.0  ;;  %v175_v39 = vsel %vm50_vm0, %v141_v16, 0.0 }
  0xa8   :  { %170 = vadd.xlane.f32.xlu1 %v169_v31  ;;  %173 = vadd.xlane.f32.xlu0 %v172_v36  ;;  %v89_v37 = vpop.xlane.xlu0 %88  ;;  %v92_v38 = vpop.xlane.xlu1 %91 }
  0xa9   :  { %v112_v40 = vmul.f32 0.03125, %v89_v37  ;;  %v113_v41 = vmul.f32 0.03125, %v92_v38  ;;  %v142_v42 = vmul.f32 %v8619_v35, %v8619_v35  ;;  %v143_v20 = vmul.f32 %v8622_v17, %v8622_v17 }
  0xab   :  { %v8631_v43 = vsub.f32 %v8503_v24, %v112_v40  ;;  %v8634_v21 = vsub.f32 %v8508_v25, %v113_v41  ;;  %v178_v46 = vsel %vm50_vm0, %v142_v42, 0.0  ;;  %v181_v49 = vsel %vm50_vm0, %v143_v20, 0.0 }
  0xac   :  { %176 = vadd.xlane.f32.xlu1 %v175_v39  ;;  %179 = vadd.xlane.f32.xlu0 %v178_v46  ;;  %v95_v47 = vpop.xlane.xlu0 %94  ;;  %v98_v48 = vpop.xlane.xlu1 %97 }
  0xad   :  { %v114_v50 = vmul.f32 0.03125, %v95_v47  ;;  %v115_v51 = vmul.f32 0.03125, %v98_v48  ;;  %v144_v54 = vmul.f32 %v8631_v43, %v8631_v43  ;;  %v145_v24 = vmul.f32 %v8634_v21, %v8634_v21  ;;  %v8687_v48 = vld [vmem:[%s13495_s1] ss:$0 sm:$0xff] }
  0xaf   :  { %v8643_v55 = vsub.f32 %v8517_v28, %v114_v50  ;;  %v8646_v25 = vsub.f32 %v8522_v29, %v115_v51  ;;  %v184_v56 = vsel %vm50_vm0, %v144_v54, 0.0  ;;  %v187_v57 = vsel %vm50_vm0, %v145_v24, 0.0  ;;  %v314_v29 = vld [vmem:[%s13496_s3] sm:$0xff] }
  0xb0   :  { %182 = vadd.xlane.f32.xlu1 %v181_v49  ;;  %185 = vadd.xlane.f32.xlu0 %v184_v56  ;;  %v7590_v0 = vpack.c.bf16 %v315_v61, %v314_v29  ;;  %v8668_v4 = vpop.permute.xlu0 %304  ;;  %v8674_v7 = vpop.permute.xlu1 %308  ;;  %v8693_v56 = vld [vmem:[%s13495_s1 + $0x1] ss:$0 sm:$0xff] }
  0xb1   :  { %v146_v58 = vmul.f32 %v8643_v55, %v8643_v55  ;;  %v147_v59 = vmul.f32 %v8646_v25, %v8646_v25 }
  0xb2   :  { %7591 = vmatprep.subr.bf16.mxu0 %v7590_v0 }
  0xb3   :  { %v190_v60 = vsel %vm50_vm0, %v146_v58, 0.0  ;;  %v193_v28 = vsel %vm50_vm0, %v147_v59, 0.0  ;;  %7593 = vmatpush3.bf16.msra.mxu0 %v7590_v0 }
  0xb4   :  { %188 = vadd.xlane.f32.xlu1 %v187_v57  ;;  %191 = vadd.xlane.f32.xlu0 %v190_v60  ;;  %v8670_v5 = vpop.permute.xlu0 %1219  ;;  %v8678_v11 = vpop.permute.xlu1 %1243 }
  0xb5   :  { %7595 = vmatprep.subr.bf16.mxu0 %v7594_v3  ;;  %13655 = vst [vmem:[#allocation2_spill] sm:$0xff] %v8670_v5  ;;  %13658 = vst [vmem:[#allocation5_spill] sm:$0xff] %v8678_v11 }
  0xb7   :  { %7597 = vmatpush3.bf16.msra.mxu0 %v7594_v3 }
  0xb8   :  { %194 = vadd.xlane.f32.xlu1 %v193_v28  ;;  %v8672_v6 = vpop.permute.xlu0 %1334  ;;  %v8682_v15 = vpop.permute.xlu1 %1374 }
  0xb9   :  { %13656 = vst [vmem:[#allocation3_spill] sm:$0xff] %v8672_v6  ;;  %13660 = vst [vmem:[#allocation7_spill] sm:$0xff] %v8682_v15 }
  0xbc   :  { %v8676_v10 = vpop.permute.xlu0 %1414 }
  0xbd   :  { %13657 = vst [vmem:[#allocation4_spill] sm:$0xff] %v8676_v10 }
  0xc0   :  { %v8680_v14 = vpop.permute.xlu0 %2017 }
  0xc1   :  { %13659 = vst [vmem:[#allocation6_spill] sm:$0xff] %v8680_v14 }
 0x125   :  { %v150_v18 = vpop.xlane.xlu0 %149 }
 0x126   :  { %v196_v19 = vmul.f32 0.03125, %v150_v18 }
 0x128   :  { %v212_v22 = vadd.f32 1e-12, %v196_v19 }
 0x129   :  { %v153_v12 = vpop.xlane.xlu1 %152  ;;  %v156_v26 = vpop.xlane.xlu0 %155 }
 0x12a   :  { %7801 = vrsqrt.f32 %v212_v22  ;;  %v197_v27 = vmul.f32 0.03125, %v153_v12  ;;  %v198_v30 = vmul.f32 0.03125, %v156_v26 }
 0x12c   :  { %v213_v31 = vadd.f32 1e-12, %v197_v27  ;;  %v214_v32 = vadd.f32 1e-12, %v198_v30 }
 0x12d   :  { %v159_v33 = vpop.xlane.xlu1 %158  ;;  %v162_v34 = vpop.xlane.xlu0 %161 }
 0x12e   :  { %7803 = vrsqrt.f32 %v213_v31  ;;  %v199_v16 = vmul.f32 0.03125, %v159_v33  ;;  %v200_v36 = vmul.f32 0.03125, %v162_v34 }
 0x12f   :  { %7805 = vrsqrt.f32 %v214_v32 }
 0x130   :  { %v215_v37 = vadd.f32 1e-12, %v199_v16  ;;  %v216_v38 = vadd.f32 1e-12, %v200_v36 }
 0x131   :  { %v165_v39 = vpop.xlane.xlu1 %164  ;;  %v168_v40 = vpop.xlane.xlu0 %167 }
 0x132   :  { %7807 = vrsqrt.f32 %v215_v37  ;;  %v201_v41 = vmul.f32 0.03125, %v165_v39  ;;  %v202_v42 = vmul.f32 0.03125, %v168_v40 }
 0x133   :  { %7809 = vrsqrt.f32 %v216_v38 }
 0x134   :  { %v7802_v20 = vpop.eup %7801  ;;  %v217_v46 = vadd.f32 1e-12, %v201_v41  ;;  %v218_v47 = vadd.f32 1e-12, %v202_v42 }
 0x135   :  { %v171_v49 = vpop.xlane.xlu1 %170  ;;  %v174_v50 = vpop.xlane.xlu0 %173  ;;  %v244_v51 = vmul.f32 %v7802_v20, %v8561_v44 }
 0x136   :  { %7811 = vrsqrt.f32 %v217_v46  ;;  %v203_v54 = vmul.f32 0.03125, %v171_v49  ;;  %v204_v24 = vmul.f32 0.03125, %v174_v50 }
 0x137   :  { %7813 = vrsqrt.f32 %v218_v47  ;;  %v264_v57 = vmul.f32 %v8687_v48, %v244_v51 }
 0x138   :  { %v7804_v58 = vpop.eup %7803  ;;  %v219_v59 = vadd.f32 1e-12, %v203_v54  ;;  %v220_v60 = vadd.f32 1e-12, %v204_v24 }
 0x139   :  { %v7806_v28 = vpop.eup %7805  ;;  %v177_v29 = vpop.xlane.xlu1 %176  ;;  %v8697_v0 = vadd.f32 %v8693_v56, %v264_v57  ;;  %v245_v44 = vmul.f32 %v7804_v58, %v8571_v52 }
 0x13a   :  { %v180_v61 = vpop.xlane.xlu0 %179  ;;  %7815 = vrsqrt.f32 %v219_v59  ;;  %v205_v1 = vmul.f32 0.03125, %v177_v29  ;;  %v246_v3 = vmul.f32 %v7806_v28, %v8564_v45 }
 0x13b   :  { %13661 = vst [vmem:[#allocation8_spill] sm:$0xff] %v8697_v0  ;;  %v206_v2 = vmul.f32 0.03125, %v180_v61  ;;  %7817 = vrsqrt.f32 %v220_v60  ;;  %1262 = vrot.lane.b32.xlu0 %v8697_v0, %s8364_s27  ;;  %7206 = vmatprep.mubr.msk.f32.mxu0 %vm50_vm0, %v8697_v0  ;;  %v265_v18 = vmul.f32 %v8687_v48, %v245_v44 }
 0x13c   :  { %v7808_v19 = vpop.eup %7807  ;;  %v221_v22 = vadd.f32 1e-12, %v205_v1  ;;  %v266_v26 = vmul.f32 %v8687_v48, %v246_v3 }
 0x13d   :  { %v222_v12 = vadd.f32 1e-12, %v206_v2  ;;  %v7810_v52 = vpop.eup %7809  ;;  %v183_v27 = vpop.xlane.xlu1 %182  ;;  %v8708_v31 = vadd.f32 %v8693_v56, %v265_v18  ;;  %v247_v45 = vmul.f32 %v7808_v19, %v8574_v53 }
 0x13e   :  { %v186_v30 = vpop.xlane.xlu0 %185  ;;  %7819 = vrsqrt.f32 %v221_v22  ;;  %v207_v32 = vmul.f32 0.03125, %v183_v27  ;;  %v8712_v34 = vadd.f32 %v8693_v56, %v266_v26  ;;  %v248_v36 = vmul.f32 %v7810_v52, %v8583_v62 }
 0x13f   :  { %13662 = vst [vmem:[#allocation9_spill] sm:$0xff] %v8708_v31  ;;  %v208_v33 = vmul.f32 0.03125, %v186_v30  ;;  %7821 = vrsqrt.f32 %v222_v12  ;;  %1264 = vrot.lane.b32.xlu1 %v8708_v31, %s8364_s27  ;;  %7207 = vmatmul.mubr.msk.f32.vlgmr.msra.gmra.mrb[0].mxu0 %vm50_vm0, %v8708_v31  ;;  %v267_v16 = vmul.f32 %v8687_v48, %v247_v45 }
 0x140   :  { %v7812_v37 = vpop.eup %7811  ;;  %v223_v38 = vadd.f32 1e-12, %v207_v32  ;;  %7209 = vmatprep.mubr.msk.f32.mxu0 %vm50_vm0, %v8712_v34  ;;  %v268_v20 = vmul.f32 %v8687_v48, %v248_v36 }
 0x141   :  { %v224_v53 = vadd.f32 1e-12, %v208_v33  ;;  %v7814_v39 = vpop.eup %7813  ;;  %v189_v40 = vpop.xlane.xlu1 %188  ;;  %v8723_v42 = vadd.f32 %v8693_v56, %v267_v16  ;;  %v249_v46 = vmul.f32 %v7812_v37, %v8586_v63 }
 0x142   :  { %v192_v41 = vpop.xlane.xlu0 %191  ;;  %7823 = vrsqrt.f32 %v223_v38  ;;  %v209_v47 = vmul.f32 0.03125, %v189_v40  ;;  %v250_v62 = vmul.f32 %v7814_v39, %v8595_v8  ;;  %v8733_v50 = vadd.f32 %v8693_v56, %v268_v20 }
 0x143   :  { %v210_v49 = vmul.f32 0.03125, %v192_v41  ;;  %7825 = vrsqrt.f32 %v224_v53  ;;  %1266 = vrot.lane.b32.xlu1 %v8712_v34, %s8364_s27  ;;  %7210 = vmatmul.mubr.msk.f32.gmra.mrb[2].mxu0 %vm50_vm0, %v8723_v42  ;;  %v269_v51 = vmul.f32 %v8687_v48, %v249_v46 }
 0x144   :  { %v7816_v54 = vpop.eup %7815  ;;  %v225_v24 = vadd.f32 1e-12, %v209_v47  ;;  %v270_v57 = vmul.f32 %v8687_v48, %v250_v62  ;;  %1270 = vrot.lane.b32.xlu0 %v8733_v50, %s8364_s27  ;;  %7212 = vmatprep.mubr.msk.f32.mxu0 %vm50_vm0, %v8733_v50 }
 0x145   :  { %v226_v63 = vadd.f32 1e-12, %v210_v49  ;;  %v7818_v58 = vpop.eup %7817  ;;  %v195_v8 = vpop.xlane.xlu1 %194  ;;  %v8742_v59 = vadd.f32 %v8693_v56, %v269_v51  ;;  %v251_v60 = vmul.f32 %v7816_v54, %v8598_v9 }
 0x146   :  { %7827 = vrsqrt.f32 %v225_v24  ;;  %v211_v28 = vmul.f32 0.03125, %v195_v8  ;;  %v8746_v29 = vadd.f32 %v8693_v56, %v270_v57  ;;  %v252_v61 = vmul.f32 %v7818_v58, %v8607_v23 }
 0x147   :  { %7829 = vrsqrt.f32 %v226_v63  ;;  %1268 = vrot.lane.b32.xlu1 %v8723_v42, %s8364_s27  ;;  %7213 = vmatmul.mubr.msk.f32.gmra.mrb[4].mxu0 %vm50_vm0, %v8742_v59  ;;  %v271_v44 = vmul.f32 %v8687_v48, %v251_v60 }
 0x148   :  { %v7820_v1 = vpop.eup %7819  ;;  %v227_v2 = vadd.f32 1e-12, %v211_v28  ;;  %7215 = vmatprep.mubr.msk.f32.mxu0 %vm50_vm0, %v8746_v29  ;;  %v272_v9 = vmul.f32 %v8687_v48, %v252_v61  ;;  %1274 = vrot.lane.b32.xlu0 %v8746_v29, %s8364_s27 }
 0x149   :  { %v7822_v3 = vpop.eup %7821  ;;  %v8760_v23 = vadd.f32 %v8693_v56, %v271_v44  ;;  %v253_v18 = vmul.f32 %v7820_v1, %v8610_v13 }
 0x14a   :  { %7831 = vrsqrt.f32 %v227_v2  ;;  %v8764_v19 = vadd.f32 %v8693_v56, %v272_v9  ;;  %v254_v22 = vmul.f32 %v7822_v3, %v8619_v35 }
 0x14b   :  { %13663 = vst [vmem:[#allocation10_spill] sm:$0xff] %v8760_v23  ;;  %1272 = vrot.lane.b32.xlu1 %v8742_v59, %s8364_s27  ;;  %7216 = vmatmul.mubr.msk.f32.gmra.mrb[6].mxu0 %vm50_vm0, %v8760_v23  ;;  %v273_v12 = vmul.f32 %v8687_v48, %v253_v18 }
 0x14c   :  { %v7824_v26 = vpop.eup %7823  ;;  %7218 = vmatprep.mubr.msk.f32.mxu0 %vm50_vm0, %v8764_v19  ;;  %v274_v13 = vmul.f32 %v8687_v48, %v254_v22  ;;  %1278 = vrot.lane.b32.xlu0 %v8764_v19, %s8364_s27 }
 0x14d   :  { %v7826_v52 = vpop.eup %7825  ;;  %v8778_v35 = vadd.f32 %v8693_v56, %v273_v12  ;;  %v255_v27 = vmul.f32 %v7824_v26, %v8622_v17 }
 0x14e   :  { %v8782_v30 = vadd.f32 %v8693_v56, %v274_v13  ;;  %v256_v45 = vmul.f32 %v7826_v52, %v8631_v43 }
 0x14f   :  { %1276 = vrot.lane.b32.xlu1 %v8760_v23, %s8364_s27  ;;  %7219 = vmatmul.mubr.msk.f32.gmra.mrb[8].mxu0 %vm50_vm0, %v8778_v35  ;;  %v275_v32 = vmul.f32 %v8687_v48, %v255_v27 }
 0x150   :  { %v7828_v33 = vpop.eup %7827  ;;  %7221 = vmatprep.mubr.msk.f32.mxu0 %vm50_vm0, %v8782_v30  ;;  %v276_v16 = vmul.f32 %v8687_v48, %v256_v45  ;;  %1282 = vrot.lane.b32.xlu0 %v8782_v30, %s8364_s27 }
 0x151   :  { %v7830_v17 = vpop.eup %7829  ;;  %v8796_v43 = vadd.f32 %v8693_v56, %v275_v32  ;;  %v257_v36 = vmul.f32 %v7828_v33, %v8634_v21 }
 0x152   :  { %v8800_v37 = vadd.f32 %v8693_v56, %v276_v16  ;;  %v258_v38 = vmul.f32 %v7830_v17, %v8643_v55 }
 0x153   :  { %1280 = vrot.lane.b32.xlu1 %v8778_v35, %s8364_s27  ;;  %7222 = vmatmul.mubr.msk.f32.gmra.mrb[10].mxu0 %vm50_vm0, %v8796_v43  ;;  %v277_v53 = vmul.f32 %v8687_v48, %v257_v36 }
 0x154   :  { %13664 = vst [vmem:[#allocation11_spill] sm:$0xff] %v8800_v37  ;;  %v7832_v39 = vpop.eup %7831  ;;  %7224 = vmatprep.mubr.msk.f32.mxu0 %vm50_vm0, %v8800_v37  ;;  %v278_v40 = vmul.f32 %v8687_v48, %v258_v38 }
 0x155   :  { %v8812_v21 = vadd.f32 %v8693_v56, %v277_v53  ;;  %v259_v41 = vmul.f32 %v7832_v39, %v8646_v25  ;;  %v318_v25 = vlaneseq }
 0x156   :  { %v8816_v55 = vadd.f32 %v8693_v56, %v278_v40 }
 0x157   :  { %1284 = vrot.lane.b32.xlu1 %v8796_v43, %s8364_s27  ;;  %7225 = vmatmul.mubr.msk.f32.gmra.mrb[12].mxu0 %vm50_vm0, %v8812_v21  ;;  %v279_v20 = vmul.f32 %v8687_v48, %v259_v41  ;;  %v300_v48 = vld [vmem:[%s13495_s1 + $0x7] sm:$0x1]  ;;  %v8841_v47 = vshrl.u32 %v318_v25, 7 }
 0x158   :  { %13665 = vst [vmem:[#allocation12_spill] sm:$0xff] %v8816_v55  ;;  %1290 = vrot.lane.b32.xlu0 %v8816_v55, %s8364_s27  ;;  %7227 = vmatprep.mubr.msk.f32.mxu0 %vm50_vm0, %v8816_v55 }
 0x159   :  { %v8828_v46 = vadd.f32 %v8693_v56, %v279_v20  ;;  %13666 = vst [vmem:[#allocation13_spill] sm:$0xff] %v8841_v47  ;;  %v311_v56 = vsel %vm50_vm0, %v300_v48, %v8668_v4  ;;  %v13504_v49 = vsub.s32 0, %v8841_v47 }
 0x15a   :  { %v313_v62 = vsel %vm312_vm1, %v311_v56, %v8674_v7 }
 0x15b   :  { %1286 = vrot.lane.b32.xlu1 %v8800_v37, %s8364_s27  ;;  %7228 = vmatmul.mubr.msk.f32.gmra.mrb[14].mxu0 %vm50_vm0, %v8828_v46  ;;  %v321_v51 = vrot.slane %v313_v62, %v13504_v49 }
 0x15f   :  { %1288 = vrot.lane.b32.xlu1 %v8812_v21, %s8364_s27 }
 0x163   :  { %1292 = vrot.lane.b32.xlu1 %v8828_v46, %s8364_s27 }
 0x212   :  { %v7208_v54 = vpop.f32.mrb[0].mxu0 }
 0x213   :  { %v8850_v24 = vadd.f32 %v7208_v54, %v321_v51  ;;  %v436_v63 = vpop.f32.mrb[1].mxu0 }
 0x214   :  { %v8852_v57 = vadd.f32 %v436_v63, %v321_v51 }
 0x215   :  { %13667 = vst [vmem:[#allocation14_spill] sm:$0xff] %v8850_v24  ;;  %896 = vrot.lane.b32.xlu1 %v8850_v24, %s8365_s11  ;;  %v520_v4 = vsel %vm50_vm0, %v8850_v24, 0.0 }
 0x216   :  { %13668 = vst [vmem:[#allocation15_spill] sm:$0xff] %v8852_v57  ;;  %v7211_v58 = vpop.f32.mrb[2].mxu0  ;;  %521 = vadd.xlane.f32.xlu0 %v520_v4  ;;  %v517_v7 = vsel %vm50_vm0, %v8852_v57, 0.0  ;;  %v8950_v4 = vpop.permute.xlu1 %1264 }
 0x217   :  { %v446_v8 = vpop.f32.mrb[3].mxu0  ;;  %v8874_v22 = vadd.f32 %v7211_v58, %v321_v51  ;;  %13681 = vst [vmem:[#allocation28_spill] sm:$0xff] %v8950_v4 }
 0x218   :  { %v8892_v38 = vadd.f32 %v446_v8, %v321_v51 }
 0x219   :  { %1437 = vrot.lane.b32.xlu1 %v8850_v24, %s8363_s22  ;;  %13671 = vst [vmem:[#allocation18_spill] sm:$0xff] %v8874_v22  ;;  %v526_v25 = vsel %vm50_vm0, %v8874_v22, 0.0 }
 0x21a   :  { %v7214_v60 = vpop.f32.mrb[4].mxu0  ;;  %518 = vadd.xlane.f32.xlu0 %v517_v7  ;;  %13678 = vst [vmem:[#allocation25_spill] sm:$0xff] %v8892_v38  ;;  %v523_v20 = vsel %vm50_vm0, %v8892_v38, 0.0  ;;  %v8952_v58 = vpop.permute.xlu1 %1266 }
 0x21b   :  { %v8862_v28 = vadd.f32 %v7214_v60, %v321_v51  ;;  %v456_v61 = vpop.f32.mrb[5].mxu0  ;;  %13682 = vst [vmem:[#allocation29_spill] sm:$0xff] %v8952_v58 }
 0x21c   :  { %v8864_v44 = vadd.f32 %v456_v61, %v321_v51 }
 0x21d   :  { %13669 = vst [vmem:[#allocation16_spill] sm:$0xff] %v8862_v28  ;;  %894 = vrot.lane.b32.xlu1 %v8852_v57, %s8365_s11  ;;  %v532_v48 = vsel %vm50_vm0, %v8862_v28, 0.0 }
 0x21e   :  { %v7217_v1 = vpop.f32.mrb[6].mxu0  ;;  %v529_v56 = vsel %vm50_vm0, %v8864_v44, 0.0  ;;  %v8956_v7 = vpop.permute.xlu1 %1268 }
 0x21f   :  { %v8868_v2 = vadd.f32 %v7217_v1, %v321_v51  ;;  %v466_v9 = vpop.f32.mrb[7].mxu0  ;;  %13683 = vst [vmem:[#allocation30_spill] sm:$0xff] %v8956_v7 }
 0x220   :  { %v8870_v3 = vadd.f32 %v466_v9, %v321_v51 }
 0x221   :  { %1435 = vrot.lane.b32.xlu1 %v8852_v57, %s8363_s22  ;;  %v538_v62 = vsel %vm50_vm0, %v8868_v2, 0.0 }
 0x222   :  { %13670 = vst [vmem:[#allocation17_spill] sm:$0xff] %v8870_v3  ;;  %v7220_v18 = vpop.f32.mrb[8].mxu0  ;;  %v8958_v60 = vpop.permute.xlu1 %1272 }
 0x223   :  { %v8876_v12 = vadd.f32 %v7220_v18, %v321_v51  ;;  %v476_v26 = vpop.f32.mrb[9].mxu0  ;;  %13684 = vst [vmem:[#allocation31_spill] sm:$0xff] %v8958_v60 }
 0x224   :  { %v8878_v13 = vadd.f32 %v476_v26, %v321_v51 }
 0x225   :  { %13672 = vst [vmem:[#allocation19_spill] sm:$0xff] %v8876_v12  ;;  %900 = vrot.lane.b32.xlu1 %v8874_v22, %s8365_s11  ;;  %v544_v63 = vsel %vm50_vm0, %v8876_v12, 0.0 }
 0x226   :  { %13673 = vst [vmem:[#allocation20_spill] sm:$0xff] %v8878_v13  ;;  %v7223_v52 = vpop.f32.mrb[10].mxu0  ;;  %v541_v54 = vsel %vm50_vm0, %v8878_v13, 0.0  ;;  %v8962_v1 = vpop.permute.xlu1 %1276 }
 0x227   :  { %v8882_v27 = vadd.f32 %v7223_v52, %v321_v51  ;;  %v486_v45 = vpop.f32.mrb[11].mxu0  ;;  %13685 = vst [vmem:[#allocation32_spill] sm:$0xff] %v8962_v1 }
 0x228   :  { %v8884_v32 = vadd.f32 %v486_v45, %v321_v51 }
 0x229   :  { %13674 = vst [vmem:[#allocation21_spill] sm:$0xff] %v8882_v27  ;;  %1441 = vrot.lane.b32.xlu1 %v8874_v22, %s8363_s22  ;;  %v550_v8 = vsel %vm50_vm0, %v8882_v27, 0.0 }
 0x22a   :  { %13675 = vst [vmem:[#allocation22_spill] sm:$0xff] %v8884_v32  ;;  %v7226_v33 = vpop.f32.mrb[12].mxu0  ;;  %v547_v61 = vsel %vm50_vm0, %v8884_v32, 0.0  ;;  %v8964_v9 = vpop.permute.xlu1 %1280 }
 0x22b   :  { %v8888_v16 = vadd.f32 %v7226_v33, %v321_v51  ;;  %v496_v17 = vpop.f32.mrb[13].mxu0  ;;  %13686 = vst [vmem:[#allocation33_spill] sm:$0xff] %v8964_v9  ;;  %v8980_v33 = vpop.permute.xlu0 %1262 }
 0x22c   :  { %v8890_v36 = vadd.f32 %v496_v17, %v321_v51  ;;  %13691 = vst [vmem:[#allocation38_spill] sm:$0xff] %v8980_v33 }
 0x22d   :  { %13676 = vst [vmem:[#allocation23_spill] sm:$0xff] %v8888_v16 }
 0x22e   :  { %13677 = vst [vmem:[#allocation24_spill] sm:$0xff] %v8890_v36  ;;  %v7229_v53 = vpop.f32.mrb[14].mxu0  ;;  %v8968_v18 = vpop.permute.xlu1 %1284 }
 0x22f   :  { %v8894_v39 = vadd.f32 %v7229_v53, %v321_v51  ;;  %v506_v40 = vpop.f32.mrb[15].mxu0  ;;  %13687 = vst [vmem:[#allocation34_spill] sm:$0xff] %v8968_v18  ;;  %v8982_v53 = vpop.permute.xlu0 %1270 }
 0x230   :  { %v8896_v41 = vadd.f32 %v506_v40, %v321_v51  ;;  %898 = vrot.lane.b32.xlu0 %v8892_v38, %s8365_s11  ;;  %v535_v51 = vsel %vm50_vm0, %v8870_v3, 0.0  ;;  %13692 = vst [vmem:[#allocation39_spill] sm:$0xff] %v8982_v53 }
 0x231   :  { %13679 = vst [vmem:[#allocation26_spill] sm:$0xff] %v8894_v39  ;;  %v562_v60 = vsel %vm50_vm0, %v8894_v39, 0.0 }
 0x232   :  { %13680 = vst [vmem:[#allocation27_spill] sm:$0xff] %v8896_v41  ;;  %v8974_v26 = vpop.permute.xlu1 %1286  ;;  %v559_v15 = vsel %vm50_vm0, %v8896_v41, 0.0 }
 0x233   :  { %13688 = vst [vmem:[#allocation35_spill] sm:$0xff] %v8974_v26 }
 0x236   :  { %v8976_v52 = vpop.permute.xlu1 %1288 }
 0x237   :  { %13689 = vst [vmem:[#allocation36_spill] sm:$0xff] %v8976_v52 }
 0x23a   :  { %v8978_v45 = vpop.permute.xlu1 %1292 }
 0x23b   :  { %13690 = vst [vmem:[#allocation37_spill] sm:$0xff] %v8978_v45 }
 0x24d   :  { %524 = vadd.xlane.f32.xlu1 %v523_v20  ;;  %v8984_v20 = vpop.permute.xlu0 %1274 }
 0x24e   :  { %13693 = vst [vmem:[#allocation40_spill] sm:$0xff] %v8984_v20 }
 0x24f   :  { %527 = vadd.xlane.f32.xlu0 %v526_v25  ;;  %v553_v25 = vsel %vm50_vm0, %v8890_v36, 0.0 }
 0x25e   :  { %904 = vrot.lane.b32.xlu1 %v8862_v28, %s8365_s11 }
 0x262   :  { %1445 = vrot.lane.b32.xlu1 %v8862_v28, %s8363_s22 }
 0x265   :  { %1439 = vrot.lane.b32.xlu0 %v8892_v38, %s8363_s22 }
 0x269   :  { %902 = vrot.lane.b32.xlu0 %v8864_v44, %s8365_s11 }
 0x286   :  { %533 = vadd.xlane.f32.xlu1 %v532_v48 }
 0x287   :  { %v897_v17 = vpop.permute.xlu1 %896 }
 0x288   :  { %530 = vadd.xlane.f32.xlu0 %v529_v56  ;;  %v8988_v56 = vpop.permute.xlu0 %1278 }
 0x289   :  { %13694 = vst [vmem:[#allocation41_spill] sm:$0xff] %v8988_v56 }
 0x28b   :  { %v1438_v40 = vpop.permute.xlu1 %1437 }
 0x28c   :  { %v1486_v58 = vsel %vm50_vm0, %v1438_v40, 0.0 }
 0x28f   :  { %v895_v48 = vpop.permute.xlu1 %894 }
 0x290   :  { %v942_v7 = vsel %vm50_vm0, %v895_v48, 0.0 }
 0x297   :  { %1443 = vrot.lane.b32.xlu1 %v8864_v44, %s8363_s22 }
 0x29b   :  { %908 = vrot.lane.b32.xlu1 %v8868_v2, %s8365_s11 }
 0x29e   :  { %906 = vrot.lane.b32.xlu0 %v8870_v3, %s8365_s11 }
 0x29f   :  { %1449 = vrot.lane.b32.xlu1 %v8868_v2, %s8363_s22 }
 0x2a3   :  { %1447 = vrot.lane.b32.xlu1 %v8870_v3, %s8363_s22 }
 0x2bd   :  { %539 = vadd.xlane.f32.xlu0 %v538_v62  ;;  %v556_v62 = vsel %vm50_vm0, %v8888_v16, 0.0 }
 0x2c7   :  { %536 = vadd.xlane.f32.xlu1 %v535_v51  ;;  %v1436_v51 = vpop.permute.xlu1 %1435 }
 0x2c8   :  { %v1483_v48 = vsel %vm50_vm0, %v1436_v51, 0.0 }
 0x2d3   :  { %1453 = vrot.lane.b32.xlu0 %v8876_v12, %s8363_s22 }
 0x2d7   :  { %910 = vrot.lane.b32.xlu0 %v8878_v13, %s8365_s11 }
 0x2d8   :  { %912 = vrot.lane.b32.xlu1 %v8876_v12, %s8365_s11 }
 0x2f6   :  { %542 = vadd.xlane.f32.xlu0 %v541_v54  ;;  %v8992_v54 = vpop.permute.xlu0 %1282 }
 0x2f7   :  { %13695 = vst [vmem:[#allocation42_spill] sm:$0xff] %v8992_v54 }
 0x2fc   :  { %545 = vadd.xlane.f32.xlu1 %v544_v63  ;;  %v8994_v63 = vpop.permute.xlu0 %1290 }
 0x2fd   :  { %13696 = vst [vmem:[#allocation43_spill] sm:$0xff] %v8994_v63 }
 0x30c   :  { %1457 = vrot.lane.b32.xlu0 %v8882_v27, %s8363_s22 }
 0x30d   :  { %1451 = vrot.lane.b32.xlu1 %v8878_v13, %s8363_s22 }
 0x310   :  { %914 = vrot.lane.b32.xlu0 %v8884_v32, %s8365_s11 }
 0x311   :  { %916 = vrot.lane.b32.xlu1 %v8882_v27, %s8365_s11 }
 0x315   :  { %1455 = vrot.lane.b32.xlu1 %v8884_v32, %s8363_s22 }
 0x32f   :  { %551 = vadd.xlane.f32.xlu0 %v550_v8  ;;  %v901_v8 = vpop.permute.xlu1 %900 }
 0x330   :  { %v951_v33 = vsel %vm50_vm0, %v901_v8, 0.0 }
 0x333   :  { %v1442_v49 = vpop.permute.xlu1 %1441 }
 0x337   :  { %v9004_v45 = vpop.xlane.xlu1 %524 }
 0x339   :  { %548 = vadd.xlane.f32.xlu1 %v547_v61  ;;  %v8996_v61 = vpop.xlane.xlu0 %521 }
 0x33b   :  { %v905_v63 = vpop.permute.xlu1 %904 }
 0x33f   :  { %v1446_v26 = vpop.permute.xlu1 %1445 }
 0x343   :  { %v9014_v18 = vpop.xlane.xlu1 %533 }
 0x345   :  { %1461 = vrot.lane.b32.xlu0 %v8888_v16, %s8363_s22 }
 0x347   :  { %v1444_v9 = vpop.permute.xlu1 %1443 }
 0x348   :  { %v1495_v51 = vsel %vm50_vm0, %v1444_v9, 0.0 }
 0x349   :  { %918 = vrot.lane.b32.xlu0 %v8890_v36, %s8365_s11 }
 0x34a   :  { %920 = vrot.lane.b32.xlu1 %v8888_v16, %s8365_s11 }
 0x34b   :  { %v909_v20 = vpop.permute.xlu1 %908 }
 0x34f   :  { %v1450_v14 = vpop.permute.xlu1 %1449 }
 0x353   :  { %v1448_v4 = vpop.permute.xlu1 %1447 }
 0x357   :  { %v9027_v11 = vpop.xlane.xlu1 %536 }
 0x368   :  { %554 = vadd.xlane.f32.xlu0 %v553_v25  ;;  %v9002_v25 = vpop.xlane.xlu0 %518 }
 0x36e   :  { %557 = vadd.xlane.f32.xlu1 %v556_v62  ;;  %v899_v62 = vpop.permute.xlu0 %898 }
 0x36f   :  { %v948_v40 = vsel %vm50_vm0, %v899_v62, 0.0 }
 0x372   :  { %v9012_v52 = vpop.xlane.xlu0 %527 }
 0x376   :  { %v1440_v54 = vpop.permute.xlu0 %1439 }
 0x377   :  { %v1489_v5 = vsel %vm50_vm0, %v1440_v54, 0.0  ;;  %v1498_v54 = vsel %vm50_vm0, %v1446_v26, 0.0 }
 0x37a   :  { %v903_v56 = vpop.permute.xlu0 %902 }
 0x37e   :  { %1465 = vrot.lane.b32.xlu0 %v8894_v39, %s8363_s22  ;;  %v9016_v1 = vpop.xlane.xlu0 %530 }
 0x37f   :  { %1459 = vrot.lane.b32.xlu1 %v8890_v36, %s8363_s22 }
 0x382   :  { %922 = vrot.lane.b32.xlu0 %v8896_v41, %s8365_s11  ;;  %v907_v53 = vpop.permute.xlu0 %906 }
 0x383   :  { %924 = vrot.lane.b32.xlu1 %v8894_v39, %s8365_s11 }
 0x386   :  { %v9021_v10 = vpop.xlane.xlu0 %539 }
 0x387   :  { %1463 = vrot.lane.b32.xlu1 %v8896_v41, %s8363_s22 }
 0x38a   :  { %v1454_v6 = vpop.permute.xlu0 %1453 }
 0x3a1   :  { %563 = vadd.xlane.f32.xlu0 %v562_v60  ;;  %v945_v60 = vsel %vm50_vm0, %v897_v17, 0.0  ;;  %v957_v17 = vsel %vm50_vm0, %v905_v63, 0.0  ;;  %v1501_v63 = vsel %vm50_vm0, %v1448_v4, 0.0  ;;  %v1510_v4 = vsel %vm50_vm0, %v1454_v6, 0.0 }
 0x3a5   :  { %1487 = vadd.xlane.f32.xlu0 %v1486_v58  ;;  %v911_v58 = vpop.permute.xlu0 %910 }
 0x3a6   :  { %v966_v9 = vsel %vm50_vm0, %v911_v58, 0.0 }
 0x3a9   :  { %943 = vadd.xlane.f32.xlu0 %v942_v7  ;;  %v913_v7 = vpop.permute.xlu1 %912  ;;  %v9033_v55 = vpop.xlane.xlu0 %542 }
 0x3aa   :  { %v969_v26 = vsel %vm50_vm0, %v913_v7, 0.0 }
 0x3ab   :  { %560 = vadd.xlane.f32.xlu1 %v559_v15  ;;  %v1492_v15 = vsel %vm50_vm0, %v1442_v49, 0.0 }
 0x3ad   :  { %952 = vadd.xlane.f32.xlu0 %v951_v33  ;;  %v9036_v8 = vpop.xlane.xlu1 %545  ;;  %v954_v33 = vsel %vm50_vm0, %v903_v56, 0.0  ;;  %v9040_v62 = vpop.permute.xlu0 %1457 }
 0x3af   :  { %946 = vadd.xlane.f32.xlu1 %v945_v60 }
 0x3b1   :  { %949 = vadd.xlane.f32.xlu0 %v948_v40  ;;  %v1452_v60 = vpop.permute.xlu1 %1451  ;;  %v915_v49 = vpop.permute.xlu0 %914  ;;  %v963_v40 = vsel %vm50_vm0, %v909_v20, 0.0 }
 0x3b2   :  { %v1507_v20 = vsel %vm50_vm0, %v1452_v60, 0.0 }
 0x3b3   :  { %1484 = vadd.xlane.f32.xlu1 %v1483_v48 }
 0x3b5   :  { %1490 = vadd.xlane.f32.xlu0 %v1489_v5  ;;  %v960_v5 = vsel %vm50_vm0, %v907_v53, 0.0  ;;  %v917_v56 = vpop.permute.xlu1 %916 }
 0x3b6   :  { %v975_v58 = vsel %vm50_vm0, %v917_v56, 0.0  ;;  %v566_v56 = vmul.f32 0.03125, %v8996_v61 }
 0x3b7   :  { %1493 = vadd.xlane.f32.xlu1 %v1492_v15  ;;  %v1504_v15 = vsel %vm50_vm0, %v1450_v14, 0.0  ;;  %v972_v14 = vsel %vm50_vm0, %v915_v49, 0.0  ;;  %v572_v49 = vmul.f32 0.03125, %v9021_v10  ;;  %v568_v10 = vmul.f32 0.03125, %v9012_v52 }
 0x3b9   :  { %955 = vadd.xlane.f32.xlu0 %v954_v33  ;;  %v9049_v33 = vpop.permute.xlu1 %1455 }
 0x3bb   :  { %958 = vadd.xlane.f32.xlu1 %v957_v17 }
 0x3bc   :  { %v552_v48 = vpop.xlane.xlu0 %551 }
 0x3bd   :  { %1496 = vadd.xlane.f32.xlu0 %v1495_v51 }
 0x3bf   :  { %1499 = vadd.xlane.f32.xlu1 %v1498_v54 }
 0x3c0   :  { %v9052_v53 = vpop.permute.xlu0 %1461 }
 0x3c1   :  { %961 = vadd.xlane.f32.xlu0 %v960_v5  ;;  %13697 = vst [vmem:[#allocation44_spill] sm:$0xff] %v9052_v53 }
 0x3c3   :  { %964 = vadd.xlane.f32.xlu1 %v963_v40  ;;  %v565_v40 = vmul.f32 0.03125, %v9002_v25 }
 0x3c4   :  { %v919_v51 = vpop.permute.xlu0 %918 }
 0x3c5   :  { %1502 = vadd.xlane.f32.xlu0 %v1501_v63  ;;  %v978_v7 = vsel %vm50_vm0, %v919_v51, 0.0  ;;  %v9066_v6 = vsub.f32 %v8852_v57, %v565_v40  ;;  %v9079_v51 = vsub.f32 %v8850_v24, %v566_v56  ;;  %v9090_v40 = vsub.f32 %v8874_v22, %v568_v10 }
 0x3c6   :  { %v9055_v17 = vpop.xlane.xlu1 %548 }
 0x3c7   :  { %1505 = vadd.xlane.f32.xlu1 %v1504_v15  ;;  %v597_v25 = vmul.f32 %v9066_v6, %v9066_v6  ;;  %v598_v52 = vmul.f32 %v9079_v51, %v9079_v51  ;;  %v600_v10 = vmul.f32 %v9090_v40, %v9090_v40 }
 0x3c9   :  { %967 = vadd.xlane.f32.xlu0 %v966_v9 }
 0x3ca   :  { %v921_v54 = vpop.permute.xlu1 %920 }
 0x3cb   :  { %970 = vadd.xlane.f32.xlu1 %v969_v26  ;;  %v981_v5 = vsel %vm50_vm0, %v921_v54, 0.0  ;;  %v9071_v26 = vsub.f32 %v8868_v2, %v572_v49  ;;  %v613_v54 = vsel %vm50_vm0, %v597_v25, 0.0  ;;  %v616_v25 = vsel %vm50_vm0, %v598_v52, 0.0 }
 0x3cd   :  { %1508 = vadd.xlane.f32.xlu0 %v1507_v20  ;;  %v576_v20 = vmul.f32 0.03125, %v552_v48  ;;  %v604_v48 = vmul.f32 %v9071_v26, %v9071_v26 }
 0x3cf   :  { %1511 = vadd.xlane.f32.xlu1 %v1510_v4  ;;  %v9083_v61 = vsub.f32 %v8882_v27, %v576_v20 }
 0x3d1   :  { %973 = vadd.xlane.f32.xlu0 %v972_v14  ;;  %v608_v20 = vmul.f32 %v9083_v61, %v9083_v61 }
 0x3d3   :  { %976 = vadd.xlane.f32.xlu1 %v975_v58 }
 0x3d5   :  { %979 = vadd.xlane.f32.xlu0 %v978_v7 }
 0x3d7   :  { %982 = vadd.xlane.f32.xlu1 %v981_v5  ;;  %v567_v5 = vmul.f32 0.03125, %v9004_v45 }
 0x3d9   :  { %v9102_v45 = vsub.f32 %v8892_v38, %v567_v5 }
 0x3db   :  { %v599_v5 = vmul.f32 %v9102_v45, %v9102_v45 }
 0x3f5   :  { %v555_v60 = vpop.xlane.xlu0 %554 }
 0x3f6   :  { %v577_v56 = vmul.f32 0.03125, %v555_v60 }
 0x3f8   :  { %v9109_v60 = vsub.f32 %v8890_v36, %v577_v56 }
 0x3f9   :  { %v9063_v63 = vpop.permute.xlu0 %1465 }
 0x3fa   :  { %13698 = vst [vmem:[#allocation45_spill] sm:$0xff] %v9063_v63  ;;  %v609_v52 = vmul.f32 %v9109_v60, %v9109_v60 }
 0x3fb   :  { %v558_v15 = vpop.xlane.xlu1 %557 }
 0x3fc   :  { %v578_v58 = vmul.f32 0.03125, %v558_v15 }
 0x3fd   :  { %v923_v9 = vpop.permute.xlu0 %922 }
 0x3fe   :  { %v984_v4 = vsel %vm50_vm0, %v923_v9, 0.0  ;;  %v9096_v15 = vsub.f32 %v8888_v16, %v578_v58  ;;  %v634_v9 = vsel %vm50_vm0, %v604_v48, 0.0  ;;  %v646_v58 = vsel %vm50_vm0, %v608_v20, 0.0 }
 0x3ff   :  { %v9076_v14 = vpop.permute.xlu1 %1459  ;;  %985 = vadd.xlane.f32.xlu0 %v984_v4  ;;  %v570_v4 = vmul.f32 0.03125, %v9014_v18  ;;  %v569_v18 = vmul.f32 0.03125, %v9016_v1  ;;  %v619_v20 = vsel %vm50_vm0, %v599_v5, 0.0 }
 0x400   :  { %13699 = vst [vmem:[#allocation46_spill] sm:$0xff] %v9076_v14 }
 0x401   :  { %v9115_v48 = vsub.f32 %v8862_v28, %v570_v4  ;;  %v9125_v56 = vsub.f32 %v8864_v44, %v569_v18  ;;  %v649_v4 = vsel %vm50_vm0, %v609_v52, 0.0 }
 0x403   :  { %v925_v7 = vpop.permute.xlu1 %924  ;;  %614 = vadd.xlane.f32.xlu0 %v613_v54  ;;  %v610_v54 = vmul.f32 %v9096_v15, %v9096_v15  ;;  %v602_v1 = vmul.f32 %v9115_v48, %v9115_v48 }
 0x404   :  { %v987_v49 = vsel %vm50_vm0, %v925_v7, 0.0  ;;  %v622_v7 = vsel %vm50_vm0, %v600_v10, 0.0  ;;  %v574_v10 = vmul.f32 0.03125, %v9036_v8  ;;  %v575_v8 = vmul.f32 0.03125, %v9055_v17 }
 0x405   :  { %988 = vadd.xlane.f32.xlu1 %v987_v49  ;;  %v652_v49 = vsel %vm50_vm0, %v610_v54, 0.0  ;;  %v601_v54 = vmul.f32 %v9125_v56, %v9125_v56 }
 0x406   :  { %v9141_v18 = vsub.f32 %v8876_v12, %v574_v10 }
 0x407   :  { %635 = vadd.xlane.f32.xlu0 %v634_v9  ;;  %v571_v9 = vmul.f32 0.03125, %v9027_v11  ;;  %v573_v11 = vmul.f32 0.03125, %v9033_v55  ;;  %v9154_v55 = vsub.f32 %v8884_v32, %v575_v8 }
 0x409   :  { %617 = vadd.xlane.f32.xlu1 %v616_v25  ;;  %v9133_v25 = vsub.f32 %v8870_v3, %v571_v9  ;;  %v606_v9 = vmul.f32 %v9141_v18, %v9141_v18  ;;  %v607_v17 = vmul.f32 %v9154_v55, %v9154_v55 }
 0x40b   :  { %647 = vadd.xlane.f32.xlu0 %v646_v58  ;;  %v628_v58 = vsel %vm50_vm0, %v602_v1, 0.0  ;;  %v603_v5 = vmul.f32 %v9133_v25, %v9133_v25  ;;  %v643_v10 = vsel %vm50_vm0, %v607_v17, 0.0 }
 0x40d   :  { %623 = vadd.xlane.f32.xlu1 %v622_v7  ;;  %v625_v7 = vsel %vm50_vm0, %v601_v54, 0.0  ;;  %v631_v52 = vsel %vm50_vm0, %v603_v5, 0.0  ;;  %v9168_v5 = vpop.permute.xlu1 %1463 }
 0x40e   :  { %13700 = vst [vmem:[#allocation47_spill] sm:$0xff] %v9168_v5 }
 0x40f   :  { %653 = vadd.xlane.f32.xlu0 %v652_v49  ;;  %v9147_v49 = vsub.f32 %v8878_v13, %v573_v11 }
 0x411   :  { %620 = vadd.xlane.f32.xlu1 %v619_v20  ;;  %v640_v20 = vsel %vm50_vm0, %v606_v9, 0.0  ;;  %v605_v1 = vmul.f32 %v9147_v49, %v9147_v49 }
 0x413   :  { %650 = vadd.xlane.f32.xlu0 %v649_v4  ;;  %v637_v4 = vsel %vm50_vm0, %v605_v1, 0.0 }
 0x415   :  { %629 = vadd.xlane.f32.xlu1 %v628_v58 }
 0x419   :  { %626 = vadd.xlane.f32.xlu1 %v625_v7 }
 0x41d   :  { %632 = vadd.xlane.f32.xlu1 %v631_v52 }
 0x421   :  { %641 = vadd.xlane.f32.xlu1 %v640_v20 }
 0x425   :  { %638 = vadd.xlane.f32.xlu1 %v637_v4 }
 0x429   :  { %644 = vadd.xlane.f32.xlu1 %v643_v10 }
 0x42e   :  { %v564_v58 = vpop.xlane.xlu0 %563 }
 0x42f   :  { %v580_v54 = vmul.f32 0.03125, %v564_v58 }
 0x431   :  { %v9164_v11 = vsub.f32 %v8894_v39, %v580_v54 }
 0x432   :  { %v9171_v9 = vpop.xlane.xlu0 %1487 }
 0x433   :  { %v612_v7 = vmul.f32 %v9164_v11, %v9164_v11  ;;  %13701 = vst [vmem:[#allocation48_spill] sm:$0xff] %v9171_v9 }
 0x435   :  { %v658_v8 = vsel %vm50_vm0, %v612_v7, 0.0 }
 0x436   :  { %659 = vadd.xlane.f32.xlu0 %v658_v8  ;;  %v944_v10 = vpop.xlane.xlu0 %943 }
 0x437   :  { %v990_v54 = vmul.f32 0.03125, %v944_v10 }
 0x438   :  { %v561_v52 = vpop.xlane.xlu1 %560 }
 0x439   :  { %v579_v20 = vmul.f32 0.03125, %v561_v52  ;;  %v9182_v7 = vsub.f32 %v8852_v57, %v990_v54 }
 0x43a   :  { %v953_v8 = vpop.xlane.xlu0 %952 }
 0x43b   :  { %v9174_v1 = vsub.f32 %v8896_v41, %v579_v20  ;;  %v1022_v52 = vmul.f32 %v9182_v7, %v9182_v7  ;;  %v993_v5 = vmul.f32 0.03125, %v953_v8 }
 0x43c   :  { %v947_v17 = vpop.xlane.xlu1 %946 }
 0x43d   :  { %v611_v4 = vmul.f32 %v9174_v1, %v9174_v1  ;;  %v991_v9 = vmul.f32 0.03125, %v947_v17 }
 0x43e   :  { %v950_v53 = vpop.xlane.xlu0 %949 }
 0x43f   :  { %v655_v58 = vsel %vm50_vm0, %v611_v4, 0.0  ;;  %v9189_v14 = vsub.f32 %v8850_v24, %v991_v9  ;;  %v9193_v4 = vsub.f32 %v8874_v22, %v993_v5 }
 0x440   :  { %656 = vadd.xlane.f32.xlu1 %v655_v58  ;;  %v9179_v63 = vpop.xlane.xlu1 %1484  ;;  %v992_v58 = vmul.f32 0.03125, %v950_v53 }
 0x441   :  { %13702 = vst [vmem:[#allocation49_spill] sm:$0xff] %v9179_v63  ;;  %v1023_v10 = vmul.f32 %v9189_v14, %v9189_v14  ;;  %v1025_v54 = vmul.f32 %v9193_v4, %v9193_v4 }
 0x442   :  { %v9201_v8 = vsub.f32 %v8892_v38, %v992_v58 }
 0x444   :  { %v9186_v20 = vpop.xlane.xlu1 %1493  ;;  %v1024_v5 = vmul.f32 %v9201_v8, %v9201_v8 }
 0x445   :  { %13703 = vst [vmem:[#allocation50_spill] sm:$0xff] %v9186_v20  ;;  %v9203_v20 = vpop.xlane.xlu0 %1490 }
 0x446   :  { %13704 = vst [vmem:[#allocation51_spill] sm:$0xff] %v9203_v20 }
 0x448   :  { %v959_v17 = vpop.xlane.xlu1 %958 }
 0x449   :  { %v995_v9 = vmul.f32 0.03125, %v959_v17  ;;  %v956_v53 = vpop.xlane.xlu0 %955 }
 0x44a   :  { %v994_v57 = vmul.f32 0.03125, %v956_v53 }
 0x44c   :  { %1054 = vrot.lane.b32.xlu0 %v1022_v52, %s8365_s11  ;;  %v9209_v52 = vsub.f32 %v8862_v28, %v995_v9  ;;  %v9217_v22 = vpop.xlane.xlu1 %1499 }
 0x44d   :  { %v9215_v58 = vpop.xlane.xlu0 %1496  ;;  %13706 = vst [vmem:[#allocation53_spill] sm:$0xff] %v9217_v22 }
 0x44e   :  { %13705 = vst [vmem:[#allocation52_spill] sm:$0xff] %v9215_v58 }
 0x450   :  { %v965_v9 = vpop.xlane.xlu1 %964 }
 0x451   :  { %1056 = vrot.lane.b32.xlu1 %v1023_v10, %s8365_s11  ;;  %v1027_v10 = vmul.f32 %v9209_v52, %v9209_v52  ;;  %v962_v17 = vpop.xlane.xlu0 %961 }
 0x452   :  { %v996_v58 = vmul.f32 0.03125, %v962_v17 }
 0x455   :  { %1060 = vrot.lane.b32.xlu1 %v1025_v54, %s8365_s11  ;;  %v1513_v54 = vsel %vm50_vm0, %v9049_v33, 0.0  ;;  %v9221_v38 = vpop.xlane.xlu0 %1502  ;;  %v9233_v33 = vsub.f32 %v8870_v3, %v996_v58 }
 0x456   :  { %13707 = vst [vmem:[#allocation54_spill] sm:$0xff] %v9221_v38  ;;  %v1516_v38 = vsel %vm50_vm0, %v9040_v62, 0.0 }
 0x459   :  { %1058 = vrot.lane.b32.xlu1 %v1024_v5, %s8365_s11  ;;  %v968_v28 = vpop.xlane.xlu0 %967  ;;  %v9223_v5 = vpop.xlane.xlu1 %1505 }
 0x45a   :  { %13708 = vst [vmem:[#allocation55_spill] sm:$0xff] %v9223_v5 }
 0x45d   :  { %1064 = vrot.lane.b32.xlu1 %v1027_v10, %s8365_s11  ;;  %v9225_v20 = vpop.xlane.xlu0 %1508  ;;  %v9228_v10 = vsub.f32 %v8864_v44, %v994_v57  ;;  %v971_v24 = vpop.xlane.xlu1 %970  ;;  %v1028_v57 = vmul.f32 %v9233_v33, %v9233_v33 }
 0x45e   :  { %13709 = vst [vmem:[#allocation56_spill] sm:$0xff] %v9225_v20 }
 0x45f   :  { %v1026_v22 = vmul.f32 %v9228_v10, %v9228_v10 }
 0x461   :  { %v974_v63 = vpop.xlane.xlu0 %973  ;;  %v9238_v53 = vpop.xlane.xlu1 %1511 }
 0x462   :  { %13710 = vst [vmem:[#allocation57_spill] sm:$0xff] %v9238_v53  ;;  %v1000_v20 = vmul.f32 0.03125, %v974_v63 }
 0x464   :  { %v9249_v62 = vsub.f32 %v8884_v32, %v1000_v20 }
 0x465   :  { %v980_v5 = vpop.xlane.xlu0 %979  ;;  %v977_v58 = vpop.xlane.xlu1 %976 }
 0x466   :  { %v1032_v53 = vmul.f32 %v9249_v62, %v9249_v62 }
 0x469   :  { %v983_v20 = vpop.xlane.xlu1 %982 }
 0x46b   :  { %1514 = vadd.xlane.f32.xlu0 %v1513_v54  ;;  %v998_v54 = vmul.f32 0.03125, %v968_v28 }
 0x46d   :  { %v9243_v17 = vsub.f32 %v8878_v13, %v998_v54 }
 0x46f   :  { %v1030_v28 = vmul.f32 %v9243_v17, %v9243_v17 }
 0x481   :  { %1517 = vadd.xlane.f32.xlu1 %v1516_v38  ;;  %1062 = vrot.lane.b32.xlu0 %v1026_v22, %s8365_s11  ;;  %v1002_v38 = vmul.f32 0.03125, %v980_v5  ;;  %v997_v22 = vmul.f32 0.03125, %v965_v9 }
 0x483   :  { %v9255_v54 = vsub.f32 %v8890_v36, %v1002_v38  ;;  %v9258_v63 = vsub.f32 %v8868_v2, %v997_v22  ;;  %v1001_v22 = vmul.f32 0.03125, %v977_v58 }
 0x485   :  { %1066 = vrot.lane.b32.xlu0 %v1028_v57, %s8365_s11  ;;  %13711 = vst [vmem:[#allocation58_spill] sm:$0xff] %v9255_v54  ;;  %v999_v57 = vmul.f32 0.03125, %v971_v24  ;;  %v1034_v9 = vmul.f32 %v9255_v54, %v9255_v54 }
 0x487   :  { %v9269_v38 = vsub.f32 %v8876_v12, %v999_v57  ;;  %v1003_v57 = vmul.f32 0.03125, %v983_v20 }
 0x489   :  { %1070 = vrot.lane.b32.xlu0 %v1030_v28, %s8365_s11  ;;  %v1029_v28 = vmul.f32 %v9258_v63, %v9258_v63 }
 0x48c   :  { %v986_v13 = vpop.xlane.xlu0 %985 }
 0x48d   :  { %v1004_v3 = vmul.f32 0.03125, %v986_v13  ;;  %1074 = vrot.lane.b32.xlu0 %v1032_v53, %s8365_s11 }
 0x48f   :  { %v9264_v5 = vsub.f32 %v8896_v41, %v1004_v3  ;;  %v1031_v3 = vmul.f32 %v9269_v38, %v9269_v38  ;;  %v9278_v41 = vsub.f32 %v8882_v27, %v1001_v22 }
 0x490   :  { %v615_v36 = vpop.xlane.xlu0 %614 }
 0x491   :  { %13712 = vst [vmem:[#allocation59_spill] sm:$0xff] %v9264_v5  ;;  %v661_v24 = vmul.f32 0.03125, %v615_v36  ;;  %1078 = vrot.lane.b32.xlu0 %v1034_v9, %s8365_s11  ;;  %v1036_v53 = vmul.f32 %v9264_v5, %v9264_v5  ;;  %v9285_v5 = vsub.f32 %v8888_v16, %v1003_v57 }
 0x492   :  { %v989_v13 = vpop.xlane.xlu1 %988  ;;  %1068 = vrot.lane.b32.xlu1 %v1029_v28, %s8365_s11 }
 0x493   :  { %v677_v54 = vadd.f32 1e-12, %v661_v24  ;;  %v1033_v24 = vmul.f32 %v9278_v41, %v9278_v41  ;;  %13713 = vst [vmem:[#allocation60_spill] sm:$0xff] %v9285_v5  ;;  %v1005_v12 = vmul.f32 0.03125, %v989_v13 }
 0x494   :  { %v636_v32 = vpop.xlane.xlu0 %635 }
 0x495   :  { %7833 = vrsqrt.f32 %v677_v54  ;;  %v668_v58 = vmul.f32 0.03125, %v636_v32  ;;  %1082 = vrot.lane.b32.xlu0 %v1036_v53, %s8365_s11 }
 0x496   :  { %v618_v36 = vpop.xlane.xlu1 %617  ;;  %1072 = vrot.lane.b32.xlu1 %v1031_v3, %s8365_s11  ;;  %v1035_v3 = vmul.f32 %v9285_v5, %v9285_v5  ;;  %v6794_v5 = vld [vmem:[%s13495_s1 + $0x19] ss:$0 sm:$0xff] }
 0x497   :  { %v684_v9 = vadd.f32 1e-12, %v668_v58  ;;  %v662_v28 = vmul.f32 0.03125, %v618_v36  ;;  %v9291_v58 = vsub.f32 %v8894_v39, %v1005_v12 }
 0x498   :  { %v648_v22 = vpop.xlane.xlu0 %647 }
 0x499   :  { %7835 = vrsqrt.f32 %v684_v9  ;;  %v678_v20 = vadd.f32 1e-12, %v662_v28  ;;  %v672_v27 = vmul.f32 0.03125, %v648_v22  ;;  %13714 = vst [vmem:[#allocation61_spill] sm:$0xff] %v9291_v58  ;;  %v9297_v28 = vld [vmem:[%s13495_s1 + $0xa] ss:$0 sm:$0xff]  ;;  %v1037_v12 = vmul.f32 %v9291_v58, %v9291_v58 }
 0x49a   :  { %v624_v54 = vpop.xlane.xlu1 %623  ;;  %1076 = vrot.lane.b32.xlu1 %v1033_v24, %s8365_s11 }
 0x49b   :  { %7837 = vrsqrt.f32 %v678_v20  ;;  %v688_v32 = vadd.f32 1e-12, %v672_v27  ;;  %v664_v53 = vmul.f32 0.03125, %v624_v54  ;;  %v9305_v54 = vld [vmem:[%s13495_s1 + $0xb] ss:$0 sm:$0xff] }
 0x49c   :  { %v654_v36 = vpop.xlane.xlu0 %653 }
 0x49d   :  { %7839 = vrsqrt.f32 %v688_v32  ;;  %v680_v57 = vadd.f32 1e-12, %v664_v53  ;;  %v674_v13 = vmul.f32 0.03125, %v654_v36 }
 0x49e   :  { %v621_v16 = vpop.xlane.xlu1 %620  ;;  %1080 = vrot.lane.b32.xlu1 %v1035_v3, %s8365_s11 }
 0x49f   :  { %v7834_v9 = vpop.eup %7833  ;;  %7841 = vrsqrt.f32 %v680_v57  ;;  %v690_v27 = vadd.f32 1e-12, %v674_v13  ;;  %v663_v24 = vmul.f32 0.03125, %v621_v16 }
 0x4a0   :  { %v709_v22 = vmul.f32 %v7834_v9, %v9066_v6  ;;  %v651_v20 = vpop.xlane.xlu0 %650 }
 0x4a1   :  { %7843 = vrsqrt.f32 %v690_v27  ;;  %v679_v32 = vadd.f32 1e-12, %v663_v24  ;;  %v673_v53 = vmul.f32 0.03125, %v651_v20  ;;  %v9314_v27 = vld [vmem:[%s13495_s1 + $0x10] ss:$0 sm:$0xff] }
 0x4a2   :  { %v729_v3 = vmul.f32 %v9297_v28, %v709_v22  ;;  %v630_v36 = vpop.xlane.xlu1 %629  ;;  %1084 = vrot.lane.b32.xlu1 %v1037_v12, %s8365_s11 }
 0x4a3   :  { %v7836_v16 = vpop.eup %7835  ;;  %7845 = vrsqrt.f32 %v679_v32  ;;  %v689_v6 = vadd.f32 1e-12, %v673_v53  ;;  %v666_v57 = vmul.f32 0.03125, %v630_v36 }
 0x4a4   :  { %v749_v13 = vadd.f32 %v9305_v54, %v729_v3  ;;  %v716_v9 = vmul.f32 %v7836_v16, %v9071_v26 }
 0x4a5   :  { %v7838_v39 = vpop.eup %7837  ;;  %7847 = vrsqrt.f32 %v689_v6  ;;  %v682_v24 = vadd.f32 1e-12, %v666_v57  ;;  %v9325_v6 = vld [vmem:[%s13495_s1 + $0x11] ss:$0 sm:$0xff] }
 0x4a6   :  { %v736_v22 = vmul.f32 %v9297_v28, %v716_v9  ;;  %v710_v12 = vmul.f32 %v7838_v39, %v9079_v51  ;;  %v627_v20 = vpop.xlane.xlu1 %626  ;;  %v765_v32 = vadd.f32 %v749_v13, %v8697_v0  ;;  %v2061_v13 = vld [vmem:[%s13497_s8] sm:$0xf] }
 0x4a7   :  { %v7840_v53 = vpop.eup %7839  ;;  %7849 = vrsqrt.f32 %v682_v24  ;;  %v665_v3 = vmul.f32 0.03125, %v627_v20 }
 0x4a8   :  { %v756_v26 = vadd.f32 %v9305_v54, %v736_v22  ;;  %v730_v36 = vmul.f32 %v9297_v28, %v710_v12  ;;  %v720_v16 = vmul.f32 %v7840_v53, %v9083_v61  ;;  %v788_v57 = vsub.f32 %v765_v32, %v9314_v27 }
 0x4a9   :  { %v7842_v39 = vpop.eup %7841  ;;  %v681_v51 = vadd.f32 1e-12, %v665_v3 }
 0x4aa   :  { %v772_v9 = vadd.f32 %v756_v26, %v8760_v23  ;;  %v750_v24 = vadd.f32 %v9305_v54, %v730_v36  ;;  %v740_v22 = vmul.f32 %v9297_v28, %v720_v16  ;;  %v712_v61 = vmul.f32 %v7842_v39, %v9090_v40  ;;  %v633_v12 = vpop.xlane.xlu1 %632  ;;  %v9345_v40 = vld [vmem:[%s13495_s1 + $0x12] ss:$0 sm:$0xff] }
 0x4ab   :  { %v7844_v20 = vpop.eup %7843  ;;  %7851 = vrsqrt.f32 %v681_v51  ;;  %v667_v53 = vmul.f32 0.03125, %v633_v12  ;;  %vm804_vm2 = vcmp.gt.f32.partialorder %v788_v57, 0.0  ;;  %v824_v32 = vmul.f32 %v9325_v6, %v788_v57 }
 0x4ac   :  { %v9337_v3 = vsub.f32 %v772_v9, %v9314_v27  ;;  %v766_v0 = vadd.f32 %v750_v24, %v8708_v31  ;;  %v760_v26 = vadd.f32 %v9305_v54, %v740_v22  ;;  %v732_v36 = vmul.f32 %v9297_v28, %v712_v61 }
 0x4ad   :  { %v7846_v16 = vpop.eup %7845  ;;  %v13715_v39 = vsub.s32 0, %v8841_v47  ;;  %v722_v12 = vmul.f32 %v7844_v20, %v9096_v15  ;;  %v683_v9 = vadd.f32 1e-12, %v667_v53  ;;  %v840_v23 = vsel %vm804_vm2, %v788_v57, %v824_v32 }
 0x4ae   :  { %v789_v24 = vsub.f32 %v766_v0, %v9314_v27  ;;  %v776_v22 = vadd.f32 %v760_v26, %v8796_v43  ;;  %v752_v61 = vadd.f32 %v9305_v54, %v732_v36  ;;  %v711_v31 = vmul.f32 %v7846_v16, %v9102_v45  ;;  %v642_v58 = vpop.xlane.xlu1 %641 }
 0x4af   :  { %v9349_v51 = vrot.slane %v2061_v13, %v13715_v39  ;;  %v7848_v47 = vpop.eup %7847  ;;  %v742_v13 = vmul.f32 %v9297_v28, %v722_v12  ;;  %7853 = vrsqrt.f32 %v683_v9  ;;  %v670_v15 = vmul.f32 0.03125, %v642_v58 }
 0x4b0   :  { %v9361_v57 = vadd.f32 %v9345_v40, %v840_v23  ;;  %v9364_v0 = vsub.f32 %v776_v22, %v9314_v27  ;;  %v768_v20 = vadd.f32 %v752_v61, %v8723_v42  ;;  %v731_v45 = vmul.f32 %v9297_v28, %v711_v31 }
 0x4b1   :  { %13716 = vst [vmem:[#allocation62_spill] sm:$0xff] %v9349_v51  ;;  %v721_v53 = vmul.f32 %v7848_v47, %v9109_v60  ;;  %v7850_v32 = vpop.eup %7849  ;;  %v762_v26 = vadd.f32 %v9305_v54, %v742_v13  ;;  %v686_v36 = vadd.f32 1e-12, %v670_v15  ;;  %vm805_vm3 = vcmp.gt.f32.partialorder %v789_v24, 0.0 }
 0x4b2   :  { %13717 = vst [vmem:[#allocation63_spill] sm:$0xff] %v9361_v57  ;;  %v1979_v16 = vadd.f32 %v6794_v5, %v9361_v57  ;;  %v791_v58 = vsub.f32 %v768_v20, %v9314_v27  ;;  %v751_v23 = vadd.f32 %v9305_v54, %v731_v45  ;;  %v714_v12 = vmul.f32 %v7850_v32, %v9115_v48  ;;  %v639_v9 = vpop.xlane.xlu1 %638  ;;  %v13738_v57 = vld [vmem:[#allocation3_spill] sm:$0xff] }
 0x4b3   :  { %v741_v39 = vmul.f32 %v9297_v28, %v721_v53  ;;  %v778_v31 = vadd.f32 %v762_v26, %v8812_v21  ;;  %7855 = vrsqrt.f32 %v686_v36  ;;  %v669_v47 = vmul.f32 0.03125, %v639_v9 }
 0x4b4   :  { %v9376_v60 = vmul.f32 0.35355338, %v1979_v16  ;;  %v767_v22 = vadd.f32 %v751_v23, %v8712_v34  ;;  %v734_v61 = vmul.f32 %v9297_v28, %v714_v12  ;;  %v825_v13 = vmul.f32 %v9325_v6, %v789_v24 }
 0x4b5   :  { %v761_v5 = vadd.f32 %v9305_v54, %v741_v39  ;;  %v7852_v15 = vpop.eup %7851  ;;  %v9383_v20 = vsub.f32 %v778_v31, %v9314_v27  ;;  %v685_v48 = vadd.f32 1e-12, %v669_v47  ;;  %vm807_vm4 = vcmp.gt.f32.partialorder %v791_v58, 0.0 }
 0x4b6   :  { %v2066_v45 = vmul.f32 %v9349_v51, %v9376_v60  ;;  %v790_v53 = vsub.f32 %v767_v22, %v9314_v27  ;;  %v754_v26 = vadd.f32 %v9305_v54, %v734_v61  ;;  %v713_v36 = vmul.f32 %v7852_v15, %v9125_v56  ;;  %v645_v16 = vpop.xlane.xlu1 %644 }
 0x4b7   :  { %v777_v32 = vadd.f32 %v761_v5, %v8800_v37  ;;  %7857 = vrsqrt.f32 %v685_v48  ;;  %v671_v23 = vmul.f32 0.03125, %v645_v16  ;;  %v841_v39 = vsel %vm805_vm3, %v789_v24, %v825_v13 }
 0x4b8   :  { %7262 = vmatprep.mubr.msk.f32.mxu1 %vm50_vm0, %v2066_v45  ;;  %v827_v12 = vmul.f32 %v9325_v6, %v791_v58  ;;  %v770_v31 = vadd.f32 %v754_v26, %v8742_v59  ;;  %v733_v47 = vmul.f32 %v9297_v28, %v713_v36  ;;  %v9400_v22 = vadd.f32 %v9345_v40, %v841_v39 }
 0x4b9   :  { %v9395_v9 = vsub.f32 %v777_v32, %v9314_v27  ;;  %v7854_v56 = vpop.eup %7853  ;;  %v687_v5 = vadd.f32 1e-12, %v671_v23  ;;  %vm806_vm5 = vcmp.gt.f32.partialorder %v790_v53, 0.0  ;;  %v826_v61 = vmul.f32 %v9325_v6, %v790_v53 }
 0x4ba   :  { %13718 = vst [vmem:[#allocation64_spill] sm:$0xff] %v9400_v22  ;;  %v843_v15 = vsel %vm807_vm4, %v791_v58, %v827_v12  ;;  %v793_v24 = vsub.f32 %v770_v31, %v9314_v27  ;;  %v753_v13 = vadd.f32 %v9305_v54, %v733_v47  ;;  %v715_v48 = vmul.f32 %v7854_v56, %v9133_v25 }
 0x4bb   :  { %7859 = vrsqrt.f32 %v687_v5  ;;  %v842_v45 = vsel %vm806_vm5, %v790_v53, %v826_v61  ;;  %v9408_v32 = vadd.f32 %v9345_v40, %v843_v15  ;;  %vm811_vm6 = vcmp.gt.f32.partialorder %v9337_v3, 0.0 }
 0x4bc   :  { %v769_v26 = vadd.f32 %v753_v13, %v8733_v50  ;;  %v735_v36 = vmul.f32 %v9297_v28, %v715_v48  ;;  %v9413_v16 = vadd.f32 %v9345_v40, %v842_v45  ;;  %vm809_vm7 = vcmp.gt.f32.partialorder %v793_v24, 0.0 }
 0x4bd   :  { %13719 = vst [vmem:[#allocation65_spill] sm:$0xff] %v9408_v32  ;;  %v7856_v58 = vpop.eup %7855  ;;  %v829_v23 = vmul.f32 %v9325_v6, %v793_v24  ;;  %v831_v25 = vmul.f32 %v9325_v6, %v9337_v3  ;;  %vm815_vm11 = vcmp.gt.f32.partialorder %v9364_v0, 0.0  ;;  %vm816_vm12 = vcmp.gt.f32.partialorder %v9395_v9, 0.0 }
 0x4be   :  { %13720 = vst [vmem:[#allocation66_spill] sm:$0xff] %v9413_v16  ;;  %v792_v53 = vsub.f32 %v769_v26, %v9314_v27  ;;  %v755_v39 = vadd.f32 %v9305_v54, %v735_v36  ;;  %v718_v12 = vmul.f32 %v7856_v58, %v9141_v18  ;;  %vm817_vm15 = vcmp.gt.f32.partialorder %v9383_v20, 0.0 }
 0x4bf   :  { %v845_v31 = vsel %vm809_vm7, %v793_v24, %v829_v23  ;;  %v847_v47 = vsel %vm811_vm6, %v9337_v3, %v831_v25 }
 0x4c0   :  { %v771_v56 = vadd.f32 %v755_v39, %v8746_v29  ;;  %v738_v5 = vmul.f32 %v9297_v28, %v718_v12  ;;  %vm808_vm8 = vcmp.gt.f32.partialorder %v792_v53, 0.0  ;;  %v828_v61 = vmul.f32 %v9325_v6, %v792_v53 }
 0x4c1   :  { %v7858_v15 = vpop.eup %7857  ;;  %v9427_v13 = vadd.f32 %v9345_v40, %v845_v31  ;;  %v9430_v48 = vadd.f32 %v9345_v40, %v847_v47 }
 0x4c2   :  { %v794_v45 = vsub.f32 %v771_v56, %v9314_v27  ;;  %v758_v18 = vadd.f32 %v9305_v54, %v738_v5  ;;  %v717_v3 = vmul.f32 %v7858_v15, %v9147_v49  ;;  %v844_v24 = vsel %vm808_vm8, %v792_v53, %v828_v61 }
 0x4c3   :  { %13721 = vst [vmem:[#allocation67_spill] sm:$0xff] %v9427_v13  ;;  %13722 = vst [vmem:[#allocation68_spill] sm:$0xff] %v9430_v48  ;;  %v660_v26 = vpop.xlane.xlu0 %659  ;;  %v9436_v36 = vadd.f32 %v9345_v40, %v844_v24 }
 0x4c4   :  { %v774_v58 = vadd.f32 %v758_v18, %v8778_v35  ;;  %v737_v23 = vmul.f32 %v9297_v28, %v717_v3  ;;  %v676_v25 = vmul.f32 0.03125, %v660_v26  ;;  %vm810_vm9 = vcmp.gt.f32.partialorder %v794_v45, 0.0 }
 0x4c5   :  { %13723 = vst [vmem:[#allocation69_spill] sm:$0xff] %v9436_v36  ;;  %v7860_v39 = vpop.eup %7859  ;;  %v830_v12 = vmul.f32 %v9325_v6, %v794_v45 }
 0x4c6   :  { %v797_v31 = vsub.f32 %v774_v58, %v9314_v27  ;;  %v757_v47 = vadd.f32 %v9305_v54, %v737_v23  ;;  %v719_v49 = vmul.f32 %v7860_v39, %v9154_v55  ;;  %v692_v53 = vadd.f32 1e-12, %v676_v25 }
 0x4c7   :  { %v1055_v56 = vpop.permute.xlu0 %1054  ;;  %v846_v5 = vsel %vm810_vm9, %v794_v45, %v830_v12  ;;  %v835_v45 = vmul.f32 %v9325_v6, %v9364_v0  ;;  %v836_v23 = vmul.f32 %v9325_v6, %v9395_v9 }
 0x4c8   :  { %v773_v61 = vadd.f32 %v757_v47, %v8764_v19  ;;  %v739_v15 = vmul.f32 %v9297_v28, %v719_v49  ;;  %7861 = vrsqrt.f32 %v692_v53  ;;  %v1102_v18 = vsel %vm50_vm0, %v1055_v56, 0.0 }
 0x4c9   :  { %1103 = vadd.xlane.f32.xlu0 %v1102_v18  ;;  %v9448_v3 = vadd.f32 %v9345_v40, %v846_v5  ;;  %vm813_vm10 = vcmp.gt.f32.partialorder %v797_v31, 0.0  ;;  %v833_v24 = vmul.f32 %v9325_v6, %v797_v31  ;;  %v851_v49 = vsel %vm815_vm11, %v9364_v0, %v835_v45 }
 0x4ca   :  { %v796_v26 = vsub.f32 %v773_v61, %v9314_v27  ;;  %v759_v55 = vadd.f32 %v9305_v54, %v739_v15  ;;  %v852_v53 = vsel %vm816_vm12, %v9395_v9, %v836_v23  ;;  %v9471_v15 = vadd.f32 %v9345_v40, %v851_v49 }
 0x4cb   :  { %13724 = vst [vmem:[#allocation70_spill] sm:$0xff] %v9448_v3  ;;  %v849_v58 = vsel %vm813_vm10, %v797_v31, %v833_v24  ;;  %v9474_v18 = vadd.f32 %v9345_v40, %v852_v53  ;;  %v837_v9 = vmul.f32 %v9325_v6, %v9383_v20 }
 0x4cc   :  { %v775_v25 = vadd.f32 %v759_v55, %v8782_v30  ;;  %vm812_vm13 = vcmp.gt.f32.partialorder %v796_v26, 0.0  ;;  %v832_v39 = vmul.f32 %v9325_v6, %v796_v26  ;;  %v9462_v12 = vadd.f32 %v9345_v40, %v849_v58  ;;  %13727 = vst [vmem:[#allocation73_spill] sm:$0xff] %v9471_v15 }
 0x4cd   :  { %v657_v47 = vpop.xlane.xlu1 %656  ;;  %13728 = vst [vmem:[#allocation74_spill] sm:$0xff] %v9474_v18 }
 0x4ce   :  { %13725 = vst [vmem:[#allocation71_spill] sm:$0xff] %v9462_v12  ;;  %v798_v31 = vsub.f32 %v775_v25, %v9314_v27  ;;  %v675_v56 = vmul.f32 0.03125, %v657_v47  ;;  %v848_v5 = vsel %vm812_vm13, %v796_v26, %v832_v39  ;;  %v853_v39 = vsel %vm817_vm15, %v9383_v20, %v837_v9 }
 0x4cf   :  { %v9468_v61 = vadd.f32 %v9345_v40, %v848_v5 }
 0x4d0   :  { %v691_v24 = vadd.f32 1e-12, %v675_v56  ;;  %vm814_vm14 = vcmp.gt.f32.partialorder %v798_v31, 0.0  ;;  %v834_v55 = vmul.f32 %v9325_v6, %v798_v31  ;;  %v9489_v56 = vadd.f32 %v9345_v40, %v853_v39 }
 0x4d1   :  { %13726 = vst [vmem:[#allocation72_spill] sm:$0xff] %v9468_v61  ;;  %v1057_v0 = vpop.permute.xlu1 %1056 }
 0x4d2   :  { %v7862_v26 = vpop.eup %7861  ;;  %7863 = vrsqrt.f32 %v691_v24  ;;  %v1105_v45 = vsel %vm50_vm0, %v1057_v0, 0.0  ;;  %v850_v58 = vsel %vm814_vm14, %v798_v31, %v834_v55  ;;  %13730 = vst [vmem:[#allocation76_spill] sm:$0xff] %v9489_v56 }
 0x4d3   :  { %v724_v23 = vmul.f32 %v7862_v26, %v9164_v11  ;;  %1106 = vadd.xlane.f32.xlu1 %v1105_v45  ;;  %v9483_v25 = vadd.f32 %v9345_v40, %v850_v58 }
 0x4d5   :  { %13729 = vst [vmem:[#allocation75_spill] sm:$0xff] %v9483_v25  ;;  %v744_v47 = vmul.f32 %v9297_v28, %v724_v23  ;;  %v1061_v49 = vpop.permute.xlu1 %1060 }
 0x4d6   :  { %v1111_v53 = vsel %vm50_vm0, %v1061_v49, 0.0  ;;  %v13732_v49 = vld [vmem:[#allocation12_spill] sm:$0xff] }
 0x4d7   :  { %v764_v5 = vadd.f32 %v9305_v54, %v744_v47  ;;  %1112 = vadd.xlane.f32.xlu0 %v1111_v53 }
 0x4d9   :  { %v780_v31 = vadd.f32 %v764_v5, %v8828_v46  ;;  %v1059_v11 = vpop.permute.xlu1 %1058 }
 0x4da   :  { %v1108_v24 = vsel %vm50_vm0, %v1059_v11, 0.0 }
 0x4db   :  { %v803_v55 = vsub.f32 %v780_v31, %v9314_v27  ;;  %1109 = vadd.xlane.f32.xlu0 %v1108_v24 }
 0x4dc   :  { %v7864_v20 = vpop.eup %7863 }
 0x4dd   :  { %v723_v0 = vmul.f32 %v7864_v20, %v9174_v1  ;;  %v1065_v9 = vpop.permute.xlu1 %1064  ;;  %vm819_vm2 = vcmp.gt.f32.partialorder %v803_v55, 0.0  ;;  %v839_v26 = vmul.f32 %v9325_v6, %v803_v55 }
 0x4de   :  { %v1117_v45 = vsel %vm50_vm0, %v1065_v9, 0.0 }
 0x4df   :  { %v743_v58 = vmul.f32 %v9297_v28, %v723_v0  ;;  %1118 = vadd.xlane.f32.xlu1 %v1117_v45  ;;  %v855_v23 = vsel %vm819_vm2, %v803_v55, %v839_v26  ;;  %vm9677_vm2 = vmpackc.low %vm50_vm0, %vm50_vm0 }
 0x4e0   :  { %v9500_v39 = vadd.f32 %v9345_v40, %v855_v23 }
 0x4e1   :  { %v763_v47 = vadd.f32 %v9305_v54, %v743_v58 }
 0x4e2   :  { %13731 = vst [vmem:[#allocation77_spill] sm:$0xff] %v9500_v39 }
 0x4e3   :  { %v779_v53 = vadd.f32 %v763_v47, %v13732_v49 }
 0x4e5   :  { %v802_v5 = vsub.f32 %v779_v53, %v9314_v27 }
 0x4e7   :  { %vm818_vm3 = vcmp.gt.f32.partialorder %v802_v5, 0.0  ;;  %v838_v1 = vmul.f32 %v9325_v6, %v802_v5 }
 0x4e9   :  { %v854_v31 = vsel %vm818_vm3, %v802_v5, %v838_v1 }
 0x4ea   :  { %v9507_v11 = vadd.f32 %v9345_v40, %v854_v31 }
 0x4ec   :  { %13733 = vst [vmem:[#allocation78_spill] sm:$0xff] %v9507_v11 }
 0x4f8   :  { %v9509_v24 = vpop.xlane.xlu0 %1514 }
 0x4fc   :  { %v1063_v28 = vpop.permute.xlu0 %1062 }
 0x4fd   :  { %v1114_v55 = vsel %vm50_vm0, %v1063_v28, 0.0 }
 0x4fe   :  { %1115 = vadd.xlane.f32.xlu0 %v1114_v55 }
 0x500   :  { %v1067_v20 = vpop.permute.xlu0 %1066 }
 0x501   :  { %v1120_v54 = vsel %vm50_vm0, %v1067_v20, 0.0 }
 0x502   :  { %1121 = vadd.xlane.f32.xlu0 %v1120_v54 }
 0x504   :  { %v1071_v27 = vpop.permute.xlu0 %1070 }
 0x505   :  { %v1126_v47 = vsel %vm50_vm0, %v1071_v27, 0.0 }
 0x508   :  { %v1075_v45 = vpop.permute.xlu0 %1074 }
 0x509   :  { %v1132_v31 = vsel %vm50_vm0, %v1075_v45, 0.0 }
 0x50c   :  { %v1079_v53 = vpop.permute.xlu0 %1078 }
 0x50d   :  { %v1138_v20 = vsel %vm50_vm0, %v1079_v53, 0.0 }
 0x50e   :  { %v9513_v0 = vpop.xlane.xlu1 %1517 }
 0x510   :  { %v1083_v54 = vpop.permute.xlu0 %1082 }
 0x511   :  { %v1144_v27 = vsel %vm50_vm0, %v1083_v54, 0.0 }
 0x512   :  { %v1069_v9 = vpop.permute.xlu1 %1068 }
 0x513   :  { %v1123_v6 = vsel %vm50_vm0, %v1069_v9, 0.0  ;;  %v13734_v9 = vld [vmem:[#allocation44_spill] sm:$0xff] }
 0x514   :  { %1124 = vadd.xlane.f32.xlu1 %v1123_v6  ;;  %v1522_v6 = vsel %vm50_vm0, %v13734_v9, 0.0  ;;  %v13736_v9 = vld [vmem:[#allocation5_spill] sm:$0xff] }
 0x516   :  { %v1073_v26 = vpop.permute.xlu1 %1072 }
 0x517   :  { %v1129_v40 = vsel %vm50_vm0, %v1073_v26, 0.0 }
 0x518   :  { %1130 = vadd.xlane.f32.xlu1 %v1129_v40 }
 0x51a   :  { %v1077_v58 = vpop.permute.xlu1 %1076 }
 0x51b   :  { %v1135_v23 = vsel %vm50_vm0, %v1077_v58, 0.0 }
 0x51c   :  { %1136 = vadd.xlane.f32.xlu0 %v1135_v23  ;;  %1127 = vadd.xlane.f32.xlu1 %v1126_v47 }
 0x51e   :  { %v1081_v5 = vpop.permute.xlu1 %1080 }
 0x51f   :  { %v1141_v1 = vsel %vm50_vm0, %v1081_v5, 0.0 }
 0x520   :  { %1142 = vadd.xlane.f32.xlu0 %v1141_v1  ;;  %1133 = vadd.xlane.f32.xlu1 %v1132_v31 }
 0x522   :  { %v1085_v28 = vpop.permute.xlu1 %1084 }
 0x523   :  { %v1147_v55 = vsel %vm50_vm0, %v1085_v28, 0.0 }
 0x524   :  { %1148 = vadd.xlane.f32.xlu0 %v1147_v55  ;;  %1139 = vadd.xlane.f32.xlu1 %v1138_v20  ;;  %v13735_v55 = vld [vmem:[#allocation2_spill] sm:$0xff] }
 0x528   :  { %1145 = vadd.xlane.f32.xlu1 %v1144_v27 }
 0x52c   :  { %1523 = vadd.xlane.f32.xlu1 %v1522_v6 }
 0x556   :  { %v1104_v26 = vpop.xlane.xlu0 %1103 }
 0x557   :  { %v1150_v40 = vmul.f32 0.03125, %v1104_v26 }
 0x559   :  { %v1166_v45 = vadd.f32 1e-12, %v1150_v40  ;;  %v13737_v40 = vld [vmem:[#allocation38_spill] sm:$0xff] }
 0x55b   :  { %7865 = vrsqrt.f32 %v1166_v45 }
 0x560   :  { %v1107_v58 = vpop.xlane.xlu1 %1106 }
 0x561   :  { %v1151_v23 = vmul.f32 0.03125, %v1107_v58 }
 0x563   :  { %v1167_v47 = vadd.f32 1e-12, %v1151_v23 }
 0x564   :  { %v1113_v5 = vpop.xlane.xlu0 %1112 }
 0x565   :  { %v7866_v1 = vpop.eup %7865  ;;  %7867 = vrsqrt.f32 %v1167_v47  ;;  %v1153_v53 = vmul.f32 0.03125, %v1113_v5 }
 0x566   :  { %v1198_v31 = vmul.f32 %v7866_v1, %v9182_v7 }
 0x567   :  { %v1169_v28 = vadd.f32 1e-12, %v1153_v53 }
 0x568   :  { %v1222_v20 = vmul.f32 %v13735_v55, %v1198_v31  ;;  %v1110_v54 = vpop.xlane.xlu0 %1109  ;;  %v13739_v31 = vld [vmem:[#allocation7_spill] sm:$0xff] }
 0x569   :  { %7869 = vrsqrt.f32 %v1169_v28  ;;  %v1152_v27 = vmul.f32 0.03125, %v1110_v54  ;;  %v13740_v54 = vld [vmem:[#allocation28_spill] sm:$0xff] }
 0x56a   :  { %v1246_v6 = vadd.f32 %v13736_v9, %v1222_v20 }
 0x56b   :  { %v1168_v26 = vadd.f32 1e-12, %v1152_v27 }
 0x56c   :  { %v1310_v45 = vadd.f32 %v13737_v40, %v1246_v6 }
 0x56d   :  { %7871 = vrsqrt.f32 %v1168_v26 }
 0x56e   :  { %v1337_v47 = vsub.f32 %v1310_v45, %v13738_v57 }
 0x56f   :  { %v7868_v58 = vpop.eup %7867 }
 0x570   :  { %v1199_v23 = vmul.f32 %v7868_v58, %v9189_v14  ;;  %v1377_v28 = vmul.f32 %v13739_v31, %v1337_v47  ;;  %vm1353_vm4 = vcmp.gt.f32.partialorder %v1337_v47, 0.0 }
 0x572   :  { %v1223_v5 = vmul.f32 %v13735_v55, %v1199_v23  ;;  %v1393_v45 = vsel %vm1353_vm4, %v1337_v47, %v1377_v28  ;;  %v13741_v23 = vld [vmem:[#allocation30_spill] sm:$0xff]  ;;  %v13745_v47 = vld [vmem:[#allocation29_spill] sm:$0xff] }
 0x573   :  { %v7870_v7 = vpop.eup %7869 }
 0x574   :  { %v1247_v1 = vadd.f32 %v13736_v9, %v1223_v5  ;;  %v1201_v53 = vmul.f32 %v7870_v7, %v9193_v4  ;;  %v13742_v7 = vld [vmem:[#allocation4_spill] sm:$0xff] }
 0x575   :  { %v9545_v49 = vadd.f32 %v13742_v7, %v1393_v45 }
 0x576   :  { %v1225_v20 = vmul.f32 %v13735_v55, %v1201_v53  ;;  %v1311_v27 = vadd.f32 %v13740_v54, %v1247_v1  ;;  %v1119_v54 = vpop.xlane.xlu1 %1118 }
 0x577   :  { %v7872_v6 = vpop.eup %7871  ;;  %13743 = vst [vmem:[#allocation44_spill] sm:$0xff] %v9545_v49  ;;  %v1155_v45 = vmul.f32 0.03125, %v1119_v54 }
 0x578   :  { %v1249_v26 = vadd.f32 %v13736_v9, %v1225_v20  ;;  %v1200_v14 = vmul.f32 %v7872_v6, %v9201_v8  ;;  %v1338_v40 = vsub.f32 %v1311_v27, %v13738_v57  ;;  %v13746_v6 = vld [vmem:[#allocation6_spill] sm:$0xff] }
 0x57a   :  { %v1224_v58 = vmul.f32 %v13735_v55, %v1200_v14  ;;  %vm1354_vm5 = vcmp.gt.f32.partialorder %v1338_v40, 0.0  ;;  %v1378_v4 = vmul.f32 %v13739_v31, %v1338_v40  ;;  %v1313_v5 = vadd.f32 %v13741_v23, %v1249_v26 }
 0x57b   :  { %v2020_v26 = vadd.f32 %v13746_v6, %v9545_v49 }
 0x57c   :  { %v1248_v1 = vadd.f32 %v13736_v9, %v1224_v58  ;;  %v1394_v53 = vsel %vm1354_vm5, %v1338_v40, %v1378_v4  ;;  %v1340_v20 = vsub.f32 %v1313_v5, %v13738_v57 }
 0x57d   :  { %v9550_v8 = vadd.f32 %v13742_v7, %v1394_v53 }
 0x57e   :  { %v1312_v28 = vadd.f32 %v13745_v47, %v1248_v1  ;;  %vm1356_vm6 = vcmp.gt.f32.partialorder %v1340_v20, 0.0  ;;  %v1380_v27 = vmul.f32 %v13739_v31, %v1340_v20  ;;  %v1171_v1 = vadd.f32 1e-12, %v1155_v45 }
 0x57f   :  { %13744 = vst [vmem:[#allocation2_spill] sm:$0xff] %v9550_v8  ;;  %v2021_v14 = vadd.f32 %v13746_v6, %v9550_v8 }
 0x580   :  { %v1339_v40 = vsub.f32 %v1312_v28, %v13738_v57  ;;  %v1396_v58 = vsel %vm1356_vm6, %v1340_v20, %v1380_v27  ;;  %7873 = vrsqrt.f32 %v1171_v1 }
 0x581   :  { %v7721_v4 = vpack.i.bf16 %v2021_v14, %v2020_v26  ;;  %v9562_v5 = vadd.f32 %v13742_v7, %v1396_v58 }
 0x582   :  { %vm1355_vm7 = vcmp.gt.f32.partialorder %v1339_v40, 0.0  ;;  %v1379_v23 = vmul.f32 %v13739_v31, %v1339_v40 }
 0x583   :  { %7722 = vrot.lane.b32.xlu0 %v7721_v4, %s8365_s11  ;;  %13747 = vst [vmem:[#allocation5_spill] sm:$0xff] %v9562_v5  ;;  %v2023_v20 = vadd.f32 %v13746_v6, %v9562_v5 }
 0x584   :  { %v1395_v53 = vsel %vm1355_vm7, %v1339_v40, %v1379_v23 }
 0x585   :  { %v9565_v47 = vadd.f32 %v13742_v7, %v1395_v53 }
 0x587   :  { %13748 = vst [vmem:[#allocation38_spill] sm:$0xff] %v9565_v47  ;;  %v2022_v54 = vadd.f32 %v13746_v6, %v9565_v47 }
 0x589   :  { %v7726_v28 = vpack.i.bf16 %v2023_v20, %v2022_v54 }
 0x58a   :  { %v7874_v40 = vpop.eup %7873 }
 0x58b   :  { %7727 = vrot.lane.b32.xlu1 %v7726_v28, %s8365_s11  ;;  %v1116_v27 = vpop.xlane.xlu0 %1115  ;;  %v1203_v23 = vmul.f32 %v7874_v40, %v9209_v52  ;;  %v13751_v40 = vld [vmem:[#allocation31_spill] sm:$0xff] }
 0x58c   :  { %v1154_v26 = vmul.f32 0.03125, %v1116_v27 }
 0x58d   :  { %v1227_v53 = vmul.f32 %v13735_v55, %v1203_v23 }
 0x58e   :  { %v1170_v14 = vadd.f32 1e-12, %v1154_v26 }
 0x58f   :  { %v1122_v58 = vpop.xlane.xlu0 %1121  ;;  %v1251_v1 = vadd.f32 %v13736_v9, %v1227_v53 }
 0x590   :  { %7875 = vrsqrt.f32 %v1170_v14  ;;  %v1156_v45 = vmul.f32 0.03125, %v1122_v58  ;;  %v13749_v14 = vld [vmem:[#allocation46_spill] sm:$0xff] }
 0x591   :  { %v1519_v58 = vsel %vm50_vm0, %v13749_v14, 0.0 }
 0x592   :  { %v1172_v4 = vadd.f32 1e-12, %v1156_v45  ;;  %v13750_v45 = vld [vmem:[#allocation39_spill] sm:$0xff] }
 0x594   :  { %7877 = vrsqrt.f32 %v1172_v4  ;;  %v1315_v4 = vadd.f32 %v13751_v40, %v1251_v1 }
 0x59a   :  { %v7876_v47 = vpop.eup %7875 }
 0x59b   :  { %v1202_v5 = vmul.f32 %v7876_v47, %v9228_v10 }
 0x59d   :  { %v1226_v54 = vmul.f32 %v13735_v55, %v1202_v5 }
 0x59e   :  { %v7878_v20 = vpop.eup %7877 }
 0x59f   :  { %v1250_v28 = vadd.f32 %v13736_v9, %v1226_v54  ;;  %v1204_v27 = vmul.f32 %v7878_v20, %v9233_v33  ;;  %v1342_v54 = vsub.f32 %v1315_v4, %v13738_v57 }
 0x5a1   :  { %v1125_v26 = vpop.xlane.xlu1 %1124  ;;  %v1314_v52 = vadd.f32 %v13750_v45, %v1250_v28  ;;  %v1228_v5 = vmul.f32 %v13735_v55, %v1204_v27  ;;  %vm1358_vm9 = vcmp.gt.f32.partialorder %v1342_v54, 0.0 }
 0x5a2   :  { %v1157_v23 = vmul.f32 0.03125, %v1125_v26  ;;  %1520 = vadd.xlane.f32.xlu0 %v1519_v58  ;;  %v1382_v26 = vmul.f32 %v13739_v31, %v1342_v54 }
 0x5a3   :  { %v1341_v10 = vsub.f32 %v1314_v52, %v13738_v57  ;;  %v1252_v28 = vadd.f32 %v13736_v9, %v1228_v5 }
 0x5a4   :  { %v1173_v47 = vadd.f32 1e-12, %v1157_v23  ;;  %v1398_v23 = vsel %vm1358_vm9, %v1342_v54, %v1382_v26 }
 0x5a5   :  { %v1131_v53 = vpop.xlane.xlu1 %1130  ;;  %v1381_v20 = vmul.f32 %v13739_v31, %v1341_v10  ;;  %vm1357_vm8 = vcmp.gt.f32.partialorder %v1341_v10, 0.0 }
 0x5a6   :  { %7879 = vrsqrt.f32 %v1173_v47  ;;  %v1159_v33 = vmul.f32 0.03125, %v1131_v53  ;;  %v13752_v47 = vld [vmem:[#allocation40_spill] sm:$0xff] }
 0x5a7   :  { %v1397_v27 = vsel %vm1357_vm8, %v1341_v10, %v1381_v20  ;;  %v1316_v53 = vadd.f32 %v13752_v47, %v1252_v28 }
 0x5a8   :  { %v1175_v49 = vadd.f32 1e-12, %v1159_v33  ;;  %v9591_v8 = vadd.f32 %v13742_v7, %v1397_v27 }
 0x5a9   :  { %v1128_v14 = vpop.xlane.xlu1 %1127  ;;  %v1137_v1 = vpop.xlane.xlu0 %1136  ;;  %v1343_v10 = vsub.f32 %v1316_v53, %v13738_v57 }
 0x5aa   :  { %7881 = vrsqrt.f32 %v1175_v49  ;;  %v1158_v58 = vmul.f32 0.03125, %v1128_v14  ;;  %v1161_v45 = vmul.f32 0.03125, %v1137_v1  ;;  %13753 = vst [vmem:[#allocation3_spill] sm:$0xff] %v9591_v8  ;;  %v9594_v49 = vadd.f32 %v13742_v7, %v1398_v23 }
 0x5ab   :  { %v2024_v54 = vadd.f32 %v13746_v6, %v9591_v8  ;;  %vm1359_vm10 = vcmp.gt.f32.partialorder %v1343_v10, 0.0 }
 0x5ac   :  { %v1174_v52 = vadd.f32 1e-12, %v1158_v58  ;;  %v1177_v40 = vadd.f32 1e-12, %v1161_v45  ;;  %13754 = vst [vmem:[#allocation7_spill] sm:$0xff] %v9594_v49  ;;  %v2025_v1 = vadd.f32 %v13746_v6, %v9594_v49  ;;  %v1383_v45 = vmul.f32 %v13739_v31, %v1343_v10 }
 0x5ad   :  { %v1134_v4 = vpop.xlane.xlu1 %1133 }
 0x5ae   :  { %7883 = vrsqrt.f32 %v1174_v52  ;;  %v1160_v33 = vmul.f32 0.03125, %v1134_v4  ;;  %v7731_v27 = vpack.i.bf16 %v2025_v1, %v2024_v54  ;;  %v13756_v54 = vld [vmem:[#allocation33_spill] sm:$0xff] }
 0x5af   :  { %7885 = vrsqrt.f32 %v1177_v40 }
 0x5b0   :  { %v7880_v5 = vpop.eup %7879  ;;  %v1176_v37 = vadd.f32 1e-12, %v1160_v33  ;;  %v1399_v33 = vsel %vm1359_vm10, %v1343_v10, %v1383_v45 }
 0x5b1   :  { %v1205_v14 = vmul.f32 %v7880_v5, %v9258_v63 }
 0x5b2   :  { %7887 = vrsqrt.f32 %v1176_v37  ;;  %v13755_v37 = vld [vmem:[#allocation32_spill] sm:$0xff] }
 0x5b3   :  { %v1229_v20 = vmul.f32 %v13735_v55, %v1205_v14 }
 0x5b4   :  { %v7882_v28 = vpop.eup %7881 }
 0x5b5   :  { %v1253_v26 = vadd.f32 %v13736_v9, %v1229_v20  ;;  %v1207_v58 = vmul.f32 %v7882_v28, %v9269_v38 }
 0x5b7   :  { %v1231_v63 = vmul.f32 %v13735_v55, %v1207_v58  ;;  %v1317_v52 = vadd.f32 %v13755_v37, %v1253_v26  ;;  %v9618_v26 = vadd.f32 %v13742_v7, %v1399_v33  ;;  %v13759_v37 = vld [vmem:[#allocation41_spill] sm:$0xff] }
 0x5b8   :  { %v7884_v40 = vpop.eup %7883  ;;  %7732 = vrot.lane.b32.xlu0 %v7731_v27, %s8365_s11 }
 0x5b9   :  { %v7886_v4 = vpop.eup %7885  ;;  %v1255_v23 = vadd.f32 %v13736_v9, %v1231_v63  ;;  %v1206_v47 = vmul.f32 %v7884_v40, %v9243_v17  ;;  %v1344_v53 = vsub.f32 %v1317_v52, %v13738_v57  ;;  %13757 = vst [vmem:[#allocation28_spill] sm:$0xff] %v9618_v26 }
 0x5ba   :  { %v1209_v38 = vmul.f32 %v7886_v4, %v9278_v41  ;;  %v2026_v4 = vadd.f32 %v13746_v6, %v9618_v26 }
 0x5bb   :  { %v1230_v5 = vmul.f32 %v13735_v55, %v1206_v47  ;;  %vm1360_vm11 = vcmp.gt.f32.partialorder %v1344_v53, 0.0  ;;  %v1384_v14 = vmul.f32 %v13739_v31, %v1344_v53  ;;  %v1319_v20 = vadd.f32 %v13756_v54, %v1255_v23  ;;  %v13760_v23 = vld [vmem:[#allocation34_spill] sm:$0xff] }
 0x5bc   :  { %v7888_v28 = vpop.eup %7887  ;;  %v1233_v1 = vmul.f32 %v13735_v55, %v1209_v38  ;;  %v13761_v54 = vld [vmem:[#allocation42_spill] sm:$0xff] }
 0x5bd   :  { %v1254_v17 = vadd.f32 %v13736_v9, %v1230_v5  ;;  %v1208_v58 = vmul.f32 %v7888_v28, %v9249_v62  ;;  %v1400_v10 = vsel %vm1360_vm11, %v1344_v53, %v1384_v14  ;;  %v1346_v41 = vsub.f32 %v1319_v20, %v13738_v57 }
 0x5be   :  { %v1257_v45 = vadd.f32 %v13736_v9, %v1233_v1  ;;  %v9625_v27 = vadd.f32 %v13742_v7, %v1400_v10 }
 0x5bf   :  { %v1232_v63 = vmul.f32 %v13735_v55, %v1208_v58  ;;  %v1318_v52 = vadd.f32 %v13759_v37, %v1254_v17  ;;  %vm1362_vm12 = vcmp.gt.f32.partialorder %v1346_v41, 0.0  ;;  %v1386_v40 = vmul.f32 %v13739_v31, %v1346_v41 }
 0x5c0   :  { %13758 = vst [vmem:[#allocation30_spill] sm:$0xff] %v9625_v27  ;;  %v2027_v62 = vadd.f32 %v13746_v6, %v9625_v27  ;;  %v1321_v47 = vadd.f32 %v13760_v23, %v1257_v45 }
 0x5c1   :  { %v1256_v53 = vadd.f32 %v13736_v9, %v1232_v63  ;;  %v1345_v33 = vsub.f32 %v1318_v52, %v13738_v57  ;;  %v1402_v38 = vsel %vm1362_vm12, %v1346_v41, %v1386_v40 }
 0x5c2   :  { %v7736_v5 = vpack.i.bf16 %v2027_v62, %v2026_v4  ;;  %v9641_v28 = vadd.f32 %v13742_v7, %v1402_v38  ;;  %v1348_v1 = vsub.f32 %v1321_v47, %v13738_v57  ;;  %v1143_v38 = vpop.xlane.xlu0 %1142 }
 0x5c3   :  { %vm1361_vm13 = vcmp.gt.f32.partialorder %v1345_v33, 0.0  ;;  %v1385_v14 = vmul.f32 %v13739_v31, %v1345_v33  ;;  %v1320_v20 = vadd.f32 %v13761_v54, %v1256_v53 }
 0x5c4   :  { %7737 = vrot.lane.b32.xlu0 %v7736_v5, %s8365_s11  ;;  %13762 = vst [vmem:[#allocation4_spill] sm:$0xff] %v9641_v28  ;;  %vm1364_vm14 = vcmp.gt.f32.partialorder %v1348_v1, 0.0  ;;  %v1388_v41 = vmul.f32 %v13739_v31, %v1348_v1  ;;  %v2029_v37 = vadd.f32 %v13746_v6, %v9641_v28  ;;  %v1140_v5 = vpop.xlane.xlu1 %1139 }
 0x5c5   :  { %v1401_v17 = vsel %vm1361_vm13, %v1345_v33, %v1385_v14  ;;  %v1347_v58 = vsub.f32 %v1320_v20, %v13738_v57  ;;  %v13766_v14 = vld [vmem:[#allocation47_spill] sm:$0xff]  ;;  %v13767_v20 = vld [vmem:[#allocation45_spill] sm:$0xff] }
 0x5c6   :  { %v9646_v10 = vadd.f32 %v13742_v7, %v1401_v17  ;;  %v1404_v52 = vsel %vm1364_vm14, %v1348_v1, %v1388_v41  ;;  %v1525_v54 = vsel %vm50_vm0, %v13766_v14, 0.0  ;;  %v1528_v1 = vsel %vm50_vm0, %v13767_v20, 0.0  ;;  %v9670_v17 = vpop.xlane.xlu0 %1148  ;;  %v13772_v14 = vld [vmem:[#allocation14_spill] sm:$0xff]  ;;  %v13773_v20 = vld [vmem:[#allocation51_spill] sm:$0xff] }
 0x5c7   :  { %vm1363_vm15 = vcmp.gt.f32.partialorder %v1347_v58, 0.0  ;;  %v1387_v45 = vmul.f32 %v13739_v31, %v1347_v58  ;;  %v9655_v4 = vadd.f32 %v13742_v7, %v1404_v52 }
 0x5c8   :  { %13763 = vst [vmem:[#allocation29_spill] sm:$0xff] %v9646_v10  ;;  %v2028_v63 = vadd.f32 %v13746_v6, %v9646_v10  ;;  %v13776_v10 = vld [vmem:[#allocation50_spill] sm:$0xff] }
 0x5c9   :  { %v1403_v40 = vsel %vm1363_vm15, %v1347_v58, %v1387_v45  ;;  %13764 = vst [vmem:[#allocation6_spill] sm:$0xff] %v9655_v4  ;;  %v2031_v53 = vadd.f32 %v13746_v6, %v9655_v4  ;;  %v9672_v58 = vpop.xlane.xlu1 %1145 }
 0x5ca   :  { %v7741_v62 = vpack.i.bf16 %v2029_v37, %v2028_v63  ;;  %v9658_v23 = vadd.f32 %v13742_v7, %v1403_v40  ;;  %v13768_v37 = vld [vmem:[#allocation48_spill] sm:$0xff]  ;;  %v6790_v40 = vld [vmem:[%s13495_s1 + $0xf] ss:$0 sm:$0xff] }
 0x5cb   :  { %v1532_v52 = vmul.f32 0.03125, %v13768_v37  ;;  %v13774_v37 = vld [vmem:[#allocation15_spill] sm:$0xff] }
 0x5cc   :  { %13765 = vst [vmem:[#allocation46_spill] sm:$0xff] %v9658_v23  ;;  %7742 = vrot.lane.b32.xlu1 %v7741_v62, %s8365_s11  ;;  %v2030_v47 = vadd.f32 %v13746_v6, %v9658_v23 }
 0x5ce   :  { %v7746_v33 = vpack.i.bf16 %v2031_v53, %v2030_v47  ;;  %v1524_v47 = vpop.xlane.xlu1 %1523  ;;  %v13771_v53 = vld [vmem:[#allocation49_spill] sm:$0xff] }
 0x5d0   :  { %7747 = vrot.lane.b32.xlu0 %v7746_v33, %s8365_s11  ;;  %v1531_v33 = vmul.f32 0.03125, %v13771_v53  ;;  %v13775_v53 = vld [vmem:[#allocation25_spill] sm:$0xff] }
 0x5d2   :  { %v9691_v4 = vsub.f32 %v13774_v37, %v1531_v33  ;;  %v13778_v33 = vld [vmem:[#allocation53_spill] sm:$0xff] }
 0x5d3   :  { %v1536_v37 = vmul.f32 0.03125, %v13778_v33  ;;  %v13782_v33 = vld [vmem:[#allocation55_spill] sm:$0xff] }
 0x5d4   :  { %v1538_v49 = vmul.f32 0.03125, %v13782_v33 }
 0x5ef   :  { %1526 = vadd.xlane.f32.xlu0 %v1525_v54  ;;  %v9685_v54 = vsub.f32 %v13772_v14, %v1532_v52  ;;  %v1534_v52 = vmul.f32 0.03125, %v13776_v10  ;;  %v13777_v14 = vld [vmem:[#allocation52_spill] sm:$0xff] }
 0x5f0   :  { %1529 = vadd.xlane.f32.xlu1 %v1528_v1  ;;  %v1533_v1 = vmul.f32 0.03125, %v13773_v20  ;;  %v1535_v27 = vmul.f32 0.03125, %v13777_v14  ;;  %v1162_v20 = vmul.f32 0.03125, %v1140_v5 }
 0x5f2   :  { %v9696_v28 = vsub.f32 %v13775_v53, %v1533_v1  ;;  %v13779_v53 = vld [vmem:[#allocation18_spill] sm:$0xff]  ;;  %v9712_v5 = vsub.f32 %v8864_v44, %v1535_v27 }
 0x5f3   :  { %v9709_v10 = vsub.f32 %v13779_v53, %v1534_v52  ;;  %v13783_v53 = vld [vmem:[#allocation17_spill] sm:$0xff] }
 0x5f4   :  { %v1565_v1 = vmul.f32 %v9696_v28, %v9696_v28  ;;  %v1567_v27 = vmul.f32 %v9712_v5, %v9712_v5 }
 0x5f5   :  { %v7723_v41 = vpop.permute.xlu0 %7722  ;;  %v1566_v44 = vmul.f32 %v9709_v10, %v9709_v10 }
 0x5f6   :  { %v7725_v45 = vunpack.i.h.bf16 %v7723_v41  ;;  %v7724_v63 = vunpack.i.l.bf16 %v7723_v41 }
 0x5f8   :  { %v7598_v62 = vpack.c.bf16 %v7725_v45, %v7724_v63  ;;  %v1564_v63 = vmul.f32 %v9685_v54, %v9685_v54 }
 0x5fa   :  { %7600 = vmatprep.subr.msk.bf16.mxu1 %vm9677_vm2, %v7598_v62 }
 0x5fb   :  { %7603 = vmatpush3.bf16.xpose.msk.msra.mxu1 %vm9677_vm2, %v7598_v62  ;;  %v1563_v62 = vmul.f32 %v9691_v4, %v9691_v4 }
 0x5fd   :  { %v7728_v41 = vpop.permute.xlu1 %7727 }
 0x5fe   :  { %v7730_v23 = vunpack.i.h.bf16 %v7728_v41  ;;  %v7729_v45 = vunpack.i.l.bf16 %v7728_v41  ;;  %v1163_v41 = vmul.f32 0.03125, %v1143_v38  ;;  %v13781_v38 = vld [vmem:[#allocation16_spill] sm:$0xff] }
 0x5ff   :  { %v9720_v14 = vsub.f32 %v13781_v38, %v1536_v37  ;;  %v9736_v37 = vsub.f32 %v8868_v2, %v1538_v49  ;;  %v13786_v38 = vld [vmem:[#allocation57_spill] sm:$0xff]  ;;  %v13787_v49 = vld [vmem:[#allocation19_spill] sm:$0xff] }
 0x600   :  { %v7604_v26 = vpack.c.bf16 %v7730_v23, %v7729_v45  ;;  %v13780_v23 = vld [vmem:[#allocation54_spill] sm:$0xff]  ;;  %v1179_v52 = vadd.f32 1e-12, %v1163_v41  ;;  %v1540_v33 = vmul.f32 0.03125, %v13786_v38  ;;  %v1544_v38 = vmul.f32 0.03125, %v1524_v47 }
 0x601   :  { %1597 = vrot.lane.b32.xlu1 %v1564_v63, %s8363_s22  ;;  %v1537_v45 = vmul.f32 0.03125, %v13780_v23  ;;  %v1178_v63 = vadd.f32 1e-12, %v1162_v20 }
 0x602   :  { %7606 = vmatprep.subr.msk.bf16.mxu1 %vm9677_vm2, %v7604_v26 }
 0x603   :  { %7609 = vmatpush3.bf16.xpose.msk.msra.mxu1 %vm9677_vm2, %v7604_v26  ;;  %v9728_v23 = vsub.f32 %v13783_v53, %v1537_v45  ;;  %v13784_v26 = vld [vmem:[#allocation56_spill] sm:$0xff]  ;;  %7889 = vrsqrt.f32 %v1178_v63  ;;  %v1541_v63 = vmul.f32 0.03125, %v9509_v24 }
 0x604   :  { %v1539_v20 = vmul.f32 0.03125, %v13784_v26  ;;  %7891 = vrsqrt.f32 %v1179_v52  ;;  %v9752_v52 = vsub.f32 %v13787_v49, %v1540_v33  ;;  %v1542_v26 = vmul.f32 0.03125, %v9513_v0 }
 0x605   :  { %1599 = vrot.lane.b32.xlu1 %v1565_v1, %s8363_s22  ;;  %1595 = vrot.lane.b32.xlu0 %v1563_v62, %s8363_s22  ;;  %v1568_v62 = vmul.f32 %v9720_v14, %v9720_v14  ;;  %v1569_v41 = vmul.f32 %v9728_v23, %v9728_v23  ;;  %v13785_v1 = vld [vmem:[#allocation20_spill] sm:$0xff] }
 0x606   :  { %v9741_v45 = vsub.f32 %v13785_v1, %v1539_v20  ;;  %v1572_v20 = vmul.f32 %v9752_v52, %v9752_v52 }
 0x608   :  { %v1571_v2 = vmul.f32 %v9741_v45, %v9741_v45 }
 0x609   :  { %1603 = vrot.lane.b32.xlu1 %v1567_v27, %s8363_s22  ;;  %1601 = vrot.lane.b32.xlu0 %v1566_v44, %s8363_s22  ;;  %v1570_v44 = vmul.f32 %v9736_v37, %v9736_v37  ;;  %v13788_v27 = vld [vmem:[#allocation22_spill] sm:$0xff] }
 0x60a   :  { %v9755_v53 = vsub.f32 %v13788_v27, %v1541_v63  ;;  %v13791_v63 = vld [vmem:[#allocation58_spill] sm:$0xff]  ;;  %v13793_v27 = vld [vmem:[#allocation23_spill] sm:$0xff] }
 0x60b   :  { %v9774_v8 = vsub.f32 %v13793_v27, %v1544_v38 }
 0x60c   :  { %13789 = vst [vmem:[#allocation39_spill] sm:$0xff] %v9755_v53 }
 0x60d   :  { %1607 = vrot.lane.b32.xlu1 %v1569_v41, %s8363_s22  ;;  %1605 = vrot.lane.b32.xlu0 %v1568_v62, %s8363_s22  ;;  %v7890_v24 = vpop.eup %7889  ;;  %v1573_v62 = vmul.f32 %v9755_v53, %v9755_v53  ;;  %v13790_v41 = vld [vmem:[#allocation21_spill] sm:$0xff]  ;;  %13794 = vst [vmem:[#allocation31_spill] sm:$0xff] %v9774_v8 }
 0x60e   :  { %v9765_v1 = vsub.f32 %v13790_v41, %v1542_v26  ;;  %v7892_v33 = vpop.eup %7891  ;;  %v1210_v49 = vmul.f32 %v7890_v24, %v13791_v63  ;;  %v1576_v26 = vmul.f32 %v9774_v8, %v9774_v8 }
 0x610   :  { %v1574_v0 = vmul.f32 %v9765_v1, %v9765_v1  ;;  %v1234_v53 = vmul.f32 %v13735_v55, %v1210_v49 }
 0x611   :  { %1611 = vrot.lane.b32.xlu1 %v1571_v2, %s8363_s22  ;;  %1609 = vrot.lane.b32.xlu0 %v1570_v44, %s8363_s22  ;;  %v13792_v44 = vld [vmem:[#allocation60_spill] sm:$0xff] }
 0x612   :  { %v1211_v2 = vmul.f32 %v7892_v33, %v13792_v44  ;;  %v1258_v24 = vadd.f32 %v13736_v9, %v1234_v53  ;;  %v13796_v33 = vld [vmem:[#allocation36_spill] sm:$0xff] }
 0x614   :  { %v1235_v47 = vmul.f32 %v13735_v55, %v1211_v2 }
 0x615   :  { %1615 = vrot.lane.b32.xlu1 %v1573_v62, %s8363_s22  ;;  %1613 = vrot.lane.b32.xlu0 %v1572_v20, %s8363_s22  ;;  %v13795_v62 = vld [vmem:[#allocation35_spill] sm:$0xff] }
 0x616   :  { %v1259_v20 = vadd.f32 %v13736_v9, %v1235_v47  ;;  %v1322_v41 = vadd.f32 %v13795_v62, %v1258_v24  ;;  %v13798_v24 = vld [vmem:[#allocation24_spill] sm:$0xff] }
 0x618   :  { %v1323_v38 = vadd.f32 %v13796_v33, %v1259_v20  ;;  %v1349_v63 = vsub.f32 %v1322_v41, %v13738_v57 }
 0x619   :  { %1617 = vrot.lane.b32.xlu0 %v1574_v0, %s8363_s22 }
 0x61a   :  { %v1350_v49 = vsub.f32 %v1323_v38, %v13738_v57  ;;  %v1389_v0 = vmul.f32 %v13739_v31, %v1349_v63  ;;  %vm1365_vm3 = vcmp.gt.f32.partialorder %v1349_v63, 0.0 }
 0x61c   :  { %v1390_v44 = vmul.f32 %v13739_v31, %v1350_v49  ;;  %vm1366_vm4 = vcmp.gt.f32.partialorder %v1350_v49, 0.0  ;;  %v1405_v2 = vsel %vm1365_vm3, %v1349_v63, %v1389_v0 }
 0x61d   :  { %1621 = vrot.lane.b32.xlu0 %v1576_v26, %s8363_s22  ;;  %v9791_v47 = vadd.f32 %v13742_v7, %v1405_v2 }
 0x61e   :  { %v1406_v27 = vsel %vm1366_vm4, %v1350_v49, %v1390_v44 }
 0x61f   :  { %13797 = vst [vmem:[#allocation40_spill] sm:$0xff] %v9791_v47  ;;  %v9797_v20 = vadd.f32 %v13742_v7, %v1406_v27  ;;  %v2032_v63 = vadd.f32 %v13746_v6, %v9791_v47 }
 0x621   :  { %13799 = vst [vmem:[#allocation32_spill] sm:$0xff] %v9797_v20  ;;  %v2033_v0 = vadd.f32 %v13746_v6, %v9797_v20 }
 0x623   :  { %v7751_v27 = vpack.i.bf16 %v2033_v0, %v2032_v63 }
 0x62f   :  { %v1521_v53 = vpop.xlane.xlu0 %1520 }
 0x630   :  { %v1543_v26 = vmul.f32 0.03125, %v1521_v53 }
 0x632   :  { %v9794_v62 = vsub.f32 %v13798_v24, %v1543_v26 }
 0x633   :  { %v7733_v41 = vpop.permute.xlu0 %7732 }
 0x634   :  { %v1575_v33 = vmul.f32 %v9794_v62, %v9794_v62  ;;  %v7735_v38 = vunpack.i.h.bf16 %v7733_v41  ;;  %v7734_v8 = vunpack.i.l.bf16 %v7733_v41 }
 0x636   :  { %v7610_v49 = vpack.c.bf16 %v7735_v38, %v7734_v8  ;;  %1619 = vrot.lane.b32.xlu1 %v1575_v33, %s8363_s22 }
 0x637   :  { %v7738_v44 = vpop.permute.xlu0 %7737 }
 0x638   :  { %v7740_v2 = vunpack.i.h.bf16 %v7738_v44  ;;  %v7739_v53 = vunpack.i.l.bf16 %v7738_v44  ;;  %7612 = vmatprep.subr.msk.bf16.mxu1 %vm9677_vm2, %v7610_v49  ;;  %v1164_v44 = vmul.f32 0.03125, %v9672_v58 }
 0x639   :  { %7615 = vmatpush3.bf16.xpose.msk.msra.mxu1 %vm9677_vm2, %v7610_v49 }
 0x63a   :  { %v7616_v26 = vpack.c.bf16 %v7740_v2, %v7739_v53  ;;  %7752 = vrot.lane.b32.xlu1 %v7751_v27, %s8365_s11  ;;  %v1165_v2 = vmul.f32 0.03125, %v9670_v17  ;;  %v1180_v53 = vadd.f32 1e-12, %v1164_v44  ;;  %v13802_v44 = vld [vmem:[#allocation43_spill] sm:$0xff] }
 0x63c   :  { %7618 = vmatprep.subr.msk.bf16.mxu1 %vm9677_vm2, %v7616_v26  ;;  %v1181_v27 = vadd.f32 1e-12, %v1165_v2  ;;  %7893 = vrsqrt.f32 %v1180_v53 }
 0x63e   :  { %v7743_v8 = vpop.permute.xlu1 %7742  ;;  %7895 = vrsqrt.f32 %v1181_v27 }
 0x63f   :  { %v7745_v24 = vunpack.i.h.bf16 %v7743_v8  ;;  %v7744_v41 = vunpack.i.l.bf16 %v7743_v8 }
 0x641   :  { %v7622_v33 = vpack.c.bf16 %v7745_v24, %v7744_v41  ;;  %7621 = vmatpush3.bf16.xpose.msk.msra.mxu1 %vm9677_vm2, %v7616_v26  ;;  %v13800_v24 = vld [vmem:[#allocation59_spill] sm:$0xff] }
 0x642   :  { %v7748_v38 = vpop.permute.xlu0 %7747 }
 0x643   :  { %7624 = vmatprep.subr.msk.bf16.mxu1 %vm9677_vm2, %v7622_v33  ;;  %v7750_v63 = vunpack.i.h.bf16 %v7748_v38  ;;  %v7749_v0 = vunpack.i.l.bf16 %v7748_v38  ;;  %v13801_v38 = vld [vmem:[#allocation61_spill] sm:$0xff] }
 0x645   :  { %v7628_v49 = vpack.c.bf16 %v7750_v63, %v7749_v0 }
 0x646   :  { %v7894_v26 = vpop.eup %7893 }
 0x647   :  { %v1212_v41 = vmul.f32 %v7894_v26, %v13800_v24 }
 0x648   :  { %v7896_v8 = vpop.eup %7895 }
 0x649   :  { %7627 = vmatpush3.bf16.xpose.msk.msra.mxu1 %vm9677_vm2, %v7622_v33  ;;  %v1213_v33 = vmul.f32 %v7896_v8, %v13801_v38  ;;  %v1236_v63 = vmul.f32 %v13735_v55, %v1212_v41 }
 0x64a   :  { %7630 = vmatprep.subr.msk.bf16.mxu1 %vm9677_vm2, %v7628_v49 }
 0x64b   :  { %v1237_v0 = vmul.f32 %v13735_v55, %v1213_v33  ;;  %v1260_v58 = vadd.f32 %v13736_v9, %v1236_v63 }
 0x64d   :  { %v1261_v17 = vadd.f32 %v13736_v9, %v1237_v0  ;;  %v1324_v20 = vadd.f32 %v13802_v44, %v1260_v58  ;;  %v13805_v0 = vld [vmem:[#allocation27_spill] sm:$0xff] }
 0x64f   :  { %v1351_v53 = vsub.f32 %v1324_v20, %v13738_v57  ;;  %v13807_v20 = vld [vmem:[#allocation26_spill] sm:$0xff] }
 0x651   :  { %7633 = vmatpush3.bf16.xpose.msk.msra.mxu1 %vm9677_vm2, %v7628_v49  ;;  %v13803_v49 = vld [vmem:[#allocation37_spill] sm:$0xff]  ;;  %v1391_v26 = vmul.f32 %v13739_v31, %v1351_v53  ;;  %vm1367_vm5 = vcmp.gt.f32.partialorder %v1351_v53, 0.0 }
 0x652   :  { %v1325_v2 = vadd.f32 %v13803_v49, %v1261_v17 }
 0x653   :  { %v1407_v24 = vsel %vm1367_vm5, %v1351_v53, %v1391_v26 }
 0x654   :  { %v1352_v27 = vsub.f32 %v1325_v2, %v13738_v57  ;;  %v9838_v9 = vadd.f32 %v13742_v7, %v1407_v24 }
 0x656   :  { %v1392_v8 = vmul.f32 %v13739_v31, %v1352_v27  ;;  %vm1368_vm6 = vcmp.gt.f32.partialorder %v1352_v27, 0.0  ;;  %13804 = vst [vmem:[#allocation33_spill] sm:$0xff] %v9838_v9  ;;  %v2034_v44 = vadd.f32 %v13746_v6, %v9838_v9 }
 0x658   :  { %v1408_v41 = vsel %vm1368_vm6, %v1352_v27, %v1392_v8 }
 0x659   :  { %v9844_v57 = vadd.f32 %v13742_v7, %v1408_v41 }
 0x65b   :  { %13806 = vst [vmem:[#allocation41_spill] sm:$0xff] %v9844_v57  ;;  %v2035_v2 = vadd.f32 %v13746_v6, %v9844_v57 }
 0x65d   :  { %v7756_v7 = vpack.i.bf16 %v2035_v2, %v2034_v44 }
 0x67c   :  { %v1527_v55 = vpop.xlane.xlu0 %1526 }
 0x67d   :  { %v1545_v38 = vmul.f32 0.03125, %v1527_v55  ;;  %v1530_v33 = vpop.xlane.xlu1 %1529 }
 0x67e   :  { %v1546_v63 = vmul.f32 0.03125, %v1530_v33 }
 0x67f   :  { %v9841_v58 = vsub.f32 %v13805_v0, %v1545_v38 }
 0x680   :  { %v9847_v17 = vsub.f32 %v13807_v20, %v1546_v63  ;;  %v1596_v8 = vpop.permute.xlu0 %1595 }
 0x681   :  { %v1577_v31 = vmul.f32 %v9841_v58, %v9841_v58  ;;  %v1598_v53 = vpop.permute.xlu1 %1597  ;;  %v1643_v44 = vsel %vm50_vm0, %v1596_v8, 0.0 }
 0x682   :  { %v1578_v49 = vmul.f32 %v9847_v17, %v9847_v17  ;;  %v1646_v33 = vsel %vm50_vm0, %v1598_v53, 0.0 }
 0x683   :  { %1623 = vrot.lane.b32.xlu1 %v1577_v31, %s8363_s22 }
 0x684   :  { %1625 = vrot.lane.b32.xlu0 %v1578_v49, %s8363_s22  ;;  %v1602_v55 = vpop.permute.xlu0 %1601 }
 0x685   :  { %v1600_v27 = vpop.permute.xlu1 %1599  ;;  %v1652_v53 = vsel %vm50_vm0, %v1602_v55, 0.0 }
 0x686   :  { %v1649_v6 = vsel %vm50_vm0, %v1600_v27, 0.0 }
 0x687   :  { %7757 = vrot.lane.b32.xlu1 %v7756_v7, %s8365_s11 }
 0x688   :  { %v1606_v38 = vpop.permute.xlu0 %1605 }
 0x689   :  { %v1604_v26 = vpop.permute.xlu1 %1603  ;;  %v1658_v8 = vsel %vm50_vm0, %v1606_v38, 0.0 }
 0x68a   :  { %v1655_v31 = vsel %vm50_vm0, %v1604_v26, 0.0 }
 0x68c   :  { %v1610_v0 = vpop.permute.xlu0 %1609 }
 0x68d   :  { %v1608_v24 = vpop.permute.xlu1 %1607  ;;  %v1664_v55 = vsel %vm50_vm0, %v1610_v0, 0.0 }
 0x68e   :  { %v1661_v9 = vsel %vm50_vm0, %v1608_v24, 0.0 }
 0x690   :  { %v1614_v49 = vpop.permute.xlu0 %1613 }
 0x691   :  { %v1612_v41 = vpop.permute.xlu1 %1611 }
 0x692   :  { %v1667_v26 = vsel %vm50_vm0, %v1612_v41, 0.0 }
 0x694   :  { %v1618_v27 = vpop.permute.xlu0 %1617 }
 0x695   :  { %v1616_v63 = vpop.permute.xlu1 %1615 }
 0x696   :  { %v1673_v24 = vsel %vm50_vm0, %v1616_v63, 0.0 }
 0x6a3   :  { %1647 = vadd.xlane.f32.xlu0 %v1646_v33 }
 0x6a7   :  { %1650 = vadd.xlane.f32.xlu0 %v1649_v6 }
 0x6a8   :  { %v1620_v20 = vpop.permute.xlu1 %1619 }
 0x6a9   :  { %v1679_v41 = vsel %vm50_vm0, %v1620_v20, 0.0 }
 0x6ab   :  { %1656 = vadd.xlane.f32.xlu0 %v1655_v31  ;;  %1644 = vadd.xlane.f32.xlu1 %v1643_v44  ;;  %v1676_v31 = vsel %vm50_vm0, %v1618_v27, 0.0 }
 0x6ac   :  { %v7753_v2 = vpop.permute.xlu1 %7752 }
 0x6ad   :  { %v7755_v7 = vunpack.i.h.bf16 %v7753_v2  ;;  %v7754_v57 = vunpack.i.l.bf16 %v7753_v2 }
 0x6af   :  { %v7634_v33 = vpack.c.bf16 %v7755_v7, %v7754_v57  ;;  %1662 = vadd.xlane.f32.xlu0 %v1661_v9  ;;  %1653 = vadd.xlane.f32.xlu1 %v1652_v53  ;;  %v1622_v57 = vpop.permute.xlu0 %1621  ;;  %v1670_v9 = vsel %vm50_vm0, %v1614_v49, 0.0 }
 0x6b0   :  { %v1682_v6 = vsel %vm50_vm0, %v1622_v57, 0.0 }
 0x6b1   :  { %7636 = vmatprep.subr.msk.bf16.mxu1 %vm9677_vm2, %v7634_v33 }
 0x6b2   :  { %7639 = vmatpush3.bf16.xpose.msk.msra.mxu1 %vm9677_vm2, %v7634_v33  ;;  %v8345_v33 = vld [vmem:[%s13495_s1 + $0x19] ss:$0 sm:$0xff] }
 0x6b3   :  { %1668 = vadd.xlane.f32.xlu0 %v1667_v26  ;;  %1659 = vadd.xlane.f32.xlu1 %v1658_v8  ;;  %v1980_v27 = vadd.f32 %v8345_v33, %v9400_v22  ;;  %v1981_v20 = vadd.f32 %v8345_v33, %v9413_v16  ;;  %v1982_v8 = vadd.f32 %v8345_v33, %v9408_v32 }
 0x6b5   :  { %v9889_v26 = vmul.f32 0.35355338, %v1980_v27 }
 0x6b7   :  { %1674 = vadd.xlane.f32.xlu0 %v1673_v24  ;;  %1665 = vadd.xlane.f32.xlu1 %v1664_v55  ;;  %v9892_v24 = vmul.f32 0.35355338, %v1981_v20  ;;  %v1983_v55 = vadd.f32 %v8345_v33, %v9436_v36  ;;  %v2067_v57 = vmul.f32 %v9349_v51, %v9889_v26 }
 0x6bb   :  { %1671 = vadd.xlane.f32.xlu1 %v1670_v9  ;;  %1683 = vadd.xlane.f32.xlu0 %v1682_v6  ;;  %v9897_v9 = vmul.f32 0.35355338, %v1982_v8  ;;  %v1984_v6 = vadd.f32 %v8345_v33, %v9427_v13  ;;  %v1988_v8 = vadd.f32 %v8345_v33, %v9462_v12 }
 0x6bf   :  { %1677 = vadd.xlane.f32.xlu1 %v1676_v31  ;;  %v2068_v31 = vmul.f32 %v9349_v51, %v9892_v24 }
 0x6c3   :  { %1680 = vadd.xlane.f32.xlu1 %v1679_v41  ;;  %v9905_v41 = vmul.f32 0.35355338, %v1983_v55 }
 0x6f5   :  { %v1624_v38 = vpop.permute.xlu1 %1623 }
 0x6f6   :  { %v1626_v44 = vpop.permute.xlu0 %1625  ;;  %v1685_v63 = vsel %vm50_vm0, %v1624_v38, 0.0  ;;  %v1985_v38 = vadd.f32 %v8345_v33, %v9448_v3 }
 0x6f7   :  { %1686 = vadd.xlane.f32.xlu1 %v1685_v63  ;;  %v1688_v0 = vsel %vm50_vm0, %v1626_v44, 0.0  ;;  %v2069_v44 = vmul.f32 %v9349_v51, %v9897_v9  ;;  %v9913_v63 = vmul.f32 0.35355338, %v1984_v6  ;;  %v1989_v6 = vadd.f32 %v8345_v33, %v9483_v25 }
 0x6f8   :  { %1689 = vadd.xlane.f32.xlu0 %v1688_v0  ;;  %v1986_v0 = vadd.f32 %v8345_v33, %v9430_v48 }
 0x6f9   :  { %v7758_v2 = vpop.permute.xlu1 %7757  ;;  %v2071_v27 = vmul.f32 %v9349_v51, %v9913_v63 }
 0x6fa   :  { %v7760_v49 = vunpack.i.h.bf16 %v7758_v2  ;;  %v7759_v7 = vunpack.i.l.bf16 %v7758_v2  ;;  %v2070_v2 = vmul.f32 %v9349_v51, %v9905_v41  ;;  %v9930_v20 = vmul.f32 0.35355338, %v1986_v0 }
 0x6fb   :  { %v1991_v0 = vadd.f32 %v8345_v33, %v9474_v18 }
 0x6fc   :  { %v7640_v53 = vpack.c.bf16 %v7760_v49, %v7759_v7  ;;  %v9918_v49 = vmul.f32 0.35355338, %v1985_v38  ;;  %v1987_v7 = vadd.f32 %v8345_v33, %v9468_v61 }
 0x6fe   :  { %7642 = vmatprep.subr.msk.bf16.mxu1 %vm9677_vm2, %v7640_v53  ;;  %v2072_v55 = vmul.f32 %v9349_v51, %v9918_v49 }
 0x6ff   :  { %7645 = vmatpush3.bf16.xpose.msk.msra.mxu1 %vm9677_vm2, %v7640_v53  ;;  %v6789_v53 = vld [vmem:[%s13495_s1 + $0xe] ss:$0 sm:$0xff] }
 0x706   :  { %7263 = vmatmul.mubr.msk.f32.vlgmr.msra.gmra.mrb[0].mxu1 %vm50_vm0, %v2067_v57  ;;  %v9935_v57 = vmul.f32 0.35355338, %v1987_v7 }
 0x707   :  { %7265 = vmatprep.mubr.msk.f32.mxu1 %vm50_vm0, %v2068_v31  ;;  %v9945_v31 = vmul.f32 0.35355338, %v1988_v8  ;;  %v9966_v8 = vmul.f32 0.35355338, %v1991_v0  ;;  %v13810_v0 = vld [vmem:[#allocation13_spill] sm:$0xff] }
 0x708   :  { %1784 = vrot.lane.b32.xlu1 %v6790_v40, %s8363_s22  ;;  %v1990_v40 = vadd.f32 %v8345_v33, %v9471_v15  ;;  %v2074_v38 = vmul.f32 %v9349_v51, %v9935_v57 }
 0x70a   :  { %7266 = vmatmul.mubr.msk.f32.gmra.mrb[2].mxu1 %vm50_vm0, %v2069_v44  ;;  %v9950_v44 = vmul.f32 0.35355338, %v1989_v6  ;;  %v9961_v7 = vmul.f32 0.35355338, %v1990_v40  ;;  %v13809_v6 = vld [vmem:[#allocation9_spill] sm:$0xff] }
 0x70b   :  { %7268 = vmatprep.mubr.msk.f32.mxu1 %vm50_vm0, %v2070_v2  ;;  %v13808_v2 = vld [vmem:[#allocation8_spill] sm:$0xff] }
 0x70c   :  { %1807 = vrot.lane.b32.xlu1 %v8712_v34, %s8363_s22  ;;  %v2073_v34 = vmul.f32 %v9349_v51, %v9930_v20 }
 0x70e   :  { %1760 = vrot.lane.b32.xlu0 %v6789_v53, %s8363_s22  ;;  %7269 = vmatmul.mubr.msk.f32.gmra.mrb[4].mxu1 %vm50_vm0, %v2071_v27  ;;  %v1992_v53 = vadd.f32 %v8345_v33, %v9489_v56  ;;  %v2076_v27 = vmul.f32 %v9349_v51, %v9950_v44 }
 0x70f   :  { %7271 = vmatprep.mubr.msk.f32.mxu1 %vm50_vm0, %v2072_v55  ;;  %v1993_v55 = vadd.f32 %v8345_v33, %v9507_v11 }
 0x710   :  { %1809 = vrot.lane.b32.xlu1 %v8723_v42, %s8363_s22  ;;  %v2075_v42 = vmul.f32 %v9349_v51, %v9945_v31  ;;  %v9980_v40 = vmul.f32 0.35355338, %v1992_v53 }
 0x712   :  { %1803 = vrot.lane.b32.xlu0 %v13808_v2, %s8363_s22  ;;  %7272 = vmatmul.mubr.msk.f32.gmra.mrb[6].mxu1 %vm50_vm0, %v2073_v34  ;;  %v2077_v34 = vmul.f32 %v9349_v51, %v9961_v7  ;;  %v2084_v2 = vsub.s32 1, %v13810_v0 }
 0x713   :  { %7274 = vmatprep.mubr.msk.f32.mxu1 %vm50_vm0, %v2074_v38  ;;  %v1994_v38 = vadd.f32 %v8345_v33, %v9500_v39  ;;  %v2079_v33 = vmul.f32 %v9349_v51, %v9980_v40 }
 0x714   :  { %1811 = vrot.lane.b32.xlu1 %v8733_v50, %s8363_s22  ;;  %v6791_v50 = vld [vmem:[%s13495_s1 + $0x16] ss:$0 sm:$0xff] }
 0x715   :  { %v10000_v53 = vmul.f32 0.35355338, %v1994_v38  ;;  %v6793_v38 = vld [vmem:[%s13495_s1 + $0x18] ss:$0 sm:$0xff] }
 0x716   :  { %1805 = vrot.lane.b32.xlu0 %v13809_v6, %s8363_s22  ;;  %7275 = vmatmul.mubr.msk.f32.gmra.mrb[8].mxu1 %vm50_vm0, %v2075_v42  ;;  %v2078_v42 = vmul.f32 %v9349_v51, %v9966_v8  ;;  %v9989_v6 = vmul.f32 0.35355338, %v1993_v55  ;;  %v10005_v55 = vld [vmem:[%s13497_s8] sm:$0xf] }
 0x717   :  { %7277 = vmatprep.mubr.msk.f32.mxu1 %vm50_vm0, %v2076_v27  ;;  %v6796_v27 = vld [vmem:[%s13495_s1 + $0x1b] ss:$0 sm:$0xff] }
 0x718   :  { %1813 = vrot.lane.b32.xlu1 %v8742_v59, %s8363_s22  ;;  %v6792_v59 = vld [vmem:[%s13495_s1 + $0x17] ss:$0 sm:$0xff] }
 0x71a   :  { %1875 = vrot.lane.b32.xlu0 %v6791_v50, %s8363_s22  ;;  %7278 = vmatmul.mubr.msk.f32.gmra.mrb[10].mxu1 %vm50_vm0, %v2077_v34  ;;  %v10008_v50 = vrot.slane %v10005_v55, %v2084_v2  ;;  %v2080_v34 = vmul.f32 %v9349_v51, %v9989_v6  ;;  %v2081_v2 = vmul.f32 %v9349_v51, %v10000_v53  ;;  %v2168_v51 = vld [vmem:[%s13498_s7 + $0xd0] sm:$0xff] }
 0x71b   :  { %7280 = vmatprep.mubr.msk.f32.mxu1 %vm50_vm0, %v2078_v42  ;;  %v13812_v42 = vld [vmem:[#allocation10_spill] sm:$0xff] }
 0x71c   :  { %2042 = vrot.lane.b32.xlu1 %v6796_v27, %s8363_s22  ;;  %13811 = vst [vmem:[#allocation34_spill] sm:$0xff] %v10008_v50  ;;  %v2086_v27 = vmul.f32 %v10008_v50, %v9376_v60 }
 0x71e   :  { %1915 = vrot.lane.b32.xlu0 %v6792_v59, %s8363_s22  ;;  %7281 = vmatmul.mubr.msk.f32.gmra.mrb[12].mxu1 %vm50_vm0, %v2079_v33  ;;  %v2087_v59 = vmul.f32 %v10008_v50, %v9889_v26  ;;  %v2088_v33 = vmul.f32 %v10008_v50, %v9892_v24 }
 0x71f   :  { %7283 = vmatprep.mubr.msk.f32.mxu1 %vm50_vm0, %v2080_v34  ;;  %v2089_v34 = vmul.f32 %v10008_v50, %v9897_v9 }
 0x720   :  { %1817 = vrot.lane.b32.xlu1 %v13812_v42, %s8363_s22  ;;  %v2096_v42 = vmul.f32 %v10008_v50, %v9950_v44 }
 0x722   :  { %1955 = vrot.lane.b32.xlu0 %v6793_v38, %s8363_s22  ;;  %7284 = vmatmul.mubr.msk.f32.gmra.mrb[14].mxu1 %vm50_vm0, %v2081_v2  ;;  %v13813_v38 = vld [vmem:[#allocation11_spill] sm:$0xff]  ;;  %v2097_v2 = vmul.f32 %v10008_v50, %v9961_v7 }
 0x723   :  { %7286 = vmatprep.mubr.msk.f32.mxu1 %vm50_vm0, %v2086_v27  ;;  %v2104_v27 = vsub.s32 2, %v13810_v0 }
 0x724   :  { %1821 = vrot.lane.b32.xlu1 %v8778_v35, %s8363_s22  ;;  %v2090_v35 = vmul.f32 %v10008_v50, %v9905_v41 }
 0x726   :  { %1815 = vrot.lane.b32.xlu0 %v8746_v29, %s8363_s22  ;;  %7287 = vmatmul.mubr.msk.f32.gmra.mrb[16].mxu1 %vm50_vm0, %v2087_v59  ;;  %v2091_v29 = vmul.f32 %v10008_v50, %v9913_v63  ;;  %v2098_v59 = vmul.f32 %v10008_v50, %v9966_v8 }
 0x727   :  { %7289 = vmatprep.mubr.msk.f32.mxu1 %vm50_vm0, %v2088_v33  ;;  %v2099_v33 = vmul.f32 %v10008_v50, %v9980_v40 }
 0x728   :  { %1825 = vrot.lane.b32.xlu1 %v8796_v43, %s8363_s22  ;;  %v2092_v43 = vmul.f32 %v10008_v50, %v9918_v49 }
 0x72a   :  { %1819 = vrot.lane.b32.xlu0 %v8764_v19, %s8363_s22  ;;  %7290 = vmatmul.mubr.msk.f32.gmra.mrb[18].mxu1 %vm50_vm0, %v2089_v34  ;;  %v2093_v19 = vmul.f32 %v10008_v50, %v9930_v20  ;;  %v10085_v34 = vrot.slane %v10005_v55, %v2104_v27 }
 0x72b   :  { %7292 = vmatprep.mubr.msk.f32.mxu1 %vm50_vm0, %v2090_v35  ;;  %v2100_v35 = vmul.f32 %v10008_v50, %v9989_v6 }
 0x72c   :  { %1829 = vrot.lane.b32.xlu1 %v8812_v21, %s8363_s22  ;;  %v2094_v21 = vmul.f32 %v10008_v50, %v9935_v57  ;;  %13815 = vst [vmem:[#allocation42_spill] sm:$0xff] %v10085_v34  ;;  %v2114_v27 = vmul.f32 %v10085_v34, %v9935_v57 }
 0x72e   :  { %1823 = vrot.lane.b32.xlu0 %v8782_v30, %s8363_s22  ;;  %7293 = vmatmul.mubr.msk.f32.gmra.mrb[20].mxu1 %vm50_vm0, %v2091_v29  ;;  %v2095_v30 = vmul.f32 %v10008_v50, %v9945_v31  ;;  %v2101_v29 = vmul.f32 %v10008_v50, %v10000_v53 }
 0x72f   :  { %7295 = vmatprep.mubr.msk.f32.mxu1 %vm50_vm0, %v2092_v43  ;;  %v2106_v43 = vmul.f32 %v10085_v34, %v9376_v60 }
 0x730   :  { %1833 = vrot.lane.b32.xlu1 %v8828_v46, %s8363_s22  ;;  %v13814_v46 = vld [vmem:[#allocation12_spill] sm:$0xff] }
 0x732   :  { %1827 = vrot.lane.b32.xlu0 %v13813_v38, %s8363_s22  ;;  %7296 = vmatmul.mubr.msk.f32.gmra.mrb[22].mxu1 %vm50_vm0, %v2093_v19  ;;  %v2107_v19 = vmul.f32 %v10085_v34, %v9889_v26  ;;  %v2109_v38 = vmul.f32 %v10085_v34, %v9897_v9 }
 0x733   :  { %7298 = vmatprep.mubr.msk.f32.mxu1 %vm50_vm0, %v2094_v21  ;;  %v2108_v21 = vmul.f32 %v10085_v34, %v9892_v24 }
 0x736   :  { %1831 = vrot.lane.b32.xlu0 %v13814_v46, %s8363_s22  ;;  %7299 = vmatmul.mubr.msk.f32.gmra.mrb[24].mxu1 %vm50_vm0, %v2095_v30  ;;  %v2110_v30 = vmul.f32 %v10085_v34, %v9905_v41  ;;  %v2112_v46 = vmul.f32 %v10085_v34, %v9918_v49 }
 0x737   :  { %7301 = vmatprep.mubr.msk.f32.mxu1 %vm50_vm0, %v2096_v42  ;;  %v2111_v42 = vmul.f32 %v10085_v34, %v9913_v63 }
 0x73a   :  { %7302 = vmatmul.mubr.msk.f32.gmra.mrb[26].mxu1 %vm50_vm0, %v2097_v2  ;;  %v2113_v2 = vmul.f32 %v10085_v34, %v9930_v20 }
 0x73b   :  { %7304 = vmatprep.mubr.msk.f32.mxu1 %vm50_vm0, %v2098_v59  ;;  %v2115_v59 = vmul.f32 %v10085_v34, %v9945_v31 }
 0x73e   :  { %7305 = vmatmul.mubr.msk.f32.gmra.mrb[28].mxu1 %vm50_vm0, %v2099_v33  ;;  %v2116_v33 = vmul.f32 %v10085_v34, %v9950_v44 }
 0x73f   :  { %7307 = vmatprep.mubr.msk.f32.mxu1 %vm50_vm0, %v2100_v35  ;;  %v2117_v35 = vmul.f32 %v10085_v34, %v9961_v7 }
 0x742   :  { %7308 = vmatmul.mubr.msk.f32.gmra.mrb[30].mxu1 %vm50_vm0, %v2101_v29  ;;  %v2124_v29 = vsub.s32 3, %v13810_v0  ;;  %v2121_v0 = vmul.f32 %v10085_v34, %v10000_v53 }
 0x743   :  { %7310 = vmatprep.mubr.msk.f32.mxu1 %vm50_vm0, %v2106_v43  ;;  %v2118_v43 = vmul.f32 %v10085_v34, %v9966_v8 }
 0x746   :  { %7311 = vmatmul.mubr.msk.f32.gmra.mrb[32].mxu1 %vm50_vm0, %v2107_v19  ;;  %v1645_v19 = vpop.xlane.xlu1 %1644 }
 0x747   :  { %7313 = vmatprep.mubr.msk.f32.mxu1 %vm50_vm0, %v2108_v21  ;;  %v2119_v21 = vmul.f32 %v10085_v34, %v9980_v40 }
 0x74a   :  { %7314 = vmatmul.mubr.msk.f32.gmra.mrb[34].mxu1 %vm50_vm0, %v2109_v38  ;;  %v10137_v38 = vrot.slane %v10005_v55, %v2124_v29 }
 0x74b   :  { %7316 = vmatprep.mubr.msk.f32.mxu1 %vm50_vm0, %v2110_v30  ;;  %v1648_v30 = vpop.xlane.xlu0 %1647 }
 0x74c   :  { %13816 = vst [vmem:[#allocation47_spill] sm:$0xff] %v10137_v38  ;;  %v2127_v55 = vmul.f32 %v10137_v38, %v9889_v26  ;;  %v2130_v29 = vmul.f32 %v10137_v38, %v9905_v41  ;;  %v2131_v26 = vmul.f32 %v10137_v38, %v9913_v63  ;;  %v2134_v41 = vmul.f32 %v10137_v38, %v9935_v57 }
 0x74e   :  { %7317 = vmatmul.mubr.msk.f32.gmra.mrb[36].mxu1 %vm50_vm0, %v2111_v42  ;;  %v2120_v42 = vmul.f32 %v10085_v34, %v9989_v6  ;;  %v2166_v34 = vld [vmem:[%s13498_s7 + $0xc0] sm:$0xff] }
 0x74f   :  { %7319 = vmatprep.mubr.msk.f32.mxu1 %vm50_vm0, %v2112_v46  ;;  %v2126_v46 = vmul.f32 %v10137_v38, %v9376_v60  ;;  %v2129_v60 = vmul.f32 %v10137_v38, %v9897_v9  ;;  %v2133_v9 = vmul.f32 %v10137_v38, %v9930_v20 }
 0x752   :  { %7320 = vmatmul.mubr.msk.f32.gmra.mrb[38].mxu1 %vm50_vm0, %v2113_v2  ;;  %v1654_v2 = vpop.xlane.xlu1 %1653 }
 0x753   :  { %7322 = vmatprep.mubr.msk.f32.mxu1 %vm50_vm0, %v2114_v27  ;;  %v1651_v27 = vpop.xlane.xlu0 %1650  ;;  %v1694_v20 = vmul.f32 0.03125, %v1654_v2 }
 0x754   :  { %v1693_v63 = vmul.f32 0.03125, %v1651_v27  ;;  %v2137_v27 = vmul.f32 %v10137_v38, %v9961_v7  ;;  %v2139_v7 = vmul.f32 %v10137_v38, %v9980_v40 }
 0x756   :  { %7323 = vmatmul.mubr.msk.f32.gmra.mrb[40].mxu1 %vm50_vm0, %v2115_v59  ;;  %v2128_v59 = vmul.f32 %v10137_v38, %v9892_v24  ;;  %v2132_v24 = vmul.f32 %v10137_v38, %v9918_v49  ;;  %v2135_v49 = vmul.f32 %v10137_v38, %v9945_v31  ;;  %v1709_v57 = vadd.f32 1e-12, %v1693_v63 }
 0x757   :  { %7325 = vmatprep.mubr.msk.f32.mxu1 %vm50_vm0, %v2116_v33  ;;  %v1660_v33 = vpop.xlane.xlu1 %1659  ;;  %v2138_v31 = vmul.f32 %v10137_v38, %v9966_v8  ;;  %v2140_v8 = vmul.f32 %v10137_v38, %v9989_v6 }
 0x758   :  { %7897 = vrsqrt.f32 %v1709_v57 }
 0x75a   :  { %7326 = vmatmul.mubr.msk.f32.gmra.mrb[42].mxu1 %vm50_vm0, %v2117_v35  ;;  %v1657_v35 = vpop.xlane.xlu0 %1656 }
 0x75b   :  { %7328 = vmatprep.mubr.msk.f32.mxu1 %vm50_vm0, %v2118_v43  ;;  %v1666_v43 = vpop.xlane.xlu1 %1665 }
 0x75e   :  { %7329 = vmatmul.mubr.msk.f32.gmra.mrb[44].mxu1 %vm50_vm0, %v2119_v21  ;;  %v1663_v21 = vpop.xlane.xlu0 %1662 }
 0x75f   :  { %7331 = vmatprep.mubr.msk.f32.mxu1 %vm50_vm0, %v2120_v42  ;;  %v1672_v42 = vpop.xlane.xlu1 %1671  ;;  %v1697_v63 = vmul.f32 0.03125, %v1663_v21 }
 0x760   :  { %v1700_v6 = vmul.f32 0.03125, %v1672_v42 }
 0x762   :  { %7332 = vmatmul.mubr.msk.f32.gmra.mrb[46].mxu1 %vm50_vm0, %v2121_v0  ;;  %v1691_v0 = vmul.f32 0.03125, %v1645_v19 }
 0x763   :  { %7334 = vmatprep.mubr.msk.f32.mxu1 %vm50_vm0, %v2126_v46  ;;  %v1669_v46 = vpop.xlane.xlu0 %1668 }
 0x766   :  { %7335 = vmatmul.mubr.msk.f32.gmra.mrb[48].mxu1 %vm50_vm0, %v2127_v55  ;;  %v2136_v55 = vmul.f32 %v10137_v38, %v9950_v44  ;;  %v1710_v44 = vadd.f32 1e-12, %v1694_v20  ;;  %v7898_v20 = vpop.eup %7897 }
 0x767   :  { %7337 = vmatprep.mubr.msk.f32.mxu1 %vm50_vm0, %v2128_v59  ;;  %v1692_v59 = vmul.f32 0.03125, %v1648_v30  ;;  %v10186_v30 = vpop.xlane.xlu0 %1674  ;;  %v1741_v42 = vmul.f32 %v7898_v20, %v9696_v28 }
 0x769   :  { %v1708_v19 = vadd.f32 1e-12, %v1692_v59 }
 0x76a   :  { %7338 = vmatmul.mubr.msk.f32.gmra.mrb[50].mxu1 %vm50_vm0, %v2129_v60  ;;  %v1695_v60 = vmul.f32 0.03125, %v1657_v35  ;;  %v1696_v35 = vmul.f32 0.03125, %v1660_v33  ;;  %v2141_v33 = vmul.f32 %v10137_v38, %v10000_v53 }
 0x76b   :  { %7340 = vmatprep.mubr.msk.f32.mxu1 %vm50_vm0, %v2130_v29  ;;  %v1707_v29 = vadd.f32 1e-12, %v1691_v0 }
 0x76c   :  { %v1711_v2 = vadd.f32 1e-12, %v1695_v60 }
 0x76d   :  { %7899 = vrsqrt.f32 %v1707_v29 }
 0x76e   :  { %7341 = vmatmul.mubr.msk.f32.gmra.mrb[52].mxu1 %vm50_vm0, %v2131_v26  ;;  %v10183_v26 = vpop.xlane.xlu1 %1677  ;;  %7901 = vrsqrt.f32 %v1708_v19 }
 0x76f   :  { %7343 = vmatprep.mubr.msk.f32.mxu1 %vm50_vm0, %v2132_v24  ;;  %v1698_v24 = vmul.f32 0.03125, %v1666_v43  ;;  %7903 = vrsqrt.f32 %v1710_v44  ;;  %v1699_v43 = vmul.f32 0.03125, %v1669_v46 }
 0x770   :  { %7905 = vrsqrt.f32 %v1711_v2 }
 0x771   :  { %v1714_v40 = vadd.f32 1e-12, %v1698_v24  ;;  %v1715_v57 = vadd.f32 1e-12, %v1699_v43 }
 0x772   :  { %7344 = vmatmul.mubr.msk.f32.gmra.mrb[54].mxu1 %vm50_vm0, %v2133_v9  ;;  %v1712_v9 = vadd.f32 1e-12, %v1696_v35 }
 0x773   :  { %7346 = vmatprep.mubr.msk.f32.mxu1 %vm50_vm0, %v2134_v41  ;;  %v10195_v41 = vpop.xlane.xlu1 %1680 }
 0x774   :  { %7907 = vrsqrt.f32 %v1712_v9 }
 0x775   :  { %7909 = vrsqrt.f32 %v1714_v40 }
 0x776   :  { %7347 = vmatmul.mubr.msk.f32.gmra.mrb[56].mxu1 %vm50_vm0, %v2135_v49  ;;  %v10199_v49 = vpop.xlane.xlu0 %1683 }
 0x777   :  { %7349 = vmatprep.mubr.msk.f32.mxu1 %vm50_vm0, %v2136_v55  ;;  %v1713_v55 = vadd.f32 1e-12, %v1697_v63  ;;  %v7900_v60 = vpop.eup %7899 }
 0x778   :  { %v7902_v53 = vpop.eup %7901  ;;  %v1739_v19 = vmul.f32 %v7900_v60, %v9691_v4 }
 0x779   :  { %v7904_v29 = vpop.eup %7903  ;;  %7911 = vrsqrt.f32 %v1713_v55 }
 0x77a   :  { %7350 = vmatmul.mubr.msk.f32.gmra.mrb[58].mxu1 %vm50_vm0, %v2137_v27  ;;  %v1716_v27 = vadd.f32 1e-12, %v1700_v6  ;;  %7913 = vrsqrt.f32 %v1715_v57 }
 0x77b   :  { %7352 = vmatprep.mubr.msk.f32.mxu1 %vm50_vm0, %v2138_v31  ;;  %v7906_v31 = vpop.eup %7905 }
 0x77c   :  { %7915 = vrsqrt.f32 %v1716_v27  ;;  %v1743_v9 = vmul.f32 %v7906_v31, %v9712_v5 }
 0x77e   :  { %7353 = vmatmul.mubr.msk.f32.gmra.mrb[60].mxu1 %vm50_vm0, %v2139_v7  ;;  %v1742_v7 = vmul.f32 %v7904_v29, %v9709_v10 }
 0x77f   :  { %7355 = vmatprep.mubr.msk.f32.mxu1 %vm50_vm0, %v2140_v8  ;;  %v1740_v8 = vmul.f32 %v7902_v53, %v9685_v54 }
 0x782   :  { %7356 = vmatmul.mubr.msk.f32.gmra.mrb[62].mxu1 %vm50_vm0, %v2141_v33  ;;  %v7908_v33 = vpop.eup %7907 }
 0x783   :  { %v7910_v40 = vpop.eup %7909  ;;  %v1744_v10 = vmul.f32 %v7908_v33, %v9720_v14 }
 0x784   :  { %v10202_v0 = vpop.xlane.xlu1 %1686  ;;  %v1746_v5 = vmul.f32 %v7910_v40, %v9736_v37  ;;  %v7912_v57 = vpop.eup %7911 }
 0x785   :  { %v10204_v59 = vpop.xlane.xlu0 %1689  ;;  %v7914_v29 = vpop.eup %7913  ;;  %v1745_v37 = vmul.f32 %v7912_v57, %v9728_v23 }
 0x786   :  { %v1747_v23 = vmul.f32 %v7914_v29, %v9741_v45 }
 0x788   :  { %v10206_v21 = vpop.permute.xlu1 %1784 }
 0x789   :  { %v10208_v46 = vpop.permute.xlu0 %1760 }
 0x78a   :  { %v1765_v2 = vmul.f32 %v10208_v46, %v1741_v42  ;;  %v1763_v35 = vmul.f32 %v10208_v46, %v1739_v19  ;;  %v1766_v63 = vmul.f32 %v10208_v46, %v1742_v7  ;;  %v1764_v28 = vmul.f32 %v10208_v46, %v1740_v8  ;;  %v7916_v7 = vpop.eup %7915 }
 0x78b   :  { %v1767_v4 = vmul.f32 %v10208_v46, %v1743_v9  ;;  %v1768_v53 = vmul.f32 %v10208_v46, %v1744_v10 }
 0x78c   :  { %v1808_v44 = vpop.permute.xlu1 %1807  ;;  %v1789_v43 = vadd.f32 %v10206_v21, %v1765_v2  ;;  %v1787_v6 = vadd.f32 %v10206_v21, %v1763_v35  ;;  %v1790_v54 = vadd.f32 %v10206_v21, %v1766_v63  ;;  %v1788_v60 = vadd.f32 %v10206_v21, %v1764_v28 }
 0x78d   :  { %v1804_v24 = vpop.permute.xlu0 %1803  ;;  %v1791_v27 = vadd.f32 %v10206_v21, %v1767_v4  ;;  %v1770_v35 = vmul.f32 %v10208_v46, %v1746_v5 }
 0x78e   :  { %v1853_v31 = vadd.f32 %v1808_v44, %v1789_v43  ;;  %v1851_v42 = vadd.f32 %v1804_v24, %v1787_v6  ;;  %v1792_v44 = vadd.f32 %v10206_v21, %v1768_v53  ;;  %v1769_v6 = vmul.f32 %v10208_v46, %v1745_v37 }
 0x78f   :  { %v1794_v43 = vadd.f32 %v10206_v21, %v1770_v35 }
 0x790   :  { %v1810_v55 = vpop.permute.xlu1 %1809 }
 0x791   :  { %v1806_v20 = vpop.permute.xlu0 %1805  ;;  %v1854_v19 = vadd.f32 %v1810_v55, %v1790_v54  ;;  %v1748_v55 = vmul.f32 %v7916_v7, %v9752_v52 }
 0x792   :  { %v1852_v14 = vadd.f32 %v1806_v20, %v1788_v60 }
 0x794   :  { %v1812_v2 = vpop.permute.xlu1 %1811 }
 0x795   :  { %v1855_v8 = vadd.f32 %v1812_v2, %v1791_v27  ;;  %v10229_v9 = vpop.permute.xlu0 %1875  ;;  %v1793_v2 = vadd.f32 %v10206_v21, %v1769_v6 }
 0x796   :  { %v1880_v33 = vsub.f32 %v1853_v31, %v10229_v9  ;;  %v1881_v63 = vsub.f32 %v1854_v19, %v10229_v9  ;;  %v1878_v40 = vsub.f32 %v1851_v42, %v10229_v9  ;;  %v1879_v24 = vsub.f32 %v1852_v14, %v10229_v9 }
 0x797   :  { %v1882_v28 = vsub.f32 %v1855_v8, %v10229_v9 }
 0x798   :  { %v1814_v4 = vpop.permute.xlu1 %1813  ;;  %vm1896_vm7 = vcmp.gt.f32.partialorder %v1880_v33, 0.0  ;;  %vm1897_vm8 = vcmp.gt.f32.partialorder %v1881_v63, 0.0  ;;  %vm1894_vm9 = vcmp.gt.f32.partialorder %v1878_v40, 0.0  ;;  %vm1895_vm10 = vcmp.gt.f32.partialorder %v1879_v24, 0.0 }
 0x799   :  { %v1856_v20 = vadd.f32 %v1814_v4, %v1792_v44  ;;  %v10242_v10 = vpop.permute.xlu0 %1915  ;;  %vm1898_vm11 = vcmp.gt.f32.partialorder %v1882_v28, 0.0 }
 0x79a   :  { %v1920_v54 = vmul.f32 %v10242_v10, %v1880_v33  ;;  %v1921_v5 = vmul.f32 %v10242_v10, %v1881_v63  ;;  %v1918_v57 = vmul.f32 %v10242_v10, %v1878_v40  ;;  %v1919_v60 = vmul.f32 %v10242_v10, %v1879_v24 }
 0x79b   :  { %v1883_v27 = vsub.f32 %v1856_v20, %v10229_v9  ;;  %v1922_v45 = vmul.f32 %v10242_v10, %v1882_v28 }
 0x79c   :  { %v10250_v52 = vpop.permute.xlu1 %2042  ;;  %v1936_v53 = vsel %vm1896_vm7, %v1880_v33, %v1920_v54  ;;  %v1937_v29 = vsel %vm1897_vm8, %v1881_v63, %v1921_v5  ;;  %v1934_v31 = vsel %vm1894_vm9, %v1878_v40, %v1918_v57  ;;  %v1935_v42 = vsel %vm1895_vm10, %v1879_v24, %v1919_v60 }
 0x79d   :  { %vm1899_vm12 = vcmp.gt.f32.partialorder %v1883_v27, 0.0  ;;  %v10252_v19 = vpop.permute.xlu0 %1955  ;;  %v1923_v35 = vmul.f32 %v10242_v10, %v1883_v27  ;;  %v1938_v7 = vsel %vm1898_vm11, %v1882_v28, %v1922_v45  ;;  %v1772_v63 = vmul.f32 %v10208_v46, %v1748_v55 }
 0x79e   :  { %v10257_v14 = vadd.f32 %v10252_v19, %v1936_v53  ;;  %v10260_v8 = vadd.f32 %v10252_v19, %v1937_v29  ;;  %v10263_v37 = vadd.f32 %v10252_v19, %v1934_v31  ;;  %v10266_v33 = vadd.f32 %v10252_v19, %v1935_v42 }
 0x79f   :  { %v1771_v40 = vmul.f32 %v10208_v46, %v1747_v23  ;;  %v1939_v44 = vsel %vm1899_vm12, %v1883_v27, %v1923_v35  ;;  %v10271_v24 = vadd.f32 %v10252_v19, %v1938_v7  ;;  %v1796_v53 = vadd.f32 %v10206_v21, %v1772_v63 }
 0x7a0   :  { %13817 = vst [vmem:[#allocation45_spill] sm:$0xff] %v10257_v14  ;;  %13818 = vst [vmem:[#allocation48_spill] sm:$0xff] %v10260_v8  ;;  %v1818_v28 = vpop.permute.xlu1 %1817  ;;  %v2047_v4 = vadd.f32 %v10250_v52, %v10257_v14  ;;  %v2048_v6 = vadd.f32 %v10250_v52, %v10260_v8  ;;  %v2045_v20 = vadd.f32 %v10250_v52, %v10263_v37 }
 0x7a1   :  { %13819 = vst [vmem:[#allocation49_spill] sm:$0xff] %v10263_v37  ;;  %13820 = vst [vmem:[#allocation14_spill] sm:$0xff] %v10266_v33  ;;  %v2046_v54 = vadd.f32 %v10250_v52, %v10266_v33  ;;  %v1858_v55 = vadd.f32 %v1818_v28, %v1794_v43  ;;  %v1816_v5 = vpop.permute.xlu0 %1815  ;;  %v10282_v23 = vadd.f32 %v10252_v19, %v1939_v44 }
 0x7a2   :  { %13821 = vst [vmem:[#allocation51_spill] sm:$0xff] %v10271_v24  ;;  %v1857_v57 = vadd.f32 %v1816_v5, %v1793_v2  ;;  %v7766_v60 = vpack.i.bf16 %v2048_v6, %v2047_v4  ;;  %v1795_v43 = vadd.f32 %v10206_v21, %v1771_v40  ;;  %v2049_v2 = vadd.f32 %v10250_v52, %v10271_v24 }
 0x7a3   :  { %13822 = vst [vmem:[#allocation15_spill] sm:$0xff] %v10282_v23  ;;  %v7761_v27 = vpack.i.bf16 %v2046_v54, %v2045_v20  ;;  %v1885_v45 = vsub.f32 %v1858_v55, %v10229_v9  ;;  %v2050_v29 = vadd.f32 %v10250_v52, %v10282_v23 }
 0x7a4   :  { %v1884_v31 = vsub.f32 %v1857_v57, %v10229_v9  ;;  %v1822_v42 = vpop.permute.xlu1 %1821  ;;  %7767 = vrot.lane.b32.xlu1 %v7766_v60, %s8363_s22 }
 0x7a5   :  { %7762 = vrot.lane.b32.xlu0 %v7761_v27, %s8363_s22  ;;  %vm1901_vm13 = vcmp.gt.f32.partialorder %v1885_v45, 0.0  ;;  %v1925_v35 = vmul.f32 %v10242_v10, %v1885_v45  ;;  %v1860_v7 = vadd.f32 %v1822_v42, %v1796_v53  ;;  %v1820_v63 = vpop.permute.xlu0 %1819  ;;  %v7771_v4 = vpack.i.bf16 %v2050_v29, %v2049_v2 }
 0x7a6   :  { %vm1900_vm14 = vcmp.gt.f32.partialorder %v1884_v31, 0.0  ;;  %v1924_v44 = vmul.f32 %v10242_v10, %v1884_v31  ;;  %v1859_v28 = vadd.f32 %v1820_v63, %v1795_v43  ;;  %v2143_v63 = vld [vmem:[%s13498_s7 + $0x8] sm:$0xff] }
 0x7a7   :  { %v1941_v6 = vsel %vm1901_vm13, %v1885_v45, %v1925_v35  ;;  %v1887_v20 = vsub.f32 %v1860_v7, %v10229_v9 }
 0x7a8   :  { %v10298_v54 = vadd.f32 %v10252_v19, %v1941_v6  ;;  %v1940_v40 = vsel %vm1900_vm14, %v1884_v31, %v1924_v44  ;;  %v1886_v55 = vsub.f32 %v1859_v28, %v10229_v9  ;;  %v2142_v44 = vld [vmem:[%s13498_s7] sm:$0xff] }
 0x7a9   :  { %7772 = vrot.lane.b32.xlu0 %v7771_v4, %s8363_s22  ;;  %v10303_v5 = vadd.f32 %v10252_v19, %v1940_v40  ;;  %vm1903_vm15 = vcmp.gt.f32.partialorder %v1887_v20, 0.0  ;;  %v1927_v57 = vmul.f32 %v10242_v10, %v1887_v20  ;;  %v2145_v40 = vld [vmem:[%s13498_s7 + $0x18] sm:$0xff] }
 0x7aa   :  { %13823 = vst [vmem:[#allocation25_spill] sm:$0xff] %v10298_v54  ;;  %vm1902_vm2 = vcmp.gt.f32.partialorder %v1886_v55, 0.0  ;;  %v1926_v60 = vmul.f32 %v10242_v10, %v1886_v55  ;;  %v2052_v27 = vadd.f32 %v10250_v52, %v10298_v54  ;;  %v2170_v54 = vld [vmem:[%s13498_s7 + $0xe0] sm:$0xff] }
 0x7ab   :  { %13824 = vst [vmem:[#allocation50_spill] sm:$0xff] %v10303_v5  ;;  %v1943_v45 = vsel %vm1903_vm15, %v1887_v20, %v1927_v57  ;;  %v2051_v53 = vadd.f32 %v10250_v52, %v10303_v5  ;;  %v2173_v5 = vld [vmem:[%s13498_s7 + $0xf8] sm:$0xff] }
 0x7ac   :  { %v10312_v29 = vadd.f32 %v10252_v19, %v1943_v45  ;;  %v1942_v31 = vsel %vm1902_vm2, %v1886_v55, %v1926_v60  ;;  %v2144_v55 = vld [vmem:[%s13498_s7 + $0x10] sm:$0xff] }
 0x7ad   :  { %v10315_v42 = vadd.f32 %v10252_v19, %v1942_v31  ;;  %v7776_v43 = vpack.i.bf16 %v2052_v27, %v2051_v53  ;;  %v2147_v53 = vld [vmem:[%s13498_s7 + $0x28] sm:$0xff] }
 0x7ae   :  { %13825 = vst [vmem:[#allocation52_spill] sm:$0xff] %v10312_v29  ;;  %v2054_v35 = vadd.f32 %v10250_v52, %v10312_v29 }
 0x7af   :  { %13826 = vst [vmem:[#allocation53_spill] sm:$0xff] %v10315_v42  ;;  %v2053_v2 = vadd.f32 %v10250_v52, %v10315_v42  ;;  %7777 = vrot.lane.b32.xlu1 %v7776_v43, %s8363_s22 }
 0x7b1   :  { %v7781_v7 = vpack.i.bf16 %v2054_v35, %v2053_v2  ;;  %v2146_v35 = vld [vmem:[%s13498_s7 + $0x20] sm:$0xff] }
 0x7b3   :  { %7782 = vrot.lane.b32.xlu0 %v7781_v7, %s8363_s22  ;;  %v2149_v7 = vld [vmem:[%s13498_s7 + $0x38] sm:$0xff] }
 0x7d9   :  { %v7264_v28 = vpop.f32.mrb[0].mxu1 }
 0x7da   :  { %v10329_v4 = vadd.f32 %v7264_v28, %v2143_v63  ;;  %v2544_v6 = vpop.f32.mrb[1].mxu1 }
 0x7db   :  { %v10331_v20 = vadd.f32 %v2544_v6, %v2142_v44 }
 0x7dc   :  { %2865 = vmax.xlane.f32.xlu1 %v10329_v4 }
 0x7dd   :  { %v7267_v57 = vpop.f32.mrb[2].mxu1  ;;  %2863 = vmax.xlane.f32.xlu0 %v10331_v20 }
 0x7de   :  { %v10341_v60 = vadd.f32 %v7267_v57, %v2145_v40  ;;  %v2554_v27 = vpop.f32.mrb[3].mxu1  ;;  %v2148_v40 = vld [vmem:[%s13498_s7 + $0x30] sm:$0xff] }
 0x7df   :  { %v10343_v45 = vadd.f32 %v2554_v27, %v2144_v55  ;;  %v2151_v55 = vld [vmem:[%s13498_s7 + $0x48] sm:$0xff] }
 0x7e0   :  { %2869 = vmax.xlane.f32.xlu1 %v10341_v60 }
 0x7e1   :  { %v7270_v31 = vpop.f32.mrb[4].mxu1  ;;  %2867 = vmax.xlane.f32.xlu0 %v10343_v45 }
 0x7e2   :  { %v10350_v43 = vadd.f32 %v7270_v31, %v2147_v53  ;;  %v2564_v2 = vpop.f32.mrb[5].mxu1 }
 0x7e3   :  { %v10359_v44 = vadd.f32 %v2564_v2, %v2146_v35  ;;  %v2150_v2 = vld [vmem:[%s13498_s7 + $0x40] sm:$0xff]  ;;  %v2152_v35 = vld [vmem:[%s13498_s7 + $0x50] sm:$0xff] }
 0x7e4   :  { %2873 = vmax.xlane.f32.xlu1 %v10350_v43 }
 0x7e5   :  { %v7273_v63 = vpop.f32.mrb[6].mxu1 }
 0x7e6   :  { %v10361_v28 = vadd.f32 %v7273_v63, %v2149_v7  ;;  %v2574_v6 = vpop.f32.mrb[7].mxu1 }
 0x7e7   :  { %v10371_v27 = vadd.f32 %v2574_v6, %v2148_v40  ;;  %v2153_v40 = vld [vmem:[%s13498_s7 + $0x58] sm:$0xff] }
 0x7e8   :  { %2871 = vmax.xlane.f32.xlu1 %v10359_v44  ;;  %2877 = vmax.xlane.f32.xlu0 %v10361_v28 }
 0x7e9   :  { %v7276_v57 = vpop.f32.mrb[8].mxu1 }
 0x7ea   :  { %v10373_v53 = vadd.f32 %v7276_v57, %v2151_v55  ;;  %v2584_v31 = vpop.f32.mrb[9].mxu1  ;;  %v2154_v57 = vld [vmem:[%s13498_s7 + $0x60] sm:$0xff] }
 0x7eb   :  { %v10383_v63 = vadd.f32 %v2584_v31, %v2150_v2  ;;  %v2155_v2 = vld [vmem:[%s13498_s7 + $0x68] sm:$0xff] }
 0x7ec   :  { %2875 = vmax.xlane.f32.xlu1 %v10371_v27  ;;  %2881 = vmax.xlane.f32.xlu0 %v10373_v53 }
 0x7ed   :  { %v7279_v7 = vpop.f32.mrb[10].mxu1 }
 0x7ee   :  { %v2594_v6 = vpop.f32.mrb[11].mxu1  ;;  %v10395_v39 = vadd.f32 %v7279_v7, %v2153_v40  ;;  %v2157_v40 = vld [vmem:[%s13498_s7 + $0x78] sm:$0xff] }
 0x7ef   :  { %v10388_v55 = vadd.f32 %v2594_v6, %v2152_v35  ;;  %v2156_v35 = vld [vmem:[%s13498_s7 + $0x70] sm:$0xff] }
 0x7f0   :  { %2879 = vmax.xlane.f32.xlu1 %v10383_v63 }
 0x7f1   :  { %v7282_v11 = vpop.f32.mrb[12].mxu1  ;;  %2883 = vmax.xlane.f32.xlu0 %v10388_v55 }
 0x7f2   :  { %v2604_v31 = vpop.f32.mrb[13].mxu1  ;;  %v10407_v56 = vadd.f32 %v7282_v11, %v2155_v2  ;;  %v2159_v2 = vld [vmem:[%s13498_s7 + $0x88] sm:$0xff] }
 0x7f3   :  { %v10400_v18 = vadd.f32 %v2604_v31, %v2154_v57  ;;  %v2158_v57 = vld [vmem:[%s13498_s7 + $0x80] sm:$0xff] }
 0x7f4   :  { %2885 = vmax.xlane.f32.xlu1 %v10395_v39 }
 0x7f5   :  { %v7285_v6 = vpop.f32.mrb[14].mxu1  ;;  %2887 = vmax.xlane.f32.xlu0 %v10400_v18 }
 0x7f6   :  { %v2614_v7 = vpop.f32.mrb[15].mxu1  ;;  %v10419_v15 = vadd.f32 %v7285_v6, %v2157_v40  ;;  %v2161_v40 = vld [vmem:[%s13498_s7 + $0x98] sm:$0xff] }
 0x7f7   :  { %v10412_v25 = vadd.f32 %v2614_v7, %v2156_v35  ;;  %v2160_v35 = vld [vmem:[%s13498_s7 + $0x90] sm:$0xff] }
 0x7f8   :  { %2889 = vmax.xlane.f32.xlu1 %v10407_v56 }
 0x7f9   :  { %v7288_v31 = vpop.f32.mrb[16].mxu1  ;;  %2891 = vmax.xlane.f32.xlu0 %v10412_v25 }
 0x7fa   :  { %v2624_v11 = vpop.f32.mrb[17].mxu1  ;;  %v10431_v12 = vadd.f32 %v7288_v31, %v2159_v2  ;;  %v2163_v2 = vld [vmem:[%s13498_s7 + $0xa8] sm:$0xff] }
 0x7fb   :  { %v10424_v61 = vadd.f32 %v2624_v11, %v2158_v57  ;;  %v2162_v57 = vld [vmem:[%s13498_s7 + $0xa0] sm:$0xff] }
 0x7fc   :  { %2893 = vmax.xlane.f32.xlu1 %v10419_v15 }
 0x7fd   :  { %v7291_v7 = vpop.f32.mrb[18].mxu1  ;;  %2895 = vmax.xlane.f32.xlu0 %v10424_v61 }
 0x7fe   :  { %v2634_v6 = vpop.f32.mrb[19].mxu1  ;;  %v10443_v48 = vadd.f32 %v7291_v7, %v2161_v40  ;;  %v10457_v7 = vpop.permute.xlu0 %1823 }
 0x7ff   :  { %v10436_v3 = vadd.f32 %v2634_v6, %v2160_v35  ;;  %v2165_v35 = vld [vmem:[%s13498_s7 + $0xb8] sm:$0xff]  ;;  %v10454_v6 = vpop.permute.xlu1 %1825 }
 0x800   :  { %2897 = vmax.xlane.f32.xlu1 %v10431_v12 }
 0x801   :  { %v7294_v11 = vpop.f32.mrb[20].mxu1  ;;  %2899 = vmax.xlane.f32.xlu0 %v10436_v3 }
 0x802   :  { %v2644_v31 = vpop.f32.mrb[21].mxu1  ;;  %v10459_v40 = vadd.f32 %v7294_v11, %v2163_v2  ;;  %v10480_v38 = vpop.permute.xlu0 %1827 }
 0x803   :  { %v10448_v36 = vadd.f32 %v2644_v31, %v2162_v57  ;;  %v2167_v57 = vld [vmem:[%s13498_s7 + $0xc8] sm:$0xff]  ;;  %v2164_v31 = vld [vmem:[%s13498_s7 + $0xb0] sm:$0xff]  ;;  %v10473_v2 = vpop.permute.xlu1 %1829 }
 0x804   :  { %2901 = vmax.xlane.f32.xlu1 %v10443_v48 }
 0x805   :  { %v7297_v13 = vpop.f32.mrb[22].mxu1  ;;  %2903 = vmax.xlane.f32.xlu0 %v10448_v36 }
 0x806   :  { %v10461_v16 = vadd.f32 %v7297_v13, %v2165_v35  ;;  %v2654_v32 = vpop.f32.mrb[23].mxu1  ;;  %v2169_v35 = vld [vmem:[%s13498_s7 + $0xd8] sm:$0xff] }
 0x807   :  { %v10475_v13 = vadd.f32 %v2654_v32, %v2164_v31  ;;  %v2171_v31 = vld [vmem:[%s13498_s7 + $0xe8] sm:$0xff]  ;;  %v10498_v29 = vpop.permute.xlu1 %1833 }
 0x808   :  { %2905 = vmax.xlane.f32.xlu1 %v10459_v40 }
 0x809   :  { %v7300_v22 = vpop.f32.mrb[24].mxu1  ;;  %2909 = vmax.xlane.f32.xlu0 %v10461_v16  ;;  %13828 = vst [vmem:[#allocation54_spill] sm:$0xff] %v10475_v13 }
 0x80a   :  { %v10471_v47 = vadd.f32 %v7300_v22, %v2167_v57  ;;  %v2664_v11 = vpop.f32.mrb[25].mxu1 }
 0x80b   :  { %v10489_v32 = vadd.f32 %v2664_v11, %v2166_v34 }
 0x80c   :  { %13827 = vst [vmem:[#allocation18_spill] sm:$0xff] %v10471_v47  ;;  %2913 = vmax.xlane.f32.xlu1 %v10471_v47 }
 0x80d   :  { %v7303_v50 = vpop.f32.mrb[26].mxu1  ;;  %2907 = vmax.xlane.f32.xlu0 %v10475_v13  ;;  %13830 = vst [vmem:[#allocation55_spill] sm:$0xff] %v10489_v32  ;;  %v2177_v13 = vld [vmem:[%s13498_s7 + $0x118] sm:$0xff] }
 0x80e   :  { %v10487_v22 = vadd.f32 %v7303_v50, %v2169_v35  ;;  %v2674_v57 = vpop.f32.mrb[27].mxu1  ;;  %v10501_v50 = vpop.permute.xlu0 %1831 }
 0x80f   :  { %v10505_v11 = vadd.f32 %v2674_v57, %v2168_v51 }
 0x810   :  { %13829 = vst [vmem:[#allocation16_spill] sm:$0xff] %v10487_v22  ;;  %2917 = vmax.xlane.f32.xlu1 %v10487_v22 }
 0x811   :  { %v7306_v42 = vpop.f32.mrb[28].mxu1  ;;  %2911 = vmax.xlane.f32.xlu0 %v10489_v32  ;;  %13832 = vst [vmem:[#allocation56_spill] sm:$0xff] %v10505_v11  ;;  %v2175_v32 = vld [vmem:[%s13498_s7 + $0x108] sm:$0xff] }
 0x812   :  { %v10503_v35 = vadd.f32 %v7306_v42, %v2171_v31  ;;  %v2684_v34 = vpop.f32.mrb[29].mxu1 }
 0x813   :  { %v10515_v24 = vadd.f32 %v2684_v34, %v2170_v54 }
 0x814   :  { %13831 = vst [vmem:[#allocation17_spill] sm:$0xff] %v10503_v35  ;;  %2921 = vmax.xlane.f32.xlu1 %v10503_v35  ;;  %v2172_v35 = vld [vmem:[%s13498_s7 + $0xf0] sm:$0xff] }
 0x815   :  { %v7309_v23 = vpop.f32.mrb[30].mxu1  ;;  %2915 = vmax.xlane.f32.xlu0 %v10505_v11  ;;  %13833 = vst [vmem:[#allocation20_spill] sm:$0xff] %v10515_v24 }
 0x816   :  { %v10517_v42 = vadd.f32 %v7309_v23, %v2173_v5  ;;  %v7768_v31 = vpop.permute.xlu1 %7767  ;;  %v2694_v37 = vpop.f32.mrb[31].mxu1 }
 0x817   :  { %v7763_v51 = vpop.permute.xlu0 %7762  ;;  %v7770_v57 = vunpack.i.h.bf16 %v7768_v31  ;;  %v7769_v8 = vunpack.i.l.bf16 %v7768_v31 }
 0x818   :  { %13834 = vst [vmem:[#allocation57_spill] sm:$0xff] %v10517_v42  ;;  %v7765_v14 = vunpack.i.h.bf16 %v7763_v51  ;;  %v7764_v33 = vunpack.i.l.bf16 %v7763_v51  ;;  %2925 = vmax.xlane.f32.xlu1 %v10517_v42  ;;  %v10529_v51 = vadd.f32 %v2694_v37, %v2172_v35  ;;  %v2174_v42 = vld [vmem:[%s13498_s7 + $0x100] sm:$0xff] }
 0x819   :  { %v7312_v54 = vpop.f32.mrb[32].mxu1  ;;  %2919 = vmax.xlane.f32.xlu0 %v10515_v24  ;;  %v7650_v47 = vpack.c.bf16 %v7770_v57, %v7769_v8  ;;  %v2179_v8 = vld [vmem:[%s13498_s7 + $0x128] sm:$0xff]  ;;  %v2176_v57 = vld [vmem:[%s13498_s7 + $0x110] sm:$0xff] }
 0x81a   :  { %v7646_v23 = vpack.c.bf16 %v7765_v14, %v7764_v33  ;;  %v10527_v5 = vadd.f32 %v7312_v54, %v2175_v32  ;;  %v2704_v31 = vpop.f32.mrb[33].mxu1  ;;  %13836 = vst [vmem:[#allocation22_spill] sm:$0xff] %v10529_v51 }
 0x81b   :  { %v7773_v34 = vpop.permute.xlu0 %7772  ;;  %v10541_v32 = vadd.f32 %v2704_v31, %v2174_v42  ;;  %v1702_v31 = vmul.f32 0.03125, %v10183_v26 }
 0x81c   :  { %13835 = vst [vmem:[#allocation19_spill] sm:$0xff] %v10527_v5  ;;  %v7775_v11 = vunpack.i.h.bf16 %v7773_v34  ;;  %v7774_v22 = vunpack.i.l.bf16 %v7773_v34  ;;  %7647 = vmatprep.subr.bf16.mxu0 %v7646_v23  ;;  %2929 = vmax.xlane.f32.xlu1 %v10527_v5 }
 0x81d   :  { %7649 = vmatpush3.bf16.msra.mxu0 %v7646_v23  ;;  %v7315_v14 = vpop.f32.mrb[34].mxu1  ;;  %2923 = vmax.xlane.f32.xlu0 %v10529_v51  ;;  %13838 = vst [vmem:[#allocation58_spill] sm:$0xff] %v10541_v32 }
 0x81e   :  { %7651 = vmatprep.subr.bf16.mxu0 %v7650_v47  ;;  %v10539_v37 = vadd.f32 %v7315_v14, %v2177_v13  ;;  %v2714_v33 = vpop.f32.mrb[35].mxu1  ;;  %v7654_v35 = vpack.c.bf16 %v7775_v11, %v7774_v22  ;;  %v1701_v13 = vmul.f32 0.03125, %v10186_v30 }
 0x81f   :  { %v10555_v22 = vadd.f32 %v2714_v33, %v2176_v57 }
 0x820   :  { %13837 = vst [vmem:[#allocation21_spill] sm:$0xff] %v10539_v37  ;;  %2933 = vmax.xlane.f32.xlu1 %v10539_v37  ;;  %v1717_v26 = vadd.f32 1e-12, %v1701_v13 }
 0x821   :  { %7653 = vmatpush3.bf16.msra.mxu0 %v7650_v47  ;;  %v7318_v54 = vpop.f32.mrb[36].mxu1  ;;  %2927 = vmax.xlane.f32.xlu0 %v10541_v32  ;;  %v7778_v42 = vpop.permute.xlu1 %7777  ;;  %13840 = vst [vmem:[#allocation23_spill] sm:$0xff] %v10555_v22  ;;  %v2181_v47 = vld [vmem:[%s13498_s7 + $0x138] sm:$0xff]  ;;  %v2178_v32 = vld [vmem:[%s13498_s7 + $0x120] sm:$0xff] }
 0x822   :  { %7655 = vmatprep.subr.bf16.mxu0 %v7654_v35  ;;  %v10552_v23 = vadd.f32 %v7318_v54, %v2179_v8  ;;  %v2724_v34 = vpop.f32.mrb[37].mxu1  ;;  %v7780_v11 = vunpack.i.h.bf16 %v7778_v42  ;;  %v7779_v14 = vunpack.i.l.bf16 %v7778_v42  ;;  %v1718_v42 = vadd.f32 1e-12, %v1702_v31 }
 0x823   :  { %v10567_v37 = vadd.f32 %v2724_v34, %v2178_v32  ;;  %7917 = vrsqrt.f32 %v1717_v26  ;;  %v2187_v26 = vld [vmem:[%s13498_s7 + $0x168] sm:$0xff] }
 0x824   :  { %13839 = vst [vmem:[#allocation60_spill] sm:$0xff] %v10552_v23  ;;  %2937 = vmax.xlane.f32.xlu1 %v10552_v23  ;;  %v7658_v8 = vpack.c.bf16 %v7780_v11, %v7779_v14  ;;  %7919 = vrsqrt.f32 %v1718_v42  ;;  %v2185_v14 = vld [vmem:[%s13498_s7 + $0x158] sm:$0xff] }
 0x825   :  { %7657 = vmatpush3.bf16.msra.mxu0 %v7654_v35  ;;  %v7321_v30 = vpop.f32.mrb[38].mxu1  ;;  %2931 = vmax.xlane.f32.xlu0 %v10555_v22  ;;  %v7783_v33 = vpop.permute.xlu0 %7782  ;;  %13842 = vst [vmem:[#allocation36_spill] sm:$0xff] %v10567_v37  ;;  %v2183_v35 = vld [vmem:[%s13498_s7 + $0x148] sm:$0xff]  ;;  %v2180_v22 = vld [vmem:[%s13498_s7 + $0x130] sm:$0xff] }
 0x826   :  { %v10565_v57 = vadd.f32 %v7321_v30, %v2181_v47  ;;  %v2734_v54 = vpop.f32.mrb[39].mxu1  ;;  %v7785_v51 = vunpack.i.h.bf16 %v7783_v33  ;;  %v7784_v5 = vunpack.i.l.bf16 %v7783_v33  ;;  %7659 = vmatprep.subr.bf16.mxu0 %v7658_v8  ;;  %v2182_v47 = vld [vmem:[%s13498_s7 + $0x140] sm:$0xff] }
 0x827   :  { %v10579_v11 = vadd.f32 %v2734_v54, %v2180_v22 }
 0x828   :  { %13841 = vst [vmem:[#allocation35_spill] sm:$0xff] %v10565_v57  ;;  %2941 = vmax.xlane.f32.xlu1 %v10565_v57  ;;  %v7662_v31 = vpack.c.bf16 %v7785_v51, %v7784_v5 }
 0x829   :  { %7661 = vmatpush3.bf16.msra.mxu0 %v7658_v8  ;;  %v7324_v13 = vpop.f32.mrb[40].mxu1  ;;  %2935 = vmax.xlane.f32.xlu0 %v10567_v37  ;;  %13844 = vst [vmem:[#allocation59_spill] sm:$0xff] %v10579_v11  ;;  %v2184_v8 = vld [vmem:[%s13498_s7 + $0x150] sm:$0xff] }
 0x82a   :  { %v10577_v32 = vadd.f32 %v7324_v13, %v2183_v35  ;;  %v2744_v34 = vpop.f32.mrb[41].mxu1  ;;  %7663 = vmatprep.subr.bf16.mxu0 %v7662_v31  ;;  %v2186_v13 = vld [vmem:[%s13498_s7 + $0x160] sm:$0xff] }
 0x82b   :  { %v10591_v22 = vadd.f32 %v2744_v34, %v2182_v47 }
 0x82c   :  { %13843 = vst [vmem:[#allocation24_spill] sm:$0xff] %v10577_v32  ;;  %2945 = vmax.xlane.f32.xlu1 %v10577_v32  ;;  %v2188_v32 = vld [vmem:[%s13498_s7 + $0x170] sm:$0xff] }
 0x82d   :  { %7665 = vmatpush3.bf16.msra.mxu0 %v7662_v31  ;;  %v7327_v5 = vpop.f32.mrb[42].mxu1  ;;  %2939 = vmax.xlane.f32.xlu0 %v10579_v11  ;;  %13846 = vst [vmem:[#allocation43_spill] sm:$0xff] %v10591_v22  ;;  %v7918_v31 = vpop.eup %7917 }
 0x82e   :  { %v10589_v51 = vadd.f32 %v7327_v5, %v2185_v14  ;;  %v2754_v30 = vpop.f32.mrb[43].mxu1  ;;  %v7920_v34 = vpop.eup %7919 }
 0x82f   :  { %v10601_v54 = vadd.f32 %v2754_v30, %v2184_v8  ;;  %v2189_v30 = vld [vmem:[%s13498_s7 + $0x178] sm:$0xff]  ;;  %v2191_v8 = vld [vmem:[%s13498_s7 + $0x188] sm:$0xff] }
 0x830   :  { %13845 = vst [vmem:[#allocation61_spill] sm:$0xff] %v10589_v51  ;;  %2949 = vmax.xlane.f32.xlu1 %v10589_v51 }
 0x831   :  { %v7330_v33 = vpop.f32.mrb[44].mxu1  ;;  %2943 = vmax.xlane.f32.xlu0 %v10591_v22  ;;  %13847 = vst [vmem:[#allocation37_spill] sm:$0xff] %v10601_v54 }
 0x832   :  { %v10603_v42 = vadd.f32 %v7330_v33, %v2187_v26  ;;  %v2764_v35 = vpop.f32.mrb[45].mxu1  ;;  %v1750_v26 = vmul.f32 %v7920_v34, %v9765_v1  ;;  %v13850_v33 = vld [vmem:[#allocation39_spill] sm:$0xff]  ;;  %v2193_v1 = vld [vmem:[%s13498_s7 + $0x198] sm:$0xff] }
 0x833   :  { %v10610_v47 = vadd.f32 %v2764_v35, %v2186_v13  ;;  %v1749_v22 = vmul.f32 %v7918_v31, %v13850_v33 }
 0x834   :  { %13848 = vst [vmem:[#allocation27_spill] sm:$0xff] %v10603_v42  ;;  %2947 = vmax.xlane.f32.xlu1 %v10601_v54 }
 0x835   :  { %v7333_v14 = vpop.f32.mrb[46].mxu1  ;;  %2953 = vmax.xlane.f32.xlu0 %v10603_v42  ;;  %13849 = vst [vmem:[#allocation26_spill] sm:$0xff] %v10610_v47  ;;  %v1774_v42 = vmul.f32 %v10208_v46, %v1750_v26  ;;  %v1773_v35 = vmul.f32 %v10208_v46, %v1749_v22  ;;  %v2195_v26 = vld [vmem:[%s13498_s7 + $0x1a8] sm:$0xff] }
 0x836   :  { %v2774_v5 = vpop.f32.mrb[47].mxu1  ;;  %v10623_v13 = vadd.f32 %v7333_v14, %v2189_v30 }
 0x837   :  { %v1798_v22 = vadd.f32 %v10206_v21, %v1774_v42  ;;  %v1797_v34 = vadd.f32 %v10206_v21, %v1773_v35 }
 0x838   :  { %2951 = vmax.xlane.f32.xlu1 %v10610_v47  ;;  %13851 = vst [vmem:[#allocation8_spill] sm:$0xff] %v10623_v13 }
 0x839   :  { %v7336_v54 = vpop.f32.mrb[48].mxu1  ;;  %v1862_v33 = vadd.f32 %v10454_v6, %v1798_v22  ;;  %v2194_v6 = vld [vmem:[%s13498_s7 + $0x1a0] sm:$0xff] }
 0x83a   :  { %v10625_v51 = vadd.f32 %v7336_v54, %v2191_v8  ;;  %v2784_v11 = vpop.f32.mrb[49].mxu1  ;;  %v10637_v54 = vadd.f32 %v2774_v5, %v2188_v32  ;;  %v2190_v8 = vld [vmem:[%s13498_s7 + $0x180] sm:$0xff] }
 0x83b   :  { %v10651_v42 = vadd.f32 %v2784_v11, %v2190_v8 }
 0x83c   :  { %13852 = vst [vmem:[#allocation9_spill] sm:$0xff] %v10625_v51  ;;  %2957 = vmax.xlane.f32.xlu1 %v10623_v13  ;;  %2961 = vmax.xlane.f32.xlu0 %v10625_v51  ;;  %13853 = vst [vmem:[#allocation13_spill] sm:$0xff] %v10637_v54  ;;  %v1861_v51 = vadd.f32 %v10457_v7, %v1797_v34  ;;  %v1889_v7 = vsub.f32 %v1862_v33, %v10229_v9 }
 0x83d   :  { %v7339_v31 = vpop.f32.mrb[50].mxu1  ;;  %13855 = vst [vmem:[#allocation11_spill] sm:$0xff] %v10651_v42 }
 0x83e   :  { %v10639_v14 = vadd.f32 %v7339_v31, %v2193_v1  ;;  %v2794_v30 = vpop.f32.mrb[51].mxu1  ;;  %v2192_v1 = vld [vmem:[%s13498_s7 + $0x190] sm:$0xff]  ;;  %v1888_v31 = vsub.f32 %v1861_v51, %v10229_v9  ;;  %vm1905_vm3 = vcmp.gt.f32.partialorder %v1889_v7, 0.0 }
 0x83f   :  { %v10667_v22 = vadd.f32 %v2794_v30, %v2192_v1 }
 0x840   :  { %13854 = vst [vmem:[#allocation10_spill] sm:$0xff] %v10639_v14  ;;  %2955 = vmax.xlane.f32.xlu1 %v10637_v54  ;;  %2965 = vmax.xlane.f32.xlu0 %v10639_v14  ;;  %vm1904_vm4 = vcmp.gt.f32.partialorder %v1888_v31, 0.0 }
 0x841   :  { %v7342_v32 = vpop.f32.mrb[52].mxu1  ;;  %13857 = vst [vmem:[#allocation39_spill] sm:$0xff] %v10667_v22 }
 0x842   :  { %v10653_v5 = vadd.f32 %v7342_v32, %v2195_v26  ;;  %v2804_v35 = vpop.f32.mrb[53].mxu1  ;;  %v1929_v26 = vmul.f32 %v10242_v10, %v1889_v7  ;;  %v1928_v32 = vmul.f32 %v10242_v10, %v1888_v31 }
 0x843   :  { %v10669_v34 = vadd.f32 %v2804_v35, %v2194_v6 }
 0x844   :  { %13856 = vst [vmem:[#allocation12_spill] sm:$0xff] %v10653_v5  ;;  %2959 = vmax.xlane.f32.xlu1 %v10651_v42  ;;  %2969 = vmax.xlane.f32.xlu0 %v10653_v5  ;;  %v1945_v30 = vsel %vm1905_vm3, %v1889_v7, %v1929_v26  ;;  %v1944_v1 = vsel %vm1904_vm4, %v1888_v31, %v1928_v32 }
 0x845   :  { %v10665_v11 = vpop.f32.mrb[54].mxu1  ;;  %13858 = vst [vmem:[#allocation79_spill] sm:$0xff] %v10669_v34  ;;  %v10686_v5 = vadd.f32 %v10252_v19, %v1945_v30  ;;  %v10689_v42 = vadd.f32 %v10252_v19, %v1944_v1  ;;  %v1704_v30 = vmul.f32 0.03125, %v10199_v49  ;;  %v1703_v1 = vmul.f32 0.03125, %v10195_v41 }
 0x846   :  { %v10671_v8 = vpop.f32.mrb[55].mxu1  ;;  %v1705_v41 = vmul.f32 0.03125, %v10202_v0 }
 0x847   :  { %13859 = vst [vmem:[#allocation80_spill] sm:$0xff] %v10686_v5  ;;  %13860 = vst [vmem:[#allocation81_spill] sm:$0xff] %v10689_v42  ;;  %v2055_v14 = vadd.f32 %v10250_v52, %v10689_v42  ;;  %v2056_v7 = vadd.f32 %v10250_v52, %v10686_v5  ;;  %v1720_v37 = vadd.f32 1e-12, %v1704_v30  ;;  %v1719_v57 = vadd.f32 1e-12, %v1703_v1 }
 0x848   :  { %2963 = vmax.xlane.f32.xlu1 %v10667_v22  ;;  %2967 = vmax.xlane.f32.xlu0 %v10669_v34 }
 0x849   :  { %v10677_v51 = vpop.f32.mrb[56].mxu1  ;;  %v7786_v32 = vpack.i.bf16 %v2056_v7, %v2055_v14 }
 0x84a   :  { %v10679_v33 = vpop.f32.mrb[57].mxu1 }
 0x84d   :  { %v10681_v35 = vpop.f32.mrb[58].mxu1 }
 0x84e   :  { %v10683_v6 = vpop.f32.mrb[59].mxu1 }
 0x851   :  { %v10691_v22 = vpop.f32.mrb[60].mxu1 }
 0x852   :  { %v10693_v34 = vpop.f32.mrb[61].mxu1 }
 0x855   :  { %v10699_v31 = vpop.f32.mrb[62].mxu1 }
 0x856   :  { %v10701_v26 = vpop.f32.mrb[63].mxu1 }
 0x859   :  { %7787 = vrot.lane.b32.xlu1 %v7786_v32, %s8363_s22 }
 0x869   :  { %v2866_v54 = vpop.xlane.xlu1 %2865 }
 0x86a   :  { %v2992_v13 = vsub.f32 %v10329_v4, %v2866_v54  ;;  %v2864_v47 = vpop.xlane.xlu0 %2863  ;;  %v1706_v4 = vmul.f32 0.03125, %v10204_v59 }
 0x86b   :  { %v2991_v42 = vsub.f32 %v10331_v20, %v2864_v47 }
 0x86c   :  { %v3057_v5 = vmul.f32 1.442695, %v2992_v13  ;;  %v1721_v13 = vadd.f32 1e-12, %v1705_v41 }
 0x86d   :  { %v3055_v23 = vmul.f32 1.442695, %v2991_v42  ;;  %v2870_v24 = vpop.xlane.xlu1 %2869 }
 0x86e   :  { %7921 = vpow2.f32 %v3057_v5  ;;  %v2994_v14 = vsub.f32 %v10341_v60, %v2870_v24  ;;  %v2868_v7 = vpop.xlane.xlu0 %2867  ;;  %v1722_v5 = vadd.f32 1e-12, %v1706_v4  ;;  %v13861_v4 = vld [vmem:[#allocation31_spill] sm:$0xff] }
 0x86f   :  { %7923 = vrsqrt.f32 %v1720_v37  ;;  %v2993_v49 = vsub.f32 %v10343_v45, %v2868_v7 }
 0x870   :  { %7925 = vrsqrt.f32 %v1719_v57  ;;  %v3061_v32 = vmul.f32 1.442695, %v2994_v14 }
 0x871   :  { %7927 = vpow2.f32 %v3055_v23  ;;  %v3059_v54 = vmul.f32 1.442695, %v2993_v49  ;;  %v2874_v20 = vpop.xlane.xlu1 %2873 }
 0x872   :  { %7929 = vpow2.f32 %v3061_v32  ;;  %v2996_v47 = vsub.f32 %v10350_v43, %v2874_v20 }
 0x873   :  { %7931 = vpow2.f32 %v3059_v54 }
 0x874   :  { %v3065_v42 = vmul.f32 1.442695, %v2996_v47 }
 0x875   :  { %v2872_v24 = vpop.xlane.xlu1 %2871  ;;  %v2878_v60 = vpop.xlane.xlu0 %2877 }
 0x876   :  { %7933 = vpow2.f32 %v3065_v42  ;;  %v2995_v45 = vsub.f32 %v10359_v44, %v2872_v24  ;;  %v2998_v0 = vsub.f32 %v10361_v28, %v2878_v60 }
 0x877   :  { %7935 = vrsqrt.f32 %v1721_v13 }
 0x878   :  { %v10715_v37 = vpop.eup %7921  ;;  %v3063_v59 = vmul.f32 1.442695, %v2995_v45  ;;  %v3069_v23 = vmul.f32 1.442695, %v2998_v0  ;;  %7937 = vrsqrt.f32 %v1722_v5 }
 0x879   :  { %v7924_v57 = vpop.eup %7923  ;;  %v2876_v30 = vpop.xlane.xlu1 %2875  ;;  %3185 = vadd.xlane.f32.xlu0 %v10715_v37 }
 0x87a   :  { %v2882_v43 = vpop.xlane.xlu0 %2881  ;;  %v7926_v1 = vpop.eup %7925  ;;  %7939 = vpow2.f32 %v3063_v59  ;;  %v2997_v14 = vsub.f32 %v10371_v27, %v2876_v30  ;;  %v1752_v54 = vmul.f32 %v7924_v57, %v13861_v4 }
 0x87b   :  { %v3000_v7 = vsub.f32 %v10373_v53, %v2882_v43  ;;  %v10720_v44 = vpop.eup %7927  ;;  %7941 = vpow2.f32 %v3069_v23  ;;  %v1751_v27 = vmul.f32 %v7926_v1, %v9794_v62 }
 0x87c   :  { %v10722_v28 = vpop.eup %7929  ;;  %v3067_v49 = vmul.f32 1.442695, %v2997_v14  ;;  %v1776_v13 = vmul.f32 %v10208_v46, %v1752_v54 }
 0x87d   :  { %v3073_v41 = vmul.f32 1.442695, %v3000_v7  ;;  %3189 = vadd.xlane.f32.xlu1 %v10722_v28  ;;  %v2880_v32 = vpop.xlane.xlu1 %2879  ;;  %3183 = vadd.xlane.f32.xlu0 %v10720_v44  ;;  %v10727_v20 = vpop.eup %7931  ;;  %v1775_v42 = vmul.f32 %v10208_v46, %v1751_v27 }
 0x87e   :  { %7943 = vpow2.f32 %v3067_v49  ;;  %v2999_v53 = vsub.f32 %v10383_v63, %v2880_v32  ;;  %v1800_v63 = vadd.f32 %v10206_v21, %v1776_v13  ;;  %v2884_v59 = vpop.xlane.xlu0 %2883 }
 0x87f   :  { %7945 = vpow2.f32 %v3073_v41  ;;  %v1799_v57 = vadd.f32 %v10206_v21, %v1775_v42 }
 0x880   :  { %v10731_v47 = vpop.eup %7933  ;;  %v3071_v45 = vmul.f32 1.442695, %v2999_v53  ;;  %v1864_v43 = vadd.f32 %v10473_v2, %v1800_v63  ;;  %v2196_v2 = vld [vmem:[%s13498_s7 + $0x1b0] sm:$0xff] }
 0x881   :  { %v2886_v5 = vpop.xlane.xlu1 %2885  ;;  %3193 = vadd.xlane.f32.xlu0 %v10731_v47  ;;  %3187 = vadd.xlane.f32.xlu1 %v10727_v20  ;;  %v7936_v24 = vpop.eup %7935  ;;  %v1863_v1 = vadd.f32 %v10480_v38, %v1799_v57  ;;  %v10769_v27 = vadd.f32 %v10671_v8, %v2196_v2 }
 0x882   :  { %v7938_v60 = vpop.eup %7937  ;;  %v3002_v0 = vsub.f32 %v10395_v39, %v2886_v5  ;;  %7947 = vpow2.f32 %v3071_v45  ;;  %v3001_v39 = vsub.f32 %v10388_v55, %v2884_v59  ;;  %v1753_v41 = vmul.f32 %v7936_v24, %v9841_v58  ;;  %v10771_v53 = vpop.xlane.xlu0 %2887 }
 0x883   :  { %v1754_v49 = vmul.f32 %v7938_v60, %v9847_v17  ;;  %v1891_v38 = vsub.f32 %v1864_v43, %v10229_v9  ;;  %v1890_v55 = vsub.f32 %v1863_v1, %v10229_v9 }
 0x884   :  { %v10738_v62 = vpop.eup %7939  ;;  %v3077_v14 = vmul.f32 1.442695, %v3002_v0  ;;  %v3075_v54 = vmul.f32 1.442695, %v3001_v39  ;;  %v1777_v17 = vmul.f32 %v10208_v46, %v1753_v41 }
 0x885   :  { %v10741_v23 = vpop.eup %7941  ;;  %v10744_v30 = vpop.xlane.xlu1 %2889  ;;  %3191 = vadd.xlane.f32.xlu0 %v10738_v62  ;;  %v1778_v58 = vmul.f32 %v10208_v46, %v1754_v49  ;;  %v1931_v42 = vmul.f32 %v10242_v10, %v1891_v38  ;;  %v1930_v5 = vmul.f32 %v10242_v10, %v1890_v55  ;;  %vm1907_vm5 = vcmp.gt.f32.partialorder %v1891_v38, 0.0 }
 0x886   :  { %3197 = vadd.xlane.f32.xlu1 %v10741_v23  ;;  %7949 = vpow2.f32 %v3077_v14  ;;  %vm1906_vm6 = vcmp.gt.f32.partialorder %v1890_v55, 0.0  ;;  %v1801_v46 = vadd.f32 %v10206_v21, %v1777_v17  ;;  %v2892_v63 = vpop.xlane.xlu0 %2891 }
 0x887   :  { %7951 = vpow2.f32 %v3075_v54  ;;  %v1802_v24 = vadd.f32 %v10206_v21, %v1778_v58  ;;  %v1947_v59 = vsel %vm1907_vm5, %v1891_v38, %v1931_v42  ;;  %v1946_v57 = vsel %vm1906_vm6, %v1890_v55, %v1930_v5 }
 0x888   :  { %v10751_v7 = vpop.eup %7943  ;;  %v1865_v0 = vadd.f32 %v10501_v50, %v1801_v46  ;;  %v10792_v39 = vadd.f32 %v10252_v19, %v1947_v59  ;;  %v10795_v21 = vadd.f32 %v10252_v19, %v1946_v57 }
 0x889   :  { %v10755_v32 = vpop.eup %7945  ;;  %v10760_v4 = vpop.xlane.xlu1 %2893  ;;  %v1866_v45 = vadd.f32 %v10498_v29, %v1802_v24 }
 0x88a   :  { %3195 = vadd.xlane.f32.xlu1 %v10751_v7  ;;  %3201 = vadd.xlane.f32.xlu0 %v10755_v32  ;;  %13862 = vst [vmem:[#allocation31_spill] sm:$0xff] %v10792_v39  ;;  %13863 = vst [vmem:[#allocation82_spill] sm:$0xff] %v10795_v21  ;;  %v1892_v29 = vsub.f32 %v1865_v0, %v10229_v9  ;;  %v10800_v50 = vpop.xlane.xlu0 %2895  ;;  %v2057_v55 = vadd.f32 %v10250_v52, %v10795_v21 }
 0x88b   :  { %v1893_v14 = vsub.f32 %v1866_v45, %v10229_v9  ;;  %v2058_v9 = vadd.f32 %v10250_v52, %v10792_v39 }
 0x88c   :  { %v10780_v60 = vpop.eup %7947  ;;  %v1932_v38 = vmul.f32 %v10242_v10, %v1892_v29  ;;  %vm1908_vm8 = vcmp.gt.f32.partialorder %v1892_v29, 0.0 }
 0x88d   :  { %v10773_v13 = vpop.xlane.xlu1 %2897  ;;  %v1933_v2 = vmul.f32 %v10242_v10, %v1893_v14  ;;  %vm1909_vm7 = vcmp.gt.f32.partialorder %v1893_v14, 0.0  ;;  %v7791_v5 = vpack.i.bf16 %v2058_v9, %v2057_v55  ;;  %v3004_v9 = vsub.f32 %v10407_v56, %v10744_v30 }
 0x88e   :  { %2971 = vmax.xlane.f32.xlu1 %v10769_v27  ;;  %v1948_v17 = vsel %vm1908_vm8, %v1892_v29, %v1932_v38  ;;  %v10815_v42 = vpop.xlane.xlu0 %2899 }
 0x88f   :  { %v1949_v58 = vsel %vm1909_vm7, %v1893_v14, %v1933_v2  ;;  %v10822_v24 = vadd.f32 %v10252_v19, %v1948_v17 }
 0x890   :  { %v10787_v43 = vpop.eup %7949  ;;  %v10819_v10 = vadd.f32 %v10252_v19, %v1949_v58 }
 0x891   :  { %v10782_v8 = vpop.xlane.xlu1 %2901  ;;  %v10802_v49 = vpop.eup %7951  ;;  %13865 = vst [vmem:[#allocation84_spill] sm:$0xff] %v10822_v24  ;;  %v2059_v59 = vadd.f32 %v10250_v52, %v10822_v24 }
 0x892   :  { %3199 = vadd.xlane.f32.xlu1 %v10780_v60  ;;  %13864 = vst [vmem:[#allocation83_spill] sm:$0xff] %v10819_v10  ;;  %v10826_v45 = vpop.xlane.xlu0 %2903  ;;  %v2060_v57 = vadd.f32 %v10250_v52, %v10819_v10  ;;  %v3081_v52 = vmul.f32 1.442695, %v3004_v9  ;;  %v2198_v9 = vld [vmem:[%s13498_s7 + $0x1c0] sm:$0xff] }
 0x894   :  { %v7796_v29 = vpack.i.bf16 %v2060_v57, %v2059_v59  ;;  %v2197_v59 = vld [vmem:[%s13498_s7 + $0x1b8] sm:$0xff]  ;;  %v3003_v57 = vsub.f32 %v10400_v18, %v10771_v53  ;;  %7953 = vpow2.f32 %v3081_v52  ;;  %v10871_v18 = vadd.f32 %v10679_v33, %v2198_v9  ;;  %v2199_v33 = vld [vmem:[%s13498_s7 + $0x1c8] sm:$0xff] }
 0x895   :  { %v10789_v1 = vpop.xlane.xlu1 %2905  ;;  %v10862_v56 = vadd.f32 %v10665_v11, %v2197_v59  ;;  %v3006_v11 = vsub.f32 %v10419_v15, %v10760_v4 }
 0x896   :  { %3205 = vadd.xlane.f32.xlu1 %v10787_v43  ;;  %v10836_v2 = vpop.xlane.xlu0 %2909  ;;  %v3079_v39 = vmul.f32 1.442695, %v3003_v57 }
 0x897   :  { %v3085_v59 = vmul.f32 1.442695, %v3006_v11 }
 0x898   :  { %7955 = vpow2.f32 %v3079_v39  ;;  %v3007_v39 = vsub.f32 %v10424_v61, %v10800_v50  ;;  %v2201_v61 = vld [vmem:[%s13498_s7 + $0x1d8] sm:$0xff] }
 0x899   :  { %v10804_v41 = vpop.xlane.xlu1 %2913 }
 0x89a   :  { %3203 = vadd.xlane.f32.xlu1 %v10802_v49  ;;  %v10841_v38 = vpop.xlane.xlu0 %2907  ;;  %v3087_v4 = vmul.f32 1.442695, %v3007_v39 }
 0x89d   :  { %v10813_v54 = vpop.xlane.xlu1 %2917 }
 0x89e   :  { %v10849_v17 = vpop.xlane.xlu0 %2911  ;;  %v10882_v52 = vpop.eup %7953 }
 0x89f   :  { %13866 = vst [vmem:[#allocation85_spill] sm:$0xff] %v10882_v52 }
 0x8a0   :  { %7792 = vrot.lane.b32.xlu0 %v7791_v5, %s8363_s22 }
 0x8a1   :  { %v10824_v46 = vpop.xlane.xlu1 %2921 }
 0x8a2   :  { %v10859_v10 = vpop.xlane.xlu0 %2915  ;;  %v10900_v9 = vpop.eup %7955 }
 0x8a3   :  { %13867 = vst [vmem:[#allocation86_spill] sm:$0xff] %v10900_v9 }
 0x8a5   :  { %v10828_v0 = vpop.xlane.xlu1 %2925 }
 0x8a9   :  { %v10834_v14 = vpop.xlane.xlu1 %2929 }
 0x8ab   :  { %7797 = vrot.lane.b32.xlu1 %v7796_v29, %s8363_s22  ;;  %v3005_v29 = vsub.f32 %v10412_v25, %v2892_v63  ;;  %v10875_v25 = vpop.xlane.xlu0 %2919 }
 0x8ad   :  { %v10839_v19 = vpop.xlane.xlu1 %2933  ;;  %v3083_v24 = vmul.f32 1.442695, %v3005_v29  ;;  %v3008_v29 = vsub.f32 %v10431_v12, %v10773_v13  ;;  %v3009_v13 = vsub.f32 %v10436_v3, %v10815_v42 }
 0x8af   :  { %7957 = vpow2.f32 %v3083_v24  ;;  %v10890_v57 = vpop.xlane.xlu0 %2923  ;;  %v10893_v24 = vadd.f32 %v10677_v51, %v2199_v33  ;;  %v2200_v51 = vld [vmem:[%s13498_s7 + $0x1d0] sm:$0xff]  ;;  %v3089_v12 = vmul.f32 1.442695, %v3008_v29  ;;  %v10919_v33 = vadd.f32 %v10681_v35, %v2201_v61 }
 0x8b0   :  { %7959 = vpow2.f32 %v3085_v59  ;;  %v10922_v59 = vadd.f32 %v10683_v6, %v2200_v51  ;;  %v3091_v3 = vmul.f32 1.442695, %v3009_v13  ;;  %v3012_v35 = vsub.f32 %v10459_v40, %v10789_v1 }
 0x8b1   :  { %v10843_v55 = vpop.xlane.xlu1 %2937  ;;  %7961 = vpow2.f32 %v3087_v4  ;;  %v3011_v61 = vsub.f32 %v10448_v36, %v10826_v45 }
 0x8b2   :  { %7963 = vpow2.f32 %v3089_v12  ;;  %v3097_v40 = vmul.f32 1.442695, %v3012_v35 }
 0x8b3   :  { %v10912_v50 = vpop.xlane.xlu0 %2927  ;;  %7965 = vpow2.f32 %v3091_v3  ;;  %v3095_v13 = vmul.f32 1.442695, %v3011_v61  ;;  %v13870_v3 = vld [vmem:[#allocation18_spill] sm:$0xff]  ;;  %v13872_v61 = vld [vmem:[#allocation16_spill] sm:$0xff] }
 0x8b4   :  { %v3016_v35 = vsub.f32 %v13870_v3, %v10804_v41 }
 0x8b5   :  { %v10847_v58 = vpop.xlane.xlu1 %2941 }
 0x8b6   :  { %v3105_v41 = vmul.f32 1.442695, %v3016_v35 }
 0x8b7   :  { %v10935_v6 = vpop.xlane.xlu0 %2931 }
 0x8b9   :  { %v10851_v5 = vpop.xlane.xlu1 %2945  ;;  %v10904_v21 = vpop.eup %7957 }
 0x8ba   :  { %13868 = vst [vmem:[#allocation87_spill] sm:$0xff] %v10904_v21  ;;  %v10942_v29 = vpop.eup %7959 }
 0x8bb   :  { %13869 = vst [vmem:[#allocation88_spill] sm:$0xff] %v10942_v29  ;;  %v10956_v51 = vpop.eup %7961  ;;  %v10961_v36 = vpop.xlane.xlu0 %2935 }
 0x8bd   :  { %v10864_v30 = vpop.xlane.xlu1 %2949 }
 0x8bf   :  { %2973 = vmax.xlane.f32.xlu0 %v10862_v56 }
 0x8c1   :  { %v10873_v53 = vpop.xlane.xlu1 %2947 }
 0x8c3   :  { %2975 = vmax.xlane.f32.xlu0 %v10871_v18 }
 0x8c5   :  { %v10880_v63 = vpop.xlane.xlu1 %2951 }
 0x8c7   :  { %3209 = vadd.xlane.f32.xlu0 %v10882_v52  ;;  %v2202_v52 = vld [vmem:[%s13498_s7 + $0x1e0] sm:$0xff] }
 0x8c8   :  { %v10938_v42 = vadd.f32 %v10693_v34, %v2202_v52  ;;  %v3014_v34 = vsub.f32 %v10461_v16, %v10836_v2 }
 0x8c9   :  { %v10895_v15 = vpop.xlane.xlu1 %2957 }
 0x8ca   :  { %v3101_v16 = vmul.f32 1.442695, %v3014_v34 }
 0x8cb   :  { %2977 = vmax.xlane.f32.xlu0 %v10893_v24 }
 0x8cd   :  { %v10902_v11 = vpop.xlane.xlu1 %2955 }
 0x8cf   :  { %3207 = vadd.xlane.f32.xlu1 %v10900_v9  ;;  %3211 = vadd.xlane.f32.xlu0 %v10904_v21  ;;  %v3010_v21 = vsub.f32 %v10443_v48, %v10782_v8  ;;  %v2203_v48 = vld [vmem:[%s13498_s7 + $0x1e8] sm:$0xff]  ;;  %v10972_v9 = vpop.eup %7963 }
 0x8d0   :  { %v10954_v1 = vadd.f32 %v10691_v22, %v2203_v48  ;;  %v13871_v22 = vld [vmem:[#allocation54_spill] sm:$0xff] }
 0x8d1   :  { %v10924_v39 = vpop.xlane.xlu1 %2959  ;;  %v3093_v8 = vmul.f32 1.442695, %v3010_v21  ;;  %v2204_v21 = vld [vmem:[%s13498_s7 + $0x1f0] sm:$0xff]  ;;  %v3013_v2 = vsub.f32 %v13871_v22, %v10841_v38 }
 0x8d3   :  { %2981 = vmax.xlane.f32.xlu1 %v10919_v33  ;;  %2979 = vmax.xlane.f32.xlu0 %v10922_v59  ;;  %7967 = vpow2.f32 %v3093_v8  ;;  %v2205_v8 = vld [vmem:[%s13498_s7 + $0x1f8] sm:$0xff]  ;;  %v3099_v38 = vmul.f32 1.442695, %v3013_v2 }
 0x8d4   :  { %7969 = vpow2.f32 %v3097_v40  ;;  %v3018_v40 = vsub.f32 %v13872_v61, %v10813_v54  ;;  %v13874_v54 = vld [vmem:[#allocation17_spill] sm:$0xff] }
 0x8d5   :  { %v10940_v4 = vpop.xlane.xlu1 %2963  ;;  %7971 = vpow2.f32 %v3095_v13  ;;  %v3020_v13 = vsub.f32 %v13874_v54, %v10824_v46 }
 0x8d6   :  { %7973 = vpow2.f32 %v3101_v16 }
 0x8d7   :  { %2983 = vmax.xlane.f32.xlu1 %v10938_v42  ;;  %3213 = vadd.xlane.f32.xlu0 %v10942_v29  ;;  %v10970_v29 = vadd.f32 %v10701_v26, %v2204_v21  ;;  %v13873_v26 = vld [vmem:[#allocation55_spill] sm:$0xff]  ;;  %v10986_v21 = vadd.f32 %v10699_v31, %v2205_v8  ;;  %7975 = vpow2.f32 %v3105_v41  ;;  %v3113_v2 = vmul.f32 1.442695, %v3020_v13  ;;  %v13877_v41 = vld [vmem:[#allocation20_spill] sm:$0xff] }
 0x8d8   :  { %v3015_v34 = vsub.f32 %v13873_v26, %v10849_v17  ;;  %7977 = vpow2.f32 %v3099_v38  ;;  %v13875_v17 = vld [vmem:[#allocation56_spill] sm:$0xff]  ;;  %v13878_v26 = vld [vmem:[#allocation19_spill] sm:$0xff] }
 0x8d9   :  { %v7788_v52 = vpop.permute.xlu1 %7787  ;;  %v3017_v35 = vsub.f32 %v13875_v17, %v10859_v10  ;;  %v3019_v10 = vsub.f32 %v13877_v41, %v10875_v25 }
 0x8da   :  { %v7790_v45 = vunpack.i.h.bf16 %v7788_v52  ;;  %v7789_v12 = vunpack.i.l.bf16 %v7788_v52  ;;  %v10983_v52 = vpop.xlane.xlu0 %2939  ;;  %v3103_v3 = vmul.f32 1.442695, %v3015_v34  ;;  %v3024_v34 = vsub.f32 %v13878_v26, %v10834_v14 }
 0x8db   :  { %2985 = vmax.xlane.f32.xlu1 %v10954_v1  ;;  %3215 = vadd.xlane.f32.xlu0 %v10956_v51  ;;  %v3107_v8 = vmul.f32 1.442695, %v3017_v35  ;;  %v13880_v35 = vld [vmem:[#allocation21_spill] sm:$0xff] }
 0x8dc   :  { %v7666_v48 = vpack.c.bf16 %v7790_v45, %v7789_v12  ;;  %v10988_v45 = vpop.eup %7965  ;;  %v3109_v12 = vmul.f32 1.442695, %v3018_v40  ;;  %v3121_v17 = vmul.f32 1.442695, %v3024_v34  ;;  %v3026_v14 = vsub.f32 %v13880_v35, %v10839_v19  ;;  %v13883_v34 = vld [vmem:[#allocation23_spill] sm:$0xff] }
 0x8dd   :  { %v10996_v16 = vpop.eup %7967  ;;  %v13884_v35 = vld [vmem:[#allocation35_spill] sm:$0xff] }
 0x8de   :  { %7667 = vmatprep.subr.bf16.mxu0 %v7666_v48  ;;  %v10998_v31 = vpop.eup %7969  ;;  %v11000_v22 = vpop.xlane.xlu0 %2943  ;;  %7979 = vpow2.f32 %v3109_v12  ;;  %v13879_v12 = vld [vmem:[#allocation22_spill] sm:$0xff] }
 0x8df   :  { %2987 = vmax.xlane.f32.xlu1 %v10970_v29  ;;  %3217 = vadd.xlane.f32.xlu0 %v10972_v9  ;;  %7981 = vpow2.f32 %v3103_v3  ;;  %v11008_v61 = vpop.eup %7971  ;;  %v3021_v54 = vsub.f32 %v13879_v12, %v10890_v57 }
 0x8e0   :  { %7669 = vmatpush3.bf16.msra.mxu0 %v7666_v48  ;;  %v13876_v48 = vld [vmem:[#allocation57_spill] sm:$0xff]  ;;  %v11010_v40 = vpop.eup %7973  ;;  %7983 = vpow2.f32 %v3113_v2 }
 0x8e1   :  { %v3022_v46 = vsub.f32 %v13876_v48, %v10828_v0  ;;  %7985 = vpow2.f32 %v3107_v8  ;;  %v3111_v0 = vmul.f32 1.442695, %v3019_v10  ;;  %v11020_v25 = vpop.eup %7975  ;;  %v3115_v2 = vmul.f32 1.442695, %v3021_v54  ;;  %v13881_v48 = vld [vmem:[#allocation58_spill] sm:$0xff] }
 0x8e2   :  { %v11018_v13 = vpop.xlane.xlu0 %2953  ;;  %v11022_v3 = vpop.eup %7977  ;;  %v3023_v57 = vsub.f32 %v13881_v48, %v10912_v50  ;;  %v3125_v10 = vmul.f32 1.442695, %v3026_v14  ;;  %v3025_v50 = vsub.f32 %v13883_v34, %v10935_v6 }
 0x8e3   :  { %2989 = vmax.xlane.f32.xlu1 %v10986_v21  ;;  %3219 = vadd.xlane.f32.xlu0 %v10988_v45  ;;  %v3117_v38 = vmul.f32 1.442695, %v3022_v46 }
 0x8e4   :  { %v3119_v26 = vmul.f32 1.442695, %v3023_v57  ;;  %v3123_v14 = vmul.f32 1.442695, %v3025_v50 }
 0x8e5   :  { %7987 = vpow2.f32 %v3117_v38  ;;  %v13882_v38 = vld [vmem:[#allocation60_spill] sm:$0xff] }
 0x8e6   :  { %7989 = vpow2.f32 %v3111_v0  ;;  %v11030_v46 = vpop.xlane.xlu0 %2961  ;;  %v3028_v19 = vsub.f32 %v13882_v38, %v10843_v55  ;;  %v3030_v55 = vsub.f32 %v13884_v35, %v10847_v58 }
 0x8e7   :  { %3225 = vadd.xlane.f32.xlu1 %v10998_v31  ;;  %3221 = vadd.xlane.f32.xlu0 %v10996_v16  ;;  %7991 = vpow2.f32 %v3121_v17 }
 0x8e8   :  { %v11032_v8 = vpop.eup %7979  ;;  %7993 = vpow2.f32 %v3115_v2  ;;  %v3129_v17 = vmul.f32 1.442695, %v3028_v19  ;;  %v13885_v2 = vld [vmem:[#allocation36_spill] sm:$0xff]  ;;  %v3133_v38 = vmul.f32 1.442695, %v3030_v55  ;;  %v13890_v55 = vld [vmem:[#allocation61_spill] sm:$0xff] }
 0x8e9   :  { %v11034_v41 = vpop.eup %7981  ;;  %7995 = vpow2.f32 %v3125_v10  ;;  %v3027_v6 = vsub.f32 %v13885_v2, %v10961_v36  ;;  %v13887_v10 = vld [vmem:[#allocation24_spill] sm:$0xff]  ;;  %v13891_v2 = vld [vmem:[#allocation43_spill] sm:$0xff] }
 0x8ea   :  { %v11042_v0 = vpop.eup %7983  ;;  %v11046_v54 = vpop.xlane.xlu0 %2965  ;;  %7997 = vpow2.f32 %v3119_v26  ;;  %v3032_v19 = vsub.f32 %v13887_v10, %v10851_v5  ;;  %v13888_v26 = vld [vmem:[#allocation59_spill] sm:$0xff]  ;;  %v3034_v5 = vsub.f32 %v13890_v55, %v10864_v30 }
 0x8eb   :  { %3223 = vadd.xlane.f32.xlu0 %v11008_v61  ;;  %3229 = vadd.xlane.f32.xlu1 %v11010_v40  ;;  %v11044_v12 = vpop.eup %7985  ;;  %7999 = vpow2.f32 %v3129_v17  ;;  %v3127_v58 = vmul.f32 1.442695, %v3027_v6  ;;  %v3029_v34 = vsub.f32 %v13888_v26, %v10983_v52  ;;  %v3031_v52 = vsub.f32 %v13891_v2, %v11000_v22  ;;  %v13893_v26 = vld [vmem:[#allocation37_spill] sm:$0xff]  ;;  %v13894_v55 = vld [vmem:[#allocation27_spill] sm:$0xff] }
 0x8ec   :  { %8001 = vpow2.f32 %v3123_v14  ;;  %v3137_v17 = vmul.f32 1.442695, %v3032_v19  ;;  %v3141_v30 = vmul.f32 1.442695, %v3034_v5 }
 0x8ed   :  { %8003 = vpow2.f32 %v3133_v38  ;;  %v3131_v14 = vmul.f32 1.442695, %v3029_v34  ;;  %v3033_v38 = vsub.f32 %v13893_v26, %v10873_v53  ;;  %v3135_v22 = vmul.f32 1.442695, %v3031_v52 }
 0x8ee   :  { %v11064_v50 = vpop.xlane.xlu0 %2969  ;;  %8005 = vpow2.f32 %v3127_v58 }
 0x8ef   :  { %3233 = vadd.xlane.f32.xlu1 %v11020_v25  ;;  %3227 = vadd.xlane.f32.xlu0 %v11022_v3  ;;  %v11054_v48 = vpop.eup %7987  ;;  %8007 = vpow2.f32 %v3137_v17  ;;  %v3139_v2 = vmul.f32 1.442695, %v3033_v38  ;;  %v13896_v17 = vld [vmem:[#allocation26_spill] sm:$0xff] }
 0x8f0   :  { %13886 = vst [vmem:[#allocation18_spill] sm:$0xff] %v11054_v48  ;;  %v11056_v57 = vpop.eup %7989  ;;  %8009 = vpow2.f32 %v3131_v14  ;;  %v3035_v5 = vsub.f32 %v13896_v17, %v10880_v63  ;;  %v13900_v63 = vld [vmem:[#allocation9_spill] sm:$0xff] }
 0x8f1   :  { %v11066_v36 = vpop.eup %7991  ;;  %8011 = vpow2.f32 %v3141_v30 }
 0x8f2   :  { %13889 = vst [vmem:[#allocation54_spill] sm:$0xff] %v11066_v36  ;;  %v11068_v35 = vpop.eup %7993  ;;  %v11082_v19 = vpop.xlane.xlu0 %2967  ;;  %8013 = vpow2.f32 %v3135_v22 }
 0x8f3   :  { %3237 = vadd.xlane.f32.xlu1 %v11032_v8  ;;  %3231 = vadd.xlane.f32.xlu0 %v11034_v41  ;;  %v11076_v6 = vpop.eup %7995  ;;  %8015 = vpow2.f32 %v3139_v2 }
 0x8f4   :  { %13892 = vst [vmem:[#allocation16_spill] sm:$0xff] %v11076_v6  ;;  %v11078_v10 = vpop.eup %7997 }
 0x8f5   :  { %v11088_v58 = vpop.eup %7999 }
 0x8f6   :  { %13895 = vst [vmem:[#allocation55_spill] sm:$0xff] %v11088_v58  ;;  %v11090_v34 = vpop.eup %8001 }
 0x8f7   :  { %3241 = vadd.xlane.f32.xlu1 %v11042_v0  ;;  %3235 = vadd.xlane.f32.xlu0 %v11044_v12  ;;  %v11100_v52 = vpop.eup %8003 }
 0x8f8   :  { %13898 = vst [vmem:[#allocation17_spill] sm:$0xff] %v11100_v52  ;;  %v11102_v26 = vpop.eup %8005 }
 0x8f9   :  { %13899 = vst [vmem:[#allocation56_spill] sm:$0xff] %v11102_v26 }
 0x8fb   :  { %3245 = vadd.xlane.f32.xlu1 %v11054_v48  ;;  %3239 = vadd.xlane.f32.xlu0 %v11056_v57 }
 0x8ff   :  { %3249 = vadd.xlane.f32.xlu1 %v11066_v36  ;;  %3243 = vadd.xlane.f32.xlu0 %v11068_v35  ;;  %v3036_v36 = vsub.f32 %v13894_v55, %v11018_v13  ;;  %v13897_v13 = vld [vmem:[#allocation8_spill] sm:$0xff]  ;;  %v3040_v55 = vsub.f32 %v13900_v63, %v11030_v46  ;;  %v13903_v46 = vld [vmem:[#allocation10_spill] sm:$0xff] }
 0x900   :  { %v3038_v14 = vsub.f32 %v13897_v13, %v10895_v15  ;;  %v13901_v15 = vld [vmem:[#allocation13_spill] sm:$0xff]  ;;  %v11112_v13 = vpop.eup %8007  ;;  %v3042_v63 = vsub.f32 %v13903_v46, %v11046_v54 }
 0x901   :  { %v3145_v53 = vmul.f32 1.442695, %v3036_v36  ;;  %v3143_v36 = vmul.f32 1.442695, %v3035_v5  ;;  %v3037_v17 = vsub.f32 %v13901_v15, %v10902_v11  ;;  %13902 = vst [vmem:[#allocation57_spill] sm:$0xff] %v11112_v13  ;;  %v11114_v2 = vpop.eup %8009 }
 0x902   :  { %v3149_v22 = vmul.f32 1.442695, %v3038_v14  ;;  %v3153_v5 = vmul.f32 1.442695, %v3040_v55  ;;  %v13904_v14 = vld [vmem:[#allocation11_spill] sm:$0xff]  ;;  %v11126_v15 = vpop.eup %8011  ;;  %v13907_v55 = vld [vmem:[#allocation12_spill] sm:$0xff] }
 0x903   :  { %3253 = vadd.xlane.f32.xlu1 %v11076_v6  ;;  %3247 = vadd.xlane.f32.xlu0 %v11078_v10  ;;  %8017 = vpow2.f32 %v3145_v53  ;;  %v3147_v11 = vmul.f32 1.442695, %v3037_v17  ;;  %13905 = vst [vmem:[#allocation20_spill] sm:$0xff] %v11126_v15  ;;  %v3044_v6 = vsub.f32 %v13907_v55, %v11064_v50  ;;  %v13908_v17 = vld [vmem:[#allocation39_spill] sm:$0xff] }
 0x904   :  { %v3041_v46 = vsub.f32 %v13908_v17, %v10940_v4  ;;  %v13909_v50 = vld [vmem:[#allocation79_spill] sm:$0xff] }
 0x905   :  { %v3043_v55 = vsub.f32 %v13909_v50, %v11082_v19 }
 0x906   :  { %v11092_v48 = vpop.xlane.xlu0 %3185 }
 0x907   :  { %3257 = vadd.xlane.f32.xlu1 %v11088_v58  ;;  %3251 = vadd.xlane.f32.xlu0 %v11090_v34 }
 0x90a   :  { %v11104_v38 = vpop.xlane.xlu1 %3189  ;;  %v3184_v30 = vpop.xlane.xlu0 %3183 }
 0x90b   :  { %3261 = vadd.xlane.f32.xlu1 %v11100_v52  ;;  %3255 = vadd.xlane.f32.xlu0 %v11102_v26  ;;  %8019 = vrcp.f32 %v3184_v30  ;;  %v3039_v30 = vsub.f32 %v13904_v14, %v10924_v39  ;;  %v11128_v52 = vpop.eup %8013 }
 0x90c   :  { %8021 = vpow2.f32 %v3143_v36  ;;  %13906 = vst [vmem:[#allocation19_spill] sm:$0xff] %v11128_v52  ;;  %v3157_v36 = vmul.f32 1.442695, %v3042_v63  ;;  %v3161_v63 = vmul.f32 1.442695, %v3044_v6 }
 0x90d   :  { %8023 = vpow2.f32 %v3149_v22  ;;  %v11136_v22 = vpop.eup %8015  ;;  %v3151_v39 = vmul.f32 1.442695, %v3039_v30  ;;  %v3155_v30 = vmul.f32 1.442695, %v3041_v46  ;;  %v3159_v6 = vmul.f32 1.442695, %v3043_v55 }
 0x90e   :  { %v11116_v58 = vpop.xlane.xlu1 %3187  ;;  %v11118_v53 = vpop.xlane.xlu0 %3193  ;;  %8025 = vpow2.f32 %v3153_v5 }
 0x90f   :  { %3265 = vadd.xlane.f32.xlu1 %v11112_v13  ;;  %3259 = vadd.xlane.f32.xlu0 %v11114_v2  ;;  %8027 = vpow2.f32 %v3147_v11  ;;  %v11140_v14 = vpop.eup %8017 }
 0x910   :  { %8029 = vpow2.f32 %v3157_v36 }
 0x911   :  { %8031 = vpow2.f32 %v3151_v39 }
 0x912   :  { %v3192_v26 = vpop.xlane.xlu0 %3191  ;;  %8033 = vpow2.f32 %v3161_v63 }
 0x913   :  { %v11132_v54 = vpop.xlane.xlu1 %3197  ;;  %3269 = vadd.xlane.f32.xlu1 %v11126_v15  ;;  %3263 = vadd.xlane.f32.xlu0 %v11128_v52  ;;  %8035 = vpow2.f32 %v3155_v30 }
 0x914   :  { %8037 = vpow2.f32 %v3159_v6 }
 0x915   :  { %v8020_v5 = vpop.eup %8019 }
 0x916   :  { %v3375_v11 = vmul.f32 %v8020_v5, %v10720_v44  ;;  %v11147_v52 = vpop.eup %8021 }
 0x917   :  { %v3196_v13 = vpop.xlane.xlu1 %3195  ;;  %3267 = vadd.xlane.f32.xlu0 %v11136_v22  ;;  %3273 = vadd.xlane.f32.xlu1 %v11140_v14  ;;  %v3202_v15 = vpop.xlane.xlu0 %3201 }
 0x918   :  { %7390 = vmatprep.mubr.f32.mxu0 %v3375_v11  ;;  %v11149_v4 = vpop.eup %8023 }
 0x919   :  { %v11154_v39 = vpop.eup %8025 }
 0x91a   :  { %v11156_v46 = vpop.eup %8027 }
 0x91b   :  { %v2972_v36 = vpop.xlane.xlu1 %2971  ;;  %3271 = vadd.xlane.f32.xlu0 %v11147_v52  ;;  %3277 = vadd.xlane.f32.xlu1 %v11149_v4  ;;  %v7793_v19 = vpop.permute.xlu0 %7792 }
 0x91c   :  { %v3045_v17 = vsub.f32 %v10769_v27, %v2972_v36  ;;  %v7795_v50 = vunpack.i.h.bf16 %v7793_v19  ;;  %v7794_v44 = vunpack.i.l.bf16 %v7793_v19  ;;  %v11160_v55 = vpop.eup %8029 }
 0x91d   :  { %v11162_v30 = vpop.eup %8031 }
 0x91e   :  { %v7670_v5 = vpack.c.bf16 %v7795_v50, %v7794_v44  ;;  %v3163_v63 = vmul.f32 1.442695, %v3045_v17  ;;  %v11166_v36 = vpop.eup %8033 }
 0x91f   :  { %v3200_v11 = vpop.xlane.xlu1 %3199  ;;  %3275 = vadd.xlane.f32.xlu0 %v11156_v46  ;;  %3281 = vadd.xlane.f32.xlu1 %v11154_v39  ;;  %13910 = vst [vmem:[#allocation22_spill] sm:$0xff] %v11166_v36  ;;  %v11169_v19 = vpop.eup %8035 }
 0x920   :  { %7671 = vmatprep.subr.bf16.mxu0 %v7670_v5  ;;  %8039 = vpow2.f32 %v3163_v63  ;;  %v11175_v17 = vpop.eup %8037 }
 0x921   :  { %7673 = vmatpush3.bf16.msra.mxu0 %v7670_v5  ;;  %8041 = vrcp.f32 %v11092_v48  ;;  %13911 = vst [vmem:[#allocation21_spill] sm:$0xff] %v11175_v17 }
 0x922   :  { %8043 = vrcp.f32 %v11116_v58 }
 0x923   :  { %v3206_v27 = vpop.xlane.xlu1 %3205  ;;  %3279 = vadd.xlane.f32.xlu0 %v11162_v30  ;;  %3285 = vadd.xlane.f32.xlu1 %v11160_v55  ;;  %8045 = vrcp.f32 %v11104_v38 }
 0x924   :  { %8047 = vrcp.f32 %v3192_v26 }
 0x925   :  { %8049 = vrcp.f32 %v11118_v53 }
 0x926   :  { %8051 = vrcp.f32 %v3196_v13 }
 0x927   :  { %v3204_v6 = vpop.xlane.xlu1 %3203  ;;  %3283 = vadd.xlane.f32.xlu0 %v11169_v19  ;;  %3289 = vadd.xlane.f32.xlu1 %v11166_v36  ;;  %8053 = vrcp.f32 %v11132_v54 }
 0x928   :  { %8055 = vrcp.f32 %v3200_v11 }
 0x929   :  { %8057 = vrcp.f32 %v3202_v15 }
 0x92a   :  { %v11179_v48 = vpop.eup %8039  ;;  %8059 = vrcp.f32 %v3204_v6 }
 0x92b   :  { %v7798_v50 = vpop.permute.xlu1 %7797  ;;  %3287 = vadd.xlane.f32.xlu0 %v11175_v17  ;;  %v8042_v63 = vpop.eup %8041  ;;  %8061 = vrcp.f32 %v3206_v27 }
 0x92c   :  { %v7800_v44 = vunpack.i.h.bf16 %v7798_v50  ;;  %v7799_v5 = vunpack.i.l.bf16 %v7798_v50  ;;  %v8044_v36 = vpop.eup %8043  ;;  %v3376_v26 = vmul.f32 %v8042_v63, %v10715_v37 }
 0x92d   :  { %v8046_v38 = vpop.eup %8045  ;;  %v3377_v50 = vmul.f32 %v8044_v36, %v10727_v20 }
 0x92e   :  { %v7674_v58 = vpack.c.bf16 %v7800_v44, %v7799_v5  ;;  %v8048_v17 = vpop.eup %8047  ;;  %v3378_v13 = vmul.f32 %v8046_v38, %v10722_v28 }
 0x92f   :  { %3291 = vadd.xlane.f32.xlu0 %v11179_v48  ;;  %v8050_v53 = vpop.eup %8049  ;;  %v3379_v44 = vmul.f32 %v8048_v17, %v10738_v62 }
 0x930   :  { %7675 = vmatprep.subr.bf16.mxu0 %v7674_v58  ;;  %v8052_v5 = vpop.eup %8051  ;;  %v3380_v54 = vmul.f32 %v8050_v53, %v10731_v47 }
 0x931   :  { %7677 = vmatpush3.bf16.msra.mxu0 %v7674_v58  ;;  %v8054_v37 = vpop.eup %8053  ;;  %v3381_v11 = vmul.f32 %v8052_v5, %v10751_v7 }
 0x932   :  { %v8056_v20 = vpop.eup %8055  ;;  %v3382_v15 = vmul.f32 %v8054_v37, %v10741_v23 }
 0x933   :  { %v8058_v36 = vpop.eup %8057  ;;  %v3383_v28 = vmul.f32 %v8056_v20, %v10780_v60 }
 0x934   :  { %7391 = vmatmul.mubr.f32.vlgmr.msra.gmra.mrb[16].mxu0 %v3376_v26  ;;  %v8060_v6 = vpop.eup %8059  ;;  %v3384_v62 = vmul.f32 %v8058_v36, %v10755_v32 }
 0x935   :  { %7393 = vmatprep.mubr.f32.mxu0 %v3377_v50  ;;  %v8062_v27 = vpop.eup %8061  ;;  %v3385_v17 = vmul.f32 %v8060_v6, %v10802_v49 }
 0x936   :  { %v3386_v47 = vmul.f32 %v8062_v27, %v10787_v43 }
 0x938   :  { %7394 = vmatmul.mubr.f32.gmra.mrb[18].mxu0 %v3378_v13 }
 0x939   :  { %7396 = vmatprep.mubr.f32.mxu0 %v3379_v44 }
 0x93c   :  { %7397 = vmatmul.mubr.f32.gmra.mrb[20].mxu0 %v3380_v54 }
 0x93d   :  { %7399 = vmatprep.mubr.f32.mxu0 %v3381_v11 }
 0x940   :  { %7400 = vmatmul.mubr.f32.gmra.mrb[22].mxu0 %v3382_v15 }
 0x941   :  { %7402 = vmatprep.mubr.f32.mxu0 %v3383_v28 }
 0x944   :  { %7403 = vmatmul.mubr.f32.gmra.mrb[24].mxu0 %v3384_v62 }
 0x945   :  { %7405 = vmatprep.mubr.f32.mxu0 %v3385_v17 }
 0x948   :  { %7406 = vmatmul.mubr.f32.gmra.mrb[26].mxu0 %v3386_v47  ;;  %v13912_v47 = vld [vmem:[#allocation86_spill] sm:$0xff] }
 0x94c   :  { %v2974_v7 = vpop.xlane.xlu0 %2973 }
 0x94d   :  { %v3046_v58 = vsub.f32 %v10862_v56, %v2974_v7 }
 0x94f   :  { %v3165_v23 = vmul.f32 1.442695, %v3046_v58  ;;  %v13913_v58 = vld [vmem:[#allocation85_spill] sm:$0xff] }
 0x950   :  { %v2976_v63 = vpop.xlane.xlu0 %2975 }
 0x951   :  { %8063 = vpow2.f32 %v3165_v23  ;;  %v3047_v60 = vsub.f32 %v10871_v18, %v2976_v63  ;;  %v13914_v63 = vld [vmem:[#allocation87_spill] sm:$0xff] }
 0x953   :  { %v3167_v26 = vmul.f32 1.442695, %v3047_v60 }
 0x954   :  { %v3210_v38 = vpop.xlane.xlu0 %3209 }
 0x955   :  { %8065 = vpow2.f32 %v3167_v26 }
 0x956   :  { %8067 = vrcp.f32 %v3210_v38 }
 0x958   :  { %v2978_v32 = vpop.xlane.xlu0 %2977 }
 0x959   :  { %v3048_v50 = vsub.f32 %v10893_v24, %v2978_v32 }
 0x95b   :  { %v11197_v49 = vpop.eup %8063  ;;  %v3169_v13 = vmul.f32 1.442695, %v3048_v50 }
 0x95c   :  { %v3208_v43 = vpop.xlane.xlu1 %3207  ;;  %3293 = vadd.xlane.f32.xlu1 %v11197_v49  ;;  %v3212_v53 = vpop.xlane.xlu0 %3211 }
 0x95d   :  { %8069 = vpow2.f32 %v3169_v13 }
 0x95e   :  { %8071 = vrcp.f32 %v3208_v43 }
 0x95f   :  { %v11200_v56 = vpop.eup %8065  ;;  %8073 = vrcp.f32 %v3212_v53 }
 0x960   :  { %v2982_v18 = vpop.xlane.xlu1 %2981  ;;  %3295 = vadd.xlane.f32.xlu0 %v11200_v56  ;;  %v2980_v44 = vpop.xlane.xlu0 %2979 }
 0x961   :  { %v3050_v5 = vsub.f32 %v10919_v33, %v2982_v18  ;;  %v3049_v24 = vsub.f32 %v10922_v59, %v2980_v44  ;;  %v8068_v36 = vpop.eup %8067 }
 0x963   :  { %v3173_v54 = vmul.f32 1.442695, %v3050_v5  ;;  %v3171_v37 = vmul.f32 1.442695, %v3049_v24  ;;  %v13915_v5 = vld [vmem:[#allocation88_spill] sm:$0xff] }
 0x964   :  { %v2984_v11 = vpop.xlane.xlu1 %2983  ;;  %v3214_v20 = vpop.xlane.xlu0 %3213 }
 0x965   :  { %8075 = vpow2.f32 %v3173_v54  ;;  %v3051_v15 = vsub.f32 %v10938_v42, %v2984_v11  ;;  %v3388_v42 = vmul.f32 %v8068_v36, %v13913_v58 }
 0x966   :  { %8077 = vpow2.f32 %v3171_v37 }
 0x967   :  { %v11206_v28 = vpop.eup %8069  ;;  %v3175_v6 = vmul.f32 1.442695, %v3051_v15  ;;  %8079 = vrcp.f32 %v3214_v20 }
 0x968   :  { %v8072_v62 = vpop.eup %8071  ;;  %v2986_v27 = vpop.xlane.xlu1 %2985  ;;  %3297 = vadd.xlane.f32.xlu1 %v11206_v28 }
 0x969   :  { %v3216_v33 = vpop.xlane.xlu0 %3215  ;;  %v8074_v17 = vpop.eup %8073  ;;  %8081 = vpow2.f32 %v3175_v6  ;;  %v3052_v59 = vsub.f32 %v10954_v1, %v2986_v27  ;;  %v3387_v7 = vmul.f32 %v8072_v62, %v13912_v47 }
 0x96a   :  { %8083 = vrcp.f32 %v3216_v33  ;;  %v3389_v60 = vmul.f32 %v8074_v17, %v13914_v63 }
 0x96b   :  { %v3177_v23 = vmul.f32 1.442695, %v3052_v59  ;;  %7408 = vmatprep.mubr.f32.mxu0 %v3387_v7 }
 0x96c   :  { %7409 = vmatmul.mubr.f32.gmra.mrb[28].mxu0 %v3388_v42  ;;  %v2988_v26 = vpop.xlane.xlu1 %2987 }
 0x96d   :  { %v3218_v38 = vpop.xlane.xlu0 %3217  ;;  %8085 = vpow2.f32 %v3177_v23  ;;  %v3053_v32 = vsub.f32 %v10970_v29, %v2988_v26  ;;  %7411 = vmatprep.mubr.f32.mxu0 %v3389_v60 }
 0x96e   :  { %8087 = vrcp.f32 %v3218_v38 }
 0x96f   :  { %v11214_v50 = vpop.eup %8075  ;;  %v3179_v1 = vmul.f32 1.442695, %v3053_v32 }
 0x970   :  { %v11216_v13 = vpop.eup %8077  ;;  %v2990_v43 = vpop.xlane.xlu1 %2989  ;;  %3301 = vadd.xlane.f32.xlu1 %v11214_v50 }
 0x971   :  { %v3220_v53 = vpop.xlane.xlu0 %3219  ;;  %v8080_v18 = vpop.eup %8079  ;;  %8089 = vpow2.f32 %v3179_v1  ;;  %v3054_v44 = vsub.f32 %v10986_v21, %v2990_v43  ;;  %3299 = vadd.xlane.f32.xlu0 %v11216_v13 }
 0x972   :  { %8091 = vrcp.f32 %v3220_v53  ;;  %v3390_v29 = vmul.f32 %v8080_v18, %v13915_v5 }
 0x973   :  { %v11222_v24 = vpop.eup %8081  ;;  %v3181_v54 = vmul.f32 1.442695, %v3054_v44 }
 0x974   :  { %v8084_v37 = vpop.eup %8083  ;;  %7412 = vmatmul.mubr.f32.gmra.mrb[30].mxu0 %v3390_v29  ;;  %v3226_v11 = vpop.xlane.xlu1 %3225 }
 0x975   :  { %v3222_v20 = vpop.xlane.xlu0 %3221  ;;  %8093 = vpow2.f32 %v3181_v54  ;;  %3303 = vadd.xlane.f32.xlu0 %v11222_v24  ;;  %v3391_v15 = vmul.f32 %v8084_v37, %v10956_v51 }
 0x976   :  { %8095 = vrcp.f32 %v3222_v20 }
 0x977   :  { %v11226_v36 = vpop.eup %8085  ;;  %7414 = vmatprep.mubr.f32.mxu0 %v3391_v15  ;;  %8097 = vrcp.f32 %v3226_v11 }
 0x978   :  { %v8088_v21 = vpop.eup %8087  ;;  %v3230_v6 = vpop.xlane.xlu1 %3229  ;;  %3305 = vadd.xlane.f32.xlu1 %v11226_v36 }
 0x979   :  { %v3224_v62 = vpop.xlane.xlu0 %3223  ;;  %v3392_v27 = vmul.f32 %v8088_v21, %v10972_v9 }
 0x97a   :  { %8099 = vrcp.f32 %v3224_v62 }
 0x97b   :  { %v11230_v33 = vpop.eup %8089  ;;  %7415 = vmatmul.mubr.f32.gmra.mrb[32].mxu0 %v3392_v27  ;;  %8101 = vrcp.f32 %v3230_v6  ;;  %v13917_v6 = vld [vmem:[#allocation44_spill] sm:$0xff] }
 0x97c   :  { %v8092_v17 = vpop.eup %8091  ;;  %v3234_v59 = vpop.xlane.xlu1 %3233  ;;  %3307 = vadd.xlane.f32.xlu0 %v11230_v33 }
 0x97d   :  { %v3228_v51 = vpop.xlane.xlu0 %3227  ;;  %v3393_v47 = vmul.f32 %v8092_v17, %v10988_v45 }
 0x97e   :  { %8103 = vrcp.f32 %v3228_v51 }
 0x97f   :  { %v11234_v7 = vpop.eup %8093  ;;  %7417 = vmatprep.mubr.f32.mxu0 %v3393_v47  ;;  %8105 = vrcp.f32 %v3234_v59  ;;  %v13918_v59 = vld [vmem:[#allocation49_spill] sm:$0xff] }
 0x980   :  { %v3238_v58 = vpop.xlane.xlu1 %3237  ;;  %3309 = vadd.xlane.f32.xlu1 %v11234_v7  ;;  %v8096_v42 = vpop.eup %8095 }
 0x981   :  { %v3232_v9 = vpop.xlane.xlu0 %3231  ;;  %v3394_v23 = vmul.f32 %v8096_v42, %v10996_v16  ;;  %v8098_v63 = vpop.eup %8097 }
 0x982   :  { %8107 = vrcp.f32 %v3232_v9  ;;  %v3396_v32 = vmul.f32 %v8098_v63, %v10998_v31 }
 0x983   :  { %7418 = vmatmul.mubr.f32.gmra.mrb[34].mxu0 %v3394_v23  ;;  %8109 = vrcp.f32 %v3238_v58  ;;  %v13920_v23 = vld [vmem:[#allocation38_spill] sm:$0xff] }
 0x984   :  { %v8100_v60 = vpop.eup %8099  ;;  %v3242_v26 = vpop.xlane.xlu1 %3241 }
 0x985   :  { %v3236_v38 = vpop.xlane.xlu0 %3235  ;;  %v3395_v45 = vmul.f32 %v8100_v60, %v11008_v61  ;;  %v8102_v1 = vpop.eup %8101  ;;  %v13922_v60 = vld [vmem:[#allocation18_spill] sm:$0xff] }
 0x986   :  { %8111 = vrcp.f32 %v3236_v38  ;;  %v3398_v44 = vmul.f32 %v8102_v1, %v11010_v40  ;;  %v13916_v40 = vld [vmem:[#allocation2_spill] sm:$0xff]  ;;  %v13923_v1 = vld [vmem:[#allocation45_spill] sm:$0xff] }
 0x987   :  { %7420 = vmatprep.mubr.f32.mxu0 %v3395_v45  ;;  %8113 = vrcp.f32 %v3242_v26 }
 0x988   :  { %v8104_v43 = vpop.eup %8103  ;;  %7421 = vmatmul.mubr.f32.gmra.mrb[36].mxu0 %v3396_v32  ;;  %v3246_v53 = vpop.xlane.xlu1 %3245 }
 0x989   :  { %v3240_v18 = vpop.xlane.xlu0 %3239  ;;  %v3397_v16 = vmul.f32 %v8104_v43, %v11022_v3  ;;  %v8106_v5 = vpop.eup %8105 }
 0x98a   :  { %8115 = vrcp.f32 %v3240_v18  ;;  %v3400_v37 = vmul.f32 %v8106_v5, %v11020_v25 }
 0x98b   :  { %7423 = vmatprep.mubr.f32.mxu0 %v3397_v16  ;;  %8117 = vrcp.f32 %v3246_v53  ;;  %v13925_v53 = vld [vmem:[#allocation54_spill] sm:$0xff] }
 0x98c   :  { %v8108_v29 = vpop.eup %8107  ;;  %7424 = vmatmul.mubr.f32.gmra.mrb[38].mxu0 %v3398_v44  ;;  %v3250_v61 = vpop.xlane.xlu1 %3249 }
 0x98d   :  { %v3244_v54 = vpop.xlane.xlu0 %3243  ;;  %v3399_v31 = vmul.f32 %v8108_v29, %v11034_v41  ;;  %v8110_v11 = vpop.eup %8109 }
 0x98e   :  { %8119 = vrcp.f32 %v3244_v54  ;;  %v3402_v41 = vmul.f32 %v8110_v11, %v11032_v8 }
 0x98f   :  { %7426 = vmatprep.mubr.f32.mxu0 %v3399_v31  ;;  %8121 = vrcp.f32 %v3250_v61  ;;  %v13926_v61 = vld [vmem:[#allocation3_spill] sm:$0xff]  ;;  %v13928_v31 = vld [vmem:[#allocation16_spill] sm:$0xff] }
 0x990   :  { %v8112_v20 = vpop.eup %8111  ;;  %7427 = vmatmul.mubr.f32.gmra.mrb[40].mxu0 %v3400_v37  ;;  %v3254_v3 = vpop.xlane.xlu1 %3253 }
 0x991   :  { %v3248_v15 = vpop.xlane.xlu0 %3247  ;;  %4300 = vrot.lane.b32.xlu1 %v13916_v40, %s8365_s11  ;;  %v3401_v21 = vmul.f32 %v8112_v20, %v11044_v12  ;;  %v8114_v62 = vpop.eup %8113  ;;  %v13919_v12 = vld [vmem:[#allocation14_spill] sm:$0xff]  ;;  %v13929_v40 = vld [vmem:[#allocation51_spill] sm:$0xff] }
 0x992   :  { %8123 = vrcp.f32 %v3248_v15  ;;  %4298 = vrot.lane.b32.xlu0 %v13917_v6, %s8365_s11  ;;  %v3404_v47 = vmul.f32 %v8114_v62, %v11042_v0 }
 0x993   :  { %7429 = vmatprep.mubr.f32.mxu0 %v3401_v21  ;;  %8125 = vrcp.f32 %v3254_v3  ;;  %v13930_v21 = vld [vmem:[#allocation56_spill] sm:$0xff] }
 0x994   :  { %v8116_v25 = vpop.eup %8115  ;;  %7430 = vmatmul.mubr.f32.gmra.mrb[42].mxu0 %v3402_v41  ;;  %v3258_v27 = vpop.xlane.xlu1 %3257  ;;  %v13932_v41 = vld [vmem:[#allocation55_spill] sm:$0xff] }
 0x995   :  { %v3252_v17 = vpop.xlane.xlu0 %3251  ;;  %4378 = vrot.lane.b32.xlu1 %v13918_v59, %s8363_s22  ;;  %v3403_v51 = vmul.f32 %v8116_v25, %v11056_v57  ;;  %v8118_v58 = vpop.eup %8117  ;;  %v13921_v57 = vld [vmem:[#allocation5_spill] sm:$0xff] }
 0x996   :  { %8127 = vrcp.f32 %v3252_v17  ;;  %4380 = vrot.lane.b32.xlu0 %v13919_v12, %s8363_s22  ;;  %v3406_v26 = vmul.f32 %v8118_v58, %v13922_v60  ;;  %v13935_v58 = vld [vmem:[#allocation17_spill] sm:$0xff]  ;;  %v13937_v60 = vld [vmem:[#allocation19_spill] sm:$0xff] }
 0x997   :  { %7432 = vmatprep.mubr.f32.mxu0 %v3403_v51  ;;  %8129 = vrcp.f32 %v3258_v27  ;;  %v13933_v51 = vld [vmem:[#allocation28_spill] sm:$0xff] }
 0x998   :  { %v8120_v8 = vpop.eup %8119  ;;  %7433 = vmatmul.mubr.f32.gmra.mrb[44].mxu0 %v3404_v47  ;;  %v3262_v9 = vpop.xlane.xlu1 %3261  ;;  %v13934_v47 = vld [vmem:[#allocation30_spill] sm:$0xff] }
 0x999   :  { %v3256_v42 = vpop.xlane.xlu0 %3255  ;;  %4302 = vrot.lane.b32.xlu1 %v13920_v23, %s8365_s11  ;;  %v3405_v63 = vmul.f32 %v8120_v8, %v11068_v35  ;;  %v8122_v38 = vpop.eup %8121  ;;  %v13924_v35 = vld [vmem:[#allocation48_spill] sm:$0xff] }
 0x99a   :  { %8131 = vrcp.f32 %v3256_v42  ;;  %4304 = vrot.lane.b32.xlu0 %v13921_v57, %s8365_s11  ;;  %v3408_v18 = vmul.f32 %v8122_v38, %v13925_v53  ;;  %v13936_v57 = vld [vmem:[#allocation50_spill] sm:$0xff]  ;;  %v13939_v38 = vld [vmem:[#allocation57_spill] sm:$0xff] }
 0x99b   :  { %7435 = vmatprep.mubr.f32.mxu0 %v3405_v63  ;;  %8133 = vrcp.f32 %v3262_v9 }
 0x99c   :  { %v8124_v0 = vpop.eup %8123  ;;  %7436 = vmatmul.mubr.f32.gmra.mrb[46].mxu0 %v3406_v26  ;;  %v3266_v45 = vpop.xlane.xlu1 %3265 }
 0x99d   :  { %v3260_v32 = vpop.xlane.xlu0 %3259  ;;  %4382 = vrot.lane.b32.xlu1 %v13923_v1, %s8363_s22  ;;  %v3407_v43 = vmul.f32 %v8124_v0, %v11078_v10  ;;  %v8126_v16 = vpop.eup %8125  ;;  %v13927_v10 = vld [vmem:[#allocation7_spill] sm:$0xff] }
 0x99e   :  { %8135 = vrcp.f32 %v3260_v32  ;;  %4384 = vrot.lane.b32.xlu0 %v13924_v35, %s8363_s22  ;;  %v3410_v37 = vmul.f32 %v8126_v16, %v13928_v31  ;;  %v13940_v35 = vld [vmem:[#allocation29_spill] sm:$0xff]  ;;  %v13942_v16 = vld [vmem:[#allocation20_spill] sm:$0xff] }
 0x99f   :  { %7438 = vmatprep.mubr.f32.mxu0 %v3407_v43  ;;  %8137 = vrcp.f32 %v3266_v45 }
 0x9a0   :  { %v8128_v44 = vpop.eup %8127  ;;  %7439 = vmatmul.mubr.f32.gmra.mrb[48].mxu0 %v3408_v18  ;;  %v3270_v5 = vpop.xlane.xlu1 %3269  ;;  %v13941_v18 = vld [vmem:[#allocation4_spill] sm:$0xff] }
 0x9a1   :  { %v3264_v29 = vpop.xlane.xlu0 %3263  ;;  %4306 = vrot.lane.b32.xlu1 %v13926_v61, %s8365_s11  ;;  %v3409_v54 = vmul.f32 %v8128_v44, %v11090_v34  ;;  %v8130_v11 = vpop.eup %8129  ;;  %v13931_v34 = vld [vmem:[#allocation15_spill] sm:$0xff] }
 0x9a2   :  { %8139 = vrcp.f32 %v3264_v29  ;;  %4308 = vrot.lane.b32.xlu0 %v13927_v10, %s8365_s11  ;;  %v3412_v62 = vmul.f32 %v8130_v11, %v13932_v41  ;;  %v13943_v10 = vld [vmem:[#allocation53_spill] sm:$0xff] }
 0x9a3   :  { %7441 = vmatprep.mubr.f32.mxu0 %v3409_v54  ;;  %8141 = vrcp.f32 %v3270_v5  ;;  %v13947_v41 = vld [vmem:[#allocation81_spill] sm:$0xff] }
 0x9a4   :  { %v8132_v20 = vpop.eup %8131  ;;  %7442 = vmatmul.mubr.f32.gmra.mrb[50].mxu0 %v3410_v37  ;;  %v3274_v3 = vpop.xlane.xlu1 %3273 }
 0x9a5   :  { %v3268_v15 = vpop.xlane.xlu0 %3267  ;;  %4386 = vrot.lane.b32.xlu1 %v13929_v40, %s8363_s22  ;;  %v3411_v6 = vmul.f32 %v8132_v20, %v13930_v21  ;;  %v8134_v25 = vpop.eup %8133 }
 0x9a6   :  { %8143 = vrcp.f32 %v3268_v15  ;;  %4388 = vrot.lane.b32.xlu0 %v13931_v34, %s8363_s22  ;;  %v3414_v8 = vmul.f32 %v8134_v25, %v13935_v58  ;;  %v13945_v15 = vld [vmem:[#allocation46_spill] sm:$0xff] }
 0x9a7   :  { %7444 = vmatprep.mubr.f32.mxu0 %v3411_v6  ;;  %8145 = vrcp.f32 %v3274_v3  ;;  %v13949_v58 = vld [vmem:[#allocation22_spill] sm:$0xff] }
 0x9a8   :  { %v8136_v27 = vpop.eup %8135  ;;  %7445 = vmatmul.mubr.f32.gmra.mrb[52].mxu0 %v3412_v62  ;;  %v3278_v17 = vpop.xlane.xlu1 %3277 }
 0x9a9   :  { %v3272_v59 = vpop.xlane.xlu0 %3271  ;;  %4310 = vrot.lane.b32.xlu1 %v13933_v51, %s8365_s11  ;;  %v3413_v12 = vmul.f32 %v8136_v27, %v11114_v2  ;;  %v8138_v9 = vpop.eup %8137  ;;  %v13938_v2 = vld [vmem:[#allocation25_spill] sm:$0xff] }
 0x9aa   :  { %8147 = vrcp.f32 %v3272_v59  ;;  %4312 = vrot.lane.b32.xlu0 %v13934_v47, %s8365_s11  ;;  %v3416_v0 = vmul.f32 %v8138_v9, %v13939_v38 }
 0x9ab   :  { %7447 = vmatprep.mubr.f32.mxu0 %v3413_v12  ;;  %8149 = vrcp.f32 %v3278_v17  ;;  %v13948_v12 = vld [vmem:[#allocation21_spill] sm:$0xff] }
 0x9ac   :  { %v8140_v42 = vpop.eup %8139  ;;  %7448 = vmatmul.mubr.f32.gmra.mrb[54].mxu0 %v3414_v8  ;;  %v3282_v23 = vpop.xlane.xlu1 %3281 }
 0x9ad   :  { %v3276_v63 = vpop.xlane.xlu0 %3275  ;;  %4390 = vrot.lane.b32.xlu1 %v13936_v57, %s8363_s22  ;;  %v3415_v26 = vmul.f32 %v8140_v42, %v13937_v60  ;;  %v8142_v45 = vpop.eup %8141 }
 0x9ae   :  { %8151 = vrcp.f32 %v3276_v63  ;;  %4392 = vrot.lane.b32.xlu0 %v13938_v2, %s8363_s22  ;;  %v3418_v44 = vmul.f32 %v8142_v45, %v13942_v16 }
 0x9af   :  { %7450 = vmatprep.mubr.f32.mxu0 %v3415_v26  ;;  %8153 = vrcp.f32 %v3282_v23 }
 0x9b0   :  { %v8144_v32 = vpop.eup %8143  ;;  %7451 = vmatmul.mubr.f32.gmra.mrb[56].mxu0 %v3416_v0  ;;  %v3286_v1 = vpop.xlane.xlu1 %3285 }
 0x9b1   :  { %v3280_v43 = vpop.xlane.xlu0 %3279  ;;  %4314 = vrot.lane.b32.xlu1 %v13940_v35, %s8365_s11  ;;  %v3417_v53 = vmul.f32 %v8144_v32, %v11136_v22  ;;  %v8146_v5 = vpop.eup %8145  ;;  %v13944_v22 = vld [vmem:[#allocation52_spill] sm:$0xff] }
 0x9b2   :  { %8155 = vrcp.f32 %v3280_v43  ;;  %4316 = vrot.lane.b32.xlu0 %v13941_v18, %s8365_s11  ;;  %v3420_v37 = vmul.f32 %v8146_v5, %v11140_v14 }
 0x9b3   :  { %7453 = vmatprep.mubr.f32.mxu0 %v3417_v53  ;;  %8157 = vrcp.f32 %v3286_v1 }
 0x9b4   :  { %v8148_v29 = vpop.eup %8147  ;;  %7454 = vmatmul.mubr.f32.gmra.mrb[58].mxu0 %v3418_v44  ;;  %v3290_v54 = vpop.xlane.xlu1 %3289 }
 0x9b5   :  { %v3284_v61 = vpop.xlane.xlu0 %3283  ;;  %4394 = vrot.lane.b32.xlu1 %v13943_v10, %s8363_s22  ;;  %v3419_v31 = vmul.f32 %v8148_v29, %v11147_v52  ;;  %v8150_v11 = vpop.eup %8149  ;;  %v13946_v52 = vld [vmem:[#allocation6_spill] sm:$0xff] }
 0x9b6   :  { %8159 = vrcp.f32 %v3284_v61  ;;  %4396 = vrot.lane.b32.xlu0 %v13944_v22, %s8363_s22  ;;  %v3422_v21 = vmul.f32 %v8150_v11, %v11149_v4 }
 0x9b7   :  { %7456 = vmatprep.mubr.f32.mxu0 %v3419_v31  ;;  %8161 = vrcp.f32 %v3290_v54 }
 0x9b8   :  { %v8152_v20 = vpop.eup %8151  ;;  %7457 = vmatmul.mubr.f32.gmra.mrb[60].mxu0 %v3420_v37 }
 0x9b9   :  { %v3288_v3 = vpop.xlane.xlu0 %3287  ;;  %4318 = vrot.lane.b32.xlu1 %v13945_v15, %s8365_s11  ;;  %v3421_v40 = vmul.f32 %v8152_v20, %v11156_v46  ;;  %v8154_v6 = vpop.eup %8153 }
 0x9ba   :  { %8163 = vrcp.f32 %v3288_v3  ;;  %4320 = vrot.lane.b32.xlu0 %v13946_v52, %s8365_s11  ;;  %v3424_v25 = vmul.f32 %v8154_v6, %v11154_v39  ;;  %v13950_v6 = vld [vmem:[#allocation62_spill] sm:$0xff] }
 0x9bb   :  { %7459 = vmatprep.mubr.f32.mxu0 %v3421_v40 }
 0x9bc   :  { %v8156_v14 = vpop.eup %8155  ;;  %7460 = vmatmul.mubr.f32.gmra.mrb[62].mxu0 %v3422_v21 }
 0x9bd   :  { %v3292_v34 = vpop.xlane.xlu0 %3291  ;;  %4398 = vrot.lane.b32.xlu1 %v13947_v41, %s8363_s22  ;;  %v3423_v62 = vmul.f32 %v8156_v14, %v11162_v30  ;;  %v8158_v27 = vpop.eup %8157 }
 0x9be   :  { %8165 = vrcp.f32 %v3292_v34  ;;  %v3426_v59 = vmul.f32 %v8158_v27, %v11160_v55  ;;  %v13951_v34 = vld [vmem:[#allocation34_spill] sm:$0xff] }
 0x9bf   :  { %7462 = vmatprep.mubr.f32.mxu0 %v3423_v62 }
 0x9c0   :  { %v8160_v46 = vpop.eup %8159  ;;  %7463 = vmatmul.mubr.f32.gmra.mrb[64].mxu0 %v3424_v25 }
 0x9c1   :  { %v3425_v17 = vmul.f32 %v8160_v46, %v11169_v19  ;;  %v8162_v4 = vpop.eup %8161 }
 0x9c2   :  { %v3428_v8 = vmul.f32 %v8162_v4, %v13949_v58 }
 0x9c3   :  { %7465 = vmatprep.mubr.f32.mxu0 %v3425_v17 }
 0x9c4   :  { %v8164_v51 = vpop.eup %8163  ;;  %7466 = vmatmul.mubr.f32.gmra.mrb[66].mxu0 %v3426_v59 }
 0x9c5   :  { %v3427_v47 = vmul.f32 %v8164_v51, %v13948_v12 }
 0x9c7   :  { %7468 = vmatprep.mubr.f32.mxu0 %v3427_v47 }
 0x9c8   :  { %v8166_v30 = vpop.eup %8165  ;;  %7469 = vmatmul.mubr.f32.gmra.mrb[68].mxu0 %v3428_v8 }
 0x9c9   :  { %v3429_v39 = vmul.f32 %v8166_v30, %v11179_v48 }
 0x9cb   :  { %7471 = vmatprep.mubr.f32.mxu0 %v3429_v39 }
 0x9e9   :  { %v3294_v9 = vpop.xlane.xlu1 %3293 }
 0x9ea   :  { %8167 = vrcp.f32 %v3294_v9 }
 0x9ed   :  { %v3296_v42 = vpop.xlane.xlu0 %3295 }
 0x9ee   :  { %8169 = vrcp.f32 %v3296_v42 }
 0x9f4   :  { %v8168_v19 = vpop.eup %8167 }
 0x9f5   :  { %v3298_v23 = vpop.xlane.xlu1 %3297  ;;  %v3430_v55 = vmul.f32 %v8168_v19, %v11197_v49 }
 0x9f6   :  { %8171 = vrcp.f32 %v3298_v23 }
 0x9f7   :  { %7472 = vmatmul.mubr.f32.gmra.mrb[70].mxu0 %v3430_v55 }
 0x9f8   :  { %v8170_v63 = vpop.eup %8169 }
 0x9f9   :  { %v3431_v57 = vmul.f32 %v8170_v63, %v11200_v56 }
 0x9fb   :  { %7474 = vmatprep.mubr.f32.mxu0 %v3431_v57 }
 0x9fd   :  { %v3302_v60 = vpop.xlane.xlu1 %3301 }
 0x9fe   :  { %8173 = vrcp.f32 %v3302_v60  ;;  %v3300_v26 = vpop.xlane.xlu0 %3299 }
 0x9ff   :  { %8175 = vrcp.f32 %v3300_v26 }
 0xa00   :  { %v8172_v48 = vpop.eup %8171 }
 0xa01   :  { %v3432_v2 = vmul.f32 %v8172_v48, %v11206_v28 }
 0xa02   :  { %v3304_v38 = vpop.xlane.xlu0 %3303 }
 0xa03   :  { %8177 = vrcp.f32 %v3304_v38  ;;  %7475 = vmatmul.mubr.f32.gmra.mrb[72].mxu0 %v3432_v2 }
 0xa05   :  { %v3306_v0 = vpop.xlane.xlu1 %3305 }
 0xa06   :  { %8179 = vrcp.f32 %v3306_v0 }
 0xa07   :  { %v7392_v45 = vpop.f32.mrb[16].mxu0 }
 0xa08   :  { %v8174_v49 = vpop.eup %8173  ;;  %v3569_v32 = vpop.f32.mrb[17].mxu0  ;;  %v3889_v14 = vmul.f32 %v7392_v45, %v13950_v6 }
 0xa09   :  { %v8176_v1 = vpop.eup %8175  ;;  %v3308_v43 = vpop.xlane.xlu0 %3307  ;;  %v3434_v56 = vmul.f32 %v8174_v49, %v11214_v50 }
 0xa0a   :  { %8181 = vrcp.f32 %v3308_v43  ;;  %v3433_v35 = vmul.f32 %v8176_v1, %v11216_v13 }
 0xa0b   :  { %v7395_v53 = vpop.f32.mrb[18].mxu0 }
 0xa0c   :  { %7477 = vmatprep.mubr.f32.mxu0 %v3433_v35  ;;  %v3579_v18 = vpop.f32.mrb[19].mxu0  ;;  %v3891_v17 = vmul.f32 %v7395_v53, %v13950_v6 }
 0xa0d   :  { %v8178_v16 = vpop.eup %8177  ;;  %7478 = vmatmul.mubr.f32.gmra.mrb[74].mxu0 %v3434_v56  ;;  %v3310_v28 = vpop.xlane.xlu1 %3309  ;;  %v3890_v51 = vmul.f32 %v3579_v18, %v13950_v6 }
 0xa0e   :  { %8183 = vrcp.f32 %v3310_v28  ;;  %v3435_v44 = vmul.f32 %v8178_v16, %v11222_v24 }
 0xa0f   :  { %v7398_v5 = vpop.f32.mrb[20].mxu0 }
 0xa10   :  { %v8180_v29 = vpop.eup %8179  ;;  %7480 = vmatprep.mubr.f32.mxu0 %v3435_v44  ;;  %v3589_v61 = vpop.f32.mrb[21].mxu0  ;;  %v3893_v30 = vmul.f32 %v7398_v5, %v13950_v6 }
 0xa11   :  { %v3436_v54 = vmul.f32 %v8180_v29, %v11226_v36  ;;  %v3892_v42 = vmul.f32 %v3589_v61, %v13950_v6 }
 0xa13   :  { %v7401_v10 = vpop.f32.mrb[22].mxu0  ;;  %7481 = vmatmul.mubr.f32.gmra.mrb[76].mxu0 %v3436_v54 }
 0xa14   :  { %v8182_v50 = vpop.eup %8181  ;;  %v3599_v31 = vpop.f32.mrb[23].mxu0  ;;  %v3895_v57 = vmul.f32 %v7401_v10, %v13950_v6 }
 0xa15   :  { %v3437_v13 = vmul.f32 %v8182_v50, %v11230_v33  ;;  %v3888_v33 = vmul.f32 %v3569_v32, %v13950_v6  ;;  %v3894_v48 = vmul.f32 %v3599_v31, %v13950_v6 }
 0xa17   :  { %v7404_v22 = vpop.f32.mrb[24].mxu0  ;;  %7483 = vmatprep.mubr.f32.mxu0 %v3437_v13 }
 0xa18   :  { %v8184_v37 = vpop.eup %8183  ;;  %v3609_v11 = vpop.f32.mrb[25].mxu0  ;;  %v3897_v49 = vmul.f32 %v7404_v22, %v13950_v6 }
 0xa19   :  { %v3438_v20 = vmul.f32 %v8184_v37, %v11234_v7  ;;  %v3896_v43 = vmul.f32 %v3609_v11, %v13950_v6 }
 0xa1b   :  { %v7407_v3 = vpop.f32.mrb[26].mxu0  ;;  %7484 = vmatmul.mubr.f32.gmra.mrb[78].mxu0 %v3438_v20 }
 0xa1c   :  { %v3619_v24 = vpop.f32.mrb[27].mxu0  ;;  %v3899_v16 = vmul.f32 %v7407_v3, %v13950_v6 }
 0xa1d   :  { %v3898_v5 = vmul.f32 %v3619_v24, %v13950_v6 }
 0xa3f   :  { %v7410_v15 = vpop.f32.mrb[28].mxu0 }
 0xa40   :  { %v3629_v40 = vpop.f32.mrb[29].mxu0  ;;  %v3901_v50 = vmul.f32 %v7410_v15, %v13950_v6 }
 0xa41   :  { %v3900_v22 = vmul.f32 %v3629_v40, %v13950_v6 }
 0xa47   :  { %v7413_v52 = vpop.f32.mrb[30].mxu0 }
 0xa48   :  { %v3639_v21 = vpop.f32.mrb[31].mxu0 }
 0xa4e   :  { %v7416_v36 = vpop.f32.mrb[32].mxu0 }
 0xa4f   :  { %v3921_v41 = vmul.f32 %v7416_v36, %v13951_v34  ;;  %v3649_v62 = vpop.f32.mrb[33].mxu0  ;;  %v3903_v36 = vmul.f32 %v7413_v52, %v13950_v6 }
 0xa50   :  { %v3920_v25 = vmul.f32 %v3649_v62, %v13951_v34 }
 0xa51   :  { %v3937_v27 = vadd.f32 %v3921_v41, %v3889_v14  ;;  %v3902_v41 = vmul.f32 %v3639_v21, %v13950_v6 }
 0xa52   :  { %v3936_v46 = vadd.f32 %v3920_v25, %v3888_v33 }
 0xa56   :  { %v7419_v7 = vpop.f32.mrb[34].mxu0 }
 0xa57   :  { %v3923_v4 = vmul.f32 %v7419_v7, %v13951_v34  ;;  %v3659_v59 = vpop.f32.mrb[35].mxu0  ;;  %v13952_v7 = vld [vmem:[#allocation42_spill] sm:$0xff] }
 0xa58   :  { %v3922_v12 = vmul.f32 %v3659_v59, %v13951_v34 }
 0xa59   :  { %v3939_v47 = vadd.f32 %v3923_v4, %v3891_v17 }
 0xa5a   :  { %v3938_v58 = vadd.f32 %v3922_v12, %v3890_v51 }
 0xa5b   :  { %v7422_v8 = vpop.f32.mrb[36].mxu0 }
 0xa5c   :  { %v3925_v39 = vmul.f32 %v7422_v8, %v13951_v34  ;;  %v3669_v9 = vpop.f32.mrb[37].mxu0 }
 0xa5d   :  { %v3924_v19 = vmul.f32 %v3669_v9, %v13951_v34 }
 0xa5e   :  { %v3941_v23 = vadd.f32 %v3925_v39, %v3893_v30 }
 0xa5f   :  { %v3940_v55 = vadd.f32 %v3924_v19, %v3892_v42  ;;  %v7425_v63 = vpop.f32.mrb[38].mxu0 }
 0xa60   :  { %v3927_v60 = vmul.f32 %v7425_v63, %v13951_v34  ;;  %v3679_v26 = vpop.f32.mrb[39].mxu0 }
 0xa61   :  { %v3926_v2 = vmul.f32 %v3679_v26, %v13951_v34 }
 0xa62   :  { %v3943_v38 = vadd.f32 %v3927_v60, %v3895_v57 }
 0xa63   :  { %v3942_v0 = vadd.f32 %v3926_v2, %v3894_v48  ;;  %v7428_v45 = vpop.f32.mrb[40].mxu0 }
 0xa64   :  { %v3929_v32 = vmul.f32 %v7428_v45, %v13951_v34  ;;  %v3689_v1 = vpop.f32.mrb[41].mxu0 }
 0xa65   :  { %v3928_v56 = vmul.f32 %v3689_v1, %v13951_v34 }
 0xa66   :  { %v3945_v35 = vadd.f32 %v3929_v32, %v3897_v49 }
 0xa67   :  { %v3944_v53 = vadd.f32 %v3928_v56, %v3896_v43  ;;  %v7431_v18 = vpop.f32.mrb[42].mxu0 }
 0xa68   :  { %v3931_v28 = vmul.f32 %v7431_v18, %v13951_v34  ;;  %v3699_v44 = vpop.f32.mrb[43].mxu0 }
 0xa69   :  { %v3930_v29 = vmul.f32 %v3699_v44, %v13951_v34 }
 0xa6a   :  { %v3947_v61 = vadd.f32 %v3931_v28, %v3899_v16 }
 0xa6b   :  { %v3946_v54 = vadd.f32 %v3930_v29, %v3898_v5  ;;  %v7434_v10 = vpop.f32.mrb[44].mxu0 }
 0xa6c   :  { %v3933_v31 = vmul.f32 %v7434_v10, %v13951_v34  ;;  %v3709_v13 = vpop.f32.mrb[45].mxu0 }
 0xa6d   :  { %v3932_v37 = vmul.f32 %v3709_v13, %v13951_v34 }
 0xa6e   :  { %v3949_v11 = vadd.f32 %v3933_v31, %v3901_v50  ;;  %v13953_v31 = vld [vmem:[#allocation47_spill] sm:$0xff] }
 0xa6f   :  { %v3948_v20 = vadd.f32 %v3932_v37, %v3900_v22  ;;  %v7437_v3 = vpop.f32.mrb[46].mxu0 }
 0xa70   :  { %v3935_v24 = vmul.f32 %v7437_v3, %v13951_v34  ;;  %v3719_v14 = vpop.f32.mrb[47].mxu0 }
 0xa71   :  { %v3934_v62 = vmul.f32 %v3719_v14, %v13951_v34 }
 0xa72   :  { %v3951_v15 = vadd.f32 %v3935_v24, %v3903_v36 }
 0xa73   :  { %v3950_v33 = vadd.f32 %v3934_v62, %v3902_v41  ;;  %v7440_v25 = vpop.f32.mrb[48].mxu0 }
 0xa74   :  { %v3953_v17 = vmul.f32 %v7440_v25, %v13952_v7  ;;  %v3729_v40 = vpop.f32.mrb[49].mxu0 }
 0xa75   :  { %v3952_v4 = vmul.f32 %v3729_v40, %v13952_v7 }
 0xa76   :  { %v3969_v59 = vadd.f32 %v3953_v17, %v3937_v27 }
 0xa77   :  { %v3968_v51 = vadd.f32 %v3952_v4, %v3936_v46  ;;  %v7443_v12 = vpop.f32.mrb[50].mxu0 }
 0xa78   :  { %v3955_v52 = vmul.f32 %v7443_v12, %v13952_v7  ;;  %v3739_v8 = vpop.f32.mrb[51].mxu0 }
 0xa79   :  { %v3954_v30 = vmul.f32 %v3739_v8, %v13952_v7 }
 0xa7a   :  { %v3971_v39 = vadd.f32 %v3955_v52, %v3939_v47 }
 0xa7b   :  { %v3970_v21 = vadd.f32 %v3954_v30, %v3938_v58  ;;  %v7446_v6 = vpop.f32.mrb[52].mxu0 }
 0xa7c   :  { %v3957_v34 = vmul.f32 %v7446_v6, %v13952_v7  ;;  %v3749_v9 = vpop.f32.mrb[53].mxu0 }
 0xa7d   :  { %v3956_v42 = vmul.f32 %v3749_v9, %v13952_v7 }
 0xa7e   :  { %v3973_v19 = vadd.f32 %v3957_v34, %v3941_v23 }
 0xa7f   :  { %v3972_v63 = vadd.f32 %v3956_v42, %v3940_v55  ;;  %v7449_v57 = vpop.f32.mrb[54].mxu0 }
 0xa80   :  { %v3959_v27 = vmul.f32 %v7449_v57, %v13952_v7  ;;  %v3759_v46 = vpop.f32.mrb[55].mxu0 }
 0xa81   :  { %v3958_v60 = vmul.f32 %v3759_v46, %v13952_v7 }
 0xa82   :  { %v3975_v26 = vadd.f32 %v3959_v27, %v3943_v38 }
 0xa83   :  { %v3974_v48 = vadd.f32 %v3958_v60, %v3942_v0  ;;  %v7452_v2 = vpop.f32.mrb[56].mxu0 }
 0xa84   :  { %v3961_v47 = vmul.f32 %v7452_v2, %v13952_v7  ;;  %v3769_v58 = vpop.f32.mrb[57].mxu0 }
 0xa85   :  { %v3960_v45 = vmul.f32 %v3769_v58, %v13952_v7 }
 0xa86   :  { %v11370_v49 = vadd.f32 %v3961_v47, %v3945_v35  ;;  %v11444_v47 = vpop.permute.xlu1 %4300 }
 0xa87   :  { %v11372_v32 = vadd.f32 %v3960_v45, %v3944_v53  ;;  %v7455_v23 = vpop.f32.mrb[58].mxu0 }
 0xa88   :  { %v3963_v55 = vmul.f32 %v7455_v23, %v13952_v7  ;;  %v3779_v1 = vpop.f32.mrb[59].mxu0 }
 0xa89   :  { %v3962_v43 = vmul.f32 %v3779_v1, %v13952_v7 }
 0xa8a   :  { %v11376_v56 = vadd.f32 %v3963_v55, %v3947_v61 }
 0xa8b   :  { %v11378_v38 = vadd.f32 %v3962_v43, %v3946_v54  ;;  %v7458_v0 = vpop.f32.mrb[60].mxu0 }
 0xa8c   :  { %v3965_v18 = vmul.f32 %v7458_v0, %v13952_v7  ;;  %v3789_v16 = vpop.f32.mrb[61].mxu0 }
 0xa8d   :  { %v3964_v28 = vmul.f32 %v3789_v16, %v13952_v7  ;;  %v11462_v16 = vpop.permute.xlu1 %4378 }
 0xa8e   :  { %v11382_v35 = vadd.f32 %v3965_v18, %v3949_v11 }
 0xa8f   :  { %v11384_v53 = vadd.f32 %v3964_v28, %v3948_v20  ;;  %v7461_v44 = vpop.f32.mrb[62].mxu0 }
 0xa90   :  { %v3967_v5 = vmul.f32 %v7461_v44, %v13952_v7  ;;  %v3799_v29 = vpop.f32.mrb[63].mxu0 }
 0xa91   :  { %v3966_v10 = vmul.f32 %v3799_v29, %v13952_v7 }
 0xa92   :  { %v11388_v61 = vadd.f32 %v3967_v5, %v3951_v15  ;;  %v11466_v5 = vpop.permute.xlu0 %4298 }
 0xa93   :  { %v11390_v54 = vadd.f32 %v3966_v10, %v3950_v33  ;;  %v7464_v50 = vpop.f32.mrb[64].mxu0 }
 0xa94   :  { %v3985_v13 = vmul.f32 %v7464_v50, %v13953_v31  ;;  %v3809_v22 = vpop.f32.mrb[65].mxu0 }
 0xa95   :  { %v3984_v37 = vmul.f32 %v3809_v22, %v13953_v31  ;;  %v11478_v22 = vpop.permute.xlu1 %4302 }
 0xa96   :  { %v11394_v11 = vadd.f32 %v3985_v13, %v3969_v59 }
 0xa97   :  { %v11396_v20 = vadd.f32 %v3984_v37, %v3968_v51  ;;  %v7467_v3 = vpop.f32.mrb[66].mxu0 }
 0xa98   :  { %v3987_v36 = vmul.f32 %v7467_v3, %v13953_v31  ;;  %v3819_v24 = vpop.f32.mrb[67].mxu0  ;;  %v4021_v14 = vsel %vm50_vm0, %v11394_v11, 0.0  ;;  %v11482_v3 = vpop.permute.xlu0 %4380 }
 0xa99   :  { %v3986_v41 = vmul.f32 %v3819_v24, %v13953_v31  ;;  %4022 = vadd.xlane.f32.xlu1 %v4021_v14  ;;  %v4018_v62 = vsel %vm50_vm0, %v11396_v20, 0.0 }
 0xa9a   :  { %v11404_v15 = vadd.f32 %v3987_v36, %v3971_v39  ;;  %4019 = vadd.xlane.f32.xlu0 %v4018_v62 }
 0xa9b   :  { %v11406_v33 = vadd.f32 %v3986_v41, %v3970_v21  ;;  %v7470_v25 = vpop.f32.mrb[68].mxu0  ;;  %v11489_v41 = vpop.permute.xlu1 %4382 }
 0xa9c   :  { %v3989_v7 = vmul.f32 %v7470_v25, %v13953_v31  ;;  %v3829_v17 = vpop.f32.mrb[69].mxu0  ;;  %v4027_v40 = vsel %vm50_vm0, %v11404_v15, 0.0  ;;  %v11494_v25 = vpop.permute.xlu0 %4304 }
 0xa9d   :  { %v3988_v4 = vmul.f32 %v3829_v17, %v13953_v31  ;;  %4028 = vadd.xlane.f32.xlu1 %v4027_v40  ;;  %v4024_v59 = vsel %vm50_vm0, %v11406_v33, 0.0 }
 0xa9e   :  { %v11414_v51 = vadd.f32 %v3989_v7, %v3973_v19  ;;  %4025 = vadd.xlane.f32.xlu0 %v4024_v59 }
 0xa9f   :  { %v11416_v12 = vadd.f32 %v3988_v4, %v3972_v63  ;;  %v11500_v40 = vpop.permute.xlu1 %4306 }
 0xaa0   :  { %v4033_v52 = vsel %vm50_vm0, %v11414_v51, 0.0 }
 0xaa1   :  { %4034 = vadd.xlane.f32.xlu1 %v4033_v52  ;;  %v4030_v8 = vsel %vm50_vm0, %v11416_v12, 0.0  ;;  %v13954_v52 = vld [vmem:[#allocation40_spill] sm:$0xff] }
 0xaa2   :  { %4031 = vadd.xlane.f32.xlu0 %v4030_v8 }
 0xaca   :  { %v7473_v30 = vpop.f32.mrb[70].mxu0 }
 0xacb   :  { %v3991_v39 = vmul.f32 %v7473_v30, %v13953_v31  ;;  %v3839_v21 = vpop.f32.mrb[71].mxu0 }
 0xacc   :  { %v3990_v6 = vmul.f32 %v3839_v21, %v13953_v31 }
 0xacd   :  { %v11424_v34 = vadd.f32 %v3991_v39, %v3975_v26  ;;  %v13955_v39 = vld [vmem:[#allocation80_spill] sm:$0xff] }
 0xace   :  { %v11426_v9 = vadd.f32 %v3990_v6, %v3974_v48 }
 0xacf   :  { %v4039_v42 = vsel %vm50_vm0, %v11424_v34, 0.0 }
 0xad0   :  { %4040 = vadd.xlane.f32.xlu1 %v4039_v42  ;;  %v4036_v19 = vsel %vm50_vm0, %v11426_v9, 0.0 }
 0xad1   :  { %4037 = vadd.xlane.f32.xlu0 %v4036_v19 }
 0xad6   :  { %v7476_v63 = vpop.f32.mrb[72].mxu0 }
 0xad7   :  { %v3993_v57 = vmul.f32 %v7476_v63, %v13953_v31  ;;  %v3849_v27 = vpop.f32.mrb[73].mxu0  ;;  %v4539_v63 = vld [vmem:[%s13499_s4 + $0x10] sm:$0xff] }
 0xad8   :  { %v3992_v46 = vmul.f32 %v3849_v27, %v13953_v31 }
 0xad9   :  { %v11435_v60 = vadd.f32 %v3993_v57, %v11370_v49  ;;  %v4537_v49 = vld [vmem:[%s13499_s4] sm:$0xff]  ;;  %v4540_v57 = vld [vmem:[%s13499_s4 + $0x18] sm:$0xff] }
 0xada   :  { %v11438_v26 = vadd.f32 %v3992_v46, %v11372_v32  ;;  %v4538_v32 = vld [vmem:[%s13499_s4 + $0x8] sm:$0xff]  ;;  %v7682_v27 = vpack.c.bf16 %v4540_v57, %v4539_v63 }
 0xadb   :  { %v4045_v48 = vsel %vm50_vm0, %v11435_v60, 0.0  ;;  %v7678_v1 = vpack.c.bf16 %v4538_v32, %v4537_v49 }
 0xadc   :  { %4046 = vadd.xlane.f32.xlu1 %v4045_v48  ;;  %v4042_v2 = vsel %vm50_vm0, %v11438_v26, 0.0 }
 0xadd   :  { %4043 = vadd.xlane.f32.xlu0 %v4042_v2  ;;  %7679 = vmatprep.subr.bf16.mxu0 %v7678_v1 }
 0xade   :  { %7681 = vmatpush3.bf16.msra.mxu0 %v7678_v1 }
 0xadf   :  { %7683 = vmatprep.subr.bf16.mxu0 %v7682_v27 }
 0xae0   :  { %v7479_v58 = vpop.f32.mrb[74].mxu0 }
 0xae1   :  { %v3995_v45 = vmul.f32 %v7479_v58, %v13953_v31  ;;  %v3859_v23 = vpop.f32.mrb[75].mxu0 }
 0xae2   :  { %v3994_v55 = vmul.f32 %v3859_v23, %v13953_v31  ;;  %7685 = vmatpush3.bf16.msra.mxu0 %v7682_v27 }
 0xae3   :  { %v11455_v43 = vadd.f32 %v3995_v45, %v11376_v56 }
 0xae4   :  { %v11458_v0 = vadd.f32 %v3994_v55, %v11378_v38 }
 0xae5   :  { %v4051_v18 = vsel %vm50_vm0, %v11455_v43, 0.0 }
 0xae6   :  { %4052 = vadd.xlane.f32.xlu1 %v4051_v18  ;;  %v4048_v28 = vsel %vm50_vm0, %v11458_v0, 0.0  ;;  %v7482_v44 = vpop.f32.mrb[76].mxu0 }
 0xae7   :  { %4049 = vadd.xlane.f32.xlu0 %v4048_v28  ;;  %v3997_v56 = vmul.f32 %v7482_v44, %v13953_v31  ;;  %v3869_v29 = vpop.f32.mrb[77].mxu0 }
 0xae8   :  { %v3996_v38 = vmul.f32 %v3869_v29, %v13953_v31 }
 0xae9   :  { %v11471_v10 = vadd.f32 %v3997_v56, %v11382_v35 }
 0xaea   :  { %v11474_v50 = vadd.f32 %v3996_v38, %v11384_v53 }
 0xaeb   :  { %v4057_v13 = vsel %vm50_vm0, %v11471_v10, 0.0 }
 0xaec   :  { %4058 = vadd.xlane.f32.xlu1 %v4057_v13  ;;  %v4054_v37 = vsel %vm50_vm0, %v11474_v50, 0.0 }
 0xaed   :  { %4055 = vadd.xlane.f32.xlu0 %v4054_v37 }
 0xaee   :  { %v7485_v36 = vpop.f32.mrb[78].mxu0 }
 0xaef   :  { %v3999_v24 = vmul.f32 %v7485_v36, %v13953_v31  ;;  %v3879_v35 = vpop.f32.mrb[79].mxu0 }
 0xaf0   :  { %v3998_v14 = vmul.f32 %v3879_v35, %v13953_v31  ;;  %v11502_v31 = vpop.permute.xlu0 %4384 }
 0xaf1   :  { %v11487_v53 = vadd.f32 %v3999_v24, %v11388_v61  ;;  %v11504_v61 = vpop.permute.xlu1 %4386 }
 0xaf2   :  { %v11492_v62 = vadd.f32 %v3998_v14, %v11390_v54 }
 0xaf3   :  { %v4063_v7 = vsel %vm50_vm0, %v11487_v53, 0.0 }
 0xaf4   :  { %4064 = vadd.xlane.f32.xlu1 %v4063_v7  ;;  %v4060_v17 = vsel %vm50_vm0, %v11492_v62, 0.0  ;;  %v11506_v4 = vpop.permute.xlu0 %4308 }
 0xaf5   :  { %4061 = vadd.xlane.f32.xlu0 %v4060_v17  ;;  %v11508_v54 = vpop.permute.xlu1 %4310 }
 0xaf8   :  { %v11510_v59 = vpop.permute.xlu0 %4388 }
 0xaf9   :  { %v11514_v8 = vpop.permute.xlu1 %4390 }
 0xafc   :  { %v11516_v30 = vpop.permute.xlu0 %4312 }
 0xafd   :  { %v11520_v21 = vpop.permute.xlu1 %4314 }
 0xb00   :  { %v11522_v6 = vpop.permute.xlu0 %4392 }
 0xb01   :  { %v11524_v42 = vpop.permute.xlu1 %4394 }
 0xb04   :  { %v11526_v19 = vpop.permute.xlu0 %4316 }
 0xb05   :  { %4322 = vrot.lane.b32.xlu1 %v13954_v52, %s8365_s11  ;;  %v11534_v46 = vpop.permute.xlu1 %4318 }
 0xb08   :  { %v11536_v48 = vpop.permute.xlu0 %4396 }
 0xb09   :  { %v11538_v2 = vpop.permute.xlu1 %4398 }
 0xb0b   :  { %4400 = vrot.lane.b32.xlu0 %v13955_v39, %s8363_s22 }
 0xb0c   :  { %v11540_v58 = vpop.permute.xlu0 %4320 }
 0xb26   :  { %v4023_v45 = vpop.xlane.xlu1 %4022 }
 0xb27   :  { %v4067_v23 = vmul.f32 0.03125, %v4023_v45  ;;  %v4020_v49 = vpop.xlane.xlu0 %4019 }
 0xb28   :  { %v4066_v32 = vmul.f32 0.03125, %v4020_v49 }
 0xb29   :  { %v11543_v55 = vsub.f32 %v11394_v11, %v4067_v23 }
 0xb2a   :  { %v11546_v1 = vsub.f32 %v11396_v20, %v4066_v32  ;;  %v4029_v18 = vpop.xlane.xlu1 %4028 }
 0xb2b   :  { %v4069_v28 = vmul.f32 0.03125, %v4029_v18  ;;  %v4026_v44 = vpop.xlane.xlu0 %4025  ;;  %v4099_v56 = vmul.f32 %v11543_v55, %v11543_v55 }
 0xb2c   :  { %v4068_v29 = vmul.f32 0.03125, %v4026_v44  ;;  %v4098_v38 = vmul.f32 %v11546_v1, %v11546_v1 }
 0xb2d   :  { %v11553_v13 = vsub.f32 %v11404_v15, %v4069_v28  ;;  %v4117_v37 = vsel %vm50_vm0, %v4099_v56, 0.0 }
 0xb2e   :  { %v11557_v11 = vsub.f32 %v11406_v33, %v4068_v29  ;;  %v4035_v20 = vpop.xlane.xlu1 %4034  ;;  %4118 = vadd.xlane.f32.xlu1 %v4117_v37  ;;  %v4114_v36 = vsel %vm50_vm0, %v4098_v38, 0.0 }
 0xb2f   :  { %v4071_v24 = vmul.f32 0.03125, %v4035_v20  ;;  %v4032_v35 = vpop.xlane.xlu0 %4031  ;;  %4115 = vadd.xlane.f32.xlu0 %v4114_v36  ;;  %v4101_v14 = vmul.f32 %v11553_v13, %v11553_v13 }
 0xb30   :  { %v4070_v7 = vmul.f32 0.03125, %v4032_v35  ;;  %v4100_v15 = vmul.f32 %v11557_v11, %v11557_v11 }
 0xb31   :  { %v11565_v17 = vsub.f32 %v11414_v51, %v4071_v24  ;;  %v4123_v33 = vsel %vm50_vm0, %v4101_v14, 0.0 }
 0xb32   :  { %v11569_v52 = vsub.f32 %v11416_v12, %v4070_v7  ;;  %4124 = vadd.xlane.f32.xlu1 %v4123_v33  ;;  %v4120_v39 = vsel %vm50_vm0, %v4100_v15, 0.0 }
 0xb33   :  { %4121 = vadd.xlane.f32.xlu0 %v4120_v39  ;;  %v4103_v63 = vmul.f32 %v11565_v17, %v11565_v17 }
 0xb34   :  { %v4102_v57 = vmul.f32 %v11569_v52, %v11569_v52 }
 0xb35   :  { %v4129_v27 = vsel %vm50_vm0, %v4103_v63, 0.0 }
 0xb36   :  { %4130 = vadd.xlane.f32.xlu1 %v4129_v27  ;;  %v4126_v51 = vsel %vm50_vm0, %v4102_v57, 0.0 }
 0xb37   :  { %4127 = vadd.xlane.f32.xlu0 %v4126_v51 }
 0xb5d   :  { %v4041_v45 = vpop.xlane.xlu1 %4040 }
 0xb5e   :  { %v4073_v23 = vmul.f32 0.03125, %v4041_v45  ;;  %v4038_v12 = vpop.xlane.xlu0 %4037 }
 0xb5f   :  { %v4072_v49 = vmul.f32 0.03125, %v4038_v12 }
 0xb60   :  { %v11579_v32 = vsub.f32 %v11424_v34, %v4073_v23 }
 0xb61   :  { %v11582_v18 = vsub.f32 %v11426_v9, %v4072_v49 }
 0xb62   :  { %v4105_v28 = vmul.f32 %v11579_v32, %v11579_v32 }
 0xb63   :  { %v4104_v44 = vmul.f32 %v11582_v18, %v11582_v18 }
 0xb64   :  { %v4135_v56 = vsel %vm50_vm0, %v4105_v28, 0.0 }
 0xb65   :  { %4136 = vadd.xlane.f32.xlu1 %v4135_v56  ;;  %v4132_v29 = vsel %vm50_vm0, %v4104_v44, 0.0 }
 0xb66   :  { %4133 = vadd.xlane.f32.xlu0 %v4132_v29 }
 0xb69   :  { %v4047_v38 = vpop.xlane.xlu1 %4046 }
 0xb6a   :  { %v4075_v37 = vmul.f32 0.03125, %v4047_v38  ;;  %v4044_v20 = vpop.xlane.xlu0 %4043 }
 0xb6b   :  { %v4074_v34 = vmul.f32 0.03125, %v4044_v20 }
 0xb6c   :  { %v11591_v36 = vsub.f32 %v11435_v60, %v4075_v37 }
 0xb6d   :  { %v11594_v9 = vsub.f32 %v11438_v26, %v4074_v34 }
 0xb6e   :  { %v4107_v24 = vmul.f32 %v11591_v36, %v11591_v36 }
 0xb6f   :  { %v4106_v35 = vmul.f32 %v11594_v9, %v11594_v9 }
 0xb70   :  { %v4141_v14 = vsel %vm50_vm0, %v4107_v24, 0.0 }
 0xb71   :  { %4142 = vadd.xlane.f32.xlu1 %v4141_v14  ;;  %v4138_v7 = vsel %vm50_vm0, %v4106_v35, 0.0 }
 0xb72   :  { %4139 = vadd.xlane.f32.xlu0 %v4138_v7 }
 0xb73   :  { %v4053_v15 = vpop.xlane.xlu1 %4052 }
 0xb74   :  { %v4077_v33 = vmul.f32 0.03125, %v4053_v15  ;;  %v4050_v39 = vpop.xlane.xlu0 %4049 }
 0xb75   :  { %v4076_v60 = vmul.f32 0.03125, %v4050_v39  ;;  %v13959_v39 = vld [vmem:[#allocation84_spill] sm:$0xff] }
 0xb76   :  { %v11603_v63 = vsub.f32 %v11455_v43, %v4077_v33  ;;  %v13956_v33 = vld [vmem:[#allocation82_spill] sm:$0xff] }
 0xb77   :  { %v11606_v26 = vsub.f32 %v11458_v0, %v4076_v60  ;;  %v13960_v60 = vld [vmem:[#allocation31_spill] sm:$0xff] }
 0xb78   :  { %v4109_v57 = vmul.f32 %v11603_v63, %v11603_v63 }
 0xb79   :  { %v4059_v27 = vpop.xlane.xlu1 %4058  ;;  %v4108_v51 = vmul.f32 %v11606_v26, %v11606_v26 }
 0xb7a   :  { %v4079_v45 = vmul.f32 0.03125, %v4059_v27  ;;  %v4056_v23 = vpop.xlane.xlu0 %4055  ;;  %v4147_v12 = vsel %vm50_vm0, %v4109_v57, 0.0  ;;  %v13961_v57 = vld [vmem:[#allocation41_spill] sm:$0xff]  ;;  %v13962_v27 = vld [vmem:[#allocation83_spill] sm:$0xff] }
 0xb7b   :  { %v4078_v49 = vmul.f32 0.03125, %v4056_v23  ;;  %4148 = vadd.xlane.f32.xlu1 %v4147_v12  ;;  %v4144_v28 = vsel %vm50_vm0, %v4108_v51, 0.0 }
 0xb7c   :  { %v11615_v43 = vsub.f32 %v11471_v10, %v4079_v45  ;;  %4145 = vadd.xlane.f32.xlu0 %v4144_v28 }
 0xb7d   :  { %v11618_v0 = vsub.f32 %v11474_v50, %v4078_v49 }
 0xb7e   :  { %v4111_v44 = vmul.f32 %v11615_v43, %v11615_v43 }
 0xb7f   :  { %v4110_v56 = vmul.f32 %v11618_v0, %v11618_v0 }
 0xb80   :  { %v4153_v29 = vsel %vm50_vm0, %v4111_v44, 0.0 }
 0xb81   :  { %4154 = vadd.xlane.f32.xlu1 %v4153_v29  ;;  %v4065_v38 = vpop.xlane.xlu1 %4064  ;;  %v4150_v37 = vsel %vm50_vm0, %v4110_v56, 0.0 }
 0xb82   :  { %v4081_v20 = vmul.f32 0.03125, %v4065_v38  ;;  %4151 = vadd.xlane.f32.xlu0 %v4150_v37  ;;  %v4062_v10 = vpop.xlane.xlu0 %4061 }
 0xb83   :  { %v4080_v34 = vmul.f32 0.03125, %v4062_v10 }
 0xb84   :  { %v11627_v24 = vsub.f32 %v11487_v53, %v4081_v20  ;;  %v13957_v53 = vld [vmem:[#allocation33_spill] sm:$0xff] }
 0xb85   :  { %v11630_v50 = vsub.f32 %v11492_v62, %v4080_v34  ;;  %v13958_v62 = vld [vmem:[#allocation32_spill] sm:$0xff]  ;;  %v11652_v51 = vpop.permute.xlu1 %4322 }
 0xb86   :  { %v4113_v35 = vmul.f32 %v11627_v24, %v11627_v24  ;;  %v11654_v45 = vpop.permute.xlu0 %4400 }
 0xb87   :  { %v4112_v14 = vmul.f32 %v11630_v50, %v11630_v50 }
 0xb88   :  { %v4159_v7 = vsel %vm50_vm0, %v4113_v35, 0.0 }
 0xb89   :  { %4160 = vadd.xlane.f32.xlu1 %v4159_v7  ;;  %v4156_v15 = vsel %vm50_vm0, %v4112_v14, 0.0 }
 0xb8a   :  { %4157 = vadd.xlane.f32.xlu0 %v4156_v15 }
 0xb9a   :  { %4402 = vrot.lane.b32.xlu1 %v13956_v33, %s8363_s22 }
 0xb9e   :  { %4326 = vrot.lane.b32.xlu1 %v13957_v53, %s8365_s11 }
 0xba0   :  { %4324 = vrot.lane.b32.xlu0 %v13958_v62, %s8365_s11 }
 0xba2   :  { %4406 = vrot.lane.b32.xlu1 %v13959_v39, %s8363_s22  ;;  %v11659_v39 = vld [vmem:[%s13495_s1 + $0x1c] ss:$0 sm:$0xff] }
 0xba4   :  { %4404 = vrot.lane.b32.xlu0 %v13960_v60, %s8363_s22 }
 0xba8   :  { %4328 = vrot.lane.b32.xlu0 %v13961_v57, %s8365_s11 }
 0xbac   :  { %4408 = vrot.lane.b32.xlu0 %v13962_v27, %s8363_s22  ;;  %v11665_v27 = vld [vmem:[%s13495_s1 + $0x1d] ss:$0 sm:$0xff] }
 0xbbb   :  { %v4119_v23 = vpop.xlane.xlu1 %4118 }
 0xbbc   :  { %v4163_v12 = vmul.f32 0.03125, %v4119_v23  ;;  %v4116_v49 = vpop.xlane.xlu0 %4115 }
 0xbbd   :  { %v4162_v28 = vmul.f32 0.03125, %v4116_v49 }
 0xbbe   :  { %v4179_v44 = vadd.f32 1e-12, %v4163_v12 }
 0xbbf   :  { %v4178_v56 = vadd.f32 1e-12, %v4162_v28  ;;  %v4125_v29 = vpop.xlane.xlu1 %4124 }
 0xbc0   :  { %8185 = vrsqrt.f32 %v4179_v44  ;;  %v4165_v38 = vmul.f32 0.03125, %v4125_v29  ;;  %v4122_v37 = vpop.xlane.xlu0 %4121 }
 0xbc1   :  { %8187 = vrsqrt.f32 %v4178_v56  ;;  %v4164_v20 = vmul.f32 0.03125, %v4122_v37  ;;  %v13963_v37 = vld [vmem:[#allocation64_spill] sm:$0xff] }
 0xbc2   :  { %v4181_v10 = vadd.f32 1e-12, %v4165_v38 }
 0xbc3   :  { %v4180_v34 = vadd.f32 1e-12, %v4164_v20  ;;  %v4131_v35 = vpop.xlane.xlu1 %4130 }
 0xbc4   :  { %8189 = vrsqrt.f32 %v4181_v10  ;;  %v4167_v14 = vmul.f32 0.03125, %v4131_v35  ;;  %v4128_v7 = vpop.xlane.xlu0 %4127  ;;  %v13964_v35 = vld [vmem:[#allocation63_spill] sm:$0xff] }
 0xbc5   :  { %8191 = vrsqrt.f32 %v4180_v34  ;;  %v4166_v15 = vmul.f32 0.03125, %v4128_v7 }
 0xbc6   :  { %v4183_v33 = vadd.f32 1e-12, %v4167_v14 }
 0xbc7   :  { %v4182_v53 = vadd.f32 1e-12, %v4166_v15 }
 0xbc8   :  { %8193 = vrsqrt.f32 %v4183_v33 }
 0xbc9   :  { %8195 = vrsqrt.f32 %v4182_v53 }
 0xbca   :  { %v8186_v62 = vpop.eup %8185 }
 0xbcb   :  { %v8188_v60 = vpop.eup %8187  ;;  %v4211_v57 = vmul.f32 %v8186_v62, %v11543_v55 }
 0xbcc   :  { %v4210_v23 = vmul.f32 %v8188_v60, %v11546_v1  ;;  %v11687_v60 = vld [vmem:[%s13495_s1 + $0x1e] ss:$0 sm:$0xff] }
 0xbcd   :  { %v4231_v12 = vmul.f32 %v11659_v39, %v4211_v57 }
 0xbce   :  { %v8190_v49 = vpop.eup %8189  ;;  %v4230_v28 = vmul.f32 %v11659_v39, %v4210_v23 }
 0xbcf   :  { %v8192_v44 = vpop.eup %8191  ;;  %v4251_v56 = vadd.f32 %v11665_v27, %v4231_v12  ;;  %v4213_v29 = vmul.f32 %v8190_v49, %v11553_v13 }
 0xbd0   :  { %v4250_v38 = vadd.f32 %v11665_v27, %v4230_v28  ;;  %v4212_v55 = vmul.f32 %v8192_v44, %v11557_v11 }
 0xbd1   :  { %v4267_v20 = vadd.f32 %v4251_v56, %v13963_v37  ;;  %v4233_v10 = vmul.f32 %v11659_v39, %v4213_v29 }
 0xbd2   :  { %v8194_v34 = vpop.eup %8193  ;;  %v4232_v1 = vmul.f32 %v11659_v39, %v4212_v55  ;;  %v4266_v14 = vadd.f32 %v4250_v38, %v13964_v35  ;;  %v13968_v35 = vld [vmem:[#allocation69_spill] sm:$0xff] }
 0xbd3   :  { %v8196_v7 = vpop.eup %8195  ;;  %v4347_v15 = vadd.f32 %v11444_v47, %v4267_v20  ;;  %v4253_v33 = vadd.f32 %v11665_v27, %v4233_v10  ;;  %v4215_v13 = vmul.f32 %v8194_v34, %v11565_v17  ;;  %v13965_v47 = vld [vmem:[#allocation65_spill] sm:$0xff]  ;;  %v13967_v20 = vld [vmem:[#allocation67_spill] sm:$0xff]  ;;  %v11712_v34 = vld [vmem:[%s13495_s1 + $0x20] ss:$0 sm:$0xff] }
 0xbd4   :  { %v4252_v53 = vadd.f32 %v11665_v27, %v4232_v1  ;;  %v4214_v11 = vmul.f32 %v8196_v7, %v11569_v52  ;;  %v4346_v62 = vadd.f32 %v11466_v5, %v4266_v14  ;;  %v11697_v52 = vld [vmem:[%s13495_s1 + $0x1f] ss:$0 sm:$0xff]  ;;  %v13966_v5 = vld [vmem:[#allocation66_spill] sm:$0xff] }
 0xbd5   :  { %v4427_v57 = vadd.f32 %v11482_v3, %v4347_v15  ;;  %v4235_v23 = vmul.f32 %v11659_v39, %v4215_v13  ;;  %v4269_v12 = vadd.f32 %v4253_v33, %v13965_v47 }
 0xbd6   :  { %v4234_v49 = vmul.f32 %v11659_v39, %v4214_v11  ;;  %v4426_v17 = vadd.f32 %v11462_v16, %v4346_v62  ;;  %v4268_v28 = vadd.f32 %v4252_v53, %v13966_v5 }
 0xbd7   :  { %v4255_v44 = vadd.f32 %v11665_v27, %v4235_v23  ;;  %v4450_v56 = vsub.f32 %v4427_v57, %v11687_v60  ;;  %v4349_v3 = vadd.f32 %v11494_v25, %v4269_v12 }
 0xbd8   :  { %v4254_v29 = vadd.f32 %v11665_v27, %v4234_v49  ;;  %v4449_v38 = vsub.f32 %v4426_v17, %v11687_v60  ;;  %v4348_v55 = vadd.f32 %v11478_v22, %v4268_v28 }
 0xbd9   :  { %vm4466_vm9 = vcmp.gt.f32.partialorder %v4450_v56, 0.0  ;;  %v4486_v16 = vmul.f32 %v11697_v52, %v4450_v56  ;;  %v4429_v37 = vadd.f32 %v11502_v31, %v4349_v3  ;;  %v4271_v10 = vadd.f32 %v4255_v44, %v13967_v20 }
 0xbda   :  { %vm4465_vm10 = vcmp.gt.f32.partialorder %v4449_v38, 0.0  ;;  %v4485_v25 = vmul.f32 %v11697_v52, %v4449_v38  ;;  %v4428_v1 = vadd.f32 %v11489_v41, %v4348_v55  ;;  %v4270_v14 = vadd.f32 %v4254_v29, %v13968_v35 }
 0xbdb   :  { %v4502_v22 = vsel %vm4466_vm9, %v4450_v56, %v4486_v16  ;;  %v4452_v7 = vsub.f32 %v4429_v37, %v11687_v60  ;;  %v4351_v15 = vadd.f32 %v11506_v4, %v4271_v10 }
 0xbdc   :  { %v4501_v31 = vsel %vm4465_vm10, %v4449_v38, %v4485_v25  ;;  %v4451_v33 = vsub.f32 %v4428_v1, %v11687_v60  ;;  %v4350_v13 = vadd.f32 %v11500_v40, %v4270_v14  ;;  %v11727_v62 = vadd.f32 %v11712_v34, %v4502_v22 }
 0xbdd   :  { %v11722_v53 = vadd.f32 %v11712_v34, %v4501_v31  ;;  %vm4468_vm11 = vcmp.gt.f32.partialorder %v4452_v7, 0.0  ;;  %v4488_v11 = vmul.f32 %v11697_v52, %v4452_v7  ;;  %v4431_v41 = vadd.f32 %v11510_v59, %v4351_v15 }
 0xbde   :  { %vm4467_vm12 = vcmp.gt.f32.partialorder %v4451_v33, 0.0  ;;  %v4487_v57 = vmul.f32 %v11697_v52, %v4451_v33  ;;  %v4430_v4 = vadd.f32 %v11504_v61, %v4350_v13 }
 0xbdf   :  { %7494 = vmatprep.mubr.msk.f32.mxu0 %vm50_vm0, %v11722_v53  ;;  %v4504_v40 = vsel %vm4468_vm11, %v4452_v7, %v4488_v11  ;;  %v4454_v23 = vsub.f32 %v4431_v41, %v11687_v60 }
 0xbe0   :  { %7495 = vmatmul.mubr.msk.f32.vlgmr.msra.gmra.mrb[80].mxu0 %vm50_vm0, %v11727_v62  ;;  %v4503_v47 = vsel %vm4467_vm12, %v4451_v33, %v4487_v57  ;;  %v4453_v59 = vsub.f32 %v4430_v4, %v11687_v60  ;;  %v11742_v61 = vadd.f32 %v11712_v34, %v4504_v40  ;;  %v13969_v4 = vld [vmem:[#allocation68_spill] sm:$0xff] }
 0xbe1   :  { %v11738_v12 = vadd.f32 %v11712_v34, %v4503_v47  ;;  %vm4470_vm13 = vcmp.gt.f32.partialorder %v4454_v23, 0.0  ;;  %v4490_v49 = vmul.f32 %v11697_v52, %v4454_v23 }
 0xbe2   :  { %vm4469_vm14 = vcmp.gt.f32.partialorder %v4453_v59, 0.0  ;;  %v4489_v17 = vmul.f32 %v11697_v52, %v4453_v59 }
 0xbe3   :  { %7497 = vmatprep.mubr.msk.f32.mxu0 %vm50_vm0, %v11738_v12  ;;  %v4506_v5 = vsel %vm4470_vm13, %v4454_v23, %v4490_v49 }
 0xbe4   :  { %7498 = vmatmul.mubr.msk.f32.gmra.mrb[82].mxu0 %vm50_vm0, %v11742_v61  ;;  %v4505_v28 = vsel %vm4469_vm14, %v4453_v59, %v4489_v17  ;;  %v11753_v56 = vadd.f32 %v11712_v34, %v4506_v5  ;;  %v13970_v59 = vld [vmem:[#allocation70_spill] sm:$0xff] }
 0xbe5   :  { %v11750_v44 = vadd.f32 %v11712_v34, %v4505_v28 }
 0xbe7   :  { %7500 = vmatprep.mubr.msk.f32.mxu0 %vm50_vm0, %v11750_v44 }
 0xbe8   :  { %7501 = vmatmul.mubr.msk.f32.gmra.mrb[84].mxu0 %vm50_vm0, %v11753_v56 }
 0xbf2   :  { %v4137_v3 = vpop.xlane.xlu1 %4136 }
 0xbf3   :  { %v4169_v29 = vmul.f32 0.03125, %v4137_v3  ;;  %v4134_v38 = vpop.xlane.xlu0 %4133 }
 0xbf4   :  { %v4168_v55 = vmul.f32 0.03125, %v4134_v38 }
 0xbf5   :  { %v4185_v16 = vadd.f32 1e-12, %v4169_v29 }
 0xbf6   :  { %v4184_v37 = vadd.f32 1e-12, %v4168_v55 }
 0xbf7   :  { %8197 = vrsqrt.f32 %v4185_v16 }
 0xbf8   :  { %8199 = vrsqrt.f32 %v4184_v37 }
 0xbfe   :  { %v4143_v20 = vpop.xlane.xlu1 %4142 }
 0xbff   :  { %v4171_v10 = vmul.f32 0.03125, %v4143_v20  ;;  %v4140_v25 = vpop.xlane.xlu0 %4139 }
 0xc00   :  { %v4170_v1 = vmul.f32 0.03125, %v4140_v25 }
 0xc01   :  { %v8198_v35 = vpop.eup %8197  ;;  %v4187_v14 = vadd.f32 1e-12, %v4171_v10 }
 0xc02   :  { %v8200_v22 = vpop.eup %8199  ;;  %v4217_v7 = vmul.f32 %v8198_v35, %v11579_v32  ;;  %v4186_v15 = vadd.f32 1e-12, %v4170_v1 }
 0xc03   :  { %v4216_v31 = vmul.f32 %v8200_v22, %v11582_v18  ;;  %8201 = vrsqrt.f32 %v4187_v14 }
 0xc04   :  { %v4237_v33 = vmul.f32 %v11659_v39, %v4217_v7  ;;  %8203 = vrsqrt.f32 %v4186_v15 }
 0xc05   :  { %v4236_v13 = vmul.f32 %v11659_v39, %v4216_v31 }
 0xc06   :  { %v4257_v11 = vadd.f32 %v11665_v27, %v4237_v33 }
 0xc07   :  { %v4256_v41 = vadd.f32 %v11665_v27, %v4236_v13  ;;  %v13971_v13 = vld [vmem:[#allocation71_spill] sm:$0xff] }
 0xc08   :  { %v4149_v57 = vpop.xlane.xlu1 %4148  ;;  %v4273_v40 = vadd.f32 %v4257_v11, %v13969_v4 }
 0xc09   :  { %v4173_v23 = vmul.f32 0.03125, %v4149_v57  ;;  %v4146_v47 = vpop.xlane.xlu0 %4145  ;;  %v4272_v32 = vadd.f32 %v4256_v41, %v13970_v59  ;;  %v13972_v57 = vld [vmem:[#allocation72_spill] sm:$0xff] }
 0xc0a   :  { %v4172_v49 = vmul.f32 0.03125, %v4146_v47  ;;  %v4353_v18 = vadd.f32 %v11516_v30, %v4273_v40 }
 0xc0b   :  { %v4189_v17 = vadd.f32 1e-12, %v4173_v23  ;;  %v4352_v5 = vadd.f32 %v11508_v54, %v4272_v32 }
 0xc0c   :  { %v4188_v28 = vadd.f32 1e-12, %v4172_v49  ;;  %v4433_v3 = vadd.f32 %v11522_v6, %v4353_v18 }
 0xc0d   :  { %v8202_v29 = vpop.eup %8201  ;;  %8205 = vrsqrt.f32 %v4189_v17  ;;  %v4432_v38 = vadd.f32 %v11514_v8, %v4352_v5 }
 0xc0e   :  { %v8204_v55 = vpop.eup %8203  ;;  %v4219_v16 = vmul.f32 %v8202_v29, %v11591_v36  ;;  %8207 = vrsqrt.f32 %v4188_v28  ;;  %v4155_v37 = vpop.xlane.xlu1 %4154  ;;  %v4456_v20 = vsub.f32 %v4433_v3, %v11687_v60 }
 0xc0f   :  { %v4218_v10 = vmul.f32 %v8204_v55, %v11594_v9  ;;  %v4175_v30 = vmul.f32 0.03125, %v4155_v37  ;;  %v4152_v25 = vpop.xlane.xlu0 %4151  ;;  %v4455_v54 = vsub.f32 %v4432_v38, %v11687_v60 }
 0xc10   :  { %v4239_v1 = vmul.f32 %v11659_v39, %v4219_v16  ;;  %v4174_v6 = vmul.f32 0.03125, %v4152_v25  ;;  %vm4472_vm15 = vcmp.gt.f32.partialorder %v4456_v20, 0.0  ;;  %v4492_v35 = vmul.f32 %v11697_v52, %v4456_v20 }
 0xc11   :  { %v4238_v8 = vmul.f32 %v11659_v39, %v4218_v10  ;;  %v4191_v14 = vadd.f32 1e-12, %v4175_v30  ;;  %vm4471_vm2 = vcmp.gt.f32.partialorder %v4455_v54, 0.0  ;;  %v4491_v36 = vmul.f32 %v11697_v52, %v4455_v54 }
 0xc12   :  { %v4259_v22 = vadd.f32 %v11665_v27, %v4239_v1  ;;  %v4190_v7 = vadd.f32 1e-12, %v4174_v6  ;;  %v4508_v9 = vsel %vm4472_vm15, %v4456_v20, %v4492_v35  ;;  %v13973_v1 = vld [vmem:[#allocation73_spill] sm:$0xff] }
 0xc13   :  { %v4258_v15 = vadd.f32 %v11665_v27, %v4238_v8  ;;  %8209 = vrsqrt.f32 %v4191_v14  ;;  %v4507_v31 = vsel %vm4471_vm2, %v4455_v54, %v4491_v36  ;;  %v11786_v41 = vadd.f32 %v11712_v34, %v4508_v9  ;;  %v13974_v14 = vld [vmem:[#allocation75_spill] sm:$0xff] }
 0xc14   :  { %8211 = vrsqrt.f32 %v4190_v7  ;;  %v11782_v33 = vadd.f32 %v11712_v34, %v4507_v31  ;;  %v4275_v11 = vadd.f32 %v4259_v22, %v13971_v13 }
 0xc15   :  { %v4274_v4 = vadd.f32 %v4258_v15, %v13972_v57 }
 0xc16   :  { %v4161_v40 = vpop.xlane.xlu1 %4160  ;;  %7503 = vmatprep.mubr.msk.f32.mxu0 %vm50_vm0, %v11782_v33  ;;  %v4355_v23 = vadd.f32 %v11526_v19, %v4275_v11 }
 0xc17   :  { %v8206_v47 = vpop.eup %8205  ;;  %v4177_v59 = vmul.f32 0.03125, %v4161_v40  ;;  %7504 = vmatmul.mubr.msk.f32.gmra.mrb[86].mxu0 %vm50_vm0, %v11786_v41  ;;  %v4158_v32 = vpop.xlane.xlu0 %4157  ;;  %v4354_v49 = vadd.f32 %v11520_v21, %v4274_v4  ;;  %v13975_v40 = vld [vmem:[#allocation76_spill] sm:$0xff] }
 0xc18   :  { %v8208_v18 = vpop.eup %8207  ;;  %v4221_v17 = vmul.f32 %v8206_v47, %v11603_v63  ;;  %v4176_v5 = vmul.f32 0.03125, %v4158_v32  ;;  %v4435_v28 = vadd.f32 %v11536_v48, %v4355_v23 }
 0xc19   :  { %v4220_v3 = vmul.f32 %v8208_v18, %v11606_v26  ;;  %v4193_v29 = vadd.f32 1e-12, %v4177_v59  ;;  %v4434_v38 = vadd.f32 %v11524_v42, %v4354_v49  ;;  %v13976_v59 = vld [vmem:[#allocation74_spill] sm:$0xff] }
 0xc1a   :  { %v4241_v19 = vmul.f32 %v11659_v39, %v4221_v17  ;;  %v4192_v55 = vadd.f32 1e-12, %v4176_v5  ;;  %v4458_v16 = vsub.f32 %v4435_v28, %v11687_v60  ;;  %v4403_v4 = vpop.permute.xlu1 %4402 }
 0xc1b   :  { %v4240_v37 = vmul.f32 %v11659_v39, %v4220_v3  ;;  %8213 = vrsqrt.f32 %v4193_v29  ;;  %v4457_v21 = vsub.f32 %v4434_v38, %v11687_v60  ;;  %v4325_v42 = vpop.permute.xlu0 %4324 }
 0xc1c   :  { %v4261_v63 = vadd.f32 %v11665_v27, %v4241_v19  ;;  %8215 = vrsqrt.f32 %v4192_v55  ;;  %vm4474_vm3 = vcmp.gt.f32.partialorder %v4458_v16, 0.0  ;;  %v4494_v48 = vmul.f32 %v11697_v52, %v4458_v16 }
 0xc1d   :  { %v8210_v26 = vpop.eup %8209  ;;  %v4260_v20 = vadd.f32 %v11665_v27, %v4240_v37  ;;  %vm4473_vm4 = vcmp.gt.f32.partialorder %v4457_v21, 0.0  ;;  %v4493_v10 = vmul.f32 %v11697_v52, %v4457_v21 }
 0xc1e   :  { %v8212_v30 = vpop.eup %8211  ;;  %v4223_v25 = vmul.f32 %v8210_v26, %v11615_v43  ;;  %v4510_v54 = vsel %vm4474_vm3, %v4458_v16, %v4494_v48  ;;  %v4277_v6 = vadd.f32 %v4261_v63, %v13973_v1 }
 0xc1f   :  { %v4222_v35 = vmul.f32 %v8212_v30, %v11618_v0  ;;  %v4509_v8 = vsel %vm4473_vm4, %v4457_v21, %v4493_v10  ;;  %v4276_v36 = vadd.f32 %v4260_v20, %v13974_v14  ;;  %v11818_v31 = vadd.f32 %v11712_v34, %v4510_v54  ;;  %v4405_v57 = vpop.permute.xlu0 %4404 }
 0xc20   :  { %v4243_v22 = vmul.f32 %v11659_v39, %v4223_v25  ;;  %v11813_v7 = vadd.f32 %v11712_v34, %v4509_v8  ;;  %v4357_v9 = vadd.f32 %v11540_v58, %v4277_v6  ;;  %v13978_v25 = vld [vmem:[#allocation78_spill] sm:$0xff] }
 0xc21   :  { %v4242_v15 = vmul.f32 %v11659_v39, %v4222_v35  ;;  %v4356_v43 = vadd.f32 %v11534_v46, %v4276_v36 }
 0xc22   :  { %v4263_v13 = vadd.f32 %v11665_v27, %v4243_v22  ;;  %7506 = vmatprep.mubr.msk.f32.mxu0 %vm50_vm0, %v11813_v7  ;;  %v4437_v0 = vadd.f32 %v11654_v45, %v4357_v9 }
 0xc23   :  { %v4262_v11 = vadd.f32 %v11665_v27, %v4242_v15  ;;  %7507 = vmatmul.mubr.msk.f32.gmra.mrb[88].mxu0 %vm50_vm0, %v11818_v31  ;;  %v4436_v58 = vadd.f32 %v11538_v2, %v4356_v43  ;;  %v4329_v37 = vpop.permute.xlu0 %4328 }
 0xc24   :  { %v4279_v23 = vadd.f32 %v4263_v13, %v13975_v40  ;;  %v4460_v46 = vsub.f32 %v4437_v0, %v11687_v60 }
 0xc25   :  { %v8214_v47 = vpop.eup %8213  ;;  %v4278_v32 = vadd.f32 %v4262_v11, %v13976_v59  ;;  %v4459_v49 = vsub.f32 %v4436_v58, %v11687_v60 }
 0xc26   :  { %v8216_v18 = vpop.eup %8215  ;;  %v4359_v45 = vadd.f32 %v4325_v42, %v4279_v23  ;;  %v4225_v17 = vmul.f32 %v8214_v47, %v11627_v24  ;;  %vm4476_vm5 = vcmp.gt.f32.partialorder %v4460_v46, 0.0  ;;  %v4496_v5 = vmul.f32 %v11697_v52, %v4460_v46  ;;  %v4327_v24 = vpop.permute.xlu1 %4326  ;;  %v13977_v42 = vld [vmem:[#allocation77_spill] sm:$0xff] }
 0xc27   :  { %v4358_v28 = vadd.f32 %v11652_v51, %v4278_v32  ;;  %v4224_v2 = vmul.f32 %v8216_v18, %v11630_v50  ;;  %vm4475_vm6 = vcmp.gt.f32.partialorder %v4459_v49, 0.0  ;;  %v4495_v3 = vmul.f32 %v11697_v52, %v4459_v49  ;;  %v4409_v8 = vpop.permute.xlu0 %4408 }
 0xc28   :  { %v4439_v29 = vadd.f32 %v4405_v57, %v4359_v45  ;;  %v4245_v38 = vmul.f32 %v11659_v39, %v4225_v17  ;;  %v4512_v19 = vsel %vm4476_vm5, %v4460_v46, %v4496_v5 }
 0xc29   :  { %v4438_v55 = vadd.f32 %v4403_v4, %v4358_v28  ;;  %v4244_v16 = vmul.f32 %v11659_v39, %v4224_v2  ;;  %v4511_v21 = vsel %vm4475_vm6, %v4459_v49, %v4495_v3  ;;  %v11848_v20 = vadd.f32 %v11712_v34, %v4512_v19 }
 0xc2a   :  { %v4462_v63 = vsub.f32 %v4439_v29, %v11687_v60  ;;  %v4265_v48 = vadd.f32 %v11665_v27, %v4245_v38  ;;  %v11843_v51 = vadd.f32 %v11712_v34, %v4511_v21  ;;  %v4407_v14 = vpop.permute.xlu1 %4406 }
 0xc2b   :  { %v4461_v50 = vsub.f32 %v4438_v55, %v11687_v60  ;;  %v4264_v26 = vadd.f32 %v11665_v27, %v4244_v16 }
 0xc2c   :  { %vm4478_vm7 = vcmp.gt.f32.partialorder %v4462_v63, 0.0  ;;  %v4498_v39 = vmul.f32 %v11697_v52, %v4462_v63  ;;  %v4281_v10 = vadd.f32 %v4265_v48, %v13977_v42  ;;  %7509 = vmatprep.mubr.msk.f32.mxu0 %vm50_vm0, %v11843_v51 }
 0xc2d   :  { %vm4477_vm8 = vcmp.gt.f32.partialorder %v4461_v50, 0.0  ;;  %v4497_v30 = vmul.f32 %v11697_v52, %v4461_v50  ;;  %v4280_v54 = vadd.f32 %v4264_v26, %v13978_v25  ;;  %7510 = vmatmul.mubr.msk.f32.gmra.mrb[90].mxu0 %vm50_vm0, %v11848_v20 }
 0xc2e   :  { %v4514_v27 = vsel %vm4478_vm7, %v4462_v63, %v4498_v39  ;;  %v4361_v1 = vadd.f32 %v4329_v37, %v4281_v10 }
 0xc2f   :  { %v4513_v6 = vsel %vm4477_vm8, %v4461_v50, %v4497_v30  ;;  %v4360_v35 = vadd.f32 %v4327_v24, %v4280_v54  ;;  %v11862_v15 = vadd.f32 %v11712_v34, %v4514_v27 }
 0xc30   :  { %v4441_v36 = vadd.f32 %v4409_v8, %v4361_v1  ;;  %v11859_v22 = vadd.f32 %v11712_v34, %v4513_v6 }
 0xc31   :  { %v4440_v9 = vadd.f32 %v4407_v14, %v4360_v35 }
 0xc32   :  { %v4464_v43 = vsub.f32 %v4441_v36, %v11687_v60  ;;  %7512 = vmatprep.mubr.msk.f32.mxu0 %vm50_vm0, %v11859_v22 }
 0xc33   :  { %v4463_v13 = vsub.f32 %v4440_v9, %v11687_v60  ;;  %7513 = vmatmul.mubr.msk.f32.gmra.mrb[92].mxu0 %vm50_vm0, %v11862_v15  ;;  %v6882_v60 = vld [vmem:[%s13495_s1 + $0x21] ss:$0 sm:$0xff] }
 0xc34   :  { %vm4480_vm9 = vcmp.gt.f32.partialorder %v4464_v43, 0.0  ;;  %v4500_v0 = vmul.f32 %v11697_v52, %v4464_v43 }
 0xc35   :  { %vm4479_vm10 = vcmp.gt.f32.partialorder %v4463_v13, 0.0  ;;  %v4499_v11 = vmul.f32 %v11697_v52, %v4463_v13 }
 0xc36   :  { %v4516_v57 = vsel %vm4480_vm9, %v4464_v43, %v4500_v0 }
 0xc37   :  { %v4515_v58 = vsel %vm4479_vm10, %v4463_v13, %v4499_v11  ;;  %v11876_v40 = vadd.f32 %v11712_v34, %v4516_v57 }
 0xc38   :  { %v11873_v4 = vadd.f32 %v11712_v34, %v4515_v58 }
 0xc3a   :  { %7515 = vmatprep.mubr.msk.f32.mxu0 %vm50_vm0, %v11873_v4 }
 0xc3b   :  { %7516 = vmatmul.mubr.msk.f32.gmra.mrb[94].mxu0 %vm50_vm0, %v11876_v40 }
 0xcb3   :  { %v7496_v23 = vpop.f32.mrb[80].mxu0 }
 0xcb4   :  { %v11885_v52 = vadd.f32 %v7496_v23, %v6882_v60  ;;  %v4660_v46 = vpop.f32.mrb[81].mxu0 }
 0xcb5   :  { %v11887_v47 = vadd.f32 %v6882_v60, %v4660_v46 }
 0xcb6   :  { %v4744_v34 = vsel %vm50_vm0, %v11885_v52, 0.0 }
 0xcb7   :  { %4745 = vadd.xlane.f32.xlu0 %v4744_v34  ;;  %v7499_v59 = vpop.f32.mrb[82].mxu0  ;;  %v4741_v32 = vsel %vm50_vm0, %v11887_v47, 0.0 }
 0xcb8   :  { %v11893_v49 = vadd.f32 %v7499_v59, %v6882_v60  ;;  %4742 = vadd.xlane.f32.xlu1 %v4741_v32  ;;  %v4670_v18 = vpop.f32.mrb[83].mxu0 }
 0xcb9   :  { %v11895_v45 = vadd.f32 %v6882_v60, %v4670_v18 }
 0xcba   :  { %v4750_v17 = vsel %vm50_vm0, %v11893_v49, 0.0 }
 0xcbb   :  { %v7502_v5 = vpop.f32.mrb[84].mxu0  ;;  %v4747_v28 = vsel %vm50_vm0, %v11895_v45, 0.0 }
 0xcbc   :  { %v11901_v2 = vadd.f32 %v7502_v5, %v6882_v60  ;;  %4751 = vadd.xlane.f32.xlu1 %v4750_v17  ;;  %4748 = vadd.xlane.f32.xlu0 %v4747_v28  ;;  %v4680_v3 = vpop.f32.mrb[85].mxu0 }
 0xcbd   :  { %v11903_v29 = vadd.f32 %v6882_v60, %v4680_v3 }
 0xcbe   :  { %v4756_v38 = vsel %vm50_vm0, %v11901_v2, 0.0 }
 0xcbf   :  { %v4753_v19 = vsel %vm50_vm0, %v11903_v29, 0.0 }
 0xcc0   :  { %4757 = vadd.xlane.f32.xlu1 %v4756_v38  ;;  %4754 = vadd.xlane.f32.xlu0 %v4753_v19 }
 0xcea   :  { %v7505_v55 = vpop.f32.mrb[86].mxu0 }
 0xceb   :  { %v11909_v16 = vadd.f32 %v7505_v55, %v6882_v60  ;;  %v4690_v37 = vpop.f32.mrb[87].mxu0 }
 0xcec   :  { %v11911_v21 = vadd.f32 %v6882_v60, %v4690_v37 }
 0xced   :  { %v4762_v24 = vsel %vm50_vm0, %v11909_v16, 0.0 }
 0xcee   :  { %4763 = vadd.xlane.f32.xlu1 %v4762_v24  ;;  %v4759_v63 = vsel %vm50_vm0, %v11911_v21, 0.0 }
 0xcef   :  { %4760 = vadd.xlane.f32.xlu0 %v4759_v63 }
 0xcf6   :  { %v7508_v48 = vpop.f32.mrb[88].mxu0 }
 0xcf7   :  { %v11917_v50 = vadd.f32 %v7508_v48, %v6882_v60  ;;  %v4700_v26 = vpop.f32.mrb[89].mxu0 }
 0xcf8   :  { %v11919_v39 = vadd.f32 %v6882_v60, %v4700_v26 }
 0xcf9   :  { %v4768_v42 = vsel %vm50_vm0, %v11917_v50, 0.0 }
 0xcfa   :  { %4769 = vadd.xlane.f32.xlu1 %v4768_v42  ;;  %v4765_v10 = vsel %vm50_vm0, %v11919_v39, 0.0 }
 0xcfb   :  { %4766 = vadd.xlane.f32.xlu0 %v4765_v10 }
 0xd00   :  { %v7511_v30 = vpop.f32.mrb[90].mxu0 }
 0xd01   :  { %v11925_v25 = vadd.f32 %v7511_v30, %v6882_v60  ;;  %v4710_v54 = vpop.f32.mrb[91].mxu0 }
 0xd02   :  { %v11927_v27 = vadd.f32 %v6882_v60, %v4710_v54 }
 0xd03   :  { %v4774_v1 = vsel %vm50_vm0, %v11925_v25, 0.0 }
 0xd04   :  { %4775 = vadd.xlane.f32.xlu1 %v4774_v1  ;;  %v4771_v6 = vsel %vm50_vm0, %v11927_v27, 0.0 }
 0xd05   :  { %4772 = vadd.xlane.f32.xlu0 %v4771_v6 }
 0xd06   :  { %v7514_v35 = vpop.f32.mrb[92].mxu0 }
 0xd07   :  { %v11933_v8 = vadd.f32 %v7514_v35, %v6882_v60  ;;  %v4720_v14 = vpop.f32.mrb[93].mxu0 }
 0xd08   :  { %v11935_v36 = vadd.f32 %v6882_v60, %v4720_v14 }
 0xd09   :  { %v4780_v9 = vsel %vm50_vm0, %v11933_v8, 0.0 }
 0xd0a   :  { %4781 = vadd.xlane.f32.xlu1 %v4780_v9  ;;  %v4777_v43 = vsel %vm50_vm0, %v11935_v36, 0.0 }
 0xd0b   :  { %4778 = vadd.xlane.f32.xlu0 %v4777_v43 }
 0xd0e   :  { %v7517_v13 = vpop.f32.mrb[94].mxu0 }
 0xd0f   :  { %v11941_v0 = vadd.f32 %v7517_v13, %v6882_v60  ;;  %v4730_v11 = vpop.f32.mrb[95].mxu0 }
 0xd10   :  { %v11943_v57 = vadd.f32 %v6882_v60, %v4730_v11 }
 0xd11   :  { %v4786_v58 = vsel %vm50_vm0, %v11941_v0, 0.0 }
 0xd12   :  { %4787 = vadd.xlane.f32.xlu1 %v4786_v58  ;;  %v4783_v23 = vsel %vm50_vm0, %v11943_v57, 0.0 }
 0xd13   :  { %4784 = vadd.xlane.f32.xlu0 %v4783_v23 }
 0xd44   :  { %v4746_v46 = vpop.xlane.xlu0 %4745 }
 0xd45   :  { %v4790_v34 = vmul.f32 0.03125, %v4746_v46  ;;  %v4743_v59 = vpop.xlane.xlu1 %4742 }
 0xd46   :  { %v4789_v32 = vmul.f32 0.03125, %v4743_v59 }
 0xd47   :  { %v11950_v18 = vsub.f32 %v11885_v52, %v4790_v34 }
 0xd48   :  { %v11953_v17 = vsub.f32 %v11887_v47, %v4789_v32 }
 0xd49   :  { %v4752_v60 = vpop.xlane.xlu1 %4751  ;;  %v4749_v5 = vpop.xlane.xlu0 %4748  ;;  %v4822_v28 = vmul.f32 %v11950_v18, %v11950_v18 }
 0xd4a   :  { %v4792_v3 = vmul.f32 0.03125, %v4752_v60  ;;  %v4791_v38 = vmul.f32 0.03125, %v4749_v5  ;;  %v4821_v19 = vmul.f32 %v11953_v17, %v11953_v17 }
 0xd4b   :  { %v4840_v55 = vsel %vm50_vm0, %v4822_v28, 0.0 }
 0xd4c   :  { %v11961_v37 = vsub.f32 %v11893_v49, %v4792_v3  ;;  %v11964_v52 = vsub.f32 %v11895_v45, %v4791_v38  ;;  %4841 = vadd.xlane.f32.xlu1 %v4840_v55  ;;  %v4837_v47 = vsel %vm50_vm0, %v4821_v19, 0.0 }
 0xd4d   :  { %v4758_v24 = vpop.xlane.xlu1 %4757  ;;  %4838 = vadd.xlane.f32.xlu0 %v4837_v47  ;;  %v4755_v63 = vpop.xlane.xlu0 %4754 }
 0xd4e   :  { %v4794_v48 = vmul.f32 0.03125, %v4758_v24  ;;  %v4793_v26 = vmul.f32 0.03125, %v4755_v63  ;;  %v4824_v42 = vmul.f32 %v11961_v37, %v11961_v37  ;;  %v4823_v10 = vmul.f32 %v11964_v52, %v11964_v52 }
 0xd50   :  { %v11972_v49 = vsub.f32 %v11901_v2, %v4794_v48  ;;  %v11975_v45 = vsub.f32 %v11903_v29, %v4793_v26  ;;  %v4846_v30 = vsel %vm50_vm0, %v4824_v42, 0.0  ;;  %v4843_v54 = vsel %vm50_vm0, %v4823_v10, 0.0 }
 0xd51   :  { %4847 = vadd.xlane.f32.xlu1 %v4846_v30  ;;  %4844 = vadd.xlane.f32.xlu0 %v4843_v54 }
 0xd52   :  { %v4826_v1 = vmul.f32 %v11972_v49, %v11972_v49  ;;  %v4825_v6 = vmul.f32 %v11975_v45, %v11975_v45 }
 0xd54   :  { %v4852_v35 = vsel %vm50_vm0, %v4826_v1, 0.0  ;;  %v4849_v2 = vsel %vm50_vm0, %v4825_v6, 0.0 }
 0xd55   :  { %4853 = vadd.xlane.f32.xlu1 %v4852_v35  ;;  %4850 = vadd.xlane.f32.xlu0 %v4849_v2 }
 0xd7b   :  { %v4764_v29 = vpop.xlane.xlu1 %4763 }
 0xd7c   :  { %v4796_v14 = vmul.f32 0.03125, %v4764_v29  ;;  %v4761_v9 = vpop.xlane.xlu0 %4760 }
 0xd7d   :  { %v4795_v43 = vmul.f32 0.03125, %v4761_v9 }
 0xd7e   :  { %v11986_v13 = vsub.f32 %v11909_v16, %v4796_v14 }
 0xd7f   :  { %v11989_v11 = vsub.f32 %v11911_v21, %v4795_v43 }
 0xd80   :  { %v4828_v58 = vmul.f32 %v11986_v13, %v11986_v13 }
 0xd81   :  { %v4827_v23 = vmul.f32 %v11989_v11, %v11989_v11 }
 0xd82   :  { %v4858_v46 = vsel %vm50_vm0, %v4828_v58, 0.0 }
 0xd83   :  { %4859 = vadd.xlane.f32.xlu1 %v4858_v46  ;;  %v4855_v34 = vsel %vm50_vm0, %v4827_v23, 0.0 }
 0xd84   :  { %4856 = vadd.xlane.f32.xlu0 %v4855_v34 }
 0xd87   :  { %v4770_v59 = vpop.xlane.xlu1 %4769 }
 0xd88   :  { %v4798_v32 = vmul.f32 0.03125, %v4770_v59  ;;  %v4767_v60 = vpop.xlane.xlu0 %4766 }
 0xd89   :  { %v4797_v16 = vmul.f32 0.03125, %v4767_v60 }
 0xd8a   :  { %v11998_v5 = vsub.f32 %v11917_v50, %v4798_v32 }
 0xd8b   :  { %v12001_v21 = vsub.f32 %v11919_v39, %v4797_v16 }
 0xd8c   :  { %v4830_v28 = vmul.f32 %v11998_v5, %v11998_v5 }
 0xd8d   :  { %v4829_v3 = vmul.f32 %v12001_v21, %v12001_v21 }
 0xd8e   :  { %v4864_v38 = vsel %vm50_vm0, %v4830_v28, 0.0 }
 0xd8f   :  { %4865 = vadd.xlane.f32.xlu1 %v4864_v38  ;;  %v4861_v19 = vsel %vm50_vm0, %v4829_v3, 0.0 }
 0xd90   :  { %4862 = vadd.xlane.f32.xlu0 %v4861_v19 }
 0xd91   :  { %v4776_v55 = vpop.xlane.xlu1 %4775 }
 0xd92   :  { %v4800_v47 = vmul.f32 0.03125, %v4776_v55  ;;  %v4773_v24 = vpop.xlane.xlu0 %4772 }
 0xd93   :  { %v4799_v50 = vmul.f32 0.03125, %v4773_v24 }
 0xd94   :  { %v12010_v63 = vsub.f32 %v11925_v25, %v4800_v47 }
 0xd95   :  { %v12013_v39 = vsub.f32 %v11927_v27, %v4799_v50 }
 0xd96   :  { %v4832_v48 = vmul.f32 %v12010_v63, %v12010_v63 }
 0xd97   :  { %v4782_v26 = vpop.xlane.xlu1 %4781  ;;  %v4831_v42 = vmul.f32 %v12013_v39, %v12013_v39 }
 0xd98   :  { %v4802_v10 = vmul.f32 0.03125, %v4782_v26  ;;  %v4870_v30 = vsel %vm50_vm0, %v4832_v48, 0.0  ;;  %v4779_v54 = vpop.xlane.xlu0 %4778 }
 0xd99   :  { %4871 = vadd.xlane.f32.xlu1 %v4870_v30  ;;  %v4801_v1 = vmul.f32 0.03125, %v4779_v54  ;;  %v4867_v6 = vsel %vm50_vm0, %v4831_v42, 0.0 }
 0xd9a   :  { %v12022_v25 = vsub.f32 %v11933_v8, %v4802_v10  ;;  %4868 = vadd.xlane.f32.xlu0 %v4867_v6  ;;  %v12048_v6 = vld [vmem:[%s13495_s1 + $0x23] ss:$0 sm:$0xff] }
 0xd9b   :  { %v12025_v27 = vsub.f32 %v11935_v36, %v4801_v1 }
 0xd9c   :  { %v4834_v35 = vmul.f32 %v12022_v25, %v12022_v25 }
 0xd9d   :  { %v4833_v2 = vmul.f32 %v12025_v27, %v12025_v27 }
 0xd9e   :  { %v4876_v29 = vsel %vm50_vm0, %v4834_v35, 0.0 }
 0xd9f   :  { %v4788_v14 = vpop.xlane.xlu1 %4787  ;;  %4877 = vadd.xlane.f32.xlu1 %v4876_v29  ;;  %v4873_v9 = vsel %vm50_vm0, %v4833_v2, 0.0  ;;  %v12054_v29 = vld [vmem:[%s13495_s1 + $0x24] ss:$0 sm:$0xff] }
 0xda0   :  { %v4804_v43 = vmul.f32 0.03125, %v4788_v14  ;;  %4874 = vadd.xlane.f32.xlu0 %v4873_v9  ;;  %v4785_v8 = vpop.xlane.xlu0 %4784 }
 0xda1   :  { %v4803_v58 = vmul.f32 0.03125, %v4785_v8 }
 0xda2   :  { %v12034_v23 = vsub.f32 %v11941_v0, %v4804_v43 }
 0xda3   :  { %v12037_v36 = vsub.f32 %v11943_v57, %v4803_v58 }
 0xda4   :  { %v4836_v46 = vmul.f32 %v12034_v23, %v12034_v23 }
 0xda5   :  { %v4835_v34 = vmul.f32 %v12037_v36, %v12037_v36 }
 0xda6   :  { %v4882_v59 = vsel %vm50_vm0, %v4836_v46, 0.0 }
 0xda7   :  { %4883 = vadd.xlane.f32.xlu1 %v4882_v59  ;;  %v4879_v32 = vsel %vm50_vm0, %v4835_v34, 0.0 }
 0xda8   :  { %4880 = vadd.xlane.f32.xlu0 %v4879_v32 }
 0xdd9   :  { %v4842_v60 = vpop.xlane.xlu1 %4841 }
 0xdda   :  { %v4886_v16 = vmul.f32 0.03125, %v4842_v60  ;;  %v4839_v28 = vpop.xlane.xlu0 %4838 }
 0xddb   :  { %v4885_v0 = vmul.f32 0.03125, %v4839_v28 }
 0xddc   :  { %v4902_v3 = vadd.f32 1e-12, %v4886_v16  ;;  %v12073_v16 = vld [vmem:[%s13495_s1 + $0x26] ss:$0 sm:$0xff] }
 0xddd   :  { %v4901_v38 = vadd.f32 1e-12, %v4885_v0 }
 0xdde   :  { %8217 = vrsqrt.f32 %v4902_v3  ;;  %v4848_v57 = vpop.xlane.xlu1 %4847  ;;  %v4845_v19 = vpop.xlane.xlu0 %4844 }
 0xddf   :  { %8219 = vrsqrt.f32 %v4901_v38  ;;  %v4888_v55 = vmul.f32 0.03125, %v4848_v57  ;;  %v4887_v47 = vmul.f32 0.03125, %v4845_v19 }
 0xde1   :  { %v4904_v24 = vadd.f32 1e-12, %v4888_v55  ;;  %v4903_v50 = vadd.f32 1e-12, %v4887_v47 }
 0xde2   :  { %v4854_v48 = vpop.xlane.xlu1 %4853  ;;  %v4851_v26 = vpop.xlane.xlu0 %4850 }
 0xde3   :  { %8221 = vrsqrt.f32 %v4904_v24  ;;  %v4890_v42 = vmul.f32 0.03125, %v4854_v48  ;;  %v4889_v10 = vmul.f32 0.03125, %v4851_v26 }
 0xde4   :  { %8223 = vrsqrt.f32 %v4903_v50 }
 0xde5   :  { %v4906_v30 = vadd.f32 1e-12, %v4890_v42  ;;  %v4905_v54 = vadd.f32 1e-12, %v4889_v10 }
 0xde7   :  { %8225 = vrsqrt.f32 %v4906_v30 }
 0xde8   :  { %v8218_v1 = vpop.eup %8217  ;;  %8227 = vrsqrt.f32 %v4905_v54 }
 0xde9   :  { %v8220_v35 = vpop.eup %8219  ;;  %v4934_v2 = vmul.f32 %v8218_v1, %v11950_v18  ;;  %v12065_v18 = vld [vmem:[%s13495_s1 + $0x25] ss:$0 sm:$0xff] }
 0xdea   :  { %v4933_v14 = vmul.f32 %v8220_v35, %v11953_v17 }
 0xdeb   :  { %v4954_v9 = vmul.f32 %v12048_v6, %v4934_v2 }
 0xdec   :  { %v4953_v43 = vmul.f32 %v12048_v6, %v4933_v14 }
 0xded   :  { %v8222_v8 = vpop.eup %8221  ;;  %v4974_v58 = vadd.f32 %v12054_v29, %v4954_v9 }
 0xdee   :  { %v8224_v46 = vpop.eup %8223  ;;  %v4973_v34 = vadd.f32 %v12054_v29, %v4953_v43  ;;  %v4936_v59 = vmul.f32 %v8222_v8, %v11961_v37 }
 0xdef   :  { %v4935_v32 = vmul.f32 %v8224_v46, %v11964_v52  ;;  %v4990_v17 = vadd.f32 %v4974_v58, %v11727_v62 }
 0xdf0   :  { %v4956_v60 = vmul.f32 %v12048_v6, %v4936_v59  ;;  %v4989_v28 = vadd.f32 %v4973_v34, %v11722_v53  ;;  %v12086_v53 = vld [vmem:[%s13495_s1 + $0x27] ss:$0 sm:$0xff] }
 0xdf1   :  { %v8226_v0 = vpop.eup %8225  ;;  %v4955_v37 = vmul.f32 %v12048_v6, %v4935_v32  ;;  %v5013_v3 = vsub.f32 %v4990_v17, %v12065_v18 }
 0xdf2   :  { %v8228_v38 = vpop.eup %8227  ;;  %v4976_v57 = vadd.f32 %v12054_v29, %v4956_v60  ;;  %v4938_v52 = vmul.f32 %v8226_v0, %v11972_v49  ;;  %v5012_v62 = vsub.f32 %v4989_v28, %v12065_v18 }
 0xdf3   :  { %v4975_v19 = vadd.f32 %v12054_v29, %v4955_v37  ;;  %v4937_v55 = vmul.f32 %v8228_v38, %v11975_v45  ;;  %vm5029_vm11 = vcmp.gt.f32.partialorder %v5013_v3, 0.0  ;;  %v5049_v47 = vmul.f32 %v12073_v16, %v5013_v3  ;;  %v12096_v45 = vld [vmem:[%s13495_s1 + $0x28] ss:$0 sm:$0xff]  ;;  %v8348_v38 = vld [vmem:[%s13494_s0] sm:$0xff] }
 0xdf4   :  { %v4958_v24 = vmul.f32 %v12048_v6, %v4938_v52  ;;  %vm5028_vm12 = vcmp.gt.f32.partialorder %v5012_v62, 0.0  ;;  %v5048_v50 = vmul.f32 %v12073_v16, %v5012_v62  ;;  %v4992_v49 = vadd.f32 %v4976_v57, %v11742_v61  ;;  %v12106_v61 = vld [vmem:[%s13495_s1 + $0x29] ss:$0 sm:$0xff] }
 0xdf5   :  { %v4957_v48 = vmul.f32 %v12048_v6, %v4937_v55  ;;  %v5065_v26 = vsel %vm5029_vm11, %v5013_v3, %v5049_v47  ;;  %v4991_v42 = vadd.f32 %v4975_v19, %v11738_v12 }
 0xdf6   :  { %v4978_v10 = vadd.f32 %v12054_v29, %v4958_v24  ;;  %v5085_v30 = vadd.f32 %v12086_v53, %v5065_v26  ;;  %v5064_v54 = vsel %vm5028_vm12, %v5012_v62, %v5048_v50  ;;  %v5015_v1 = vsub.f32 %v4992_v49, %v12065_v18 }
 0xdf7   :  { %v4977_v35 = vadd.f32 %v12054_v29, %v4957_v48  ;;  %v5084_v2 = vadd.f32 %v12086_v53, %v5064_v54  ;;  %v5014_v14 = vsub.f32 %v4991_v42, %v12065_v18 }
 0xdf8   :  { %v5106_v12 = vmul.f32 %v12096_v45, %v5085_v30  ;;  %vm5031_vm13 = vcmp.gt.f32.partialorder %v5015_v1, 0.0  ;;  %v5051_v9 = vmul.f32 %v12073_v16, %v5015_v1  ;;  %v4994_v43 = vadd.f32 %v4978_v10, %v11753_v56  ;;  %v8347_v56 = vld [vmem:[%s13494_s0 + $0x8] sm:$0xff]  ;;  %v8349_v10 = vld [vmem:[%s13494_s0 + $0x18] sm:$0xff] }
 0xdf9   :  { %v5105_v8 = vmul.f32 %v12096_v45, %v5084_v2  ;;  %vm5030_vm14 = vcmp.gt.f32.partialorder %v5014_v14, 0.0  ;;  %v5050_v58 = vmul.f32 %v12073_v16, %v5014_v14  ;;  %v4993_v46 = vadd.f32 %v4977_v35, %v11750_v44 }
 0xdfa   :  { %v5127_v34 = vadd.f32 %v12106_v61, %v5106_v12  ;;  %v5067_v59 = vsel %vm5031_vm13, %v5015_v1, %v5051_v9  ;;  %v5017_v32 = vsub.f32 %v4994_v43, %v12065_v18  ;;  %v8350_v1 = vld [vmem:[%s13494_s0 + $0x10] sm:$0xff] }
 0xdfb   :  { %v5126_v17 = vadd.f32 %v12106_v61, %v5105_v8  ;;  %v5087_v60 = vadd.f32 %v12086_v53, %v5067_v59  ;;  %v5066_v28 = vsel %vm5030_vm14, %v5014_v14, %v5050_v58  ;;  %v5016_v0 = vsub.f32 %v4993_v46, %v12065_v18  ;;  %v8351_v8 = vld [vmem:[%s13494_s0 + $0x28] sm:$0xff]  ;;  %v8352_v46 = vld [vmem:[%s13494_s0 + $0x20] sm:$0xff] }
 0xdfc   :  { %v12124_v37 = vadd.f32 %v8347_v56, %v5127_v34  ;;  %v5086_v44 = vadd.f32 %v12086_v53, %v5066_v28  ;;  %vm5033_vm15 = vcmp.gt.f32.partialorder %v5017_v32, 0.0  ;;  %v5053_v3 = vmul.f32 %v12073_v16, %v5017_v32 }
 0xdfd   :  { %v12131_v57 = vadd.f32 %v8348_v38, %v5126_v17  ;;  %v5108_v52 = vmul.f32 %v12096_v45, %v5087_v60  ;;  %vm5032_vm2 = vcmp.gt.f32.partialorder %v5016_v0, 0.0  ;;  %v5052_v62 = vmul.f32 %v12073_v16, %v5016_v0 }
 0xdfe   :  { %13979 = vst [vmem:[#allocation58_spill] sm:$0xff] %v12124_v37  ;;  %v5163_v19 = vsel %vm50_vm0, %v12124_v37, 0.0  ;;  %v5107_v55 = vmul.f32 %v12096_v45, %v5086_v44  ;;  %v5069_v47 = vsel %vm5033_vm15, %v5017_v32, %v5053_v3 }
 0xdff   :  { %5164 = vadd.xlane.f32.xlu1 %v5163_v19  ;;  %v5160_v24 = vsel %vm50_vm0, %v12131_v57, 0.0  ;;  %v5129_v50 = vadd.f32 %v12106_v61, %v5108_v52  ;;  %v5089_v49 = vadd.f32 %v12086_v53, %v5069_v47  ;;  %v5068_v48 = vsel %vm5032_vm2, %v5016_v0, %v5052_v62  ;;  %v5408_v47 = vld [vmem:[%s13500_s5] sm:$0xff] }
 0xe00   :  { %5161 = vadd.xlane.f32.xlu0 %v5160_v24  ;;  %v5128_v26 = vadd.f32 %v12106_v61, %v5107_v55  ;;  %v5088_v42 = vadd.f32 %v12086_v53, %v5068_v48  ;;  %v5409_v24 = vld [vmem:[%s13500_s5 + $0x8] sm:$0xff] }
 0xe01   :  { %v12147_v30 = vadd.f32 %v8349_v10, %v5129_v50  ;;  %v5110_v54 = vmul.f32 %v12096_v45, %v5089_v49 }
 0xe02   :  { %v12153_v35 = vadd.f32 %v8350_v1, %v5128_v26  ;;  %v5109_v2 = vmul.f32 %v12096_v45, %v5088_v42  ;;  %v7686_v26 = vpack.c.bf16 %v5409_v24, %v5408_v47 }
 0xe03   :  { %13980 = vst [vmem:[#allocation60_spill] sm:$0xff] %v12147_v30  ;;  %v5169_v14 = vsel %vm50_vm0, %v12147_v30, 0.0  ;;  %v5131_v12 = vadd.f32 %v12106_v61, %v5110_v54 }
 0xe04   :  { %5170 = vadd.xlane.f32.xlu1 %v5169_v14  ;;  %v5166_v9 = vsel %vm50_vm0, %v12153_v35, 0.0  ;;  %v5130_v43 = vadd.f32 %v12106_v61, %v5109_v2  ;;  %7687 = vmatprep.subr.bf16.mxu1 %v7686_v26 }
 0xe05   :  { %5167 = vadd.xlane.f32.xlu0 %v5166_v9  ;;  %v12165_v58 = vadd.f32 %v8351_v8, %v5131_v12  ;;  %7689 = vmatpush3.bf16.msra.mxu1 %v7686_v26 }
 0xe06   :  { %v12170_v34 = vadd.f32 %v8352_v46, %v5130_v43 }
 0xe07   :  { %13981 = vst [vmem:[#allocation23_spill] sm:$0xff] %v12165_v58  ;;  %v5175_v59 = vsel %vm50_vm0, %v12165_v58, 0.0 }
 0xe08   :  { %13982 = vst [vmem:[#allocation35_spill] sm:$0xff] %v12170_v34  ;;  %5176 = vadd.xlane.f32.xlu1 %v5175_v59  ;;  %v5172_v32 = vsel %vm50_vm0, %v12170_v34, 0.0 }
 0xe09   :  { %5173 = vadd.xlane.f32.xlu0 %v5172_v32 }
 0xe10   :  { %v4860_v17 = vpop.xlane.xlu1 %4859 }
 0xe11   :  { %v4892_v60 = vmul.f32 0.03125, %v4860_v17  ;;  %v4857_v28 = vpop.xlane.xlu0 %4856 }
 0xe12   :  { %v4891_v0 = vmul.f32 0.03125, %v4857_v28 }
 0xe13   :  { %v4908_v56 = vadd.f32 1e-12, %v4892_v60 }
 0xe14   :  { %v4907_v44 = vadd.f32 1e-12, %v4891_v0 }
 0xe15   :  { %8229 = vrsqrt.f32 %v4908_v56 }
 0xe16   :  { %8231 = vrsqrt.f32 %v4907_v44 }
 0xe1c   :  { %v4866_v3 = vpop.xlane.xlu1 %4865 }
 0xe1d   :  { %v4894_v38 = vmul.f32 0.03125, %v4866_v3  ;;  %v4863_v52 = vpop.xlane.xlu0 %4862 }
 0xe1e   :  { %v4893_v62 = vmul.f32 0.03125, %v4863_v52 }
 0xe1f   :  { %v8230_v19 = vpop.eup %8229  ;;  %v4910_v55 = vadd.f32 1e-12, %v4894_v38 }
 0xe20   :  { %v8232_v50 = vpop.eup %8231  ;;  %v4940_v49 = vmul.f32 %v8230_v19, %v11986_v13  ;;  %v4909_v48 = vadd.f32 1e-12, %v4893_v62 }
 0xe21   :  { %v4939_v42 = vmul.f32 %v8232_v50, %v11989_v11  ;;  %8233 = vrsqrt.f32 %v4910_v55 }
 0xe22   :  { %v4960_v10 = vmul.f32 %v12048_v6, %v4940_v49  ;;  %8235 = vrsqrt.f32 %v4909_v48 }
 0xe23   :  { %v4959_v54 = vmul.f32 %v12048_v6, %v4939_v42 }
 0xe24   :  { %v4980_v1 = vadd.f32 %v12054_v29, %v4960_v10 }
 0xe25   :  { %v4979_v2 = vadd.f32 %v12054_v29, %v4959_v54 }
 0xe26   :  { %v4872_v14 = vpop.xlane.xlu1 %4871  ;;  %v4996_v12 = vadd.f32 %v4980_v1, %v11786_v41  ;;  %v8353_v1 = vld [vmem:[%s13494_s0 + $0x38] sm:$0xff] }
 0xe27   :  { %v4896_v13 = vmul.f32 0.03125, %v4872_v14  ;;  %v4869_v9 = vpop.xlane.xlu0 %4868  ;;  %v4995_v43 = vadd.f32 %v4979_v2, %v11782_v33 }
 0xe28   :  { %v4895_v11 = vmul.f32 0.03125, %v4869_v9  ;;  %v5019_v8 = vsub.f32 %v4996_v12, %v12065_v18 }
 0xe29   :  { %v4912_v46 = vadd.f32 1e-12, %v4896_v13  ;;  %v5018_v59 = vsub.f32 %v4995_v43, %v12065_v18  ;;  %v8354_v13 = vld [vmem:[%s13494_s0 + $0x30] sm:$0xff] }
 0xe2a   :  { %v4911_v32 = vadd.f32 1e-12, %v4895_v11  ;;  %vm5035_vm3 = vcmp.gt.f32.partialorder %v5019_v8, 0.0  ;;  %v5055_v17 = vmul.f32 %v12073_v16, %v5019_v8 }
 0xe2b   :  { %v8234_v60 = vpop.eup %8233  ;;  %8237 = vrsqrt.f32 %v4912_v46  ;;  %vm5034_vm4 = vcmp.gt.f32.partialorder %v5018_v59, 0.0  ;;  %v5054_v28 = vmul.f32 %v12073_v16, %v5018_v59 }
 0xe2c   :  { %v8236_v41 = vpop.eup %8235  ;;  %v4942_v0 = vmul.f32 %v8234_v60, %v11998_v5  ;;  %8239 = vrsqrt.f32 %v4911_v32  ;;  %v4878_v33 = vpop.xlane.xlu1 %4877  ;;  %v5071_v56 = vsel %vm5035_vm3, %v5019_v8, %v5055_v17 }
 0xe2d   :  { %v4941_v44 = vmul.f32 %v8236_v41, %v12001_v21  ;;  %v4898_v3 = vmul.f32 0.03125, %v4878_v33  ;;  %v4875_v38 = vpop.xlane.xlu0 %4874  ;;  %v5091_v52 = vadd.f32 %v12086_v53, %v5071_v56  ;;  %v5070_v62 = vsel %vm5034_vm4, %v5018_v59, %v5054_v28 }
 0xe2e   :  { %v4962_v19 = vmul.f32 %v12048_v6, %v4942_v0  ;;  %v4897_v55 = vmul.f32 0.03125, %v4875_v38  ;;  %v5090_v47 = vadd.f32 %v12086_v53, %v5070_v62 }
 0xe2f   :  { %v4961_v24 = vmul.f32 %v12048_v6, %v4941_v44  ;;  %v4914_v50 = vadd.f32 1e-12, %v4898_v3  ;;  %v5112_v5 = vmul.f32 %v12096_v45, %v5091_v52 }
 0xe30   :  { %v4982_v49 = vadd.f32 %v12054_v29, %v4962_v19  ;;  %v4913_v48 = vadd.f32 1e-12, %v4897_v55  ;;  %v5111_v21 = vmul.f32 %v12096_v45, %v5090_v47 }
 0xe31   :  { %v4981_v26 = vadd.f32 %v12054_v29, %v4961_v24  ;;  %8241 = vrsqrt.f32 %v4914_v50  ;;  %v5133_v42 = vadd.f32 %v12106_v61, %v5112_v5 }
 0xe32   :  { %8243 = vrsqrt.f32 %v4913_v48  ;;  %v5132_v10 = vadd.f32 %v12106_v61, %v5111_v21  ;;  %v4998_v54 = vadd.f32 %v4982_v49, %v11818_v31 }
 0xe33   :  { %v12210_v2 = vadd.f32 %v8353_v1, %v5133_v42  ;;  %v4997_v14 = vadd.f32 %v4981_v26, %v11813_v7 }
 0xe34   :  { %v4884_v12 = vpop.xlane.xlu1 %4883  ;;  %v12216_v9 = vadd.f32 %v8354_v13, %v5132_v10  ;;  %v5021_v43 = vsub.f32 %v4998_v54, %v12065_v18  ;;  %v8356_v13 = vld [vmem:[%s13494_s0 + $0x40] sm:$0xff] }
 0xe35   :  { %13983 = vst [vmem:[#allocation36_spill] sm:$0xff] %v12210_v2  ;;  %v8238_v11 = vpop.eup %8237  ;;  %v4900_v8 = vmul.f32 0.03125, %v4884_v12  ;;  %v4881_v31 = vpop.xlane.xlu0 %4880  ;;  %v5181_v46 = vsel %vm50_vm0, %v12210_v2, 0.0  ;;  %v5020_v59 = vsub.f32 %v4997_v14, %v12065_v18 }
 0xe36   :  { %13984 = vst [vmem:[#allocation24_spill] sm:$0xff] %v12216_v9  ;;  %v8240_v32 = vpop.eup %8239  ;;  %v4944_v7 = vmul.f32 %v8238_v11, %v12010_v63  ;;  %v4899_v17 = vmul.f32 0.03125, %v4881_v31  ;;  %5182 = vadd.xlane.f32.xlu1 %v5181_v46  ;;  %v5178_v60 = vsel %vm50_vm0, %v12216_v9, 0.0  ;;  %vm5037_vm5 = vcmp.gt.f32.partialorder %v5021_v43, 0.0 }
 0xe37   :  { %v4943_v28 = vmul.f32 %v8240_v32, %v12013_v39  ;;  %v4916_v41 = vadd.f32 1e-12, %v4900_v8  ;;  %5179 = vadd.xlane.f32.xlu0 %v5178_v60  ;;  %v5057_v0 = vmul.f32 %v12073_v16, %v5021_v43  ;;  %vm5036_vm6 = vcmp.gt.f32.partialorder %v5020_v59, 0.0 }
 0xe38   :  { %v4964_v33 = vmul.f32 %v12048_v6, %v4944_v7  ;;  %v4915_v56 = vadd.f32 1e-12, %v4899_v17  ;;  %v5056_v44 = vmul.f32 %v12073_v16, %v5020_v59 }
 0xe39   :  { %v4963_v63 = vmul.f32 %v12048_v6, %v4943_v28  ;;  %8245 = vrsqrt.f32 %v4916_v41  ;;  %v5073_v3 = vsel %vm5037_vm5, %v5021_v43, %v5057_v0 }
 0xe3a   :  { %v4984_v38 = vadd.f32 %v12054_v29, %v4964_v33  ;;  %8247 = vrsqrt.f32 %v4915_v56  ;;  %v5093_v52 = vadd.f32 %v12086_v53, %v5073_v3  ;;  %v5072_v39 = vsel %vm5036_vm6, %v5020_v59, %v5056_v44 }
 0xe3b   :  { %v8242_v62 = vpop.eup %8241  ;;  %v4983_v19 = vadd.f32 %v12054_v29, %v4963_v63  ;;  %v5092_v55 = vadd.f32 %v12086_v53, %v5072_v39 }
 0xe3c   :  { %v8244_v47 = vpop.eup %8243  ;;  %v4946_v24 = vmul.f32 %v8242_v62, %v12022_v25  ;;  %v5114_v50 = vmul.f32 %v12096_v45, %v5093_v52  ;;  %v5000_v5 = vadd.f32 %v4984_v38, %v11848_v20 }
 0xe3d   :  { %v4945_v49 = vmul.f32 %v8244_v47, %v12025_v27  ;;  %v5113_v48 = vmul.f32 %v12096_v45, %v5092_v55  ;;  %v4999_v21 = vadd.f32 %v4983_v19, %v11843_v51  ;;  %v8355_v27 = vld [vmem:[%s13494_s0 + $0x48] sm:$0xff]  ;;  %v8357_v55 = vld [vmem:[%s13494_s0 + $0x58] sm:$0xff] }
 0xe3e   :  { %v4966_v26 = vmul.f32 %v12048_v6, %v4946_v24  ;;  %v5135_v42 = vadd.f32 %v12106_v61, %v5114_v50  ;;  %v5023_v10 = vsub.f32 %v5000_v5, %v12065_v18  ;;  %v8358_v50 = vld [vmem:[%s13494_s0 + $0x50] sm:$0xff] }
 0xe3f   :  { %v4965_v54 = vmul.f32 %v12048_v6, %v4945_v49  ;;  %v5134_v25 = vadd.f32 %v12106_v61, %v5113_v48  ;;  %v5022_v1 = vsub.f32 %v4999_v21, %v12065_v18 }
 0xe40   :  { %v4986_v20 = vadd.f32 %v12054_v29, %v4966_v26  ;;  %v12250_v14 = vadd.f32 %v8355_v27, %v5135_v42  ;;  %vm5039_vm7 = vcmp.gt.f32.partialorder %v5023_v10, 0.0  ;;  %v5059_v51 = vmul.f32 %v12073_v16, %v5023_v10 }
 0xe41   :  { %v4985_v12 = vadd.f32 %v12054_v29, %v4965_v54  ;;  %v12257_v43 = vadd.f32 %v8356_v13, %v5134_v25  ;;  %vm5038_vm8 = vcmp.gt.f32.partialorder %v5022_v1, 0.0  ;;  %v5058_v11 = vmul.f32 %v12073_v16, %v5022_v1 }
 0xe42   :  { %13985 = vst [vmem:[#allocation59_spill] sm:$0xff] %v12250_v14  ;;  %v5187_v8 = vsel %vm50_vm0, %v12250_v14, 0.0  ;;  %v5075_v31 = vsel %vm5039_vm7, %v5023_v10, %v5059_v51  ;;  %v5002_v46 = vadd.f32 %v4986_v20, %v11862_v15 }
 0xe43   :  { %13986 = vst [vmem:[#allocation61_spill] sm:$0xff] %v12257_v43  ;;  %v8246_v59 = vpop.eup %8245  ;;  %5188 = vadd.xlane.f32.xlu1 %v5187_v8  ;;  %v5184_v32 = vsel %vm50_vm0, %v12257_v43, 0.0  ;;  %v5095_v7 = vadd.f32 %v12086_v53, %v5075_v31  ;;  %v5074_v17 = vsel %vm5038_vm8, %v5022_v1, %v5058_v11  ;;  %v5001_v60 = vadd.f32 %v4985_v12, %v11859_v22  ;;  %v8360_v12 = vld [vmem:[%s13494_s0 + $0x60] sm:$0xff] }
 0xe44   :  { %v8248_v28 = vpop.eup %8247  ;;  %v4948_v41 = vmul.f32 %v8246_v59, %v12034_v23  ;;  %5185 = vadd.xlane.f32.xlu0 %v5184_v32  ;;  %v5094_v0 = vadd.f32 %v12086_v53, %v5074_v17  ;;  %v5025_v33 = vsub.f32 %v5002_v46, %v12065_v18 }
 0xe45   :  { %v4947_v15 = vmul.f32 %v8248_v28, %v12037_v36  ;;  %v5116_v56 = vmul.f32 %v12096_v45, %v5095_v7  ;;  %v5024_v44 = vsub.f32 %v5001_v60, %v12065_v18  ;;  %v8361_v60 = vld [vmem:[%s13494_s0 + $0x78] sm:$0xff] }
 0xe46   :  { %v4968_v63 = vmul.f32 %v12048_v6, %v4948_v41  ;;  %v5115_v3 = vmul.f32 %v12096_v45, %v5094_v0  ;;  %vm5041_vm9 = vcmp.gt.f32.partialorder %v5025_v33, 0.0  ;;  %v5061_v22 = vmul.f32 %v12073_v16, %v5025_v33  ;;  %v8362_v41 = vld [vmem:[%s13494_s0 + $0x70] sm:$0xff] }
 0xe47   :  { %v4967_v23 = vmul.f32 %v12048_v6, %v4947_v15  ;;  %v5137_v38 = vadd.f32 %v12106_v61, %v5116_v56  ;;  %vm5040_vm10 = vcmp.gt.f32.partialorder %v5024_v44, 0.0  ;;  %v5060_v52 = vmul.f32 %v12073_v16, %v5024_v44 }
 0xe48   :  { %v4988_v36 = vadd.f32 %v12054_v29, %v4968_v63  ;;  %v5136_v39 = vadd.f32 %v12106_v61, %v5115_v3  ;;  %v5077_v62 = vsel %vm5041_vm9, %v5025_v33, %v5061_v22  ;;  %v5411_v33 = vld [vmem:[%s13500_s5 + $0x18] sm:$0xff] }
 0xe49   :  { %v4987_v19 = vadd.f32 %v12054_v29, %v4967_v23  ;;  %v12285_v47 = vadd.f32 %v8357_v55, %v5137_v38  ;;  %v5097_v6 = vadd.f32 %v12086_v53, %v5077_v62  ;;  %v5076_v24 = vsel %vm5040_vm10, %v5024_v44, %v5060_v52 }
 0xe4a   :  { %v12291_v5 = vadd.f32 %v8358_v50, %v5136_v39  ;;  %v5096_v49 = vadd.f32 %v12086_v53, %v5076_v24  ;;  %v5004_v48 = vadd.f32 %v4988_v36, %v11876_v40 }
 0xe4b   :  { %13987 = vst [vmem:[#allocation43_spill] sm:$0xff] %v12285_v47  ;;  %v5193_v29 = vsel %vm50_vm0, %v12285_v47, 0.0  ;;  %v5118_v21 = vmul.f32 %v12096_v45, %v5097_v6  ;;  %v5003_v26 = vadd.f32 %v4987_v19, %v11873_v4  ;;  %v8359_v4 = vld [vmem:[%s13494_s0 + $0x68] sm:$0xff] }
 0xe4c   :  { %13988 = vst [vmem:[#allocation37_spill] sm:$0xff] %v12291_v5  ;;  %5194 = vadd.xlane.f32.xlu1 %v5193_v29  ;;  %v5190_v42 = vsel %vm50_vm0, %v12291_v5, 0.0  ;;  %v5117_v10 = vmul.f32 %v12096_v45, %v5096_v49  ;;  %v5027_v54 = vsub.f32 %v5004_v48, %v12065_v18 }
 0xe4d   :  { %5191 = vadd.xlane.f32.xlu0 %v5190_v42  ;;  %v5139_v25 = vadd.f32 %v12106_v61, %v5118_v21  ;;  %v5026_v40 = vsub.f32 %v5003_v26, %v12065_v18 }
 0xe4e   :  { %v5138_v1 = vadd.f32 %v12106_v61, %v5117_v10  ;;  %vm5043_vm11 = vcmp.gt.f32.partialorder %v5027_v54, 0.0  ;;  %v5063_v20 = vmul.f32 %v12073_v16, %v5027_v54 }
 0xe4f   :  { %v12310_v27 = vadd.f32 %v8359_v4, %v5139_v25  ;;  %vm5042_vm12 = vcmp.gt.f32.partialorder %v5026_v40, 0.0  ;;  %v5062_v51 = vmul.f32 %v12073_v16, %v5026_v40 }
 0xe50   :  { %v12316_v13 = vadd.f32 %v8360_v12, %v5138_v1  ;;  %v5079_v18 = vsel %vm5043_vm11, %v5027_v54, %v5063_v20 }
 0xe51   :  { %13989 = vst [vmem:[#allocation27_spill] sm:$0xff] %v12310_v27  ;;  %v5199_v11 = vsel %vm50_vm0, %v12310_v27, 0.0  ;;  %v5099_v8 = vadd.f32 %v12086_v53, %v5079_v18  ;;  %v5078_v31 = vsel %vm5042_vm12, %v5026_v40, %v5062_v51 }
 0xe52   :  { %13990 = vst [vmem:[#allocation26_spill] sm:$0xff] %v12316_v13  ;;  %5200 = vadd.xlane.f32.xlu1 %v5199_v11  ;;  %v5196_v46 = vsel %vm50_vm0, %v12316_v13, 0.0  ;;  %v5098_v59 = vadd.f32 %v12086_v53, %v5078_v31 }
 0xe53   :  { %5197 = vadd.xlane.f32.xlu0 %v5196_v46  ;;  %v5120_v16 = vmul.f32 %v12096_v45, %v5099_v8 }
 0xe54   :  { %v5119_v32 = vmul.f32 %v12096_v45, %v5098_v59 }
 0xe55   :  { %v5141_v7 = vadd.f32 %v12106_v61, %v5120_v16 }
 0xe56   :  { %v5140_v17 = vadd.f32 %v12106_v61, %v5119_v32  ;;  %v5410_v61 = vld [vmem:[%s13500_s5 + $0x10] sm:$0xff] }
 0xe57   :  { %v12331_v28 = vadd.f32 %v8361_v60, %v5141_v7  ;;  %v7690_v15 = vpack.c.bf16 %v5411_v33, %v5410_v61 }
 0xe58   :  { %v12336_v53 = vadd.f32 %v8362_v41, %v5140_v17 }
 0xe59   :  { %13991 = vst [vmem:[#allocation8_spill] sm:$0xff] %v12331_v28  ;;  %v5205_v0 = vsel %vm50_vm0, %v12331_v28, 0.0  ;;  %7691 = vmatprep.subr.bf16.mxu1 %v7690_v15 }
 0xe5a   :  { %13992 = vst [vmem:[#allocation9_spill] sm:$0xff] %v12336_v53  ;;  %5206 = vadd.xlane.f32.xlu1 %v5205_v0  ;;  %v5202_v45 = vsel %vm50_vm0, %v12336_v53, 0.0  ;;  %7693 = vmatpush3.bf16.msra.mxu1 %v7690_v15 }
 0xe5b   :  { %5203 = vadd.xlane.f32.xlu0 %v5202_v45 }
 0xe8c   :  { %v5165_v56 = vpop.xlane.xlu1 %5164 }
 0xe8d   :  { %v5209_v44 = vmul.f32 0.03125, %v5165_v56  ;;  %v5162_v63 = vpop.xlane.xlu0 %5161 }
 0xe8e   :  { %v5208_v3 = vmul.f32 0.03125, %v5162_v63 }
 0xe8f   :  { %v12349_v22 = vsub.f32 %v12124_v37, %v5209_v44 }
 0xe90   :  { %v12352_v23 = vsub.f32 %v12131_v57, %v5208_v3 }
 0xe91   :  { %v5171_v38 = vpop.xlane.xlu1 %5170  ;;  %v5241_v52 = vmul.f32 %v12349_v22, %v12349_v22 }
 0xe92   :  { %v5211_v36 = vmul.f32 0.03125, %v5171_v38  ;;  %v5168_v39 = vpop.xlane.xlu0 %5167  ;;  %v5240_v62 = vmul.f32 %v12352_v23, %v12352_v23 }
 0xe93   :  { %v5210_v19 = vmul.f32 0.03125, %v5168_v39  ;;  %v5259_v55 = vsel %vm50_vm0, %v5241_v52, 0.0 }
 0xe94   :  { %v12360_v6 = vsub.f32 %v12147_v30, %v5211_v36  ;;  %5260 = vadd.xlane.f32.xlu1 %v5259_v55  ;;  %v5256_v24 = vsel %vm50_vm0, %v5240_v62, 0.0 }
 0xe95   :  { %v12364_v50 = vsub.f32 %v12153_v35, %v5210_v19  ;;  %v5177_v49 = vpop.xlane.xlu1 %5176  ;;  %5257 = vadd.xlane.f32.xlu0 %v5256_v24 }
 0xe96   :  { %v5213_v48 = vmul.f32 0.03125, %v5177_v49  ;;  %v5174_v29 = vpop.xlane.xlu0 %5173  ;;  %v5243_v21 = vmul.f32 %v12360_v6, %v12360_v6 }
 0xe97   :  { %v5212_v26 = vmul.f32 0.03125, %v5174_v29  ;;  %v5242_v42 = vmul.f32 %v12364_v50, %v12364_v50 }
 0xe98   :  { %v12371_v10 = vsub.f32 %v12165_v58, %v5213_v48  ;;  %v5265_v54 = vsel %vm50_vm0, %v5243_v21, 0.0 }
 0xe99   :  { %v12375_v25 = vsub.f32 %v12170_v34, %v5212_v26  ;;  %5266 = vadd.xlane.f32.xlu1 %v5265_v54  ;;  %v5262_v40 = vsel %vm50_vm0, %v5242_v42, 0.0 }
 0xe9a   :  { %5263 = vadd.xlane.f32.xlu0 %v5262_v40  ;;  %v5245_v1 = vmul.f32 %v12371_v10, %v12371_v10 }
 0xe9b   :  { %v5244_v20 = vmul.f32 %v12375_v25, %v12375_v25 }
 0xe9c   :  { %v5271_v4 = vsel %vm50_vm0, %v5245_v1, 0.0 }
 0xe9d   :  { %5272 = vadd.xlane.f32.xlu1 %v5271_v4  ;;  %v5268_v51 = vsel %vm50_vm0, %v5244_v20, 0.0 }
 0xe9e   :  { %5269 = vadd.xlane.f32.xlu0 %v5268_v51 }
 0xec3   :  { %v5183_v12 = vpop.xlane.xlu1 %5182 }
 0xec4   :  { %v5215_v18 = vmul.f32 0.03125, %v5183_v12  ;;  %v5180_v11 = vpop.xlane.xlu0 %5179 }
 0xec5   :  { %v5214_v8 = vmul.f32 0.03125, %v5180_v11 }
 0xec6   :  { %v12385_v31 = vsub.f32 %v12210_v2, %v5215_v18 }
 0xec7   :  { %v12388_v46 = vsub.f32 %v12216_v9, %v5214_v8 }
 0xec8   :  { %v5247_v59 = vmul.f32 %v12385_v31, %v12385_v31 }
 0xec9   :  { %v5246_v16 = vmul.f32 %v12388_v46, %v12388_v46 }
 0xeca   :  { %v5277_v32 = vsel %vm50_vm0, %v5247_v59, 0.0 }
 0xecb   :  { %5278 = vadd.xlane.f32.xlu1 %v5277_v32  ;;  %v5274_v7 = vsel %vm50_vm0, %v5246_v16, 0.0 }
 0xecc   :  { %5275 = vadd.xlane.f32.xlu0 %v5274_v7 }
 0xed0   :  { %v5189_v17 = vpop.xlane.xlu1 %5188 }
 0xed1   :  { %v5217_v60 = vmul.f32 0.03125, %v5189_v17  ;;  %v5186_v41 = vpop.xlane.xlu0 %5185 }
 0xed2   :  { %v5216_v0 = vmul.f32 0.03125, %v5186_v41 }
 0xed3   :  { %v12397_v45 = vsub.f32 %v12250_v14, %v5217_v60 }
 0xed4   :  { %v12400_v61 = vsub.f32 %v12257_v43, %v5216_v0 }
 0xed5   :  { %v5249_v33 = vmul.f32 %v12397_v45, %v12397_v45 }
 0xed6   :  { %v5248_v15 = vmul.f32 %v12400_v61, %v12400_v61 }
 0xed7   :  { %v5283_v56 = vsel %vm50_vm0, %v5249_v33, 0.0 }
 0xed8   :  { %5284 = vadd.xlane.f32.xlu1 %v5283_v56  ;;  %v5280_v44 = vsel %vm50_vm0, %v5248_v15, 0.0 }
 0xed9   :  { %v5195_v63 = vpop.xlane.xlu1 %5194  ;;  %5281 = vadd.xlane.f32.xlu0 %v5280_v44 }
 0xeda   :  { %v5219_v3 = vmul.f32 0.03125, %v5195_v63  ;;  %v5192_v38 = vpop.xlane.xlu0 %5191 }
 0xedb   :  { %v5218_v52 = vmul.f32 0.03125, %v5192_v38 }
 0xedc   :  { %v12409_v36 = vsub.f32 %v12285_v47, %v5219_v3 }
 0xedd   :  { %v12412_v39 = vsub.f32 %v12291_v5, %v5218_v52 }
 0xede   :  { %v5251_v62 = vmul.f32 %v12409_v36, %v12409_v36 }
 0xedf   :  { %v5201_v19 = vpop.xlane.xlu1 %5200  ;;  %v5250_v55 = vmul.f32 %v12412_v39, %v12412_v39 }
 0xee0   :  { %v5221_v24 = vmul.f32 0.03125, %v5201_v19  ;;  %v5289_v49 = vsel %vm50_vm0, %v5251_v62, 0.0  ;;  %v5198_v48 = vpop.xlane.xlu0 %5197 }
 0xee1   :  { %5290 = vadd.xlane.f32.xlu1 %v5289_v49  ;;  %v5220_v29 = vmul.f32 0.03125, %v5198_v48  ;;  %v5286_v21 = vsel %vm50_vm0, %v5250_v55, 0.0 }
 0xee2   :  { %v12421_v26 = vsub.f32 %v12310_v27, %v5221_v24  ;;  %5287 = vadd.xlane.f32.xlu0 %v5286_v21  ;;  %v12447_v21 = vld [vmem:[%s13495_s1 + $0x2] ss:$0 sm:$0xff] }
 0xee3   :  { %v12424_v42 = vsub.f32 %v12316_v13, %v5220_v29 }
 0xee4   :  { %v5253_v54 = vmul.f32 %v12421_v26, %v12421_v26 }
 0xee5   :  { %v5252_v40 = vmul.f32 %v12424_v42, %v12424_v42 }
 0xee6   :  { %v5295_v1 = vsel %vm50_vm0, %v5253_v54, 0.0 }
 0xee7   :  { %5296 = vadd.xlane.f32.xlu1 %v5295_v1  ;;  %v5207_v20 = vpop.xlane.xlu1 %5206  ;;  %v5292_v4 = vsel %vm50_vm0, %v5252_v40, 0.0  ;;  %v12453_v1 = vld [vmem:[%s13495_s1 + $0x3] ss:$0 sm:$0xff] }
 0xee8   :  { %v5223_v51 = vmul.f32 0.03125, %v5207_v20  ;;  %5293 = vadd.xlane.f32.xlu0 %v5292_v4  ;;  %v5204_v12 = vpop.xlane.xlu0 %5203 }
 0xee9   :  { %v5222_v18 = vmul.f32 0.03125, %v5204_v12 }
 0xeea   :  { %v12433_v11 = vsub.f32 %v12331_v28, %v5223_v51 }
 0xeeb   :  { %v12436_v8 = vsub.f32 %v12336_v53, %v5222_v18 }
 0xeec   :  { %v5255_v59 = vmul.f32 %v12433_v11, %v12433_v11 }
 0xeed   :  { %v5254_v16 = vmul.f32 %v12436_v8, %v12436_v8 }
 0xeee   :  { %v5301_v32 = vsel %vm50_vm0, %v5255_v59, 0.0 }
 0xeef   :  { %5302 = vadd.xlane.f32.xlu1 %v5301_v32  ;;  %v5298_v7 = vsel %vm50_vm0, %v5254_v16, 0.0 }
 0xef0   :  { %5299 = vadd.xlane.f32.xlu0 %v5298_v7 }
 0xf21   :  { %v5261_v17 = vpop.xlane.xlu1 %5260 }
 0xf22   :  { %v5305_v60 = vmul.f32 0.03125, %v5261_v17  ;;  %v5258_v41 = vpop.xlane.xlu0 %5257 }
 0xf23   :  { %v5304_v0 = vmul.f32 0.03125, %v5258_v41 }
 0xf24   :  { %v5321_v33 = vadd.f32 1e-12, %v5305_v60 }
 0xf25   :  { %v5320_v15 = vadd.f32 1e-12, %v5304_v0 }
 0xf26   :  { %8249 = vrsqrt.f32 %v5321_v33  ;;  %v5267_v56 = vpop.xlane.xlu1 %5266 }
 0xf27   :  { %8251 = vrsqrt.f32 %v5320_v15  ;;  %v5307_v44 = vmul.f32 0.03125, %v5267_v56  ;;  %v5264_v63 = vpop.xlane.xlu0 %5263 }
 0xf28   :  { %v5306_v3 = vmul.f32 0.03125, %v5264_v63 }
 0xf29   :  { %v5323_v38 = vadd.f32 1e-12, %v5307_v44 }
 0xf2a   :  { %v5322_v52 = vadd.f32 1e-12, %v5306_v3  ;;  %v5273_v62 = vpop.xlane.xlu1 %5272 }
 0xf2b   :  { %8253 = vrsqrt.f32 %v5323_v38  ;;  %v5309_v19 = vmul.f32 0.03125, %v5273_v62  ;;  %v5270_v55 = vpop.xlane.xlu0 %5269 }
 0xf2c   :  { %8255 = vrsqrt.f32 %v5322_v52  ;;  %v5308_v24 = vmul.f32 0.03125, %v5270_v55 }
 0xf2d   :  { %v5325_v49 = vadd.f32 1e-12, %v5309_v19 }
 0xf2e   :  { %v5324_v48 = vadd.f32 1e-12, %v5308_v24 }
 0xf2f   :  { %8257 = vrsqrt.f32 %v5325_v49 }
 0xf30   :  { %v8250_v29 = vpop.eup %8249  ;;  %8259 = vrsqrt.f32 %v5324_v48 }
 0xf31   :  { %v8252_v54 = vpop.eup %8251  ;;  %v5353_v40 = vmul.f32 %v8250_v29, %v12349_v22 }
 0xf32   :  { %v5352_v20 = vmul.f32 %v8252_v54, %v12352_v23 }
 0xf33   :  { %v5373_v4 = vmul.f32 %v12447_v21, %v5353_v40 }
 0xf34   :  { %v5372_v51 = vmul.f32 %v12447_v21, %v5352_v20 }
 0xf35   :  { %v8254_v12 = vpop.eup %8253  ;;  %v12459_v18 = vadd.f32 %v12453_v1, %v5373_v4 }
 0xf36   :  { %v8256_v59 = vpop.eup %8255  ;;  %v12462_v16 = vadd.f32 %v12453_v1, %v5372_v51  ;;  %v5355_v22 = vmul.f32 %v8254_v12, %v12360_v6 }
 0xf37   :  { %5863 = vrot.lane.b32.xlu1 %v12459_v18, %s8364_s27  ;;  %v5354_v32 = vmul.f32 %v8256_v59, %v12364_v50 }
 0xf38   :  { %5861 = vrot.lane.b32.xlu0 %v12462_v16, %s8364_s27  ;;  %7526 = vmatprep.mubr.msk.f32.mxu1 %vm50_vm0, %v12462_v16  ;;  %v5375_v23 = vmul.f32 %v12447_v21, %v5355_v22 }
 0xf39   :  { %v8258_v7 = vpop.eup %8257  ;;  %7527 = vmatmul.mubr.msk.f32.vlgmr.msra.gmra.mrb[64].mxu1 %vm50_vm0, %v12459_v18  ;;  %v5374_v17 = vmul.f32 %v12447_v21, %v5354_v32 }
 0xf3a   :  { %v8260_v6 = vpop.eup %8259  ;;  %v12477_v60 = vadd.f32 %v12453_v1, %v5375_v23  ;;  %v5357_v50 = vmul.f32 %v8258_v7, %v12371_v10 }
 0xf3b   :  { %v12481_v41 = vadd.f32 %v12453_v1, %v5374_v17  ;;  %v5356_v0 = vmul.f32 %v8260_v6, %v12375_v25 }
 0xf3c   :  { %5867 = vrot.lane.b32.xlu0 %v12477_v60, %s8364_s27  ;;  %v5377_v33 = vmul.f32 %v12447_v21, %v5357_v50 }
 0xf3d   :  { %5865 = vrot.lane.b32.xlu1 %v12481_v41, %s8364_s27  ;;  %7529 = vmatprep.mubr.msk.f32.mxu1 %vm50_vm0, %v12481_v41  ;;  %v5376_v15 = vmul.f32 %v12447_v21, %v5356_v0 }
 0xf3e   :  { %7530 = vmatmul.mubr.msk.f32.gmra.mrb[66].mxu1 %vm50_vm0, %v12477_v60  ;;  %v12495_v10 = vadd.f32 %v12453_v1, %v5377_v33 }
 0xf3f   :  { %v12498_v25 = vadd.f32 %v12453_v1, %v5376_v15 }
 0xf40   :  { %5871 = vrot.lane.b32.xlu0 %v12495_v10, %s8364_s27 }
 0xf41   :  { %5869 = vrot.lane.b32.xlu1 %v12498_v25, %s8364_s27  ;;  %7532 = vmatprep.mubr.msk.f32.mxu1 %vm50_vm0, %v12498_v25 }
 0xf42   :  { %7533 = vmatmul.mubr.msk.f32.gmra.mrb[68].mxu1 %vm50_vm0, %v12495_v10 }
 0xf58   :  { %v5279_v56 = vpop.xlane.xlu1 %5278 }
 0xf59   :  { %v5311_v44 = vmul.f32 0.03125, %v5279_v56  ;;  %v5276_v63 = vpop.xlane.xlu0 %5275 }
 0xf5a   :  { %v5310_v3 = vmul.f32 0.03125, %v5276_v63 }
 0xf5b   :  { %v5327_v38 = vadd.f32 1e-12, %v5311_v44 }
 0xf5c   :  { %v5326_v52 = vadd.f32 1e-12, %v5310_v3 }
 0xf5d   :  { %8261 = vrsqrt.f32 %v5327_v38 }
 0xf5e   :  { %8263 = vrsqrt.f32 %v5326_v52 }
 0xf65   :  { %v5285_v62 = vpop.xlane.xlu1 %5284 }
 0xf66   :  { %v5313_v19 = vmul.f32 0.03125, %v5285_v62  ;;  %v5282_v55 = vpop.xlane.xlu0 %5281 }
 0xf67   :  { %v8262_v24 = vpop.eup %8261  ;;  %v5312_v49 = vmul.f32 0.03125, %v5282_v55 }
 0xf68   :  { %v8264_v48 = vpop.eup %8263  ;;  %v5329_v29 = vadd.f32 1e-12, %v5313_v19  ;;  %v5359_v54 = vmul.f32 %v8262_v24, %v12385_v31 }
 0xf69   :  { %v5328_v40 = vadd.f32 1e-12, %v5312_v49  ;;  %v5358_v20 = vmul.f32 %v8264_v48, %v12388_v46 }
 0xf6a   :  { %8265 = vrsqrt.f32 %v5329_v29  ;;  %v5379_v4 = vmul.f32 %v12447_v21, %v5359_v54 }
 0xf6b   :  { %8267 = vrsqrt.f32 %v5328_v40  ;;  %v5378_v51 = vmul.f32 %v12447_v21, %v5358_v20 }
 0xf6c   :  { %v12513_v12 = vadd.f32 %v12453_v1, %v5379_v4 }
 0xf6d   :  { %v12516_v59 = vadd.f32 %v12453_v1, %v5378_v51 }
 0xf6e   :  { %v5291_v22 = vpop.xlane.xlu1 %5290  ;;  %5875 = vrot.lane.b32.xlu0 %v12513_v12, %s8364_s27 }
 0xf6f   :  { %v5315_v31 = vmul.f32 0.03125, %v5291_v22  ;;  %v5288_v32 = vpop.xlane.xlu0 %5287  ;;  %5873 = vrot.lane.b32.xlu1 %v12516_v59, %s8364_s27  ;;  %7535 = vmatprep.mubr.msk.f32.mxu1 %vm50_vm0, %v12516_v59 }
 0xf70   :  { %v5314_v46 = vmul.f32 0.03125, %v5288_v32  ;;  %7536 = vmatmul.mubr.msk.f32.gmra.mrb[70].mxu1 %vm50_vm0, %v12513_v12 }
 0xf71   :  { %v5331_v23 = vadd.f32 1e-12, %v5315_v31 }
 0xf72   :  { %v5330_v7 = vadd.f32 1e-12, %v5314_v46 }
 0xf73   :  { %8269 = vrsqrt.f32 %v5331_v23 }
 0xf74   :  { %v8266_v17 = vpop.eup %8265  ;;  %8271 = vrsqrt.f32 %v5330_v7  ;;  %v5297_v6 = vpop.xlane.xlu1 %5296 }
 0xf75   :  { %v8268_v50 = vpop.eup %8267  ;;  %v5317_v0 = vmul.f32 0.03125, %v5297_v6  ;;  %v5294_v33 = vpop.xlane.xlu0 %5293  ;;  %v5361_v15 = vmul.f32 %v8266_v17, %v12397_v45 }
 0xf76   :  { %v5316_v56 = vmul.f32 0.03125, %v5294_v33  ;;  %v5360_v44 = vmul.f32 %v8268_v50, %v12400_v61 }
 0xf77   :  { %v5333_v63 = vadd.f32 1e-12, %v5317_v0  ;;  %v5381_v3 = vmul.f32 %v12447_v21, %v5361_v15 }
 0xf78   :  { %v5332_v38 = vadd.f32 1e-12, %v5316_v56  ;;  %v5380_v52 = vmul.f32 %v12447_v21, %v5360_v44 }
 0xf79   :  { %8273 = vrsqrt.f32 %v5333_v63  ;;  %v12531_v62 = vadd.f32 %v12453_v1, %v5381_v3 }
 0xf7a   :  { %8275 = vrsqrt.f32 %v5332_v38  ;;  %v12534_v19 = vadd.f32 %v12453_v1, %v5380_v52 }
 0xf7b   :  { %5879 = vrot.lane.b32.xlu0 %v12531_v62, %s8364_s27 }
 0xf7c   :  { %5877 = vrot.lane.b32.xlu1 %v12534_v19, %s8364_s27  ;;  %7538 = vmatprep.mubr.msk.f32.mxu1 %vm50_vm0, %v12534_v19  ;;  %v5303_v45 = vpop.xlane.xlu1 %5302 }
 0xf7d   :  { %v8270_v61 = vpop.eup %8269  ;;  %v5319_v55 = vmul.f32 0.03125, %v5303_v45  ;;  %7539 = vmatmul.mubr.msk.f32.gmra.mrb[72].mxu1 %vm50_vm0, %v12531_v62  ;;  %v5300_v24 = vpop.xlane.xlu0 %5299 }
 0xf7e   :  { %v8272_v49 = vpop.eup %8271  ;;  %v5318_v48 = vmul.f32 0.03125, %v5300_v24  ;;  %v5363_v29 = vmul.f32 %v8270_v61, %v12409_v36 }
 0xf7f   :  { %v5335_v54 = vadd.f32 1e-12, %v5319_v55  ;;  %v5362_v40 = vmul.f32 %v8272_v49, %v12412_v39 }
 0xf80   :  { %v5334_v20 = vadd.f32 1e-12, %v5318_v48  ;;  %v5383_v4 = vmul.f32 %v12447_v21, %v5363_v29 }
 0xf81   :  { %8277 = vrsqrt.f32 %v5335_v54  ;;  %v5382_v51 = vmul.f32 %v12447_v21, %v5362_v40 }
 0xf82   :  { %8279 = vrsqrt.f32 %v5334_v20  ;;  %v12552_v46 = vadd.f32 %v12453_v1, %v5383_v4 }
 0xf83   :  { %v8274_v22 = vpop.eup %8273  ;;  %v12549_v31 = vadd.f32 %v12453_v1, %v5382_v51 }
 0xf84   :  { %v8276_v32 = vpop.eup %8275  ;;  %v5365_v36 = vmul.f32 %v8274_v22, %v12421_v26 }
 0xf85   :  { %5881 = vrot.lane.b32.xlu1 %v12549_v31, %s8364_s27  ;;  %7541 = vmatprep.mubr.msk.f32.mxu1 %vm50_vm0, %v12549_v31  ;;  %v5364_v39 = vmul.f32 %v8276_v32, %v12424_v42 }
 0xf86   :  { %7542 = vmatmul.mubr.msk.f32.gmra.mrb[74].mxu1 %vm50_vm0, %v12552_v46  ;;  %v5385_v23 = vmul.f32 %v12447_v21, %v5365_v36 }
 0xf87   :  { %v5384_v7 = vmul.f32 %v12447_v21, %v5364_v39 }
 0xf88   :  { %v12568_v26 = vadd.f32 %v12453_v1, %v5385_v23 }
 0xf89   :  { %v12565_v17 = vadd.f32 %v12453_v1, %v5384_v7 }
 0xf8b   :  { %v8278_v6 = vpop.eup %8277  ;;  %7544 = vmatprep.mubr.msk.f32.mxu1 %vm50_vm0, %v12565_v17 }
 0xf8c   :  { %v8280_v50 = vpop.eup %8279  ;;  %7545 = vmatmul.mubr.msk.f32.gmra.mrb[76].mxu1 %vm50_vm0, %v12568_v26  ;;  %v5367_v42 = vmul.f32 %v8278_v6, %v12433_v11  ;;  %v12591_v11 = vld [vmem:[%s13501_s2] ss:$0 sm:$0xff] }
 0xf8d   :  { %v5366_v0 = vmul.f32 %v8280_v50, %v12436_v8 }
 0xf8e   :  { %v5387_v33 = vmul.f32 %v12447_v21, %v5367_v42 }
 0xf8f   :  { %v5386_v15 = vmul.f32 %v12447_v21, %v5366_v0 }
 0xf90   :  { %v12582_v44 = vadd.f32 %v12453_v1, %v5387_v33 }
 0xf91   :  { %v12579_v56 = vadd.f32 %v12453_v1, %v5386_v15 }
 0xf93   :  { %7547 = vmatprep.mubr.msk.f32.mxu1 %vm50_vm0, %v12579_v56 }
 0xf94   :  { %7548 = vmatmul.mubr.msk.f32.gmra.mrb[78].mxu1 %vm50_vm0, %v12582_v44 }
0x100c   :  { %v7528_v8 = vpop.f32.mrb[64].mxu1 }
0x100d   :  { %v12594_v21 = vadd.f32 %v7528_v8, %v12591_v11  ;;  %v5531_v63 = vpop.f32.mrb[65].mxu1 }
0x100e   :  { %v12597_v3 = vadd.f32 %v12591_v11, %v5531_v63 }
0x100f   :  { %v5615_v1 = vsel %vm312_vm1, %v12594_v21, 0.0 }
0x1010   :  { %5616 = vadd.xlane.f32.xlu1 %v5615_v1  ;;  %v5612_v38 = vsel %vm312_vm1, %v12597_v3, 0.0 }
0x1011   :  { %v7531_v52 = vpop.f32.mrb[66].mxu1  ;;  %5613 = vadd.xlane.f32.xlu0 %v5612_v38 }
0x1012   :  { %v12604_v45 = vadd.f32 %v7531_v52, %v12591_v11  ;;  %v5541_v61 = vpop.f32.mrb[67].mxu1 }
0x1013   :  { %v12607_v55 = vadd.f32 %v12591_v11, %v5541_v61 }
0x1014   :  { %v5621_v24 = vsel %vm312_vm1, %v12604_v45, 0.0 }
0x1015   :  { %v7534_v49 = vpop.f32.mrb[68].mxu1  ;;  %5622 = vadd.xlane.f32.xlu1 %v5621_v24  ;;  %v5618_v48 = vsel %vm312_vm1, %v12607_v55, 0.0 }
0x1016   :  { %v12614_v29 = vadd.f32 %v7534_v49, %v12591_v11  ;;  %5619 = vadd.xlane.f32.xlu0 %v5618_v48  ;;  %v5551_v54 = vpop.f32.mrb[69].mxu1 }
0x1017   :  { %v12617_v40 = vadd.f32 %v12591_v11, %v5551_v54 }
0x1018   :  { %v5627_v20 = vsel %vm312_vm1, %v12614_v29, 0.0 }
0x1019   :  { %5628 = vadd.xlane.f32.xlu1 %v5627_v20  ;;  %v5624_v4 = vsel %vm312_vm1, %v12617_v40, 0.0 }
0x101a   :  { %5625 = vadd.xlane.f32.xlu0 %v5624_v4 }
0x1043   :  { %v7537_v51 = vpop.f32.mrb[70].mxu1 }
0x1044   :  { %v12624_v22 = vadd.f32 %v7537_v51, %v12591_v11  ;;  %v5561_v32 = vpop.f32.mrb[71].mxu1 }
0x1045   :  { %v12627_v36 = vadd.f32 %v12591_v11, %v5561_v32  ;;  %v12667_v32 = vpop.permute.xlu1 %5863 }
0x1046   :  { %v5633_v39 = vsel %vm312_vm1, %v12624_v22, 0.0 }
0x1047   :  { %5634 = vadd.xlane.f32.xlu1 %v5633_v39  ;;  %v5630_v23 = vsel %vm312_vm1, %v12627_v36, 0.0  ;;  %v12669_v39 = vpop.permute.xlu0 %5861 }
0x1048   :  { %5631 = vadd.xlane.f32.xlu0 %v5630_v23 }
0x1049   :  { %v12671_v23 = vpop.permute.xlu1 %5865 }
0x1050   :  { %v7540_v7 = vpop.f32.mrb[72].mxu1 }
0x1051   :  { %v12634_v6 = vadd.f32 %v7540_v7, %v12591_v11  ;;  %v5571_v50 = vpop.f32.mrb[73].mxu1  ;;  %v12673_v7 = vpop.permute.xlu0 %5867 }
0x1052   :  { %v12637_v42 = vadd.f32 %v12591_v11, %v5571_v50  ;;  %v12675_v50 = vpop.permute.xlu1 %5869 }
0x1053   :  { %v5639_v0 = vsel %vm312_vm1, %v12634_v6, 0.0 }
0x1054   :  { %5640 = vadd.xlane.f32.xlu1 %v5639_v0  ;;  %v5636_v33 = vsel %vm312_vm1, %v12637_v42, 0.0 }
0x1055   :  { %5637 = vadd.xlane.f32.xlu0 %v5636_v33 }
0x1056   :  { %v12680_v33 = vpop.permute.xlu1 %5873 }
0x1059   :  { %v7543_v15 = vpop.f32.mrb[74].mxu1 }
0x105a   :  { %v12644_v8 = vadd.f32 %v7543_v15, %v12591_v11  ;;  %v5581_v63 = vpop.f32.mrb[75].mxu1 }
0x105b   :  { %v12647_v1 = vadd.f32 %v12591_v11, %v5581_v63 }
0x105c   :  { %v5645_v38 = vsel %vm312_vm1, %v12644_v8, 0.0 }
0x105d   :  { %5646 = vadd.xlane.f32.xlu1 %v5645_v38  ;;  %v5642_v52 = vsel %vm312_vm1, %v12647_v1, 0.0  ;;  %v12687_v38 = vpop.permute.xlu0 %5871 }
0x105e   :  { %5643 = vadd.xlane.f32.xlu0 %v5642_v52  ;;  %v12689_v52 = vpop.permute.xlu1 %5877 }
0x105f   :  { %v7546_v61 = vpop.f32.mrb[76].mxu1 }
0x1060   :  { %v12654_v24 = vadd.f32 %v7546_v61, %v12591_v11  ;;  %v5591_v49 = vpop.f32.mrb[77].mxu1 }
0x1061   :  { %v12657_v48 = vadd.f32 %v12591_v11, %v5591_v49  ;;  %v12693_v49 = vpop.permute.xlu0 %5875 }
0x1062   :  { %v5651_v54 = vsel %vm312_vm1, %v12654_v24, 0.0 }
0x1063   :  { %5652 = vadd.xlane.f32.xlu0 %v5651_v54  ;;  %v5648_v20 = vsel %vm312_vm1, %v12657_v48, 0.0  ;;  %v12695_v54 = vpop.permute.xlu1 %5881 }
0x1067   :  { %5649 = vadd.xlane.f32.xlu0 %v5648_v20  ;;  %v7549_v4 = vpop.f32.mrb[78].mxu1  ;;  %v12697_v20 = vpop.permute.xlu0 %5879 }
0x1068   :  { %v5601_v51 = vpop.f32.mrb[79].mxu1  ;;  %v12678_v0 = vadd.f32 %v7549_v4, %v12591_v11 }
0x1069   :  { %v12683_v15 = vadd.f32 %v12591_v11, %v5601_v51 }
0x106a   :  { %v5657_v63 = vsel %vm312_vm1, %v12678_v0, 0.0 }
0x106b   :  { %v5654_v61 = vsel %vm312_vm1, %v12683_v15, 0.0 }
0x106e   :  { %5885 = vrot.lane.b32.xlu1 %v12565_v17, %s8364_s27 }
0x107d   :  { %5883 = vrot.lane.b32.xlu0 %v12552_v46, %s8364_s27 }
0x1092   :  { %5658 = vadd.xlane.f32.xlu1 %v5657_v63 }
0x1096   :  { %5655 = vadd.xlane.f32.xlu1 %v5654_v61 }
0x109d   :  { %v5617_v11 = vpop.xlane.xlu1 %5616 }
0x109e   :  { %v5662_v4 = vmul.f32 0.015625, %v5617_v11  ;;  %v5614_v51 = vpop.xlane.xlu0 %5613 }
0x109f   :  { %v5661_v28 = vmul.f32 0.015625, %v5614_v51 }
0x10a0   :  { %v12700_v27 = vsub.f32 %v12594_v21, %v5662_v4 }
0x10a1   :  { %v12703_v63 = vsub.f32 %v12597_v3, %v5661_v28 }
0x10a2   :  { %v5623_v47 = vpop.xlane.xlu1 %5622  ;;  %v5694_v53 = vmul.f32 %v12700_v27, %v12700_v27 }
0x10a3   :  { %v5664_v13 = vmul.f32 0.015625, %v5623_v47  ;;  %v5620_v61 = vpop.xlane.xlu0 %5619  ;;  %v5693_v5 = vmul.f32 %v12703_v63, %v12703_v63 }
0x10a4   :  { %v5663_v14 = vmul.f32 0.015625, %v5620_v61  ;;  %v5712_v11 = vsel %vm312_vm1, %v5694_v53, 0.0 }
0x10a5   :  { %v12711_v51 = vsub.f32 %v12604_v45, %v5664_v13  ;;  %5713 = vadd.xlane.f32.xlu1 %v5712_v11  ;;  %v5709_v21 = vsel %vm312_vm1, %v5693_v5, 0.0 }
0x10a6   :  { %v12715_v28 = vsub.f32 %v12607_v55, %v5663_v14  ;;  %v5629_v3 = vpop.xlane.xlu1 %5628  ;;  %5710 = vadd.xlane.f32.xlu0 %v5709_v21  ;;  %v6038_v21 = vld [vmem:[%s13502_s6 + $0x10] sm:$0xff] }
0x10a7   :  { %v5666_v4 = vmul.f32 0.015625, %v5629_v3  ;;  %v5626_v47 = vpop.xlane.xlu0 %5625  ;;  %v5696_v43 = vmul.f32 %v12711_v51, %v12711_v51  ;;  %v6039_v3 = vld [vmem:[%s13502_s6 + $0x18] sm:$0xff] }
0x10a8   :  { %v5665_v2 = vmul.f32 0.015625, %v5626_v47  ;;  %v5695_v53 = vmul.f32 %v12715_v28, %v12715_v28  ;;  %v6040_v47 = vld [vmem:[%s13502_s6 + $0x20] sm:$0xff] }
0x10a9   :  { %v12722_v13 = vsub.f32 %v12614_v29, %v5666_v4  ;;  %v5718_v45 = vsel %vm312_vm1, %v5696_v43, 0.0  ;;  %v6036_v29 = vld [vmem:[%s13502_s6] sm:$0xff]  ;;  %v6037_v43 = vld [vmem:[%s13502_s6 + $0x8] sm:$0xff]  ;;  %v7698_v4 = vpack.c.bf16 %v6039_v3, %v6038_v21 }
0x10aa   :  { %v12726_v5 = vsub.f32 %v12617_v40, %v5665_v2  ;;  %5719 = vadd.xlane.f32.xlu1 %v5718_v45  ;;  %v5715_v14 = vsel %vm312_vm1, %v5695_v53, 0.0  ;;  %v7694_v40 = vpack.c.bf16 %v6037_v43, %v6036_v29  ;;  %v6041_v53 = vld [vmem:[%s13502_s6 + $0x28] sm:$0xff]  ;;  %v6042_v45 = vld [vmem:[%s13502_s6 + $0x30] sm:$0xff] }
0x10ab   :  { %5716 = vadd.xlane.f32.xlu0 %v5715_v14  ;;  %v5698_v55 = vmul.f32 %v12722_v13, %v12722_v13  ;;  %v7702_v14 = vpack.c.bf16 %v6041_v53, %v6040_v47 }
0x10ac   :  { %v5697_v61 = vmul.f32 %v12726_v5, %v12726_v5  ;;  %7695 = vmatprep.subr.bf16.mxu0 %v7694_v40  ;;  %7710 = vmatprep.subr.bf16.mxu1 %v7694_v40 }
0x10ad   :  { %v5724_v2 = vsel %vm312_vm1, %v5698_v55, 0.0  ;;  %7697 = vmatpush3.bf16.msra.mxu0 %v7694_v40  ;;  %7714 = vmatpush3.bf16.msra.mxu1 %v7694_v40  ;;  %v6043_v55 = vld [vmem:[%s13502_s6 + $0x38] sm:$0xff] }
0x10ae   :  { %5725 = vadd.xlane.f32.xlu1 %v5724_v2  ;;  %v5721_v11 = vsel %vm312_vm1, %v5697_v61, 0.0  ;;  %7699 = vmatprep.subr.bf16.mxu0 %v7698_v4  ;;  %v7706_v61 = vpack.c.bf16 %v6043_v55, %v6042_v45 }
0x10af   :  { %5722 = vadd.xlane.f32.xlu0 %v5721_v11  ;;  %7711 = vmatprep.subr.bf16.mxu1 %v7698_v4 }
0x10b1   :  { %7701 = vmatpush3.bf16.msra.mxu0 %v7698_v4  ;;  %7715 = vmatpush3.bf16.msra.mxu1 %v7698_v4 }
0x10b2   :  { %7703 = vmatprep.subr.bf16.mxu0 %v7702_v14  ;;  %7712 = vmatprep.subr.bf16.mxu1 %v7702_v14 }
0x10b5   :  { %7705 = vmatpush3.bf16.msra.mxu0 %v7702_v14  ;;  %7716 = vmatpush3.bf16.msra.mxu1 %v7702_v14 }
0x10b6   :  { %7707 = vmatprep.subr.bf16.mxu0 %v7706_v61  ;;  %7713 = vmatprep.subr.bf16.mxu1 %v7706_v61 }
0x10b9   :  { %7709 = vmatpush3.bf16.msra.mxu0 %v7706_v61  ;;  %7717 = vmatpush3.bf16.msra.mxu1 %v7706_v61 }
0x10d4   :  { %v5635_v29 = vpop.xlane.xlu1 %5634 }
0x10d5   :  { %v5668_v43 = vmul.f32 0.015625, %v5635_v29  ;;  %v5632_v2 = vpop.xlane.xlu0 %5631 }
0x10d6   :  { %v5667_v40 = vmul.f32 0.015625, %v5632_v2 }
0x10d7   :  { %v12760_v11 = vsub.f32 %v12624_v22, %v5668_v43 }
0x10d8   :  { %v12763_v21 = vsub.f32 %v12627_v36, %v5667_v40 }
0x10d9   :  { %v5700_v3 = vmul.f32 %v12760_v11, %v12760_v11 }
0x10da   :  { %v5699_v4 = vmul.f32 %v12763_v21, %v12763_v21 }
0x10db   :  { %v5730_v47 = vsel %vm312_vm1, %v5700_v3, 0.0 }
0x10dc   :  { %5731 = vadd.xlane.f32.xlu1 %v5730_v47  ;;  %v5727_v53 = vsel %vm312_vm1, %v5699_v4, 0.0 }
0x10dd   :  { %5728 = vadd.xlane.f32.xlu0 %v5727_v53 }
0x10e1   :  { %v5641_v45 = vpop.xlane.xlu1 %5640 }
0x10e2   :  { %v5670_v22 = vmul.f32 0.015625, %v5641_v45  ;;  %v5638_v14 = vpop.xlane.xlu0 %5637 }
0x10e3   :  { %v5669_v55 = vmul.f32 0.015625, %v5638_v14 }
0x10e4   :  { %v12772_v36 = vsub.f32 %v12634_v6, %v5670_v22 }
0x10e5   :  { %v12775_v61 = vsub.f32 %v12637_v42, %v5669_v55 }
0x10e6   :  { %v5702_v29 = vmul.f32 %v12772_v36, %v12772_v36 }
0x10e7   :  { %v5701_v43 = vmul.f32 %v12775_v61, %v12775_v61 }
0x10e8   :  { %v5736_v2 = vsel %vm312_vm1, %v5702_v29, 0.0 }
0x10e9   :  { %5737 = vadd.xlane.f32.xlu1 %v5736_v2  ;;  %v5733_v40 = vsel %vm312_vm1, %v5701_v43, 0.0 }
0x10ea   :  { %v5647_v3 = vpop.xlane.xlu1 %5646  ;;  %5734 = vadd.xlane.f32.xlu0 %v5733_v40 }
0x10eb   :  { %v5672_v4 = vmul.f32 0.015625, %v5647_v3  ;;  %v5644_v47 = vpop.xlane.xlu0 %5643 }
0x10ec   :  { %v5671_v6 = vmul.f32 0.015625, %v5644_v47 }
0x10ed   :  { %v12784_v53 = vsub.f32 %v12644_v8, %v5672_v4 }
0x10ee   :  { %v12787_v42 = vsub.f32 %v12647_v1, %v5671_v6 }
0x10ef   :  { %v5704_v45 = vmul.f32 %v12784_v53, %v12784_v53 }
0x10f0   :  { %v5653_v22 = vpop.xlane.xlu0 %5652  ;;  %v5703_v14 = vmul.f32 %v12787_v42, %v12787_v42 }
0x10f1   :  { %v5674_v55 = vmul.f32 0.015625, %v5653_v22  ;;  %v5742_v29 = vsel %vm312_vm1, %v5704_v45, 0.0 }
0x10f2   :  { %5743 = vadd.xlane.f32.xlu1 %v5742_v29  ;;  %v5739_v43 = vsel %vm312_vm1, %v5703_v14, 0.0 }
0x10f3   :  { %v12796_v2 = vsub.f32 %v12654_v24, %v5674_v55  ;;  %5740 = vadd.xlane.f32.xlu0 %v5739_v43  ;;  %v12813_v24 = vpop.permute.xlu1 %5885 }
0x10f4   :  { %v5650_v8 = vpop.xlane.xlu0 %5649 }
0x10f5   :  { %v5673_v1 = vmul.f32 0.015625, %v5650_v8  ;;  %v5706_v40 = vmul.f32 %v12796_v2, %v12796_v2 }
0x10f7   :  { %v12801_v3 = vsub.f32 %v12657_v48, %v5673_v1  ;;  %v5748_v4 = vsel %vm312_vm1, %v5706_v40, 0.0 }
0x10f8   :  { %5749 = vadd.xlane.f32.xlu0 %v5748_v4  ;;  %v12827_v4 = vpop.permute.xlu0 %5883 }
0x10f9   :  { %v5705_v47 = vmul.f32 %v12801_v3, %v12801_v3 }
0x10fb   :  { %v5745_v6 = vsel %vm312_vm1, %v5705_v47, 0.0 }
0x10fc   :  { %5746 = vadd.xlane.f32.xlu0 %v5745_v6 }
0x1103   :  { %5887 = vrot.lane.b32.xlu1 %v12568_v26, %s8364_s27 }
0x1112   :  { %5889 = vrot.lane.b32.xlu0 %v12579_v56, %s8364_s27 }
0x1116   :  { %5891 = vrot.lane.b32.xlu0 %v12582_v44, %s8364_s27 }
0x111f   :  { %v5659_v48 = vpop.xlane.xlu1 %5658 }
0x1120   :  { %v5676_v45 = vmul.f32 0.015625, %v5659_v48 }
0x1122   :  { %v12816_v22 = vsub.f32 %v12678_v0, %v5676_v45 }
0x1123   :  { %v5656_v14 = vpop.xlane.xlu1 %5655 }
0x1124   :  { %v5675_v55 = vmul.f32 0.015625, %v5656_v14  ;;  %v5708_v29 = vmul.f32 %v12816_v22, %v12816_v22 }
0x1126   :  { %v12821_v43 = vsub.f32 %v12683_v15, %v5675_v55  ;;  %v5754_v8 = vsel %vm312_vm1, %v5708_v29, 0.0 }
0x1127   :  { %5755 = vadd.xlane.f32.xlu1 %v5754_v8 }
0x1128   :  { %v5707_v1 = vmul.f32 %v12821_v43, %v12821_v43 }
0x112a   :  { %v5751_v40 = vsel %vm312_vm1, %v5707_v1, 0.0 }
0x112b   :  { %5752 = vadd.xlane.f32.xlu1 %v5751_v40 }
0x1132   :  { %v5714_v0 = vpop.xlane.xlu1 %5713 }
0x1133   :  { %v5758_v47 = vmul.f32 0.015625, %v5714_v0  ;;  %v5711_v6 = vpop.xlane.xlu0 %5710 }
0x1134   :  { %v5757_v48 = vmul.f32 0.015625, %v5711_v6 }
0x1135   :  { %v5774_v45 = vadd.f32 1e-12, %v5758_v47  ;;  %v12832_v47 = vld [vmem:[%s13501_s2 + $0x1] ss:$0 sm:$0xff] }
0x1136   :  { %v5773_v14 = vadd.f32 1e-12, %v5757_v48 }
0x1137   :  { %8281 = vrsqrt.f32 %v5774_v45  ;;  %v5720_v15 = vpop.xlane.xlu1 %5719 }
0x1138   :  { %8283 = vrsqrt.f32 %v5773_v14  ;;  %v5760_v55 = vmul.f32 0.015625, %v5720_v15  ;;  %v5717_v29 = vpop.xlane.xlu0 %5716 }
0x1139   :  { %v5759_v8 = vmul.f32 0.015625, %v5717_v29 }
0x113a   :  { %v5776_v58 = vadd.f32 1e-12, %v5760_v55  ;;  %v5910_v55 = vsel %vm50_vm0, %v12459_v18, %v12667_v32  ;;  %v12862_v18 = vld [vmem:[%s13501_s2 + $0x4] ss:$0 sm:$0xff] }
0x113b   :  { %v5775_v30 = vadd.f32 1e-12, %v5759_v8  ;;  %v5726_v37 = vpop.xlane.xlu1 %5725  ;;  %v5909_v8 = vsel %vm50_vm0, %v12462_v16, %v12669_v39 }
0x113c   :  { %8285 = vrsqrt.f32 %v5776_v58  ;;  %v5762_v1 = vmul.f32 0.015625, %v5726_v37  ;;  %v5723_v40 = vpop.xlane.xlu0 %5722  ;;  %v12838_v37 = vld [vmem:[%s13501_s2 + $0x2] ss:$0 sm:$0xff] }
0x113d   :  { %8287 = vrsqrt.f32 %v5775_v30  ;;  %v5761_v9 = vmul.f32 0.015625, %v5723_v40 }
0x113e   :  { %v5778_v34 = vadd.f32 1e-12, %v5762_v1 }
0x113f   :  { %v5777_v0 = vadd.f32 1e-12, %v5761_v9 }
0x1140   :  { %8289 = vrsqrt.f32 %v5778_v34 }
0x1141   :  { %v8282_v6 = vpop.eup %8281  ;;  %8291 = vrsqrt.f32 %v5777_v0 }
0x1142   :  { %v8284_v48 = vpop.eup %8283  ;;  %v5806_v45 = vmul.f32 %v8282_v6, %v12700_v27  ;;  %v12850_v27 = vld [vmem:[%s13501_s2 + $0x3] ss:$0 sm:$0xff] }
0x1143   :  { %v5805_v30 = vmul.f32 %v8284_v48, %v12703_v63 }
0x1144   :  { %v5826_v58 = vmul.f32 %v12832_v47, %v5806_v45 }
0x1145   :  { %v5825_v34 = vmul.f32 %v12832_v47, %v5805_v30 }
0x1146   :  { %v8286_v9 = vpop.eup %8285  ;;  %v5846_v14 = vadd.f32 %v12838_v37, %v5826_v58 }
0x1147   :  { %v8288_v15 = vpop.eup %8287  ;;  %v5845_v29 = vadd.f32 %v12838_v37, %v5825_v34  ;;  %v5808_v63 = vmul.f32 %v8286_v9, %v12711_v51  ;;  %v5912_v51 = vsel %vm50_vm0, %v12477_v60, %v12673_v7 }
0x1148   :  { %v5926_v1 = vadd.f32 %v5910_v55, %v5846_v14  ;;  %v5807_v40 = vmul.f32 %v8288_v15, %v12715_v28  ;;  %v5911_v28 = vsel %vm50_vm0, %v12481_v41, %v12671_v23  ;;  %v12882_v14 = vld [vmem:[%s13501_s2 + $0x5] ss:$0 sm:$0xff] }
0x1149   :  { %v5828_v0 = vmul.f32 %v12832_v47, %v5808_v63  ;;  %v5925_v6 = vadd.f32 %v5909_v8, %v5845_v29 }
0x114a   :  { %v8290_v32 = vpop.eup %8289  ;;  %v5949_v48 = vsub.f32 %v5926_v1, %v12850_v27  ;;  %v5827_v16 = vmul.f32 %v12832_v47, %v5807_v40  ;;  %v5913_v1 = vsel %vm50_vm0, %v12498_v25, %v12675_v50 }
0x114b   :  { %v8292_v39 = vpop.eup %8291  ;;  %v5848_v45 = vadd.f32 %v12838_v37, %v5828_v0  ;;  %v5810_v30 = vmul.f32 %v8290_v32, %v12722_v13  ;;  %v5948_v58 = vsub.f32 %v5925_v6, %v12850_v27 }
0x114c   :  { %v5847_v34 = vadd.f32 %v12838_v37, %v5827_v16  ;;  %v5809_v9 = vmul.f32 %v8292_v39, %v12726_v5  ;;  %vm5965_vm13 = vcmp.gt.f32.partialorder %v5949_v48, 0.0  ;;  %v5985_v60 = vmul.f32 %v12862_v18, %v5949_v48 }
0x114d   :  { %v5830_v7 = vmul.f32 %v12832_v47, %v5810_v30  ;;  %vm5964_vm14 = vcmp.gt.f32.partialorder %v5948_v58, 0.0  ;;  %v5984_v41 = vmul.f32 %v12862_v18, %v5948_v58  ;;  %v5928_v23 = vadd.f32 %v5912_v51, %v5848_v45 }
0x114e   :  { %v5829_v13 = vmul.f32 %v12832_v47, %v5809_v9  ;;  %v6001_v15 = vsel %vm5965_vm13, %v5949_v48, %v5985_v60  ;;  %v5927_v55 = vadd.f32 %v5911_v28, %v5847_v34  ;;  %v5914_v5 = vsel %vm50_vm0, %v12495_v10, %v12687_v38 }
0x114f   :  { %v5850_v29 = vadd.f32 %v12838_v37, %v5830_v7  ;;  %v6000_v63 = vsel %vm5964_vm14, %v5948_v58, %v5984_v41  ;;  %v5951_v8 = vsub.f32 %v5928_v23, %v12850_v27  ;;  %v6021_v32 = vadd.f32 %v12882_v14, %v6001_v15 }
0x1150   :  { %v5849_v40 = vadd.f32 %v12838_v37, %v5829_v13  ;;  %v6020_v0 = vadd.f32 %v12882_v14, %v6000_v63  ;;  %v5950_v6 = vsub.f32 %v5927_v55, %v12850_v27 }
0x1151   :  { %vm5967_vm15 = vcmp.gt.f32.partialorder %v5951_v8, 0.0  ;;  %v5987_v10 = vmul.f32 %v12862_v18, %v5951_v8  ;;  %v5930_v38 = vadd.f32 %v5914_v5, %v5850_v29 }
0x1152   :  { %7566 = vmatprep.mubr.msk.f32.mxu0 %vm312_vm1, %v6020_v0  ;;  %vm5966_vm2 = vcmp.gt.f32.partialorder %v5950_v6, 0.0  ;;  %v5986_v51 = vmul.f32 %v12862_v18, %v5950_v6  ;;  %v5929_v48 = vadd.f32 %v5913_v1, %v5849_v40 }
0x1153   :  { %7567 = vmatmul.mubr.msk.f32.vlgmr.msra.gmra.mrb[96].mxu0 %vm312_vm1, %v6021_v32  ;;  %v6003_v25 = vsel %vm5967_vm15, %v5951_v8, %v5987_v10  ;;  %v5953_v50 = vsub.f32 %v5930_v38, %v12850_v27 }
0x1154   :  { %v6002_v16 = vsel %vm5966_vm2, %v5950_v6, %v5986_v51  ;;  %v5952_v39 = vsub.f32 %v5929_v48, %v12850_v27  ;;  %v6023_v30 = vadd.f32 %v12882_v14, %v6003_v25 }
0x1155   :  { %v6022_v28 = vadd.f32 %v12882_v14, %v6002_v16  ;;  %vm5969_vm3 = vcmp.gt.f32.partialorder %v5953_v50, 0.0  ;;  %v5989_v45 = vmul.f32 %v12862_v18, %v5953_v50 }
0x1156   :  { %vm5968_vm4 = vcmp.gt.f32.partialorder %v5952_v39, 0.0  ;;  %v5988_v58 = vmul.f32 %v12862_v18, %v5952_v39 }
0x1157   :  { %7569 = vmatprep.mubr.msk.f32.mxu0 %vm312_vm1, %v6022_v28  ;;  %v6005_v34 = vsel %vm5969_vm3, %v5953_v50, %v5989_v45  ;;  %v5916_v50 = vsel %vm50_vm0, %v12513_v12, %v12693_v49 }
0x1158   :  { %7570 = vmatmul.mubr.msk.f32.gmra.mrb[98].mxu0 %vm312_vm1, %v6023_v30  ;;  %v6004_v9 = vsel %vm5968_vm4, %v5952_v39, %v5988_v58  ;;  %v6025_v7 = vadd.f32 %v12882_v14, %v6005_v34 }
0x1159   :  { %v6024_v60 = vadd.f32 %v12882_v14, %v6004_v9 }
0x115b   :  { %7572 = vmatprep.mubr.msk.f32.mxu0 %vm312_vm1, %v6024_v60 }
0x115c   :  { %7573 = vmatmul.mubr.msk.f32.gmra.mrb[100].mxu0 %vm312_vm1, %v6025_v7 }
0x1169   :  { %v5732_v41 = vpop.xlane.xlu1 %5731 }
0x116a   :  { %v5764_v23 = vmul.f32 0.015625, %v5732_v41  ;;  %v5729_v13 = vpop.xlane.xlu0 %5728 }
0x116b   :  { %v5763_v15 = vmul.f32 0.015625, %v5729_v13 }
0x116c   :  { %v5780_v55 = vadd.f32 1e-12, %v5764_v23 }
0x116d   :  { %v5779_v5 = vadd.f32 1e-12, %v5763_v15 }
0x116e   :  { %8293 = vrsqrt.f32 %v5780_v55 }
0x116f   :  { %8295 = vrsqrt.f32 %v5779_v5 }
0x1176   :  { %v5738_v29 = vpop.xlane.xlu1 %5737 }
0x1177   :  { %v5766_v63 = vmul.f32 0.015625, %v5738_v29  ;;  %v5735_v8 = vpop.xlane.xlu0 %5734 }
0x1178   :  { %v8294_v1 = vpop.eup %8293  ;;  %v5765_v40 = vmul.f32 0.015625, %v5735_v8 }
0x1179   :  { %v8296_v0 = vpop.eup %8295  ;;  %v5812_v6 = vmul.f32 %v8294_v1, %v12760_v11  ;;  %v5782_v32 = vadd.f32 1e-12, %v5766_v63  ;;  %v5915_v11 = vsel %vm50_vm0, %v12516_v59, %v12680_v33 }
0x117a   :  { %v5811_v10 = vmul.f32 %v8296_v0, %v12763_v21  ;;  %v5781_v38 = vadd.f32 1e-12, %v5765_v40 }
0x117b   :  { %v5832_v51 = vmul.f32 %v12832_v47, %v5812_v6  ;;  %8297 = vrsqrt.f32 %v5782_v32 }
0x117c   :  { %v5831_v48 = vmul.f32 %v12832_v47, %v5811_v10  ;;  %8299 = vrsqrt.f32 %v5781_v38  ;;  %v5917_v10 = vsel %vm50_vm0, %v12534_v19, %v12689_v52 }
0x117d   :  { %v5852_v25 = vadd.f32 %v12838_v37, %v5832_v51 }
0x117e   :  { %v5851_v16 = vadd.f32 %v12838_v37, %v5831_v48 }
0x117f   :  { %v5744_v21 = vpop.xlane.xlu1 %5743  ;;  %v5932_v39 = vadd.f32 %v5916_v50, %v5852_v25 }
0x1180   :  { %v5768_v28 = vmul.f32 0.015625, %v5744_v21  ;;  %v5741_v45 = vpop.xlane.xlu0 %5740  ;;  %v5931_v30 = vadd.f32 %v5915_v11, %v5851_v16 }
0x1181   :  { %v5767_v58 = vmul.f32 0.015625, %v5741_v45  ;;  %v5955_v34 = vsub.f32 %v5932_v39, %v12850_v27 }
0x1182   :  { %v5784_v9 = vadd.f32 1e-12, %v5768_v28  ;;  %v5954_v60 = vsub.f32 %v5931_v30, %v12850_v27 }
0x1183   :  { %v5783_v7 = vadd.f32 1e-12, %v5767_v58  ;;  %vm5971_vm5 = vcmp.gt.f32.partialorder %v5955_v34, 0.0  ;;  %v5991_v12 = vmul.f32 %v12862_v18, %v5955_v34 }
0x1184   :  { %8301 = vrsqrt.f32 %v5784_v9  ;;  %vm5970_vm6 = vcmp.gt.f32.partialorder %v5954_v60, 0.0  ;;  %v5990_v49 = vmul.f32 %v12862_v18, %v5954_v60  ;;  %v5919_v9 = vsel %vm50_vm0, %v12549_v31, %v12695_v54 }
0x1185   :  { %v8298_v59 = vpop.eup %8297  ;;  %8303 = vrsqrt.f32 %v5783_v7  ;;  %v5750_v33 = vpop.xlane.xlu0 %5749  ;;  %v6007_v41 = vsel %vm5971_vm5, %v5955_v34, %v5991_v12 }
0x1186   :  { %v8300_v23 = vpop.eup %8299  ;;  %v5814_v13 = vmul.f32 %v8298_v59, %v12772_v36  ;;  %v5770_v15 = vmul.f32 0.015625, %v5750_v33  ;;  %v6006_v55 = vsel %vm5970_vm6, %v5954_v60, %v5990_v49  ;;  %v6027_v1 = vadd.f32 %v12882_v14, %v6007_v41  ;;  %v5888_v59 = vpop.permute.xlu1 %5887 }
0x1187   :  { %v5813_v5 = vmul.f32 %v8300_v23, %v12775_v61  ;;  %v6026_v29 = vadd.f32 %v12882_v14, %v6006_v55  ;;  %v5918_v61 = vsel %vm50_vm0, %v12531_v62, %v12697_v20  ;;  %v5922_v23 = vsel %vm50_vm0, %v12568_v26, %v5888_v59  ;;  %v13016_v59 = vld [vmem:[%s13495_s1 + $0x2b] ss:$0 sm:$0xff] }
0x1188   :  { %v5834_v63 = vmul.f32 %v12832_v47, %v5814_v13  ;;  %v5786_v8 = vadd.f32 1e-12, %v5770_v15 }
0x1189   :  { %v5833_v40 = vmul.f32 %v12832_v47, %v5813_v5  ;;  %7575 = vmatprep.mubr.msk.f32.mxu0 %vm312_vm1, %v6026_v29  ;;  %v5747_v0 = vpop.xlane.xlu0 %5746 }
0x118a   :  { %v5854_v6 = vadd.f32 %v12838_v37, %v5834_v63  ;;  %8305 = vrsqrt.f32 %v5786_v8  ;;  %v5769_v36 = vmul.f32 0.015625, %v5747_v0  ;;  %7576 = vmatmul.mubr.msk.f32.gmra.mrb[102].mxu0 %vm312_vm1, %v6027_v1  ;;  %v5921_v1 = vsel %vm50_vm0, %v12565_v17, %v12813_v24 }
0x118b   :  { %v5853_v32 = vadd.f32 %v12838_v37, %v5833_v40 }
0x118c   :  { %v5785_v38 = vadd.f32 1e-12, %v5769_v36  ;;  %v5934_v51 = vadd.f32 %v5918_v61, %v5854_v6 }
0x118d   :  { %v5933_v48 = vadd.f32 %v5917_v10, %v5853_v32 }
0x118e   :  { %v8302_v25 = vpop.eup %8301  ;;  %8307 = vrsqrt.f32 %v5785_v38  ;;  %v5957_v50 = vsub.f32 %v5934_v51, %v12850_v27 }
0x118f   :  { %v8304_v16 = vpop.eup %8303  ;;  %v5816_v11 = vmul.f32 %v8302_v25, %v12784_v53  ;;  %v5956_v21 = vsub.f32 %v5933_v48, %v12850_v27  ;;  %v5920_v53 = vsel %vm50_vm0, %v12552_v46, %v12827_v4 }
0x1190   :  { %v5815_v62 = vmul.f32 %v8304_v16, %v12787_v42  ;;  %vm5973_vm7 = vcmp.gt.f32.partialorder %v5957_v50, 0.0  ;;  %v5993_v20 = vmul.f32 %v12862_v18, %v5957_v50  ;;  %v5890_v16 = vpop.permute.xlu0 %5889 }
0x1191   :  { %v5836_v39 = vmul.f32 %v12832_v47, %v5816_v11  ;;  %vm5972_vm8 = vcmp.gt.f32.partialorder %v5956_v21, 0.0  ;;  %v5992_v19 = vmul.f32 %v12862_v18, %v5956_v21 }
0x1192   :  { %v5835_v52 = vmul.f32 %v12832_v47, %v5815_v62  ;;  %v6009_v28 = vsel %vm5973_vm7, %v5957_v50, %v5993_v20 }
0x1193   :  { %v5856_v45 = vadd.f32 %v12838_v37, %v5836_v39  ;;  %v6008_v30 = vsel %vm5972_vm8, %v5956_v21, %v5992_v19  ;;  %v6029_v7 = vadd.f32 %v12882_v14, %v6009_v28 }
0x1194   :  { %v8306_v58 = vpop.eup %8305  ;;  %v5855_v42 = vadd.f32 %v12838_v37, %v5835_v52  ;;  %v6028_v34 = vadd.f32 %v12882_v14, %v6008_v30  ;;  %v5892_v62 = vpop.permute.xlu0 %5891 }
0x1195   :  { %v5818_v60 = vmul.f32 %v8306_v58, %v12796_v2  ;;  %v5936_v12 = vadd.f32 %v5920_v53, %v5856_v45  ;;  %v5924_v28 = vsel %vm50_vm0, %v12582_v44, %v5892_v62 }
0x1196   :  { %7578 = vmatprep.mubr.msk.f32.mxu0 %vm312_vm1, %v6028_v34  ;;  %v5935_v49 = vadd.f32 %v5919_v9, %v5855_v42 }
0x1197   :  { %v5838_v33 = vmul.f32 %v12832_v47, %v5818_v60  ;;  %7579 = vmatmul.mubr.msk.f32.gmra.mrb[104].mxu0 %vm312_vm1, %v6029_v7  ;;  %v5959_v46 = vsub.f32 %v5936_v12, %v12850_v27 }
0x1198   :  { %v8308_v4 = vpop.eup %8307  ;;  %v5958_v41 = vsub.f32 %v5935_v49, %v12850_v27 }
0x1199   :  { %v5858_v31 = vadd.f32 %v12838_v37, %v5838_v33  ;;  %v5817_v54 = vmul.f32 %v8308_v4, %v12801_v3  ;;  %vm5975_vm9 = vcmp.gt.f32.partialorder %v5959_v46, 0.0  ;;  %v5995_v2 = vmul.f32 %v12862_v18, %v5959_v46 }
0x119a   :  { %vm5974_vm10 = vcmp.gt.f32.partialorder %v5958_v41, 0.0  ;;  %v5994_v13 = vmul.f32 %v12862_v18, %v5958_v41 }
0x119b   :  { %v5837_v15 = vmul.f32 %v12832_v47, %v5817_v54  ;;  %v6011_v55 = vsel %vm5975_vm9, %v5959_v46, %v5995_v2  ;;  %v5938_v5 = vadd.f32 %v5922_v23, %v5858_v31 }
0x119c   :  { %v6010_v29 = vsel %vm5974_vm10, %v5958_v41, %v5994_v13  ;;  %v6031_v26 = vadd.f32 %v12882_v14, %v6011_v55 }
0x119d   :  { %v5857_v63 = vadd.f32 %v12838_v37, %v5837_v15  ;;  %v6030_v8 = vadd.f32 %v12882_v14, %v6010_v29  ;;  %v5961_v3 = vsub.f32 %v5938_v5, %v12850_v27 }
0x119f   :  { %7581 = vmatprep.mubr.msk.f32.mxu0 %vm312_vm1, %v6030_v8  ;;  %v5937_v40 = vadd.f32 %v5921_v1, %v5857_v63  ;;  %v5997_v0 = vmul.f32 %v12862_v18, %v5961_v3  ;;  %vm5977_vm11 = vcmp.gt.f32.partialorder %v5961_v3, 0.0 }
0x11a0   :  { %7582 = vmatmul.mubr.msk.f32.gmra.mrb[106].mxu0 %vm312_vm1, %v6031_v26 }
0x11a1   :  { %v5960_v6 = vsub.f32 %v5937_v40, %v12850_v27  ;;  %v6013_v61 = vsel %vm5977_vm11, %v5961_v3, %v5997_v0 }
0x11a2   :  { %v6033_v17 = vadd.f32 %v12882_v14, %v6013_v61 }
0x11a3   :  { %vm5976_vm12 = vcmp.gt.f32.partialorder %v5960_v6, 0.0  ;;  %v5996_v36 = vmul.f32 %v12862_v18, %v5960_v6 }
0x11a5   :  { %v6012_v32 = vsel %vm5976_vm12, %v5960_v6, %v5996_v36 }
0x11a6   :  { %v6032_v10 = vadd.f32 %v12882_v14, %v6012_v32 }
0x11a8   :  { %7584 = vmatprep.mubr.msk.f32.mxu0 %vm312_vm1, %v6032_v10 }
0x11a9   :  { %7585 = vmatmul.mubr.msk.f32.gmra.mrb[108].mxu0 %vm312_vm1, %v6033_v17 }
0x11b4   :  { %v5756_v24 = vpop.xlane.xlu1 %5755 }
0x11b5   :  { %v5772_v38 = vmul.f32 0.015625, %v5756_v24 }
0x11b7   :  { %v5788_v51 = vadd.f32 1e-12, %v5772_v38 }
0x11b8   :  { %v5753_v48 = vpop.xlane.xlu1 %5752 }
0x11b9   :  { %8309 = vrsqrt.f32 %v5788_v51  ;;  %v5771_v25 = vmul.f32 0.015625, %v5753_v48 }
0x11bb   :  { %v5787_v50 = vadd.f32 1e-12, %v5771_v25 }
0x11bd   :  { %8311 = vrsqrt.f32 %v5787_v50 }
0x11c3   :  { %v8310_v11 = vpop.eup %8309 }
0x11c4   :  { %v5820_v21 = vmul.f32 %v8310_v11, %v12816_v22  ;;  %v5923_v22 = vsel %vm50_vm0, %v12579_v56, %v5890_v16 }
0x11c6   :  { %v5840_v20 = vmul.f32 %v12832_v47, %v5820_v21 }
0x11c7   :  { %v8312_v39 = vpop.eup %8311 }
0x11c8   :  { %v5860_v19 = vadd.f32 %v12838_v37, %v5840_v20  ;;  %v5819_v52 = vmul.f32 %v8312_v39, %v12821_v43 }
0x11ca   :  { %v5940_v45 = vadd.f32 %v5924_v28, %v5860_v19  ;;  %v5839_v30 = vmul.f32 %v12832_v47, %v5819_v52 }
0x11cc   :  { %v5963_v58 = vsub.f32 %v5940_v45, %v12850_v27  ;;  %v5859_v53 = vadd.f32 %v12838_v37, %v5839_v30 }
0x11ce   :  { %v5939_v42 = vadd.f32 %v5923_v22, %v5859_v53  ;;  %v5999_v34 = vmul.f32 %v12862_v18, %v5963_v58  ;;  %vm5979_vm13 = vcmp.gt.f32.partialorder %v5963_v58, 0.0 }
0x11d0   :  { %v5962_v9 = vsub.f32 %v5939_v42, %v12850_v27  ;;  %v6015_v44 = vsel %vm5979_vm13, %v5963_v58, %v5999_v34 }
0x11d1   :  { %v6035_v7 = vadd.f32 %v12882_v14, %v6015_v44 }
0x11d2   :  { %vm5978_vm14 = vcmp.gt.f32.partialorder %v5962_v9, 0.0  ;;  %v5998_v43 = vmul.f32 %v12862_v18, %v5962_v9 }
0x11d4   :  { %v6014_v60 = vsel %vm5978_vm14, %v5962_v9, %v5998_v43 }
0x11d5   :  { %v6034_v47 = vadd.f32 %v12882_v14, %v6014_v60 }
0x11d7   :  { %7587 = vmatprep.mubr.msk.f32.mxu1 %vm312_vm1, %v6034_v47 }
0x11d8   :  { %7588 = vmatmul.mubr.msk.f32.vlgmr.msra.gmra.mrb[80].mxu1 %vm312_vm1, %v6035_v7 }
0x1226   :  { %v7568_v56 = vpop.f32.mrb[96].mxu0 }
0x1227   :  { %6526 = vrot.lane.b32.xlu1 %v7568_v56, %s8365_s11  ;;  %v6158_v37 = vpop.f32.mrb[97].mxu0  ;;  %v13019_v14 = vadd.f32 %v7568_v56, %v13016_v59 }
0x1228   :  { %6524 = vrot.lane.b32.xlu0 %v6158_v37, %s8365_s11  ;;  %v13022_v33 = vadd.f32 %v13016_v59, %v6158_v37 }
0x1229   :  { %v6263_v46 = vsel %vm50_vm0, %v13019_v14, 0.0 }
0x122a   :  { %v6260_v4 = vsel %vm50_vm0, %v13022_v33, 0.0 }
0x122b   :  { %v7571_v27 = vpop.f32.mrb[98].mxu0 }
0x122c   :  { %v6168_v12 = vpop.f32.mrb[99].mxu0  ;;  %v13032_v55 = vadd.f32 %v7571_v27, %v13016_v59 }
0x122d   :  { %v6244_v15 = vadd.f32 %v13016_v59, %v6168_v12 }
0x122e   :  { %v6269_v8 = vsel %vm50_vm0, %v13032_v55, 0.0 }
0x122f   :  { %v7574_v49 = vpop.f32.mrb[100].mxu0  ;;  %v6266_v5 = vsel %vm50_vm0, %v6244_v15, 0.0 }
0x1230   :  { %v6178_v18 = vpop.f32.mrb[101].mxu0  ;;  %v13049_v40 = vadd.f32 %v7574_v49, %v13016_v59 }
0x1231   :  { %v6246_v1 = vadd.f32 %v13016_v59, %v6178_v18 }
0x1232   :  { %v6275_v6 = vsel %vm50_vm0, %v13049_v40, 0.0 }
0x1233   :  { %v6272_v0 = vsel %vm50_vm0, %v6246_v1, 0.0 }
0x1247   :  { %6264 = vadd.xlane.f32.xlu0 %v6263_v46 }
0x124b   :  { %6261 = vadd.xlane.f32.xlu1 %v6260_v4 }
0x125c   :  { %6528 = vrot.lane.b32.xlu1 %v6168_v12, %s8365_s11 }
0x125d   :  { %6530 = vrot.lane.b32.xlu0 %v7571_v27, %s8365_s11  ;;  %v7577_v41 = vpop.f32.mrb[102].mxu0 }
0x125e   :  { %v6188_v31 = vpop.f32.mrb[103].mxu0  ;;  %v13058_v61 = vadd.f32 %v7577_v41, %v13016_v59 }
0x125f   :  { %v6248_v36 = vadd.f32 %v13016_v59, %v6188_v31 }
0x1260   :  { %v6281_v10 = vsel %vm50_vm0, %v13058_v61, 0.0 }
0x1261   :  { %v6278_v32 = vsel %vm50_vm0, %v6248_v36, 0.0 }
0x126a   :  { %v7580_v54 = vpop.f32.mrb[104].mxu0 }
0x126b   :  { %v6198_v2 = vpop.f32.mrb[105].mxu0  ;;  %v13069_v24 = vadd.f32 %v7580_v54, %v13016_v59 }
0x126c   :  { %v13066_v17 = vadd.f32 %v13016_v59, %v6198_v2 }
0x126d   :  { %v6287_v25 = vsel %vm50_vm0, %v13069_v24, 0.0 }
0x126e   :  { %v6284_v51 = vsel %vm50_vm0, %v13066_v17, 0.0 }
0x1273   :  { %v7583_v23 = vpop.f32.mrb[106].mxu0 }
0x1274   :  { %v6208_v13 = vpop.f32.mrb[107].mxu0  ;;  %v13101_v45 = vadd.f32 %v7583_v23, %v13016_v59 }
0x1275   :  { %v13072_v38 = vadd.f32 %v13016_v59, %v6208_v13 }
0x1276   :  { %v6293_v34 = vsel %vm50_vm0, %v13101_v45, 0.0 }
0x1277   :  { %v6290_v50 = vsel %vm50_vm0, %v13072_v38, 0.0 }
0x127c   :  { %6267 = vadd.xlane.f32.xlu0 %v6266_v5  ;;  %v13035_v29 = vpop.f32.mrb[108].mxu0 }
0x127d   :  { %v13037_v63 = vpop.f32.mrb[109].mxu0  ;;  %v13107_v53 = vadd.f32 %v13035_v29, %v13016_v59 }
0x127e   :  { %v13078_v48 = vadd.f32 %v13016_v59, %v13037_v63 }
0x127f   :  { %v6299_v43 = vsel %vm50_vm0, %v13107_v53, 0.0 }
0x1280   :  { %6270 = vadd.xlane.f32.xlu1 %v6269_v8  ;;  %v6296_v11 = vsel %vm50_vm0, %v13078_v48, 0.0 }
0x1291   :  { %6532 = vrot.lane.b32.xlu1 %v6178_v18, %s8365_s11 }
0x1292   :  { %6534 = vrot.lane.b32.xlu0 %v7574_v49, %s8365_s11 }
0x1299   :  { %v13098_v19 = vpop.permute.xlu1 %6526 }
0x129a   :  { %v13093_v62 = vpop.permute.xlu0 %6524 }
0x12ab   :  { %v13043_v3 = vpop.f32.mrb[80].mxu1 }
0x12ac   :  { %v13046_v26 = vpop.f32.mrb[81].mxu1  ;;  %v13118_v44 = vadd.f32 %v13043_v3, %v13016_v59 }
0x12ad   :  { %v13086_v16 = vadd.f32 %v13016_v59, %v13046_v26 }
0x12ae   :  { %v6305_v37 = vsel %vm50_vm0, %v13118_v44, 0.0 }
0x12af   :  { %v6302_v21 = vsel %vm50_vm0, %v13086_v16, 0.0 }
0x12b1   :  { %6273 = vadd.xlane.f32.xlu0 %v6272_v0 }
0x12b5   :  { %6276 = vadd.xlane.f32.xlu1 %v6275_v6 }
0x12c6   :  { %6536 = vrot.lane.b32.xlu1 %v6188_v31, %s8365_s11 }
0x12c7   :  { %6538 = vrot.lane.b32.xlu0 %v7577_v41, %s8365_s11 }
0x12d4   :  { %v6265_v20 = vpop.xlane.xlu0 %6264 }
0x12d5   :  { %v6309_v5 = vmul.f32 0.03125, %v6265_v20 }
0x12d8   :  { %v13096_v39 = vpop.permute.xlu0 %6530  ;;  %v6262_v28 = vpop.xlane.xlu1 %6261 }
0x12d9   :  { %v6308_v30 = vmul.f32 0.03125, %v6262_v28 }
0x12db   :  { %v13110_v22 = vsub.f32 %v13022_v33, %v6308_v30 }
0x12dc   :  { %v13139_v41 = vpop.permute.xlu1 %6528 }
0x12dd   :  { %v6340_v7 = vmul.f32 %v13110_v22, %v13110_v22 }
0x12df   :  { %v6356_v27 = vsel %vm50_vm0, %v6340_v7, 0.0 }
0x12e6   :  { %6279 = vadd.xlane.f32.xlu0 %v6278_v32 }
0x12ea   :  { %6282 = vadd.xlane.f32.xlu1 %v6281_v10 }
0x12fb   :  { %6540 = vrot.lane.b32.xlu1 %v6198_v2, %s8365_s11 }
0x12fc   :  { %6542 = vrot.lane.b32.xlu0 %v7580_v54, %s8365_s11 }
0x1309   :  { %v6268_v52 = vpop.xlane.xlu0 %6267 }
0x130a   :  { %v6310_v42 = vmul.f32 0.03125, %v6268_v52 }
0x130c   :  { %v13120_v60 = vsub.f32 %v6244_v15, %v6310_v42 }
0x130d   :  { %v13103_v58 = vpop.permute.xlu0 %6534  ;;  %v6271_v2 = vpop.xlane.xlu1 %6270 }
0x130e   :  { %v6342_v12 = vmul.f32 %v13120_v60, %v13120_v60  ;;  %v6311_v8 = vmul.f32 0.03125, %v6271_v2 }
0x1310   :  { %v6362_v49 = vsel %vm50_vm0, %v6342_v12, 0.0  ;;  %v13154_v0 = vsub.f32 %v13032_v55, %v6311_v8 }
0x131b   :  { %6285 = vadd.xlane.f32.xlu0 %v6284_v51 }
0x131f   :  { %6288 = vadd.xlane.f32.xlu1 %v6287_v25  ;;  %6291 = vadd.xlane.f32.xlu0 %v6290_v50 }
0x1323   :  { %6297 = vadd.xlane.f32.xlu0 %v6296_v11 }
0x1327   :  { %6303 = vadd.xlane.f32.xlu0 %v6302_v21 }
0x1330   :  { %6544 = vrot.lane.b32.xlu1 %v6208_v13, %s8365_s11  ;;  %v13146_v13 = vpop.permute.xlu1 %6532 }
0x133d   :  { %6546 = vrot.lane.b32.xlu0 %v7583_v23, %s8365_s11 }
0x133e   :  { %v6274_v9 = vpop.xlane.xlu0 %6273 }
0x133f   :  { %v6312_v47 = vmul.f32 0.03125, %v6274_v9 }
0x1341   :  { %v13124_v56 = vsub.f32 %v6246_v1, %v6312_v47 }
0x1342   :  { %v13137_v33 = vpop.permute.xlu0 %6538  ;;  %v6277_v15 = vpop.xlane.xlu1 %6276 }
0x1343   :  { %v6344_v18 = vmul.f32 %v13124_v56, %v13124_v56  ;;  %v6313_v6 = vmul.f32 0.03125, %v6277_v15 }
0x1345   :  { %v6368_v59 = vsel %vm50_vm0, %v6344_v18, 0.0  ;;  %v13159_v10 = vsub.f32 %v13049_v40, %v6313_v6 }
0x1346   :  { %v13151_v1 = vpop.permute.xlu1 %6536 }
0x1347   :  { %v6345_v11 = vmul.f32 %v13159_v10, %v13159_v10 }
0x1349   :  { %v6371_v21 = vsel %vm50_vm0, %v6345_v11, 0.0 }
0x1354   :  { %6294 = vadd.xlane.f32.xlu1 %v6293_v34 }
0x1358   :  { %6300 = vadd.xlane.f32.xlu1 %v6299_v43 }
0x135c   :  { %6306 = vadd.xlane.f32.xlu1 %v6305_v37  ;;  %6357 = vadd.xlane.f32.xlu0 %v6356_v27 }
0x1360   :  { %6363 = vadd.xlane.f32.xlu0 %v6362_v49 }
0x1364   :  { %6369 = vadd.xlane.f32.xlu0 %v6368_v59 }
0x136d   :  { %6548 = vrot.lane.b32.xlu1 %v13037_v63, %s8365_s11  ;;  %v13149_v63 = vsub.f32 %v13019_v14, %v6309_v5  ;;  %v6343_v14 = vmul.f32 %v13154_v0, %v13154_v0 }
0x136f   :  { %v6365_v55 = vsel %vm50_vm0, %v6343_v14, 0.0 }
0x1373   :  { %v6280_v46 = vpop.xlane.xlu0 %6279 }
0x1374   :  { %v6314_v4 = vmul.f32 0.03125, %v6280_v46 }
0x1376   :  { %v13141_v31 = vsub.f32 %v6248_v36, %v6314_v4  ;;  %v6341_v36 = vmul.f32 %v13149_v63, %v13149_v63 }
0x1377   :  { %v6283_v32 = vpop.xlane.xlu1 %6282  ;;  %v13174_v52 = vpop.permute.xlu0 %6542 }
0x1378   :  { %v6346_v54 = vmul.f32 %v13141_v31, %v13141_v31  ;;  %v6315_v51 = vmul.f32 0.03125, %v6283_v32  ;;  %v6359_v25 = vsel %vm50_vm0, %v6341_v36, 0.0 }
0x137a   :  { %v6374_v23 = vsel %vm50_vm0, %v6346_v54, 0.0  ;;  %v13165_v50 = vsub.f32 %v13058_v61, %v6315_v51 }
0x137b   :  { %6375 = vadd.xlane.f32.xlu0 %v6374_v23  ;;  %v13176_v28 = vpop.permute.xlu1 %6540 }
0x137c   :  { %v6347_v40 = vmul.f32 %v13165_v50, %v13165_v50 }
0x137e   :  { %v6377_v20 = vsel %vm50_vm0, %v6347_v40, 0.0 }
0x1391   :  { %6360 = vadd.xlane.f32.xlu1 %v6359_v25 }
0x1395   :  { %6366 = vadd.xlane.f32.xlu1 %v6365_v55 }
0x1399   :  { %6372 = vadd.xlane.f32.xlu1 %v6371_v21 }
0x139d   :  { %6378 = vadd.xlane.f32.xlu1 %v6377_v20 }
0x13a8   :  { %v6286_v61 = vpop.xlane.xlu0 %6285 }
0x13a9   :  { %v6316_v30 = vmul.f32 0.03125, %v6286_v61 }
0x13ab   :  { %v13179_v42 = vsub.f32 %v13066_v17, %v6316_v30 }
0x13ac   :  { %v6289_v34 = vpop.xlane.xlu1 %6288  ;;  %v6292_v9 = vpop.xlane.xlu0 %6291 }
0x13ad   :  { %v6317_v43 = vmul.f32 0.03125, %v6289_v34  ;;  %v6318_v47 = vmul.f32 0.03125, %v6292_v9  ;;  %v6348_v7 = vmul.f32 %v13179_v42, %v13179_v42 }
0x13af   :  { %v13184_v37 = vsub.f32 %v13069_v24, %v6317_v43  ;;  %v13187_v27 = vsub.f32 %v13072_v38, %v6318_v47  ;;  %v6380_v12 = vsel %vm50_vm0, %v6348_v7, 0.0 }
0x13b0   :  { %6381 = vadd.xlane.f32.xlu0 %v6380_v12  ;;  %v6298_v49 = vpop.xlane.xlu0 %6297  ;;  %v13212_v8 = vpop.permute.xlu1 %6544 }
0x13b1   :  { %v6320_v18 = vmul.f32 0.03125, %v6298_v49  ;;  %v6349_v17 = vmul.f32 %v13184_v37, %v13184_v37  ;;  %v6350_v59 = vmul.f32 %v13187_v27, %v13187_v27 }
0x13b3   :  { %v13195_v46 = vsub.f32 %v13078_v48, %v6320_v18  ;;  %v6383_v24 = vsel %vm50_vm0, %v6349_v17, 0.0  ;;  %v6386_v4 = vsel %vm50_vm0, %v6350_v59, 0.0  ;;  %v13237_v18 = vld [vmem:[%s13495_s1 + $0x2c] ss:$0 sm:$0xff]  ;;  %v13243_v59 = vld [vmem:[%s13495_s1 + $0x2d] ss:$0 sm:$0xff] }
0x13b4   :  { %6384 = vadd.xlane.f32.xlu1 %v6383_v24  ;;  %6387 = vadd.xlane.f32.xlu0 %v6386_v4  ;;  %v6304_v38 = vpop.xlane.xlu0 %6303 }
0x13b5   :  { %v6322_v54 = vmul.f32 0.03125, %v6304_v38  ;;  %v6352_v2 = vmul.f32 %v13195_v46, %v13195_v46 }
0x13b7   :  { %v13202_v23 = vsub.f32 %v13086_v16, %v6322_v54  ;;  %v6392_v15 = vsel %vm50_vm0, %v6352_v2, 0.0  ;;  %v13251_v2 = vld [vmem:[%s13495_s1 + $0x2e] ss:$0 sm:$0xff] }
0x13b8   :  { %6393 = vadd.xlane.f32.xlu0 %v6392_v15  ;;  %v13217_v32 = vpop.permute.xlu0 %6546 }
0x13b9   :  { %v6354_v48 = vmul.f32 %v13202_v23, %v13202_v23 }
0x13bb   :  { %v6398_v5 = vsel %vm50_vm0, %v6354_v48, 0.0 }
0x13bc   :  { %6399 = vadd.xlane.f32.xlu0 %v6398_v5  ;;  %v13258_v5 = vld [vmem:[%s13495_s1 + $0x2f] ss:$0 sm:$0xff] }
0x13d2   :  { %6550 = vrot.lane.b32.xlu0 %v13035_v29, %s8365_s11 }
0x13d6   :  { %6554 = vrot.lane.b32.xlu0 %v13043_v3, %s8365_s11 }
0x13e1   :  { %v6295_v6 = vpop.xlane.xlu1 %6294 }
0x13e2   :  { %v6319_v16 = vmul.f32 0.03125, %v6295_v6 }
0x13e4   :  { %v13215_v36 = vsub.f32 %v13101_v45, %v6319_v16 }
0x13e5   :  { %v6301_v51 = vpop.xlane.xlu1 %6300 }
0x13e6   :  { %v6321_v25 = vmul.f32 0.03125, %v6301_v51  ;;  %v6351_v14 = vmul.f32 %v13215_v36, %v13215_v36 }
0x13e8   :  { %v13222_v55 = vsub.f32 %v13107_v53, %v6321_v25  ;;  %v6389_v29 = vsel %vm50_vm0, %v6351_v14, 0.0 }
0x13e9   :  { %v6307_v3 = vpop.xlane.xlu1 %6306  ;;  %6390 = vadd.xlane.f32.xlu1 %v6389_v29  ;;  %v6358_v11 = vpop.xlane.xlu0 %6357  ;;  %v13276_v29 = vld [vmem:[%s13495_s1 + $0x31] ss:$0 sm:$0xff] }
0x13ea   :  { %v6323_v21 = vmul.f32 0.03125, %v6307_v3  ;;  %v6404_v40 = vmul.f32 0.03125, %v6358_v11  ;;  %v6353_v45 = vmul.f32 %v13222_v55, %v13222_v55 }
0x13ec   :  { %v13228_v20 = vsub.f32 %v13118_v44, %v6323_v21  ;;  %v6420_v61 = vadd.f32 1e-12, %v6404_v40  ;;  %v6395_v30 = vsel %vm50_vm0, %v6353_v45, 0.0  ;;  %v13284_v21 = vld [vmem:[%s13495_s1 + $0x32] ss:$0 sm:$0xff] }
0x13ed   :  { %6396 = vadd.xlane.f32.xlu1 %v6395_v30  ;;  %v6364_v34 = vpop.xlane.xlu0 %6363 }
0x13ee   :  { %8313 = vrsqrt.f32 %v6420_v61  ;;  %v6406_v53 = vmul.f32 0.03125, %v6364_v34  ;;  %v6355_v9 = vmul.f32 %v13228_v20, %v13228_v20 }
0x13f0   :  { %v6422_v43 = vadd.f32 1e-12, %v6406_v53  ;;  %v6401_v47 = vsel %vm50_vm0, %v6355_v9, 0.0 }
0x13f1   :  { %6402 = vadd.xlane.f32.xlu1 %v6401_v47  ;;  %v6370_v7 = vpop.xlane.xlu0 %6369 }
0x13f2   :  { %8315 = vrsqrt.f32 %v6422_v43  ;;  %v6408_v12 = vmul.f32 0.03125, %v6370_v7 }
0x13f4   :  { %v6424_v49 = vadd.f32 1e-12, %v6408_v12 }
0x13f6   :  { %8317 = vrsqrt.f32 %v6424_v49 }
0x13f8   :  { %v8314_v44 = vpop.eup %8313 }
0x13f9   :  { %v6452_v17 = vmul.f32 %v8314_v44, %v13110_v22 }
0x13fb   :  { %v6472_v24 = vmul.f32 %v13237_v18, %v6452_v17 }
0x13fc   :  { %v8316_v4 = vpop.eup %8315 }
0x13fd   :  { %v6492_v38 = vadd.f32 %v13243_v59, %v6472_v24  ;;  %v6454_v54 = vmul.f32 %v8316_v4, %v13120_v60 }
0x13ff   :  { %v6572_v15 = vadd.f32 %v13093_v62, %v6492_v38  ;;  %v6474_v22 = vmul.f32 %v13237_v18, %v6454_v54  ;;  %v13268_v62 = vld [vmem:[%s13495_s1 + $0x30] ss:$0 sm:$0xff]  ;;  %v13993_v38 = vld [vmem:[#allocation35_spill] sm:$0xff] }
0x1400   :  { %v8318_v48 = vpop.eup %8317 }
0x1401   :  { %v6595_v6 = vsub.f32 %v6572_v15, %v13251_v2  ;;  %v6494_v16 = vadd.f32 %v13243_v59, %v6474_v22  ;;  %v6456_v60 = vmul.f32 %v8318_v48, %v13124_v56 }
0x1402   :  { %6552 = vrot.lane.b32.xlu1 %v13046_v26, %s8365_s11 }
0x1403   :  { %vm6611_vm1 = vcmp.gt.f32.partialorder %v6595_v6, 0.0  ;;  %v6631_v51 = vmul.f32 %v13258_v5, %v6595_v6  ;;  %v6574_v25 = vadd.f32 %v13139_v41, %v6494_v16  ;;  %v6476_v14 = vmul.f32 %v13237_v18, %v6456_v60 }
0x1405   :  { %v6647_v56 = vsel %vm6611_vm1, %v6595_v6, %v6631_v51  ;;  %v6597_v26 = vsub.f32 %v6574_v25, %v13251_v2  ;;  %v6496_v3 = vadd.f32 %v13243_v59, %v6476_v14 }
0x1406   :  { %v6667_v11 = vadd.f32 %v13268_v62, %v6647_v56 }
0x1407   :  { %vm6613_vm15 = vcmp.gt.f32.partialorder %v6597_v26, 0.0  ;;  %v6633_v41 = vmul.f32 %v13258_v5, %v6597_v26  ;;  %v6576_v40 = vadd.f32 %v13146_v13, %v6496_v3 }
0x1408   :  { %v6688_v45 = vmul.f32 %v13276_v29, %v6667_v11  ;;  %v6376_v61 = vpop.xlane.xlu0 %6375 }
0x1409   :  { %v6649_v30 = vsel %vm6613_vm15, %v6597_v26, %v6633_v41  ;;  %v6599_v34 = vsub.f32 %v6576_v40, %v13251_v2  ;;  %v6410_v53 = vmul.f32 0.03125, %v6376_v61 }
0x140a   :  { %v6709_v9 = vadd.f32 %v13284_v21, %v6688_v45  ;;  %v6669_v43 = vadd.f32 %v13268_v62, %v6649_v30 }
0x140b   :  { %vm6615_vm2 = vcmp.gt.f32.partialorder %v6599_v34, 0.0  ;;  %v6635_v47 = vmul.f32 %v13258_v5, %v6599_v34  ;;  %v6426_v7 = vadd.f32 1e-12, %v6410_v53  ;;  %v13994_v53 = vld [vmem:[#allocation24_spill] sm:$0xff] }
0x140c   :  { %v6725_v12 = vadd.f32 %v6709_v9, %v12131_v57  ;;  %v6690_v49 = vmul.f32 %v13276_v29, %v6669_v43 }
0x140d   :  { %v6651_v13 = vsel %vm6615_vm2, %v6599_v34, %v6635_v47  ;;  %8319 = vrsqrt.f32 %v6426_v7 }
0x140e   :  { %6741 = vst.msk [vmem:[%s13503_s9] sm:$0xff] %vm50_vm0, %v6725_v12  ;;  %v6711_v44 = vadd.f32 %v13284_v21, %v6690_v49  ;;  %v6671_v17 = vadd.f32 %v13268_v62, %v6651_v13 }
0x1410   :  { %v6727_v24 = vadd.f32 %v6711_v44, %v12153_v35  ;;  %v6692_v4 = vmul.f32 %v13276_v29, %v6671_v17  ;;  %v13314_v35 = vpop.permute.xlu1 %6548 }
0x1412   :  { %6743 = vst.msk [vmem:[%s13503_s9 + $0x10] sm:$0xff] %vm50_vm0, %v6727_v24  ;;  %v6713_v57 = vadd.f32 %v13284_v21, %v6692_v4 }
0x1414   :  { %v6729_v54 = vadd.f32 %v6713_v57, %v13993_v38 }
0x1416   :  { %6745 = vst.msk [vmem:[%s13503_s9 + $0x20] sm:$0xff] %vm50_vm0, %v6729_v54 }
0x1417   :  { %v8320_v15 = vpop.eup %8319 }
0x1418   :  { %v6458_v22 = vmul.f32 %v8320_v15, %v13141_v31 }
0x141a   :  { %v6478_v48 = vmul.f32 %v13237_v18, %v6458_v22 }
0x141c   :  { %v6498_v6 = vadd.f32 %v13243_v59, %v6478_v48 }
0x141e   :  { %v6578_v16 = vadd.f32 %v13151_v1, %v6498_v6  ;;  %v6361_v60 = vpop.xlane.xlu1 %6360 }
0x141f   :  { %v6405_v51 = vmul.f32 0.03125, %v6361_v60 }
0x1420   :  { %v6601_v25 = vsub.f32 %v6578_v16, %v13251_v2 }
0x1421   :  { %v6421_v14 = vadd.f32 1e-12, %v6405_v51 }
0x1422   :  { %vm6617_vm3 = vcmp.gt.f32.partialorder %v6601_v25, 0.0  ;;  %v6637_v56 = vmul.f32 %v13258_v5, %v6601_v25  ;;  %v6367_v26 = vpop.xlane.xlu1 %6366 }
0x1423   :  { %8321 = vrsqrt.f32 %v6421_v14  ;;  %v6407_v3 = vmul.f32 0.03125, %v6367_v26 }
0x1424   :  { %v6653_v31 = vsel %vm6617_vm3, %v6601_v25, %v6637_v56 }
0x1425   :  { %v6673_v11 = vadd.f32 %v13268_v62, %v6653_v31  ;;  %v6423_v41 = vadd.f32 1e-12, %v6407_v3 }
0x1426   :  { %v6373_v40 = vpop.xlane.xlu1 %6372 }
0x1427   :  { %v6694_v45 = vmul.f32 %v13276_v29, %v6673_v11  ;;  %8323 = vrsqrt.f32 %v6423_v41  ;;  %v6409_v1 = vmul.f32 0.03125, %v6373_v40 }
0x1429   :  { %v6715_v61 = vadd.f32 %v13284_v21, %v6694_v45  ;;  %v6425_v30 = vadd.f32 1e-12, %v6409_v1  ;;  %v13995_v1 = vld [vmem:[#allocation58_spill] sm:$0xff] }
0x142a   :  { %v6379_v34 = vpop.xlane.xlu1 %6378 }
0x142b   :  { %v6731_v9 = vadd.f32 %v6715_v61, %v13994_v53  ;;  %8325 = vrsqrt.f32 %v6425_v30  ;;  %v6411_v43 = vmul.f32 0.03125, %v6379_v34 }
0x142d   :  { %v8322_v47 = vpop.eup %8321  ;;  %6747 = vst.msk [vmem:[%s13503_s9 + $0x30] sm:$0xff] %vm50_vm0, %v6731_v9  ;;  %v6427_v7 = vadd.f32 1e-12, %v6411_v43 }
0x142e   :  { %v6453_v12 = vmul.f32 %v8322_v47, %v13149_v63 }
0x142f   :  { %8327 = vrsqrt.f32 %v6427_v7 }
0x1430   :  { %v6473_v49 = vmul.f32 %v13237_v18, %v6453_v12 }
0x1431   :  { %v8324_v13 = vpop.eup %8323 }
0x1432   :  { %v6493_v44 = vadd.f32 %v13243_v59, %v6473_v49  ;;  %v6455_v17 = vmul.f32 %v8324_v13, %v13154_v0 }
0x1434   :  { %v6573_v24 = vadd.f32 %v13098_v19, %v6493_v44  ;;  %v6475_v4 = vmul.f32 %v13237_v18, %v6455_v17  ;;  %v13996_v44 = vld [vmem:[#allocation60_spill] sm:$0xff] }
0x1435   :  { %v8326_v57 = vpop.eup %8325 }
0x1436   :  { %v6596_v38 = vsub.f32 %v6573_v24, %v13251_v2  ;;  %v6495_v54 = vadd.f32 %v13243_v59, %v6475_v4  ;;  %v6457_v15 = vmul.f32 %v8326_v57, %v13159_v10 }
0x1438   :  { %vm6612_vm4 = vcmp.gt.f32.partialorder %v6596_v38, 0.0  ;;  %v6632_v63 = vmul.f32 %v13258_v5, %v6596_v38  ;;  %v6575_v22 = vadd.f32 %v13096_v39, %v6495_v54  ;;  %v6477_v48 = vmul.f32 %v13237_v18, %v6457_v15 }
0x1439   :  { %v8328_v6 = vpop.eup %8327 }
0x143a   :  { %v6648_v0 = vsel %vm6612_vm4, %v6596_v38, %v6632_v63  ;;  %v6598_v19 = vsub.f32 %v6575_v22, %v13251_v2  ;;  %v6497_v16 = vadd.f32 %v13243_v59, %v6477_v48  ;;  %v6459_v60 = vmul.f32 %v8328_v6, %v13165_v50  ;;  %v13997_v48 = vld [vmem:[#allocation23_spill] sm:$0xff] }
0x143b   :  { %v6668_v51 = vadd.f32 %v13268_v62, %v6648_v0 }
0x143c   :  { %vm6614_vm5 = vcmp.gt.f32.partialorder %v6598_v19, 0.0  ;;  %v6634_v10 = vmul.f32 %v13258_v5, %v6598_v19  ;;  %v6577_v25 = vadd.f32 %v13103_v58, %v6497_v16  ;;  %v6479_v14 = vmul.f32 %v13237_v18, %v6459_v60  ;;  %v13998_v60 = vld [vmem:[#allocation36_spill] sm:$0xff] }
0x143d   :  { %v6689_v39 = vmul.f32 %v13276_v29, %v6668_v51  ;;  %v6382_v56 = vpop.xlane.xlu0 %6381 }
0x143e   :  { %v6650_v26 = vsel %vm6614_vm5, %v6598_v19, %v6634_v10  ;;  %v6600_v3 = vsub.f32 %v6577_v25, %v13251_v2  ;;  %v6499_v31 = vadd.f32 %v13243_v59, %v6479_v14  ;;  %v6412_v11 = vmul.f32 0.03125, %v6382_v56 }
0x143f   :  { %v6710_v50 = vadd.f32 %v13284_v21, %v6689_v39  ;;  %v6670_v41 = vadd.f32 %v13268_v62, %v6650_v26 }
0x1440   :  { %vm6616_vm6 = vcmp.gt.f32.partialorder %v6600_v3, 0.0  ;;  %v6636_v40 = vmul.f32 %v13258_v5, %v6600_v3  ;;  %v6579_v58 = vadd.f32 %v13137_v33, %v6499_v31  ;;  %v6428_v45 = vadd.f32 1e-12, %v6412_v11 }
0x1441   :  { %v6726_v61 = vadd.f32 %v6710_v50, %v13995_v1  ;;  %v6691_v30 = vmul.f32 %v13276_v29, %v6670_v41  ;;  %v6385_v34 = vpop.xlane.xlu1 %6384  ;;  %v6388_v53 = vpop.xlane.xlu0 %6387 }
0x1442   :  { %v6652_v9 = vsel %vm6616_vm6, %v6600_v3, %v6636_v40  ;;  %v6602_v43 = vsub.f32 %v6579_v58, %v13251_v2  ;;  %8329 = vrsqrt.f32 %v6428_v45  ;;  %v6413_v47 = vmul.f32 0.03125, %v6385_v34 }
0x1443   :  { %6742 = vst.msk [vmem:[%s13503_s9 + $0x8] sm:$0xff] %vm50_vm0, %v6726_v61  ;;  %v6712_v7 = vadd.f32 %v13284_v21, %v6691_v30  ;;  %v6672_v33 = vadd.f32 %v13268_v62, %v6652_v9  ;;  %v6414_v12 = vmul.f32 0.03125, %v6388_v53 }
0x1444   :  { %vm6618_vm7 = vcmp.gt.f32.partialorder %v6602_v43, 0.0  ;;  %v6638_v49 = vmul.f32 %v13258_v5, %v6602_v43  ;;  %v6429_v13 = vadd.f32 1e-12, %v6413_v47 }
0x1445   :  { %v6728_v17 = vadd.f32 %v6712_v7, %v13996_v44  ;;  %v6693_v24 = vmul.f32 %v13276_v29, %v6672_v33  ;;  %v6430_v4 = vadd.f32 1e-12, %v6414_v12  ;;  %v6394_v57 = vpop.xlane.xlu0 %6393 }
0x1446   :  { %v6654_v38 = vsel %vm6618_vm7, %v6602_v43, %v6638_v49  ;;  %8331 = vrsqrt.f32 %v6429_v13  ;;  %v6416_v54 = vmul.f32 0.03125, %v6394_v57 }
0x1447   :  { %6744 = vst.msk [vmem:[%s13503_s9 + $0x18] sm:$0xff] %vm50_vm0, %v6728_v17  ;;  %v6714_v15 = vadd.f32 %v13284_v21, %v6693_v24  ;;  %v6674_v63 = vadd.f32 %v13268_v62, %v6654_v38  ;;  %8333 = vrsqrt.f32 %v6430_v4  ;;  %v13999_v17 = vld [vmem:[#allocation61_spill] sm:$0xff] }
0x1448   :  { %v6432_v22 = vadd.f32 1e-12, %v6416_v54 }
0x1449   :  { %v6730_v6 = vadd.f32 %v6714_v15, %v13997_v48  ;;  %v6695_v0 = vmul.f32 %v13276_v29, %v6674_v63  ;;  %v6400_v38 = vpop.xlane.xlu0 %6399 }
0x144a   :  { %8335 = vrsqrt.f32 %v6432_v22  ;;  %v14000_v22 = vld [vmem:[#allocation59_spill] sm:$0xff] }
0x144b   :  { %6746 = vst.msk [vmem:[%s13503_s9 + $0x28] sm:$0xff] %vm50_vm0, %v6730_v6  ;;  %v6716_v19 = vadd.f32 %v13284_v21, %v6695_v0  ;;  %v6418_v0 = vmul.f32 0.03125, %v6400_v38 }
0x144c   :  { %v8330_v16 = vpop.eup %8329 }
0x144d   :  { %v6732_v51 = vadd.f32 %v6716_v19, %v13998_v60  ;;  %v6460_v10 = vmul.f32 %v8330_v16, %v13179_v42  ;;  %v14001_v19 = vld [vmem:[#allocation37_spill] sm:$0xff] }
0x144f   :  { %6748 = vst.msk [vmem:[%s13503_s9 + $0x38] sm:$0xff] %vm50_vm0, %v6732_v51  ;;  %v6480_v25 = vmul.f32 %v13237_v18, %v6460_v10  ;;  %v14002_v51 = vld [vmem:[#allocation26_spill] sm:$0xff] }
0x1450   :  { %v8332_v14 = vpop.eup %8331 }
0x1451   :  { %v8334_v39 = vpop.eup %8333  ;;  %v6500_v56 = vadd.f32 %v13243_v59, %v6480_v25  ;;  %v6461_v26 = vmul.f32 %v8332_v14, %v13184_v37  ;;  %v6434_v25 = vadd.f32 1e-12, %v6418_v0  ;;  %v14004_v0 = vld [vmem:[#allocation43_spill] sm:$0xff] }
0x1452   :  { %v6462_v3 = vmul.f32 %v8334_v39, %v13187_v27 }
0x1453   :  { %v6580_v31 = vadd.f32 %v13176_v28, %v6500_v56  ;;  %v6481_v11 = vmul.f32 %v13237_v18, %v6461_v26  ;;  %8337 = vrsqrt.f32 %v6434_v25 }
0x1454   :  { %v8336_v42 = vpop.eup %8335  ;;  %v6482_v50 = vmul.f32 %v13237_v18, %v6462_v3 }
0x1455   :  { %v6603_v41 = vsub.f32 %v6580_v31, %v13251_v2  ;;  %v6501_v40 = vadd.f32 %v13243_v59, %v6481_v11  ;;  %v6464_v58 = vmul.f32 %v8336_v42, %v13195_v46 }
0x1456   :  { %v6502_v45 = vadd.f32 %v13243_v59, %v6482_v50 }
0x1457   :  { %vm6619_vm8 = vcmp.gt.f32.partialorder %v6603_v41, 0.0  ;;  %v6639_v37 = vmul.f32 %v13258_v5, %v6603_v41  ;;  %v6581_v27 = vadd.f32 %v13174_v52, %v6501_v40  ;;  %v6484_v28 = vmul.f32 %v13237_v18, %v6464_v58 }
0x1458   :  { %v6582_v1 = vadd.f32 %v13212_v8, %v6502_v45 }
0x1459   :  { %v6655_v61 = vsel %vm6619_vm8, %v6603_v41, %v6639_v37  ;;  %v6604_v30 = vsub.f32 %v6581_v27, %v13251_v2  ;;  %v6504_v34 = vadd.f32 %v13243_v59, %v6484_v28 }
0x145a   :  { %v6675_v53 = vadd.f32 %v13268_v62, %v6655_v61  ;;  %v6605_v46 = vsub.f32 %v6582_v1, %v13251_v2 }
0x145b   :  { %vm6620_vm9 = vcmp.gt.f32.partialorder %v6604_v30, 0.0  ;;  %v6640_v9 = vmul.f32 %v13258_v5, %v6604_v30  ;;  %v6584_v43 = vadd.f32 %v13314_v35, %v6504_v34 }
0x145c   :  { %v6696_v52 = vmul.f32 %v13276_v29, %v6675_v53  ;;  %vm6621_vm10 = vcmp.gt.f32.partialorder %v6605_v46, 0.0  ;;  %v6641_v47 = vmul.f32 %v13258_v5, %v6605_v46 }
0x145d   :  { %v6656_v8 = vsel %vm6620_vm9, %v6604_v30, %v6640_v9  ;;  %v6607_v7 = vsub.f32 %v6584_v43, %v13251_v2  ;;  %v8338_v14 = vpop.eup %8337 }
0x145e   :  { %v6717_v33 = vadd.f32 %v13284_v21, %v6696_v52  ;;  %v6676_v12 = vadd.f32 %v13268_v62, %v6656_v8  ;;  %v6657_v49 = vsel %vm6621_vm10, %v6605_v46, %v6641_v47  ;;  %v6466_v3 = vmul.f32 %v8338_v14, %v13202_v23 }
0x145f   :  { %v6677_v13 = vadd.f32 %v13268_v62, %v6657_v49  ;;  %vm6623_vm11 = vcmp.gt.f32.partialorder %v6607_v7, 0.0  ;;  %v6643_v44 = vmul.f32 %v13258_v5, %v6607_v7 }
0x1460   :  { %v6733_v35 = vadd.f32 %v6717_v33, %v13999_v17  ;;  %v6697_v24 = vmul.f32 %v13276_v29, %v6676_v12  ;;  %v6486_v50 = vmul.f32 %v13237_v18, %v6466_v3  ;;  %v14003_v17 = vld [vmem:[#allocation9_spill] sm:$0xff] }
0x1461   :  { %v6698_v4 = vmul.f32 %v13276_v29, %v6677_v13  ;;  %v6659_v57 = vsel %vm6623_vm11, %v6607_v7, %v6643_v44  ;;  %v6551_v7 = vpop.permute.xlu0 %6550 }
0x1462   :  { %6749 = vst.msk [vmem:[%s13503_s9 + $0x40] sm:$0xff] %vm50_vm0, %v6733_v35  ;;  %v6718_v54 = vadd.f32 %v13284_v21, %v6697_v24  ;;  %v6679_v15 = vadd.f32 %v13268_v62, %v6659_v57  ;;  %v6506_v45 = vadd.f32 %v13243_v59, %v6486_v50 }
0x1463   :  { %v6719_v63 = vadd.f32 %v13284_v21, %v6698_v4 }
0x1464   :  { %v6734_v48 = vadd.f32 %v6718_v54, %v14000_v22  ;;  %v6700_v6 = vmul.f32 %v13276_v29, %v6679_v15 }
0x1465   :  { %v6735_v16 = vadd.f32 %v6719_v63, %v14001_v19  ;;  %v6555_v38 = vpop.permute.xlu0 %6554 }
0x1466   :  { %6750 = vst.msk [vmem:[%s13503_s9 + $0x48] sm:$0xff] %vm50_vm0, %v6734_v48  ;;  %v6721_v60 = vadd.f32 %v13284_v21, %v6700_v6 }
0x1467   :  { %6751 = vst.msk [vmem:[%s13503_s9 + $0x50] sm:$0xff] %vm50_vm0, %v6735_v16 }
0x1468   :  { %v6737_v10 = vadd.f32 %v6721_v60, %v14002_v51 }
0x146a   :  { %6753 = vst.msk [vmem:[%s13503_s9 + $0x60] sm:$0xff] %vm50_vm0, %v6737_v10  ;;  %v14005_v10 = vld [vmem:[#allocation27_spill] sm:$0xff] }
0x1476   :  { %v6391_v39 = vpop.xlane.xlu1 %6390 }
0x1477   :  { %v6415_v56 = vmul.f32 0.03125, %v6391_v39  ;;  %v14006_v39 = vld [vmem:[#allocation8_spill] sm:$0xff] }
0x1479   :  { %v6431_v26 = vadd.f32 1e-12, %v6415_v56 }
0x147a   :  { %v6397_v31 = vpop.xlane.xlu1 %6396 }
0x147b   :  { %8339 = vrsqrt.f32 %v6431_v26  ;;  %v6417_v11 = vmul.f32 0.03125, %v6397_v31 }
0x147d   :  { %v6433_v42 = vadd.f32 1e-12, %v6417_v11 }
0x147e   :  { %v6403_v41 = vpop.xlane.xlu1 %6402 }
0x147f   :  { %8341 = vrsqrt.f32 %v6433_v42  ;;  %v6419_v40 = vmul.f32 0.03125, %v6403_v41 }
0x1481   :  { %v6435_v58 = vadd.f32 1e-12, %v6419_v40 }
0x1482   :  { %v6553_v37 = vpop.permute.xlu1 %6552 }
0x1483   :  { %8343 = vrsqrt.f32 %v6435_v58  ;;  %v6586_v27 = vadd.f32 %v6553_v37, %v6506_v45 }
0x1485   :  { %v8340_v28 = vpop.eup %8339  ;;  %v6609_v1 = vsub.f32 %v6586_v27, %v13251_v2 }
0x1486   :  { %v6463_v23 = vmul.f32 %v8340_v28, %v13215_v36 }
0x1487   :  { %vm6625_vm12 = vcmp.gt.f32.partialorder %v6609_v1, 0.0  ;;  %v6645_v61 = vmul.f32 %v13258_v5, %v6609_v1 }
0x1488   :  { %v6483_v30 = vmul.f32 %v13237_v18, %v6463_v23 }
0x1489   :  { %v8342_v34 = vpop.eup %8341  ;;  %v6661_v53 = vsel %vm6625_vm12, %v6609_v1, %v6645_v61 }
0x148a   :  { %v6503_v46 = vadd.f32 %v13243_v59, %v6483_v30  ;;  %v6465_v9 = vmul.f32 %v8342_v34, %v13222_v55  ;;  %v6681_v43 = vadd.f32 %v13268_v62, %v6661_v53 }
0x148c   :  { %v6583_v52 = vadd.f32 %v13217_v32, %v6503_v46  ;;  %v6485_v47 = vmul.f32 %v13237_v18, %v6465_v9  ;;  %v6702_v8 = vmul.f32 %v13276_v29, %v6681_v43 }
0x148d   :  { %v8344_v36 = vpop.eup %8343 }
0x148e   :  { %v6606_v33 = vsub.f32 %v6583_v52, %v13251_v2  ;;  %v6505_v12 = vadd.f32 %v13243_v59, %v6485_v47  ;;  %v6467_v49 = vmul.f32 %v8344_v36, %v13228_v20  ;;  %v6723_v13 = vadd.f32 %v13284_v21, %v6702_v8 }
0x1490   :  { %vm6622_vm13 = vcmp.gt.f32.partialorder %v6606_v33, 0.0  ;;  %v6642_v55 = vmul.f32 %v13258_v5, %v6606_v33  ;;  %v6585_v44 = vadd.f32 %v6551_v7, %v6505_v12  ;;  %v6487_v32 = vmul.f32 %v13237_v18, %v6467_v49 }
0x1491   :  { %v6739_v35 = vadd.f32 %v6723_v13, %v14003_v17 }
0x1492   :  { %v6658_v24 = vsel %vm6622_vm13, %v6606_v33, %v6642_v55  ;;  %v6608_v4 = vsub.f32 %v6585_v44, %v13251_v2  ;;  %v6507_v57 = vadd.f32 %v13243_v59, %v6487_v32 }
0x1493   :  { %v6678_v54 = vadd.f32 %v13268_v62, %v6658_v24  ;;  %6755 = vst.msk [vmem:[%s13503_s9 + $0x70] sm:$0xff] %vm50_vm0, %v6739_v35 }
0x1494   :  { %vm6624_vm14 = vcmp.gt.f32.partialorder %v6608_v4, 0.0  ;;  %v6644_v20 = vmul.f32 %v13258_v5, %v6608_v4  ;;  %v6587_v15 = vadd.f32 %v6555_v38, %v6507_v57 }
0x1495   :  { %v6699_v18 = vmul.f32 %v13276_v29, %v6678_v54 }
0x1496   :  { %v6660_v63 = vsel %vm6624_vm14, %v6608_v4, %v6644_v20  ;;  %v6610_v22 = vsub.f32 %v6587_v15, %v13251_v2 }
0x1497   :  { %v6720_v48 = vadd.f32 %v13284_v21, %v6699_v18  ;;  %v6680_v59 = vadd.f32 %v13268_v62, %v6660_v63 }
0x1498   :  { %vm6626_vm1 = vcmp.gt.f32.partialorder %v6610_v22, 0.0  ;;  %v6646_v6 = vmul.f32 %v13258_v5, %v6610_v22 }
0x1499   :  { %v6736_v19 = vadd.f32 %v6720_v48, %v14004_v0  ;;  %v6701_v16 = vmul.f32 %v13276_v29, %v6680_v59 }
0x149a   :  { %v6662_v60 = vsel %vm6626_vm1, %v6610_v22, %v6646_v6 }
0x149b   :  { %6752 = vst.msk [vmem:[%s13503_s9 + $0x58] sm:$0xff] %vm50_vm0, %v6736_v19  ;;  %v6722_v51 = vadd.f32 %v13284_v21, %v6701_v16  ;;  %v6682_v2 = vadd.f32 %v13268_v62, %v6662_v60 }
0x149d   :  { %v6738_v25 = vadd.f32 %v6722_v51, %v14005_v10  ;;  %v6703_v14 = vmul.f32 %v13276_v29, %v6682_v2 }
0x149f   :  { %6754 = vst.msk [vmem:[%s13503_s9 + $0x68] sm:$0xff] %vm50_vm0, %v6738_v25  ;;  %v6724_v5 = vadd.f32 %v13284_v21, %v6703_v14 }
0x14a1   :  { %v6740_v56 = vadd.f32 %v6724_v5, %v14006_v39 }
0x14a3   :  { %6756 = vst.msk [vmem:[%s13503_s9 + $0x78] sm:$0xff] %vm50_vm0, %v6740_v56 }

</bundles_post_ra>
